<compile_context>
chip_gen: v6e
topology: v6e:2x2x1
jax: 0.10.0
libtpu: 0.0.40
codegen_flags: <defaults>
</compile_context>

<pallas_src>
import jax
import jax.numpy as jnp
from jax.experimental import pallas as pl
from jax.experimental.pallas import tpu as pltpu

N_WIRES = 3606          # fixed by the module
HIDDEN = 512
ENCODED_DIM = 64        # VAE(encoded_dim)
ENC_PAD = 128           # encoded dim padded to one full lane tile (zeros -> exact)
MAX_TB = 128            # batch tile upper bound (safe on v7x's 64 MiB VMEM)
DEC_CHUNK = 512         # decoder output lane-chunk width


def _round_up(x, m):
    return (x + m - 1) // m * m


def _dec_chunks():
    """Static (start, width) chunks covering N_WIRES; small tail merged into last."""
    chunks, s = [], 0
    while s < N_WIRES:
        e = s + DEC_CHUNK
        if N_WIRES - e < 128:        # avoid a tiny trailing chunk
            e = N_WIRES
        chunks.append((s, e - s))
        s = e
    return tuple(chunks)


DEC_CHUNKS = _dec_chunks()           # ((0,512) x6, (3072,534))


def vae_kernel(x_ref, w1_ref, b1_ref, w2_ref, b2_ref, w3_ref, b3_ref,
               w4_hbm_ref, b4_ref, o_ref, w4_vmem, w4_sem):
    step = pl.program_id(0)
    bf16 = jnp.bfloat16

    # Kick off the decoder-weight DMA (HBM -> VMEM scratch) so it overlaps the
    # encoder matmuls. Guarded to step 0; scratch persists across grid steps and
    # the grid axis is "arbitrary" (sequential), so step 0 always runs first.
    @pl.when(step == 0)
    def _start_w4():
        pltpu.make_async_copy(w4_hbm_ref, w4_vmem, w4_sem).start()

    # ---- Encoder: Linear(3606,512) + LeakyReLU(0.2); Linear(512,enc) + Tanh ----
    x = x_ref[...].astype(bf16)
    h1 = jnp.dot(x, w1_ref[...], preferred_element_type=jnp.float32) + b1_ref[...]
    h1 = jnp.where(h1 > 0, h1, 0.2 * h1)
    z = jnp.tanh(jnp.dot(h1.astype(bf16), w2_ref[...],
                         preferred_element_type=jnp.float32) + b2_ref[...])

    # ---- Decoder: Linear(enc,512) + ReLU; Linear(512,3606) ----
    h2 = jnp.maximum(jnp.dot(z.astype(bf16), w3_ref[...],
                             preferred_element_type=jnp.float32) + b3_ref[...], 0.0)
    h2 = h2.astype(bf16)

    @pl.when(step == 0)
    def _wait_w4():
        pltpu.make_async_copy(w4_hbm_ref, w4_vmem, w4_sem).wait()

    # Final matmul produced in lane chunks, stored straight to the output block.
    for s, w in DEC_CHUNKS:
        y = jnp.dot(h2, w4_vmem[:, s:s + w],
                    preferred_element_type=jnp.float32) + b4_ref[:, s:s + w]
        o_ref[:, s:s + w] = y.astype(o_ref.dtype)


def prepare_params(params):
    """One-time packing: bf16 weights, 2-D f32 biases, encoded dim zero-padded to 128."""
    w1, b1, w2, b2, w3, b3, w4, b4 = params
    f32, bf16 = jnp.float32, jnp.bfloat16
    w2p = jnp.zeros((HIDDEN, ENC_PAD), f32).at[:, :ENCODED_DIM].set(w2).astype(bf16)
    b2p = jnp.zeros((1, ENC_PAD), f32).at[:, :ENCODED_DIM].set(b2[None, :])
    w3p = jnp.zeros((ENC_PAD, HIDDEN), f32).at[:ENCODED_DIM, :].set(w3).astype(bf16)
    return (w1.astype(bf16), b1[None, :].astype(f32), w2p, b2p, w3p,
            b3[None, :].astype(f32), w4.astype(bf16), b4[None, :].astype(f32))


def _pick_batch_tile(B):
    """Static (trace-time) batch-tile choice."""
    if B <= MAX_TB:
        return B                      # one grid step, zero waste, no ragged block
    best_key, best_tb = None, 8
    for tb in range(8, MAX_TB + 1, 8):
        steps = -(-B // tb)
        waste = steps * tb - B
        key = (steps, waste, -tb)     # fewest steps, then least padded rows
        if best_key is None or key < best_key:
            best_key, best_tb = key, tb
    return best_tb


@jax.jit
def vae_forward(x, prepared):
    """x: (B, N_WIRES) float32 -> (B, N_WIRES) float32."""
    w1, b1, w2, b2, w3, b3, w4, b4 = prepared
    B = x.shape[0]
    tb = _pick_batch_tile(B)
    steps = -(-B // tb)

    const = lambda i: (0, 0)          # weights/biases resident across all batch tiles
    single = pl.Buffered(1)           # constant blocks: one VMEM copy, no double buffer

    rows = steps * tb
    flops = 2 * rows * (2 * N_WIRES * HIDDEN + 2 * HIDDEN * ENC_PAD)
    bytes_accessed = (2 * (2 * N_WIRES * HIDDEN + 2 * HIDDEN * ENC_PAD)   # bf16 weights
                      + 4 * (2 * HIDDEN + ENC_PAD + N_WIRES)              # f32 biases
                      + 4 * 2 * B * N_WIRES)                              # x read + y write

    out = pl.pallas_call(
        vae_kernel,
        out_shape=jax.ShapeDtypeStruct((B, N_WIRES), jnp.float32),
        grid=(steps,),
        in_specs=[
            pl.BlockSpec((tb, N_WIRES), lambda i: (i, 0)),                        # x
            pl.BlockSpec((N_WIRES, HIDDEN), const, pipeline_mode=single),         # W1 bf16
            pl.BlockSpec((1, HIDDEN), const, pipeline_mode=single),               # b1
            pl.BlockSpec((HIDDEN, ENC_PAD), const, pipeline_mode=single),         # W2 bf16
            pl.BlockSpec((1, ENC_PAD), const, pipeline_mode=single),              # b2
            pl.BlockSpec((ENC_PAD, HIDDEN), const, pipeline_mode=single),         # W3 bf16
            pl.BlockSpec((1, HIDDEN), const, pipeline_mode=single),               # b3
            pl.BlockSpec(memory_space=pl.ANY),                                    # W4 (HBM)
            pl.BlockSpec((1, N_WIRES), const, pipeline_mode=single),              # b4
        ],
        out_specs=pl.BlockSpec((tb, N_WIRES), lambda i: (i, 0)),
        scratch_shapes=[
            pltpu.VMEM((HIDDEN, N_WIRES), jnp.bfloat16),   # W4 landing buffer
            pltpu.SemaphoreType.DMA,                       # its completion semaphore
        ],
        compiler_params=pltpu.CompilerParams(
            # "arbitrary": the step==0 W4-prefetch guard needs sequential traversal.
            dimension_semantics=("arbitrary",),
            vmem_limit_bytes=48 << 20,
        ),
        cost_estimate=pl.CostEstimate(
            flops=flops,
            transcendentals=rows * ENCODED_DIM,
            bytes_accessed=bytes_accessed),
    )(x, w1, b1, w2, b2, w3, b3, w4, b4)

    return out


def init_params(key):
    ks = jax.random.split(key, 8)
    scale = 0.02
    w1 = scale * jax.random.normal(ks[0], (N_WIRES, HIDDEN), jnp.float32)
    b1 = scale * jax.random.normal(ks[1], (HIDDEN,), jnp.float32)
    w2 = scale * jax.random.normal(ks[2], (HIDDEN, ENCODED_DIM), jnp.float32)
    b2 = scale * jax.random.normal(ks[3], (ENCODED_DIM,), jnp.float32)
    w3 = scale * jax.random.normal(ks[4], (ENCODED_DIM, HIDDEN), jnp.float32)
    b3 = scale * jax.random.normal(ks[5], (HIDDEN,), jnp.float32)
    w4 = scale * jax.random.normal(ks[6], (HIDDEN, N_WIRES), jnp.float32)
    b4 = scale * jax.random.normal(ks[7], (N_WIRES,), jnp.float32)
    return (w1, b1, w2, b2, w3, b3, w4, b4)


def vae_forward_ref(x, params):
    """Pure-JAX f32 reference of the PyTorch forward pass."""
    w1, b1, w2, b2, w3, b3, w4, b4 = params
    h1 = x @ w1 + b1
    h1 = jnp.where(h1 > 0, h1, 0.2 * h1)
    z = jnp.tanh(h1 @ w2 + b2)
    h2 = jnp.maximum(z @ w3 + b3, 0.0)
    return h2 @ w4 + b4


def vae_forward_prepared_ref(x, prepared):
    """Pure-JAX reference at the kernel's precision (bf16 operands, f32 accumulate)."""
    w1, b1, w2, b2, w3, b3, w4, b4 = prepared
    bf16, f32 = jnp.bfloat16, jnp.float32
    h1 = jnp.dot(x.astype(bf16), w1, preferred_element_type=f32) + b1
    h1 = jnp.where(h1 > 0, h1, 0.2 * h1)
    z = jnp.tanh(jnp.dot(h1.astype(bf16), w2, preferred_element_type=f32) + b2)
    h2 = jnp.maximum(jnp.dot(z.astype(bf16), w3, preferred_element_type=f32) + b3, 0.0)
    return jnp.dot(h2.astype(bf16), w4, preferred_element_type=f32) + b4


if __name__ == "__main__":
    key = jax.random.PRNGKey(0)
    k_param, k_x = jax.random.split(key)
    params = init_params(k_param)
    prepared = prepare_params(params)          # one-time param packing (hoisted)

    B = 2
    x = jax.random.normal(k_x, (B, N_WIRES), jnp.float32)

    y = vae_forward(x, prepared)
    jax.block_until_ready(y)
    assert y.shape == (B, N_WIRES), y.shape

    # Matched-precision check (same bf16-operand / f32-accumulate math as the kernel).
    y_ref_bf16 = vae_forward_prepared_ref(x, prepared)
    assert jnp.allclose(y, y_ref_bf16, rtol=1e-2, atol=1e-3), (
        float(jnp.max(jnp.abs(y - y_ref_bf16))))

    # Loose sanity check against the pure-f32 reference (bf16 weights => looser tol).
    y_ref_f32 = vae_forward_ref(x, params)
    assert jnp.allclose(y, y_ref_f32, rtol=5e-2, atol=2e-2), (
        float(jnp.max(jnp.abs(y - y_ref_f32))))

    print("KERNEL_OK")
</pallas_src>

<mosaic_0001>
module attributes {stable_mosaic.version = 11 : i64} {
  func.func @vae_kernel(%arg0: i32, %arg1: memref<2x3606xf32, #tpu.memory_space<vmem>>, %arg2: memref<3606x512xbf16, #tpu.memory_space<vmem>>, %arg3: memref<1x512xf32, #tpu.memory_space<vmem>>, %arg4: memref<512x128xbf16, #tpu.memory_space<vmem>>, %arg5: memref<1x128xf32, #tpu.memory_space<vmem>>, %arg6: memref<128x512xbf16, #tpu.memory_space<vmem>>, %arg7: memref<1x512xf32, #tpu.memory_space<vmem>>, %arg8: memref<512x3606xbf16, #tpu.memory_space<any>>, %arg9: memref<1x3606xf32, #tpu.memory_space<vmem>>, %arg10: memref<2x3606xf32, #tpu.memory_space<vmem>>, %arg11: memref<512x3606xbf16, #tpu.memory_space<vmem>>, %arg12: memref<!tpu.dma_semaphore, #tpu.memory_space<semaphore_mem>>) attributes {dimension_semantics = [#tpu.dimension_semantics<arbitrary>], iteration_bounds = array<i64: 1>, scalar_prefetch = 0 : i64, scratch_operands = 2 : i64, tpu.core_type = #tpu.core_type<tc>, window_params = [{transform_indices = @transform_0, window_bounds = array<i64: 2, 3606>}, {pipeline_mode = #tpu.pipeline_mode<synchronous>, transform_indices = @transform_1, window_bounds = array<i64: 3606, 512>}, {pipeline_mode = #tpu.pipeline_mode<synchronous>, transform_indices = @transform_2, window_bounds = array<i64: 1, 512>}, {pipeline_mode = #tpu.pipeline_mode<synchronous>, transform_indices = @transform_3, window_bounds = array<i64: 512, 128>}, {pipeline_mode = #tpu.pipeline_mode<synchronous>, transform_indices = @transform_4, window_bounds = array<i64: 1, 128>}, {pipeline_mode = #tpu.pipeline_mode<synchronous>, transform_indices = @transform_5, window_bounds = array<i64: 128, 512>}, {pipeline_mode = #tpu.pipeline_mode<synchronous>, transform_indices = @transform_6, window_bounds = array<i64: 1, 512>}, {}, {pipeline_mode = #tpu.pipeline_mode<synchronous>, transform_indices = @transform_8, window_bounds = array<i64: 1, 3606>}, {transform_indices = @transform_9, window_bounds = array<i64: 2, 3606>}]} {
    %c0_i32 = arith.constant 0 : i32
    %0 = arith.cmpi eq, %arg0, %c0_i32 : i32
    %1 = arith.extui %0 : i1 to i32
    %c0_i32_0 = arith.constant 0 : i32
    %2 = arith.cmpi ne, %1, %c0_i32_0 : i32
    scf.if %2 {
      tpu.enqueue_dma source(%arg8 : memref<512x3606xbf16, #tpu.memory_space<any>>) target(%arg11 : memref<512x3606xbf16, #tpu.memory_space<vmem>>) target_semaphore(%arg12 : memref<!tpu.dma_semaphore, #tpu.memory_space<semaphore_mem>>)
    } else {
    }
    %c0 = arith.constant 0 : index
    %c0_1 = arith.constant 0 : index
    %3 = vector.load %arg1[%c0, %c0_1] : memref<2x3606xf32, #tpu.memory_space<vmem>>, vector<2x3606xf32>
    %4 = arith.truncf %3 : vector<2x3606xf32> to vector<2x3606xbf16>
    %c0_2 = arith.constant 0 : index
    %c0_3 = arith.constant 0 : index
    %5 = vector.load %arg2[%c0_2, %c0_3] : memref<3606x512xbf16, #tpu.memory_space<vmem>>, vector<3606x512xbf16>
    %cst = arith.constant dense<0.000000e+00> : vector<2x512xf32>
    %6 = tpu.matmul %4, %5, %cst {dimension_numbers = #tpu.dot_dimension_numbers<[1], [0], [0], [1], [0, 0, 1, 1], [], []>} : vector<2x3606xbf16>, vector<3606x512xbf16>, vector<2x512xf32> -> vector<2x512xf32>
    %c0_4 = arith.constant 0 : index
    %c0_5 = arith.constant 0 : index
    %7 = vector.load %arg3[%c0_4, %c0_5] : memref<1x512xf32, #tpu.memory_space<vmem>>, vector<1x512xf32>
    %8 = vector.broadcast %7 : vector<1x512xf32> to vector<2x512xf32>
    %9 = arith.addf %6, %8 : vector<2x512xf32>
    %cst_6 = arith.constant 0.000000e+00 : f32
    %10 = vector.broadcast %cst_6 : f32 to vector<2x512xf32>
    %11 = arith.cmpf ogt, %9, %10 : vector<2x512xf32>
    %cst_7 = arith.constant 2.000000e-01 : f32
    %12 = vector.broadcast %cst_7 : f32 to vector<2x512xf32>
    %13 = arith.mulf %12, %9 : vector<2x512xf32>
    %14 = arith.select %11, %9, %13 : vector<2x512xi1>, vector<2x512xf32>
    %15 = arith.truncf %14 : vector<2x512xf32> to vector<2x512xbf16>
    %c0_8 = arith.constant 0 : index
    %c0_9 = arith.constant 0 : index
    %16 = vector.load %arg4[%c0_8, %c0_9] : memref<512x128xbf16, #tpu.memory_space<vmem>>, vector<512x128xbf16>
    %cst_10 = arith.constant dense<0.000000e+00> : vector<2x128xf32>
    %17 = tpu.matmul %15, %16, %cst_10 {dimension_numbers = #tpu.dot_dimension_numbers<[1], [0], [0], [1], [0, 0, 1, 1], [], []>} : vector<2x512xbf16>, vector<512x128xbf16>, vector<2x128xf32> -> vector<2x128xf32>
    %c0_11 = arith.constant 0 : index
    %c0_12 = arith.constant 0 : index
    %18 = vector.load %arg5[%c0_11, %c0_12] : memref<1x128xf32, #tpu.memory_space<vmem>>, vector<1x128xf32>
    %19 = vector.broadcast %18 : vector<1x128xf32> to vector<2x128xf32>
    %20 = arith.addf %17, %19 : vector<2x128xf32>
    %21 = math.tanh %20 : vector<2x128xf32>
    %22 = arith.truncf %21 : vector<2x128xf32> to vector<2x128xbf16>
    %c0_13 = arith.constant 0 : index
    %c0_14 = arith.constant 0 : index
    %23 = vector.load %arg6[%c0_13, %c0_14] : memref<128x512xbf16, #tpu.memory_space<vmem>>, vector<128x512xbf16>
    %cst_15 = arith.constant dense<0.000000e+00> : vector<2x512xf32>
    %24 = tpu.matmul %22, %23, %cst_15 {dimension_numbers = #tpu.dot_dimension_numbers<[1], [0], [0], [1], [0, 0, 1, 1], [], []>} : vector<2x128xbf16>, vector<128x512xbf16>, vector<2x512xf32> -> vector<2x512xf32>
    %c0_16 = arith.constant 0 : index
    %c0_17 = arith.constant 0 : index
    %25 = vector.load %arg7[%c0_16, %c0_17] : memref<1x512xf32, #tpu.memory_space<vmem>>, vector<1x512xf32>
    %26 = vector.broadcast %25 : vector<1x512xf32> to vector<2x512xf32>
    %27 = arith.addf %24, %26 : vector<2x512xf32>
    %cst_18 = arith.constant 0.000000e+00 : f32
    %28 = vector.broadcast %cst_18 : f32 to vector<2x512xf32>
    %29 = arith.maximumf %27, %28 : vector<2x512xf32>
    %30 = arith.truncf %29 : vector<2x512xf32> to vector<2x512xbf16>
    %c0_i32_19 = arith.constant 0 : i32
    %31 = arith.cmpi eq, %arg0, %c0_i32_19 : i32
    %32 = arith.extui %31 : i1 to i32
    %c0_i32_20 = arith.constant 0 : i32
    %33 = arith.cmpi ne, %32, %c0_i32_20 : i32
    scf.if %33 {
      tpu.wait_dma2 semaphore(%arg12 : memref<!tpu.dma_semaphore, #tpu.memory_space<semaphore_mem>>) src(%arg8 : memref<512x3606xbf16, #tpu.memory_space<any>>) dst(%arg11 : memref<512x3606xbf16, #tpu.memory_space<vmem>>)
    } else {
    }
    %c0_21 = arith.constant 0 : index
    %c0_22 = arith.constant 0 : index
    %34 = vector.load %arg11[%c0_21, %c0_22] : memref<512x3606xbf16, #tpu.memory_space<vmem>>, vector<512x512xbf16>
    %cst_23 = arith.constant dense<0.000000e+00> : vector<2x512xf32>
    %35 = tpu.matmul %30, %34, %cst_23 {dimension_numbers = #tpu.dot_dimension_numbers<[1], [0], [0], [1], [0, 0, 1, 1], [], []>} : vector<2x512xbf16>, vector<512x512xbf16>, vector<2x512xf32> -> vector<2x512xf32>
    %c0_24 = arith.constant 0 : index
    %c0_25 = arith.constant 0 : index
    %36 = vector.load %arg9[%c0_24, %c0_25] : memref<1x3606xf32, #tpu.memory_space<vmem>>, vector<1x512xf32>
    %37 = vector.broadcast %36 : vector<1x512xf32> to vector<2x512xf32>
    %38 = arith.addf %35, %37 : vector<2x512xf32>
    %c0_26 = arith.constant 0 : index
    %c0_27 = arith.constant 0 : index
    %39 = vector.load %arg10[%c0_26, %c0_27] : memref<2x3606xf32, #tpu.memory_space<vmem>>, vector<2x512xf32>
    tpu.vector_store %arg10[%c0_26, %c0_27], %38 {strides = array<i32>} : memref<2x3606xf32, #tpu.memory_space<vmem>>, vector<2x512xf32>,
    %c0_28 = arith.constant 0 : index
    %c512 = arith.constant 512 : index
    %40 = vector.load %arg11[%c0_28, %c512] : memref<512x3606xbf16, #tpu.memory_space<vmem>>, vector<512x512xbf16>
    %cst_29 = arith.constant dense<0.000000e+00> : vector<2x512xf32>
    %41 = tpu.matmul %30, %40, %cst_29 {dimension_numbers = #tpu.dot_dimension_numbers<[1], [0], [0], [1], [0, 0, 1, 1], [], []>} : vector<2x512xbf16>, vector<512x512xbf16>, vector<2x512xf32> -> vector<2x512xf32>
    %c0_30 = arith.constant 0 : index
    %c512_31 = arith.constant 512 : index
    %42 = vector.load %arg9[%c0_30, %c512_31] : memref<1x3606xf32, #tpu.memory_space<vmem>>, vector<1x512xf32>
    %43 = vector.broadcast %42 : vector<1x512xf32> to vector<2x512xf32>
    %44 = arith.addf %41, %43 : vector<2x512xf32>
    %c0_32 = arith.constant 0 : index
    %c512_33 = arith.constant 512 : index
    %45 = vector.load %arg10[%c0_32, %c512_33] : memref<2x3606xf32, #tpu.memory_space<vmem>>, vector<2x512xf32>
    tpu.vector_store %arg10[%c0_32, %c512_33], %44 {strides = array<i32>} : memref<2x3606xf32, #tpu.memory_space<vmem>>, vector<2x512xf32>,
    %c0_34 = arith.constant 0 : index
    %c1024 = arith.constant 1024 : index
    %46 = vector.load %arg11[%c0_34, %c1024] : memref<512x3606xbf16, #tpu.memory_space<vmem>>, vector<512x512xbf16>
    %cst_35 = arith.constant dense<0.000000e+00> : vector<2x512xf32>
    %47 = tpu.matmul %30, %46, %cst_35 {dimension_numbers = #tpu.dot_dimension_numbers<[1], [0], [0], [1], [0, 0, 1, 1], [], []>} : vector<2x512xbf16>, vector<512x512xbf16>, vector<2x512xf32> -> vector<2x512xf32>
    %c0_36 = arith.constant 0 : index
    %c1024_37 = arith.constant 1024 : index
    %48 = vector.load %arg9[%c0_36, %c1024_37] : memref<1x3606xf32, #tpu.memory_space<vmem>>, vector<1x512xf32>
    %49 = vector.broadcast %48 : vector<1x512xf32> to vector<2x512xf32>
    %50 = arith.addf %47, %49 : vector<2x512xf32>
    %c0_38 = arith.constant 0 : index
    %c1024_39 = arith.constant 1024 : index
    %51 = vector.load %arg10[%c0_38, %c1024_39] : memref<2x3606xf32, #tpu.memory_space<vmem>>, vector<2x512xf32>
    tpu.vector_store %arg10[%c0_38, %c1024_39], %50 {strides = array<i32>} : memref<2x3606xf32, #tpu.memory_space<vmem>>, vector<2x512xf32>,
    %c0_40 = arith.constant 0 : index
    %c1536 = arith.constant 1536 : index
    %52 = vector.load %arg11[%c0_40, %c1536] : memref<512x3606xbf16, #tpu.memory_space<vmem>>, vector<512x512xbf16>
    %cst_41 = arith.constant dense<0.000000e+00> : vector<2x512xf32>
    %53 = tpu.matmul %30, %52, %cst_41 {dimension_numbers = #tpu.dot_dimension_numbers<[1], [0], [0], [1], [0, 0, 1, 1], [], []>} : vector<2x512xbf16>, vector<512x512xbf16>, vector<2x512xf32> -> vector<2x512xf32>
    %c0_42 = arith.constant 0 : index
    %c1536_43 = arith.constant 1536 : index
    %54 = vector.load %arg9[%c0_42, %c1536_43] : memref<1x3606xf32, #tpu.memory_space<vmem>>, vector<1x512xf32>
    %55 = vector.broadcast %54 : vector<1x512xf32> to vector<2x512xf32>
    %56 = arith.addf %53, %55 : vector<2x512xf32>
    %c0_44 = arith.constant 0 : index
    %c1536_45 = arith.constant 1536 : index
    %57 = vector.load %arg10[%c0_44, %c1536_45] : memref<2x3606xf32, #tpu.memory_space<vmem>>, vector<2x512xf32>
    tpu.vector_store %arg10[%c0_44, %c1536_45], %56 {strides = array<i32>} : memref<2x3606xf32, #tpu.memory_space<vmem>>, vector<2x512xf32>,
    %c0_46 = arith.constant 0 : index
    %c2048 = arith.constant 2048 : index
    %58 = vector.load %arg11[%c0_46, %c2048] : memref<512x3606xbf16, #tpu.memory_space<vmem>>, vector<512x512xbf16>
    %cst_47 = arith.constant dense<0.000000e+00> : vector<2x512xf32>
    %59 = tpu.matmul %30, %58, %cst_47 {dimension_numbers = #tpu.dot_dimension_numbers<[1], [0], [0], [1], [0, 0, 1, 1], [], []>} : vector<2x512xbf16>, vector<512x512xbf16>, vector<2x512xf32> -> vector<2x512xf32>
    %c0_48 = arith.constant 0 : index
    %c2048_49 = arith.constant 2048 : index
    %60 = vector.load %arg9[%c0_48, %c2048_49] : memref<1x3606xf32, #tpu.memory_space<vmem>>, vector<1x512xf32>
    %61 = vector.broadcast %60 : vector<1x512xf32> to vector<2x512xf32>
    %62 = arith.addf %59, %61 : vector<2x512xf32>
    %c0_50 = arith.constant 0 : index
    %c2048_51 = arith.constant 2048 : index
    %63 = vector.load %arg10[%c0_50, %c2048_51] : memref<2x3606xf32, #tpu.memory_space<vmem>>, vector<2x512xf32>
    tpu.vector_store %arg10[%c0_50, %c2048_51], %62 {strides = array<i32>} : memref<2x3606xf32, #tpu.memory_space<vmem>>, vector<2x512xf32>,
    %c0_52 = arith.constant 0 : index
    %c2560 = arith.constant 2560 : index
    %64 = vector.load %arg11[%c0_52, %c2560] : memref<512x3606xbf16, #tpu.memory_space<vmem>>, vector<512x512xbf16>
    %cst_53 = arith.constant dense<0.000000e+00> : vector<2x512xf32>
    %65 = tpu.matmul %30, %64, %cst_53 {dimension_numbers = #tpu.dot_dimension_numbers<[1], [0], [0], [1], [0, 0, 1, 1], [], []>} : vector<2x512xbf16>, vector<512x512xbf16>, vector<2x512xf32> -> vector<2x512xf32>
    %c0_54 = arith.constant 0 : index
    %c2560_55 = arith.constant 2560 : index
    %66 = vector.load %arg9[%c0_54, %c2560_55] : memref<1x3606xf32, #tpu.memory_space<vmem>>, vector<1x512xf32>
    %67 = vector.broadcast %66 : vector<1x512xf32> to vector<2x512xf32>
    %68 = arith.addf %65, %67 : vector<2x512xf32>
    %c0_56 = arith.constant 0 : index
    %c2560_57 = arith.constant 2560 : index
    %69 = vector.load %arg10[%c0_56, %c2560_57] : memref<2x3606xf32, #tpu.memory_space<vmem>>, vector<2x512xf32>
    tpu.vector_store %arg10[%c0_56, %c2560_57], %68 {strides = array<i32>} : memref<2x3606xf32, #tpu.memory_space<vmem>>, vector<2x512xf32>,
    %c0_58 = arith.constant 0 : index
    %c3072 = arith.constant 3072 : index
    %70 = vector.load %arg11[%c0_58, %c3072] : memref<512x3606xbf16, #tpu.memory_space<vmem>>, vector<512x534xbf16>
    %cst_59 = arith.constant dense<0.000000e+00> : vector<2x534xf32>
    %71 = tpu.matmul %30, %70, %cst_59 {dimension_numbers = #tpu.dot_dimension_numbers<[1], [0], [0], [1], [0, 0, 1, 1], [], []>} : vector<2x512xbf16>, vector<512x534xbf16>, vector<2x534xf32> -> vector<2x534xf32>
    %c0_60 = arith.constant 0 : index
    %c3072_61 = arith.constant 3072 : index
    %72 = vector.load %arg9[%c0_60, %c3072_61] : memref<1x3606xf32, #tpu.memory_space<vmem>>, vector<1x534xf32>
    %73 = vector.broadcast %72 : vector<1x534xf32> to vector<2x534xf32>
    %74 = arith.addf %71, %73 : vector<2x534xf32>
    %c0_62 = arith.constant 0 : index
    %c3072_63 = arith.constant 3072 : index
    %75 = vector.load %arg10[%c0_62, %c3072_63] : memref<2x3606xf32, #tpu.memory_space<vmem>>, vector<2x534xf32>
    tpu.vector_store %arg10[%c0_62, %c3072_63], %74 {strides = array<i32>} : memref<2x3606xf32, #tpu.memory_space<vmem>>, vector<2x534xf32>,
    return
  }
  func.func @transform_0(%arg0: i32) -> (i32, i32) {
    %c0_i32 = arith.constant 0 : i32
    %c0_i32_0 = arith.constant 0 : i32
    return %arg0, %c0_i32 : i32, i32
  }
  func.func @transform_1(%arg0: i32) -> (i32, i32) {
    %c0_i32 = arith.constant 0 : i32
    %c0_i32_0 = arith.constant 0 : i32
    %c0_i32_1 = arith.constant 0 : i32
    return %c0_i32, %c0_i32_0 : i32, i32
  }
  func.func @transform_2(%arg0: i32) -> (i32, i32) {
    %c0_i32 = arith.constant 0 : i32
    %c0_i32_0 = arith.constant 0 : i32
    %c0_i32_1 = arith.constant 0 : i32
    return %c0_i32, %c0_i32_0 : i32, i32
  }
  func.func @transform_3(%arg0: i32) -> (i32, i32) {
    %c0_i32 = arith.constant 0 : i32
    %c0_i32_0 = arith.constant 0 : i32
    %c0_i32_1 = arith.constant 0 : i32
    return %c0_i32, %c0_i32_0 : i32, i32
  }
  func.func @transform_4(%arg0: i32) -> (i32, i32) {
    %c0_i32 = arith.constant 0 : i32
    %c0_i32_0 = arith.constant 0 : i32
    %c0_i32_1 = arith.constant 0 : i32
    return %c0_i32, %c0_i32_0 : i32, i32
  }
  func.func @transform_5(%arg0: i32) -> (i32, i32) {
    %c0_i32 = arith.constant 0 : i32
    %c0_i32_0 = arith.constant 0 : i32
    %c0_i32_1 = arith.constant 0 : i32
    return %c0_i32, %c0_i32_0 : i32, i32
  }
  func.func @transform_6(%arg0: i32) -> (i32, i32) {
    %c0_i32 = arith.constant 0 : i32
    %c0_i32_0 = arith.constant 0 : i32
    %c0_i32_1 = arith.constant 0 : i32
    return %c0_i32, %c0_i32_0 : i32, i32
  }
  func.func @transform_8(%arg0: i32) -> (i32, i32) {
    %c0_i32 = arith.constant 0 : i32
    %c0_i32_0 = arith.constant 0 : i32
    %c0_i32_1 = arith.constant 0 : i32
    return %c0_i32, %c0_i32_0 : i32, i32
  }
  func.func @transform_9(%arg0: i32) -> (i32, i32) {
    %c0_i32 = arith.constant 0 : i32
    %c0_i32_0 = arith.constant 0 : i32
    return %arg0, %c0_i32 : i32, i32
  }
}

</mosaic_0001>

<bundles_post_ra>
// kernel: vae_forward.1
= control target key start
LH: loop header
LB: loop body
LE: loop exit
PB: predicated region body
PF: predicated region fallthrough
CT: control target
= control target key end

     0   :  { %14 = vsyncpa [#allocation5], 0  ;;  %s27838_s0 = inlined_call_operand.vmem [shape: f32[2,3606], index: 0, kind: input, shape index: {}]   ;;  %s27839_s1 = inlined_call_operand.vmem [shape: bf16[3606,512], index: 1, kind: input, shape index: {}]   ;;  %s27840_s2 = inlined_call_operand.vmem [shape: f32[1,512], index: 2, kind: input, shape index: {}]   ;;  %s27841_s3 = inlined_call_operand.vmem [shape: bf16[512,128], index: 3, kind: input, shape index: {}]   ;;  %s27842_s4 = inlined_call_operand.vmem [shape: f32[1,128], index: 4, kind: input, shape index: {}]   ;;  %s27843_s5 = inlined_call_operand.vmem [shape: bf16[128,512], index: 5, kind: input, shape index: {}]   ;;  %s27844_s6 = inlined_call_operand.vmem [shape: f32[1,512], index: 6, kind: input, shape index: {}]   ;;  %s27845_s7 = inlined_call_operand.vmem [shape: bf16[512,3606], index: 7, kind: input, shape index: {}]   ;;  %s27846_s8 = inlined_call_operand.vmem [shape: f32[1,3606], index: 8, kind: input, shape index: {}]   ;;  %s27847_s9 = inlined_call_operand.hbm [shape: f32[2,3606], index: 9, kind: output, shape index: {}]  }
   0x1   :  { %v69_v0 = vld [vmem:[%s27845_s7] sm:$0xff]  ;;  %v71_v1 = vld [vmem:[%s27845_s7 + $0x8] sm:$0xff]  ;;  %v73_v2 = vld [vmem:[%s27845_s7 + $0x10] sm:$0xff] }
   0x2   :  { %70 = vst [vmem:[#allocation2] sm:$0xff] %v69_v0  ;;  %72 = vst [vmem:[#allocation2 + $0x8] sm:$0xff] %v71_v1  ;;  %v75_v3 = vld [vmem:[%s27845_s7 + $0x18] sm:$0xff]  ;;  %v77_v4 = vld [vmem:[%s27845_s7 + $0x20] sm:$0xff] }
   0x3   :  { %74 = vst [vmem:[#allocation2 + $0x10] sm:$0xff] %v73_v2  ;;  %76 = vst [vmem:[#allocation2 + $0x18] sm:$0xff] %v75_v3  ;;  %v79_v5 = vld [vmem:[%s27845_s7 + $0x28] sm:$0xff]  ;;  %v81_v6 = vld [vmem:[%s27845_s7 + $0x30] sm:$0xff] }
   0x4   :  { %78 = vst [vmem:[#allocation2 + $0x20] sm:$0xff] %v77_v4  ;;  %v83_v7 = vld [vmem:[%s27845_s7 + $0x38] sm:$0xff]  ;;  %80 = vst [vmem:[#allocation2 + $0x28] sm:$0xff] %v79_v5  ;;  %v85_v8 = vld [vmem:[%s27845_s7 + $0x40] sm:$0xff] }
   0x5   :  { %82 = vst [vmem:[#allocation2 + $0x30] sm:$0xff] %v81_v6  ;;  %84 = vst [vmem:[#allocation2 + $0x38] sm:$0xff] %v83_v7  ;;  %v87_v9 = vld [vmem:[%s27845_s7 + $0x48] sm:$0xff]  ;;  %v89_v10 = vld [vmem:[%s27845_s7 + $0x50] sm:$0xff] }
   0x6   :  { %86 = vst [vmem:[#allocation2 + $0x40] sm:$0xff] %v85_v8  ;;  %88 = vst [vmem:[#allocation2 + $0x48] sm:$0xff] %v87_v9  ;;  %v91_v11 = vld [vmem:[%s27845_s7 + $0x58] sm:$0xff]  ;;  %v93_v12 = vld [vmem:[%s27845_s7 + $0x60] sm:$0xff] }
   0x7   :  { %90 = vst [vmem:[#allocation2 + $0x50] sm:$0xff] %v89_v10  ;;  %v95_v13 = vld [vmem:[%s27845_s7 + $0x68] sm:$0xff]  ;;  %92 = vst [vmem:[#allocation2 + $0x58] sm:$0xff] %v91_v11  ;;  %v97_v14 = vld [vmem:[%s27845_s7 + $0x70] sm:$0xff] }
   0x8   :  { %94 = vst [vmem:[#allocation2 + $0x60] sm:$0xff] %v93_v12  ;;  %96 = vst [vmem:[#allocation2 + $0x68] sm:$0xff] %v95_v13  ;;  %v99_v15 = vld [vmem:[%s27845_s7 + $0x78] sm:$0xff]  ;;  %v101_v16 = vld [vmem:[%s27845_s7 + $0x80] sm:$0xff] }
   0x9   :  { %98 = vst [vmem:[#allocation2 + $0x70] sm:$0xff] %v97_v14  ;;  %100 = vst [vmem:[#allocation2 + $0x78] sm:$0xff] %v99_v15  ;;  %v103_v17 = vld [vmem:[%s27845_s7 + $0x88] sm:$0xff]  ;;  %v105_v18 = vld [vmem:[%s27845_s7 + $0x90] sm:$0xff] }
   0xa   :  { %102 = vst [vmem:[#allocation2 + $0x80] sm:$0xff] %v101_v16  ;;  %v107_v19 = vld [vmem:[%s27845_s7 + $0x98] sm:$0xff]  ;;  %104 = vst [vmem:[#allocation2 + $0x88] sm:$0xff] %v103_v17  ;;  %v109_v20 = vld [vmem:[%s27845_s7 + $0xa0] sm:$0xff] }
   0xb   :  { %106 = vst [vmem:[#allocation2 + $0x90] sm:$0xff] %v105_v18  ;;  %108 = vst [vmem:[#allocation2 + $0x98] sm:$0xff] %v107_v19  ;;  %v111_v21 = vld [vmem:[%s27845_s7 + $0xa8] sm:$0xff]  ;;  %v113_v22 = vld [vmem:[%s27845_s7 + $0xb0] sm:$0xff] }
   0xc   :  { %110 = vst [vmem:[#allocation2 + $0xa0] sm:$0xff] %v109_v20  ;;  %112 = vst [vmem:[#allocation2 + $0xa8] sm:$0xff] %v111_v21  ;;  %v115_v23 = vld [vmem:[%s27845_s7 + $0xb8] sm:$0xff]  ;;  %v117_v24 = vld [vmem:[%s27845_s7 + $0xc0] sm:$0xff] }
   0xd   :  { %114 = vst [vmem:[#allocation2 + $0xb0] sm:$0xff] %v113_v22  ;;  %v119_v25 = vld [vmem:[%s27845_s7 + $0xc8] sm:$0xff]  ;;  %116 = vst [vmem:[#allocation2 + $0xb8] sm:$0xff] %v115_v23  ;;  %v121_v26 = vld [vmem:[%s27845_s7 + $0xd0] sm:$0xff] }
   0xe   :  { %118 = vst [vmem:[#allocation2 + $0xc0] sm:$0xff] %v117_v24  ;;  %120 = vst [vmem:[#allocation2 + $0xc8] sm:$0xff] %v119_v25  ;;  %v123_v27 = vld [vmem:[%s27845_s7 + $0xd8] sm:$0xff]  ;;  %v125_v28 = vld [vmem:[%s27845_s7 + $0xe0] sm:$0xff] }
   0xf   :  { %122 = vst [vmem:[#allocation2 + $0xd0] sm:$0xff] %v121_v26  ;;  %124 = vst [vmem:[#allocation2 + $0xd8] sm:$0xff] %v123_v27  ;;  %v127_v29 = vld [vmem:[%s27845_s7 + $0xe8] sm:$0xff]  ;;  %v129_v30 = vld [vmem:[%s27845_s7 + $0xf0] sm:$0xff] }
  0x10   :  { %126 = vst [vmem:[#allocation2 + $0xe0] sm:$0xff] %v125_v28  ;;  %v131_v31 = vld [vmem:[%s27845_s7 + $0xf8] sm:$0xff]  ;;  %128 = vst [vmem:[#allocation2 + $0xe8] sm:$0xff] %v127_v29  ;;  %v133_v32 = vld [vmem:[%s27845_s7 + $0x100] sm:$0xff] }
  0x11   :  { %130 = vst [vmem:[#allocation2 + $0xf0] sm:$0xff] %v129_v30  ;;  %132 = vst [vmem:[#allocation2 + $0xf8] sm:$0xff] %v131_v31  ;;  %v135_v33 = vld [vmem:[%s27845_s7 + $0x108] sm:$0xff]  ;;  %v137_v34 = vld [vmem:[%s27845_s7 + $0x110] sm:$0xff] }
  0x12   :  { %134 = vst [vmem:[#allocation2 + $0x100] sm:$0xff] %v133_v32  ;;  %136 = vst [vmem:[#allocation2 + $0x108] sm:$0xff] %v135_v33  ;;  %v139_v35 = vld [vmem:[%s27845_s7 + $0x118] sm:$0xff]  ;;  %v141_v36 = vld [vmem:[%s27845_s7 + $0x120] sm:$0xff] }
  0x13   :  { %138 = vst [vmem:[#allocation2 + $0x110] sm:$0xff] %v137_v34  ;;  %v143_v37 = vld [vmem:[%s27845_s7 + $0x128] sm:$0xff]  ;;  %140 = vst [vmem:[#allocation2 + $0x118] sm:$0xff] %v139_v35  ;;  %v145_v38 = vld [vmem:[%s27845_s7 + $0x130] sm:$0xff] }
  0x14   :  { %142 = vst [vmem:[#allocation2 + $0x120] sm:$0xff] %v141_v36  ;;  %144 = vst [vmem:[#allocation2 + $0x128] sm:$0xff] %v143_v37  ;;  %v147_v39 = vld [vmem:[%s27845_s7 + $0x138] sm:$0xff]  ;;  %v149_v40 = vld [vmem:[%s27845_s7 + $0x140] sm:$0xff] }
  0x15   :  { %146 = vst [vmem:[#allocation2 + $0x130] sm:$0xff] %v145_v38  ;;  %148 = vst [vmem:[#allocation2 + $0x138] sm:$0xff] %v147_v39  ;;  %v151_v41 = vld [vmem:[%s27845_s7 + $0x148] sm:$0xff]  ;;  %v153_v42 = vld [vmem:[%s27845_s7 + $0x150] sm:$0xff] }
  0x16   :  { %150 = vst [vmem:[#allocation2 + $0x140] sm:$0xff] %v149_v40  ;;  %v155_v43 = vld [vmem:[%s27845_s7 + $0x158] sm:$0xff]  ;;  %152 = vst [vmem:[#allocation2 + $0x148] sm:$0xff] %v151_v41  ;;  %v157_v44 = vld [vmem:[%s27845_s7 + $0x160] sm:$0xff] }
  0x17   :  { %154 = vst [vmem:[#allocation2 + $0x150] sm:$0xff] %v153_v42  ;;  %156 = vst [vmem:[#allocation2 + $0x158] sm:$0xff] %v155_v43  ;;  %v159_v45 = vld [vmem:[%s27845_s7 + $0x168] sm:$0xff]  ;;  %v161_v46 = vld [vmem:[%s27845_s7 + $0x170] sm:$0xff] }
  0x18   :  { %158 = vst [vmem:[#allocation2 + $0x160] sm:$0xff] %v157_v44  ;;  %160 = vst [vmem:[#allocation2 + $0x168] sm:$0xff] %v159_v45  ;;  %v163_v47 = vld [vmem:[%s27845_s7 + $0x178] sm:$0xff]  ;;  %v165_v48 = vld [vmem:[%s27845_s7 + $0x180] sm:$0xff] }
  0x19   :  { %162 = vst [vmem:[#allocation2 + $0x170] sm:$0xff] %v161_v46  ;;  %v167_v49 = vld [vmem:[%s27845_s7 + $0x188] sm:$0xff]  ;;  %164 = vst [vmem:[#allocation2 + $0x178] sm:$0xff] %v163_v47  ;;  %v169_v50 = vld [vmem:[%s27845_s7 + $0x190] sm:$0xff] }
  0x1a   :  { %166 = vst [vmem:[#allocation2 + $0x180] sm:$0xff] %v165_v48  ;;  %168 = vst [vmem:[#allocation2 + $0x188] sm:$0xff] %v167_v49  ;;  %v171_v51 = vld [vmem:[%s27845_s7 + $0x198] sm:$0xff]  ;;  %v173_v52 = vld [vmem:[%s27845_s7 + $0x1a0] sm:$0xff] }
  0x1b   :  { %170 = vst [vmem:[#allocation2 + $0x190] sm:$0xff] %v169_v50  ;;  %172 = vst [vmem:[#allocation2 + $0x198] sm:$0xff] %v171_v51  ;;  %v175_v53 = vld [vmem:[%s27845_s7 + $0x1a8] sm:$0xff]  ;;  %v177_v54 = vld [vmem:[%s27845_s7 + $0x1b0] sm:$0xff] }
  0x1c   :  { %174 = vst [vmem:[#allocation2 + $0x1a0] sm:$0xff] %v173_v52  ;;  %v179_v55 = vld [vmem:[%s27845_s7 + $0x1b8] sm:$0xff]  ;;  %176 = vst [vmem:[#allocation2 + $0x1a8] sm:$0xff] %v175_v53  ;;  %v181_v56 = vld [vmem:[%s27845_s7 + $0x1c0] sm:$0xff] }
  0x1d   :  { %178 = vst [vmem:[#allocation2 + $0x1b0] sm:$0xff] %v177_v54  ;;  %180 = vst [vmem:[#allocation2 + $0x1b8] sm:$0xff] %v179_v55  ;;  %v183_v57 = vld [vmem:[%s27845_s7 + $0x1c8] sm:$0xff]  ;;  %v185_v58 = vld [vmem:[%s27845_s7 + $0x1d0] sm:$0xff] }
  0x1e   :  { %182 = vst [vmem:[#allocation2 + $0x1c0] sm:$0xff] %v181_v56  ;;  %184 = vst [vmem:[#allocation2 + $0x1c8] sm:$0xff] %v183_v57  ;;  %v187_v59 = vld [vmem:[%s27845_s7 + $0x1d8] sm:$0xff]  ;;  %v189_v60 = vld [vmem:[%s27845_s7 + $0x1e0] sm:$0xff] }
  0x1f   :  { %186 = vst [vmem:[#allocation2 + $0x1d0] sm:$0xff] %v185_v58  ;;  %v191_v61 = vld [vmem:[%s27845_s7 + $0x1e8] sm:$0xff]  ;;  %188 = vst [vmem:[#allocation2 + $0x1d8] sm:$0xff] %v187_v59  ;;  %v193_v62 = vld [vmem:[%s27845_s7 + $0x1f0] sm:$0xff] }
  0x20   :  { %190 = vst [vmem:[#allocation2 + $0x1e0] sm:$0xff] %v189_v60  ;;  %192 = vst [vmem:[#allocation2 + $0x1e8] sm:$0xff] %v191_v61  ;;  %v195_v63 = vld [vmem:[%s27845_s7 + $0x1f8] sm:$0xff]  ;;  %v197_v0 = vld [vmem:[%s27845_s7 + $0x200] sm:$0xff] }
  0x21   :  { %194 = vst [vmem:[#allocation2 + $0x1f0] sm:$0xff] %v193_v62  ;;  %196 = vst [vmem:[#allocation2 + $0x1f8] sm:$0xff] %v195_v63  ;;  %v199_v1 = vld [vmem:[%s27845_s7 + $0x208] sm:$0xff]  ;;  %v201_v2 = vld [vmem:[%s27845_s7 + $0x210] sm:$0xff] }
  0x22   :  { %198 = vst [vmem:[#allocation2 + $0x200] sm:$0xff] %v197_v0  ;;  %v203_v3 = vld [vmem:[%s27845_s7 + $0x218] sm:$0xff]  ;;  %200 = vst [vmem:[#allocation2 + $0x208] sm:$0xff] %v199_v1  ;;  %v205_v4 = vld [vmem:[%s27845_s7 + $0x220] sm:$0xff] }
  0x23   :  { %202 = vst [vmem:[#allocation2 + $0x210] sm:$0xff] %v201_v2  ;;  %204 = vst [vmem:[#allocation2 + $0x218] sm:$0xff] %v203_v3  ;;  %v207_v5 = vld [vmem:[%s27845_s7 + $0x228] sm:$0xff]  ;;  %v209_v6 = vld [vmem:[%s27845_s7 + $0x230] sm:$0xff] }
  0x24   :  { %206 = vst [vmem:[#allocation2 + $0x220] sm:$0xff] %v205_v4  ;;  %208 = vst [vmem:[#allocation2 + $0x228] sm:$0xff] %v207_v5  ;;  %v211_v7 = vld [vmem:[%s27845_s7 + $0x238] sm:$0xff]  ;;  %v213_v8 = vld [vmem:[%s27845_s7 + $0x240] sm:$0xff] }
  0x25   :  { %210 = vst [vmem:[#allocation2 + $0x230] sm:$0xff] %v209_v6  ;;  %v215_v9 = vld [vmem:[%s27845_s7 + $0x248] sm:$0xff]  ;;  %212 = vst [vmem:[#allocation2 + $0x238] sm:$0xff] %v211_v7  ;;  %v217_v10 = vld [vmem:[%s27845_s7 + $0x250] sm:$0xff] }
  0x26   :  { %214 = vst [vmem:[#allocation2 + $0x240] sm:$0xff] %v213_v8  ;;  %216 = vst [vmem:[#allocation2 + $0x248] sm:$0xff] %v215_v9  ;;  %v219_v11 = vld [vmem:[%s27845_s7 + $0x258] sm:$0xff]  ;;  %v221_v12 = vld [vmem:[%s27845_s7 + $0x260] sm:$0xff] }
  0x27   :  { %218 = vst [vmem:[#allocation2 + $0x250] sm:$0xff] %v217_v10  ;;  %220 = vst [vmem:[#allocation2 + $0x258] sm:$0xff] %v219_v11  ;;  %v223_v13 = vld [vmem:[%s27845_s7 + $0x268] sm:$0xff]  ;;  %v225_v14 = vld [vmem:[%s27845_s7 + $0x270] sm:$0xff] }
  0x28   :  { %222 = vst [vmem:[#allocation2 + $0x260] sm:$0xff] %v221_v12  ;;  %v227_v15 = vld [vmem:[%s27845_s7 + $0x278] sm:$0xff]  ;;  %224 = vst [vmem:[#allocation2 + $0x268] sm:$0xff] %v223_v13  ;;  %v229_v16 = vld [vmem:[%s27845_s7 + $0x280] sm:$0xff] }
  0x29   :  { %226 = vst [vmem:[#allocation2 + $0x270] sm:$0xff] %v225_v14  ;;  %228 = vst [vmem:[#allocation2 + $0x278] sm:$0xff] %v227_v15  ;;  %v231_v17 = vld [vmem:[%s27845_s7 + $0x288] sm:$0xff]  ;;  %v233_v18 = vld [vmem:[%s27845_s7 + $0x290] sm:$0xff] }
  0x2a   :  { %230 = vst [vmem:[#allocation2 + $0x280] sm:$0xff] %v229_v16  ;;  %232 = vst [vmem:[#allocation2 + $0x288] sm:$0xff] %v231_v17  ;;  %v235_v19 = vld [vmem:[%s27845_s7 + $0x298] sm:$0xff]  ;;  %v237_v20 = vld [vmem:[%s27845_s7 + $0x2a0] sm:$0xff] }
  0x2b   :  { %234 = vst [vmem:[#allocation2 + $0x290] sm:$0xff] %v233_v18  ;;  %v239_v21 = vld [vmem:[%s27845_s7 + $0x2a8] sm:$0xff]  ;;  %236 = vst [vmem:[#allocation2 + $0x298] sm:$0xff] %v235_v19  ;;  %v241_v22 = vld [vmem:[%s27845_s7 + $0x2b0] sm:$0xff] }
  0x2c   :  { %238 = vst [vmem:[#allocation2 + $0x2a0] sm:$0xff] %v237_v20  ;;  %240 = vst [vmem:[#allocation2 + $0x2a8] sm:$0xff] %v239_v21  ;;  %v243_v23 = vld [vmem:[%s27845_s7 + $0x2b8] sm:$0xff]  ;;  %v245_v24 = vld [vmem:[%s27845_s7 + $0x2c0] sm:$0xff] }
  0x2d   :  { %242 = vst [vmem:[#allocation2 + $0x2b0] sm:$0xff] %v241_v22  ;;  %244 = vst [vmem:[#allocation2 + $0x2b8] sm:$0xff] %v243_v23  ;;  %v247_v25 = vld [vmem:[%s27845_s7 + $0x2c8] sm:$0xff]  ;;  %v249_v26 = vld [vmem:[%s27845_s7 + $0x2d0] sm:$0xff] }
  0x2e   :  { %246 = vst [vmem:[#allocation2 + $0x2c0] sm:$0xff] %v245_v24  ;;  %v251_v27 = vld [vmem:[%s27845_s7 + $0x2d8] sm:$0xff]  ;;  %248 = vst [vmem:[#allocation2 + $0x2c8] sm:$0xff] %v247_v25  ;;  %v253_v28 = vld [vmem:[%s27845_s7 + $0x2e0] sm:$0xff] }
  0x2f   :  { %250 = vst [vmem:[#allocation2 + $0x2d0] sm:$0xff] %v249_v26  ;;  %252 = vst [vmem:[#allocation2 + $0x2d8] sm:$0xff] %v251_v27  ;;  %v255_v29 = vld [vmem:[%s27845_s7 + $0x2e8] sm:$0xff]  ;;  %v257_v30 = vld [vmem:[%s27845_s7 + $0x2f0] sm:$0xff] }
  0x30   :  { %254 = vst [vmem:[#allocation2 + $0x2e0] sm:$0xff] %v253_v28  ;;  %256 = vst [vmem:[#allocation2 + $0x2e8] sm:$0xff] %v255_v29  ;;  %v259_v31 = vld [vmem:[%s27845_s7 + $0x2f8] sm:$0xff]  ;;  %v261_v32 = vld [vmem:[%s27845_s7 + $0x300] sm:$0xff] }
  0x31   :  { %258 = vst [vmem:[#allocation2 + $0x2f0] sm:$0xff] %v257_v30  ;;  %v263_v33 = vld [vmem:[%s27845_s7 + $0x308] sm:$0xff]  ;;  %260 = vst [vmem:[#allocation2 + $0x2f8] sm:$0xff] %v259_v31  ;;  %v265_v34 = vld [vmem:[%s27845_s7 + $0x310] sm:$0xff] }
  0x32   :  { %262 = vst [vmem:[#allocation2 + $0x300] sm:$0xff] %v261_v32  ;;  %264 = vst [vmem:[#allocation2 + $0x308] sm:$0xff] %v263_v33  ;;  %v267_v35 = vld [vmem:[%s27845_s7 + $0x318] sm:$0xff]  ;;  %v269_v36 = vld [vmem:[%s27845_s7 + $0x320] sm:$0xff] }
  0x33   :  { %266 = vst [vmem:[#allocation2 + $0x310] sm:$0xff] %v265_v34  ;;  %268 = vst [vmem:[#allocation2 + $0x318] sm:$0xff] %v267_v35  ;;  %v271_v37 = vld [vmem:[%s27845_s7 + $0x328] sm:$0xff]  ;;  %v273_v38 = vld [vmem:[%s27845_s7 + $0x330] sm:$0xff] }
  0x34   :  { %270 = vst [vmem:[#allocation2 + $0x320] sm:$0xff] %v269_v36  ;;  %v275_v39 = vld [vmem:[%s27845_s7 + $0x338] sm:$0xff]  ;;  %272 = vst [vmem:[#allocation2 + $0x328] sm:$0xff] %v271_v37  ;;  %v277_v40 = vld [vmem:[%s27845_s7 + $0x340] sm:$0xff] }
  0x35   :  { %274 = vst [vmem:[#allocation2 + $0x330] sm:$0xff] %v273_v38  ;;  %276 = vst [vmem:[#allocation2 + $0x338] sm:$0xff] %v275_v39  ;;  %v279_v41 = vld [vmem:[%s27845_s7 + $0x348] sm:$0xff]  ;;  %v281_v42 = vld [vmem:[%s27845_s7 + $0x350] sm:$0xff] }
  0x36   :  { %278 = vst [vmem:[#allocation2 + $0x340] sm:$0xff] %v277_v40  ;;  %280 = vst [vmem:[#allocation2 + $0x348] sm:$0xff] %v279_v41  ;;  %v283_v43 = vld [vmem:[%s27845_s7 + $0x358] sm:$0xff]  ;;  %v285_v44 = vld [vmem:[%s27845_s7 + $0x360] sm:$0xff] }
  0x37   :  { %282 = vst [vmem:[#allocation2 + $0x350] sm:$0xff] %v281_v42  ;;  %v287_v45 = vld [vmem:[%s27845_s7 + $0x368] sm:$0xff]  ;;  %284 = vst [vmem:[#allocation2 + $0x358] sm:$0xff] %v283_v43  ;;  %v289_v46 = vld [vmem:[%s27845_s7 + $0x370] sm:$0xff] }
  0x38   :  { %286 = vst [vmem:[#allocation2 + $0x360] sm:$0xff] %v285_v44  ;;  %288 = vst [vmem:[#allocation2 + $0x368] sm:$0xff] %v287_v45  ;;  %v291_v47 = vld [vmem:[%s27845_s7 + $0x378] sm:$0xff]  ;;  %v293_v48 = vld [vmem:[%s27845_s7 + $0x380] sm:$0xff] }
  0x39   :  { %290 = vst [vmem:[#allocation2 + $0x370] sm:$0xff] %v289_v46  ;;  %292 = vst [vmem:[#allocation2 + $0x378] sm:$0xff] %v291_v47  ;;  %v295_v49 = vld [vmem:[%s27845_s7 + $0x388] sm:$0xff]  ;;  %v297_v50 = vld [vmem:[%s27845_s7 + $0x390] sm:$0xff] }
  0x3a   :  { %294 = vst [vmem:[#allocation2 + $0x380] sm:$0xff] %v293_v48  ;;  %v299_v51 = vld [vmem:[%s27845_s7 + $0x398] sm:$0xff]  ;;  %296 = vst [vmem:[#allocation2 + $0x388] sm:$0xff] %v295_v49  ;;  %v301_v52 = vld [vmem:[%s27845_s7 + $0x3a0] sm:$0xff] }
  0x3b   :  { %298 = vst [vmem:[#allocation2 + $0x390] sm:$0xff] %v297_v50  ;;  %300 = vst [vmem:[#allocation2 + $0x398] sm:$0xff] %v299_v51  ;;  %v303_v53 = vld [vmem:[%s27845_s7 + $0x3a8] sm:$0xff]  ;;  %v305_v54 = vld [vmem:[%s27845_s7 + $0x3b0] sm:$0xff] }
  0x3c   :  { %302 = vst [vmem:[#allocation2 + $0x3a0] sm:$0xff] %v301_v52  ;;  %304 = vst [vmem:[#allocation2 + $0x3a8] sm:$0xff] %v303_v53  ;;  %v307_v55 = vld [vmem:[%s27845_s7 + $0x3b8] sm:$0xff]  ;;  %v309_v56 = vld [vmem:[%s27845_s7 + $0x3c0] sm:$0xff] }
  0x3d   :  { %306 = vst [vmem:[#allocation2 + $0x3b0] sm:$0xff] %v305_v54  ;;  %v311_v57 = vld [vmem:[%s27845_s7 + $0x3c8] sm:$0xff]  ;;  %308 = vst [vmem:[#allocation2 + $0x3b8] sm:$0xff] %v307_v55  ;;  %v313_v58 = vld [vmem:[%s27845_s7 + $0x3d0] sm:$0xff] }
  0x3e   :  { %310 = vst [vmem:[#allocation2 + $0x3c0] sm:$0xff] %v309_v56  ;;  %312 = vst [vmem:[#allocation2 + $0x3c8] sm:$0xff] %v311_v57  ;;  %v315_v59 = vld [vmem:[%s27845_s7 + $0x3d8] sm:$0xff]  ;;  %v317_v60 = vld [vmem:[%s27845_s7 + $0x3e0] sm:$0xff] }
  0x3f   :  { %314 = vst [vmem:[#allocation2 + $0x3d0] sm:$0xff] %v313_v58  ;;  %316 = vst [vmem:[#allocation2 + $0x3d8] sm:$0xff] %v315_v59  ;;  %v319_v61 = vld [vmem:[%s27845_s7 + $0x3e8] sm:$0xff]  ;;  %v321_v62 = vld [vmem:[%s27845_s7 + $0x3f0] sm:$0xff] }
  0x40   :  { %318 = vst [vmem:[#allocation2 + $0x3e0] sm:$0xff] %v317_v60  ;;  %v323_v63 = vld [vmem:[%s27845_s7 + $0x3f8] sm:$0xff]  ;;  %320 = vst [vmem:[#allocation2 + $0x3e8] sm:$0xff] %v319_v61  ;;  %v325_v0 = vld [vmem:[%s27845_s7 + $0x400] sm:$0xff] }
  0x41   :  { %322 = vst [vmem:[#allocation2 + $0x3f0] sm:$0xff] %v321_v62  ;;  %324 = vst [vmem:[#allocation2 + $0x3f8] sm:$0xff] %v323_v63  ;;  %v327_v1 = vld [vmem:[%s27845_s7 + $0x408] sm:$0xff]  ;;  %v329_v2 = vld [vmem:[%s27845_s7 + $0x410] sm:$0xff] }
  0x42   :  { %326 = vst [vmem:[#allocation2 + $0x400] sm:$0xff] %v325_v0  ;;  %328 = vst [vmem:[#allocation2 + $0x408] sm:$0xff] %v327_v1  ;;  %v331_v3 = vld [vmem:[%s27845_s7 + $0x418] sm:$0xff]  ;;  %v333_v4 = vld [vmem:[%s27845_s7 + $0x420] sm:$0xff] }
  0x43   :  { %330 = vst [vmem:[#allocation2 + $0x410] sm:$0xff] %v329_v2  ;;  %v335_v5 = vld [vmem:[%s27845_s7 + $0x428] sm:$0xff]  ;;  %332 = vst [vmem:[#allocation2 + $0x418] sm:$0xff] %v331_v3  ;;  %v337_v6 = vld [vmem:[%s27845_s7 + $0x430] sm:$0xff] }
  0x44   :  { %334 = vst [vmem:[#allocation2 + $0x420] sm:$0xff] %v333_v4  ;;  %336 = vst [vmem:[#allocation2 + $0x428] sm:$0xff] %v335_v5  ;;  %v339_v7 = vld [vmem:[%s27845_s7 + $0x438] sm:$0xff]  ;;  %v341_v8 = vld [vmem:[%s27845_s7 + $0x440] sm:$0xff] }
  0x45   :  { %338 = vst [vmem:[#allocation2 + $0x430] sm:$0xff] %v337_v6  ;;  %340 = vst [vmem:[#allocation2 + $0x438] sm:$0xff] %v339_v7  ;;  %v343_v9 = vld [vmem:[%s27845_s7 + $0x448] sm:$0xff]  ;;  %v345_v10 = vld [vmem:[%s27845_s7 + $0x450] sm:$0xff] }
  0x46   :  { %342 = vst [vmem:[#allocation2 + $0x440] sm:$0xff] %v341_v8  ;;  %v347_v11 = vld [vmem:[%s27845_s7 + $0x458] sm:$0xff]  ;;  %344 = vst [vmem:[#allocation2 + $0x448] sm:$0xff] %v343_v9  ;;  %v349_v12 = vld [vmem:[%s27845_s7 + $0x460] sm:$0xff] }
  0x47   :  { %346 = vst [vmem:[#allocation2 + $0x450] sm:$0xff] %v345_v10  ;;  %348 = vst [vmem:[#allocation2 + $0x458] sm:$0xff] %v347_v11  ;;  %v351_v13 = vld [vmem:[%s27845_s7 + $0x468] sm:$0xff]  ;;  %v353_v14 = vld [vmem:[%s27845_s7 + $0x470] sm:$0xff] }
  0x48   :  { %350 = vst [vmem:[#allocation2 + $0x460] sm:$0xff] %v349_v12  ;;  %352 = vst [vmem:[#allocation2 + $0x468] sm:$0xff] %v351_v13  ;;  %v355_v15 = vld [vmem:[%s27845_s7 + $0x478] sm:$0xff]  ;;  %v357_v16 = vld [vmem:[%s27845_s7 + $0x480] sm:$0xff] }
  0x49   :  { %354 = vst [vmem:[#allocation2 + $0x470] sm:$0xff] %v353_v14  ;;  %v359_v17 = vld [vmem:[%s27845_s7 + $0x488] sm:$0xff]  ;;  %356 = vst [vmem:[#allocation2 + $0x478] sm:$0xff] %v355_v15  ;;  %v361_v18 = vld [vmem:[%s27845_s7 + $0x490] sm:$0xff] }
  0x4a   :  { %358 = vst [vmem:[#allocation2 + $0x480] sm:$0xff] %v357_v16  ;;  %360 = vst [vmem:[#allocation2 + $0x488] sm:$0xff] %v359_v17  ;;  %v363_v19 = vld [vmem:[%s27845_s7 + $0x498] sm:$0xff]  ;;  %v365_v20 = vld [vmem:[%s27845_s7 + $0x4a0] sm:$0xff] }
  0x4b   :  { %362 = vst [vmem:[#allocation2 + $0x490] sm:$0xff] %v361_v18  ;;  %364 = vst [vmem:[#allocation2 + $0x498] sm:$0xff] %v363_v19  ;;  %v367_v21 = vld [vmem:[%s27845_s7 + $0x4a8] sm:$0xff]  ;;  %v369_v22 = vld [vmem:[%s27845_s7 + $0x4b0] sm:$0xff] }
  0x4c   :  { %366 = vst [vmem:[#allocation2 + $0x4a0] sm:$0xff] %v365_v20  ;;  %v371_v23 = vld [vmem:[%s27845_s7 + $0x4b8] sm:$0xff]  ;;  %368 = vst [vmem:[#allocation2 + $0x4a8] sm:$0xff] %v367_v21  ;;  %v373_v24 = vld [vmem:[%s27845_s7 + $0x4c0] sm:$0xff] }
  0x4d   :  { %370 = vst [vmem:[#allocation2 + $0x4b0] sm:$0xff] %v369_v22  ;;  %372 = vst [vmem:[#allocation2 + $0x4b8] sm:$0xff] %v371_v23  ;;  %v375_v25 = vld [vmem:[%s27845_s7 + $0x4c8] sm:$0xff]  ;;  %v377_v26 = vld [vmem:[%s27845_s7 + $0x4d0] sm:$0xff] }
  0x4e   :  { %374 = vst [vmem:[#allocation2 + $0x4c0] sm:$0xff] %v373_v24  ;;  %376 = vst [vmem:[#allocation2 + $0x4c8] sm:$0xff] %v375_v25  ;;  %v379_v27 = vld [vmem:[%s27845_s7 + $0x4d8] sm:$0xff]  ;;  %v381_v28 = vld [vmem:[%s27845_s7 + $0x4e0] sm:$0xff] }
  0x4f   :  { %378 = vst [vmem:[#allocation2 + $0x4d0] sm:$0xff] %v377_v26  ;;  %v383_v29 = vld [vmem:[%s27845_s7 + $0x4e8] sm:$0xff]  ;;  %380 = vst [vmem:[#allocation2 + $0x4d8] sm:$0xff] %v379_v27  ;;  %v385_v30 = vld [vmem:[%s27845_s7 + $0x4f0] sm:$0xff] }
  0x50   :  { %382 = vst [vmem:[#allocation2 + $0x4e0] sm:$0xff] %v381_v28  ;;  %384 = vst [vmem:[#allocation2 + $0x4e8] sm:$0xff] %v383_v29  ;;  %v387_v31 = vld [vmem:[%s27845_s7 + $0x4f8] sm:$0xff]  ;;  %v389_v32 = vld [vmem:[%s27845_s7 + $0x500] sm:$0xff] }
  0x51   :  { %386 = vst [vmem:[#allocation2 + $0x4f0] sm:$0xff] %v385_v30  ;;  %388 = vst [vmem:[#allocation2 + $0x4f8] sm:$0xff] %v387_v31  ;;  %v391_v33 = vld [vmem:[%s27845_s7 + $0x508] sm:$0xff]  ;;  %v393_v34 = vld [vmem:[%s27845_s7 + $0x510] sm:$0xff] }
  0x52   :  { %390 = vst [vmem:[#allocation2 + $0x500] sm:$0xff] %v389_v32  ;;  %v395_v35 = vld [vmem:[%s27845_s7 + $0x518] sm:$0xff]  ;;  %392 = vst [vmem:[#allocation2 + $0x508] sm:$0xff] %v391_v33  ;;  %v397_v36 = vld [vmem:[%s27845_s7 + $0x520] sm:$0xff] }
  0x53   :  { %394 = vst [vmem:[#allocation2 + $0x510] sm:$0xff] %v393_v34  ;;  %396 = vst [vmem:[#allocation2 + $0x518] sm:$0xff] %v395_v35  ;;  %v399_v37 = vld [vmem:[%s27845_s7 + $0x528] sm:$0xff]  ;;  %v401_v38 = vld [vmem:[%s27845_s7 + $0x530] sm:$0xff] }
  0x54   :  { %398 = vst [vmem:[#allocation2 + $0x520] sm:$0xff] %v397_v36  ;;  %400 = vst [vmem:[#allocation2 + $0x528] sm:$0xff] %v399_v37  ;;  %v403_v39 = vld [vmem:[%s27845_s7 + $0x538] sm:$0xff]  ;;  %v405_v40 = vld [vmem:[%s27845_s7 + $0x540] sm:$0xff] }
  0x55   :  { %402 = vst [vmem:[#allocation2 + $0x530] sm:$0xff] %v401_v38  ;;  %v407_v41 = vld [vmem:[%s27845_s7 + $0x548] sm:$0xff]  ;;  %404 = vst [vmem:[#allocation2 + $0x538] sm:$0xff] %v403_v39  ;;  %v409_v42 = vld [vmem:[%s27845_s7 + $0x550] sm:$0xff] }
  0x56   :  { %406 = vst [vmem:[#allocation2 + $0x540] sm:$0xff] %v405_v40  ;;  %408 = vst [vmem:[#allocation2 + $0x548] sm:$0xff] %v407_v41  ;;  %v411_v43 = vld [vmem:[%s27845_s7 + $0x558] sm:$0xff]  ;;  %v413_v44 = vld [vmem:[%s27845_s7 + $0x560] sm:$0xff] }
  0x57   :  { %410 = vst [vmem:[#allocation2 + $0x550] sm:$0xff] %v409_v42  ;;  %412 = vst [vmem:[#allocation2 + $0x558] sm:$0xff] %v411_v43  ;;  %v415_v45 = vld [vmem:[%s27845_s7 + $0x568] sm:$0xff]  ;;  %v417_v46 = vld [vmem:[%s27845_s7 + $0x570] sm:$0xff] }
  0x58   :  { %414 = vst [vmem:[#allocation2 + $0x560] sm:$0xff] %v413_v44  ;;  %v419_v47 = vld [vmem:[%s27845_s7 + $0x578] sm:$0xff]  ;;  %416 = vst [vmem:[#allocation2 + $0x568] sm:$0xff] %v415_v45  ;;  %v421_v48 = vld [vmem:[%s27845_s7 + $0x580] sm:$0xff] }
  0x59   :  { %418 = vst [vmem:[#allocation2 + $0x570] sm:$0xff] %v417_v46  ;;  %420 = vst [vmem:[#allocation2 + $0x578] sm:$0xff] %v419_v47  ;;  %v423_v49 = vld [vmem:[%s27845_s7 + $0x588] sm:$0xff]  ;;  %v425_v50 = vld [vmem:[%s27845_s7 + $0x590] sm:$0xff] }
  0x5a   :  { %422 = vst [vmem:[#allocation2 + $0x580] sm:$0xff] %v421_v48  ;;  %424 = vst [vmem:[#allocation2 + $0x588] sm:$0xff] %v423_v49  ;;  %v427_v51 = vld [vmem:[%s27845_s7 + $0x598] sm:$0xff]  ;;  %v429_v52 = vld [vmem:[%s27845_s7 + $0x5a0] sm:$0xff] }
  0x5b   :  { %426 = vst [vmem:[#allocation2 + $0x590] sm:$0xff] %v425_v50  ;;  %v431_v53 = vld [vmem:[%s27845_s7 + $0x5a8] sm:$0xff]  ;;  %428 = vst [vmem:[#allocation2 + $0x598] sm:$0xff] %v427_v51  ;;  %v433_v54 = vld [vmem:[%s27845_s7 + $0x5b0] sm:$0xff] }
  0x5c   :  { %430 = vst [vmem:[#allocation2 + $0x5a0] sm:$0xff] %v429_v52  ;;  %432 = vst [vmem:[#allocation2 + $0x5a8] sm:$0xff] %v431_v53  ;;  %v435_v55 = vld [vmem:[%s27845_s7 + $0x5b8] sm:$0xff]  ;;  %v437_v56 = vld [vmem:[%s27845_s7 + $0x5c0] sm:$0xff] }
  0x5d   :  { %434 = vst [vmem:[#allocation2 + $0x5b0] sm:$0xff] %v433_v54  ;;  %436 = vst [vmem:[#allocation2 + $0x5b8] sm:$0xff] %v435_v55  ;;  %v439_v57 = vld [vmem:[%s27845_s7 + $0x5c8] sm:$0xff]  ;;  %v441_v58 = vld [vmem:[%s27845_s7 + $0x5d0] sm:$0xff] }
  0x5e   :  { %438 = vst [vmem:[#allocation2 + $0x5c0] sm:$0xff] %v437_v56  ;;  %v443_v59 = vld [vmem:[%s27845_s7 + $0x5d8] sm:$0xff]  ;;  %440 = vst [vmem:[#allocation2 + $0x5c8] sm:$0xff] %v439_v57  ;;  %v445_v60 = vld [vmem:[%s27845_s7 + $0x5e0] sm:$0xff] }
  0x5f   :  { %442 = vst [vmem:[#allocation2 + $0x5d0] sm:$0xff] %v441_v58  ;;  %444 = vst [vmem:[#allocation2 + $0x5d8] sm:$0xff] %v443_v59  ;;  %v447_v61 = vld [vmem:[%s27845_s7 + $0x5e8] sm:$0xff]  ;;  %v449_v62 = vld [vmem:[%s27845_s7 + $0x5f0] sm:$0xff] }
  0x60   :  { %446 = vst [vmem:[#allocation2 + $0x5e0] sm:$0xff] %v445_v60  ;;  %448 = vst [vmem:[#allocation2 + $0x5e8] sm:$0xff] %v447_v61  ;;  %v451_v63 = vld [vmem:[%s27845_s7 + $0x5f8] sm:$0xff]  ;;  %v453_v0 = vld [vmem:[%s27845_s7 + $0x600] sm:$0xff] }
  0x61   :  { %450 = vst [vmem:[#allocation2 + $0x5f0] sm:$0xff] %v449_v62  ;;  %v455_v1 = vld [vmem:[%s27845_s7 + $0x608] sm:$0xff]  ;;  %452 = vst [vmem:[#allocation2 + $0x5f8] sm:$0xff] %v451_v63  ;;  %v457_v2 = vld [vmem:[%s27845_s7 + $0x610] sm:$0xff] }
  0x62   :  { %454 = vst [vmem:[#allocation2 + $0x600] sm:$0xff] %v453_v0  ;;  %456 = vst [vmem:[#allocation2 + $0x608] sm:$0xff] %v455_v1  ;;  %v459_v3 = vld [vmem:[%s27845_s7 + $0x618] sm:$0xff]  ;;  %v461_v4 = vld [vmem:[%s27845_s7 + $0x620] sm:$0xff] }
  0x63   :  { %458 = vst [vmem:[#allocation2 + $0x610] sm:$0xff] %v457_v2  ;;  %460 = vst [vmem:[#allocation2 + $0x618] sm:$0xff] %v459_v3  ;;  %v463_v5 = vld [vmem:[%s27845_s7 + $0x628] sm:$0xff]  ;;  %v465_v6 = vld [vmem:[%s27845_s7 + $0x630] sm:$0xff] }
  0x64   :  { %462 = vst [vmem:[#allocation2 + $0x620] sm:$0xff] %v461_v4  ;;  %v467_v7 = vld [vmem:[%s27845_s7 + $0x638] sm:$0xff]  ;;  %464 = vst [vmem:[#allocation2 + $0x628] sm:$0xff] %v463_v5  ;;  %v469_v8 = vld [vmem:[%s27845_s7 + $0x640] sm:$0xff] }
  0x65   :  { %466 = vst [vmem:[#allocation2 + $0x630] sm:$0xff] %v465_v6  ;;  %468 = vst [vmem:[#allocation2 + $0x638] sm:$0xff] %v467_v7  ;;  %v471_v9 = vld [vmem:[%s27845_s7 + $0x648] sm:$0xff]  ;;  %v473_v10 = vld [vmem:[%s27845_s7 + $0x650] sm:$0xff] }
  0x66   :  { %470 = vst [vmem:[#allocation2 + $0x640] sm:$0xff] %v469_v8  ;;  %472 = vst [vmem:[#allocation2 + $0x648] sm:$0xff] %v471_v9  ;;  %v475_v11 = vld [vmem:[%s27845_s7 + $0x658] sm:$0xff]  ;;  %v477_v12 = vld [vmem:[%s27845_s7 + $0x660] sm:$0xff] }
  0x67   :  { %474 = vst [vmem:[#allocation2 + $0x650] sm:$0xff] %v473_v10  ;;  %v479_v13 = vld [vmem:[%s27845_s7 + $0x668] sm:$0xff]  ;;  %476 = vst [vmem:[#allocation2 + $0x658] sm:$0xff] %v475_v11  ;;  %v481_v14 = vld [vmem:[%s27845_s7 + $0x670] sm:$0xff] }
  0x68   :  { %478 = vst [vmem:[#allocation2 + $0x660] sm:$0xff] %v477_v12  ;;  %480 = vst [vmem:[#allocation2 + $0x668] sm:$0xff] %v479_v13  ;;  %v483_v15 = vld [vmem:[%s27845_s7 + $0x678] sm:$0xff]  ;;  %v485_v16 = vld [vmem:[%s27845_s7 + $0x680] sm:$0xff] }
  0x69   :  { %482 = vst [vmem:[#allocation2 + $0x670] sm:$0xff] %v481_v14  ;;  %484 = vst [vmem:[#allocation2 + $0x678] sm:$0xff] %v483_v15  ;;  %v487_v17 = vld [vmem:[%s27845_s7 + $0x688] sm:$0xff]  ;;  %v489_v18 = vld [vmem:[%s27845_s7 + $0x690] sm:$0xff] }
  0x6a   :  { %486 = vst [vmem:[#allocation2 + $0x680] sm:$0xff] %v485_v16  ;;  %v491_v19 = vld [vmem:[%s27845_s7 + $0x698] sm:$0xff]  ;;  %488 = vst [vmem:[#allocation2 + $0x688] sm:$0xff] %v487_v17  ;;  %v493_v20 = vld [vmem:[%s27845_s7 + $0x6a0] sm:$0xff] }
  0x6b   :  { %490 = vst [vmem:[#allocation2 + $0x690] sm:$0xff] %v489_v18  ;;  %492 = vst [vmem:[#allocation2 + $0x698] sm:$0xff] %v491_v19  ;;  %v495_v21 = vld [vmem:[%s27845_s7 + $0x6a8] sm:$0xff]  ;;  %v497_v22 = vld [vmem:[%s27845_s7 + $0x6b0] sm:$0xff] }
  0x6c   :  { %494 = vst [vmem:[#allocation2 + $0x6a0] sm:$0xff] %v493_v20  ;;  %496 = vst [vmem:[#allocation2 + $0x6a8] sm:$0xff] %v495_v21  ;;  %v499_v23 = vld [vmem:[%s27845_s7 + $0x6b8] sm:$0xff]  ;;  %v501_v24 = vld [vmem:[%s27845_s7 + $0x6c0] sm:$0xff] }
  0x6d   :  { %498 = vst [vmem:[#allocation2 + $0x6b0] sm:$0xff] %v497_v22  ;;  %v503_v25 = vld [vmem:[%s27845_s7 + $0x6c8] sm:$0xff]  ;;  %500 = vst [vmem:[#allocation2 + $0x6b8] sm:$0xff] %v499_v23  ;;  %v505_v26 = vld [vmem:[%s27845_s7 + $0x6d0] sm:$0xff] }
  0x6e   :  { %502 = vst [vmem:[#allocation2 + $0x6c0] sm:$0xff] %v501_v24  ;;  %504 = vst [vmem:[#allocation2 + $0x6c8] sm:$0xff] %v503_v25  ;;  %v507_v27 = vld [vmem:[%s27845_s7 + $0x6d8] sm:$0xff]  ;;  %v509_v28 = vld [vmem:[%s27845_s7 + $0x6e0] sm:$0xff] }
  0x6f   :  { %506 = vst [vmem:[#allocation2 + $0x6d0] sm:$0xff] %v505_v26  ;;  %508 = vst [vmem:[#allocation2 + $0x6d8] sm:$0xff] %v507_v27  ;;  %v511_v29 = vld [vmem:[%s27845_s7 + $0x6e8] sm:$0xff]  ;;  %v513_v30 = vld [vmem:[%s27845_s7 + $0x6f0] sm:$0xff] }
  0x70   :  { %510 = vst [vmem:[#allocation2 + $0x6e0] sm:$0xff] %v509_v28  ;;  %v515_v31 = vld [vmem:[%s27845_s7 + $0x6f8] sm:$0xff]  ;;  %512 = vst [vmem:[#allocation2 + $0x6e8] sm:$0xff] %v511_v29  ;;  %v517_v32 = vld [vmem:[%s27845_s7 + $0x700] sm:$0xff] }
  0x71   :  { %514 = vst [vmem:[#allocation2 + $0x6f0] sm:$0xff] %v513_v30  ;;  %516 = vst [vmem:[#allocation2 + $0x6f8] sm:$0xff] %v515_v31  ;;  %v519_v33 = vld [vmem:[%s27845_s7 + $0x708] sm:$0xff]  ;;  %v521_v34 = vld [vmem:[%s27845_s7 + $0x710] sm:$0xff] }
  0x72   :  { %518 = vst [vmem:[#allocation2 + $0x700] sm:$0xff] %v517_v32  ;;  %520 = vst [vmem:[#allocation2 + $0x708] sm:$0xff] %v519_v33  ;;  %v523_v35 = vld [vmem:[%s27845_s7 + $0x718] sm:$0xff]  ;;  %v525_v36 = vld [vmem:[%s27845_s7 + $0x720] sm:$0xff] }
  0x73   :  { %522 = vst [vmem:[#allocation2 + $0x710] sm:$0xff] %v521_v34  ;;  %v527_v37 = vld [vmem:[%s27845_s7 + $0x728] sm:$0xff]  ;;  %524 = vst [vmem:[#allocation2 + $0x718] sm:$0xff] %v523_v35  ;;  %v529_v38 = vld [vmem:[%s27845_s7 + $0x730] sm:$0xff] }
  0x74   :  { %526 = vst [vmem:[#allocation2 + $0x720] sm:$0xff] %v525_v36  ;;  %528 = vst [vmem:[#allocation2 + $0x728] sm:$0xff] %v527_v37  ;;  %v531_v39 = vld [vmem:[%s27845_s7 + $0x738] sm:$0xff]  ;;  %v533_v40 = vld [vmem:[%s27845_s7 + $0x740] sm:$0xff] }
  0x75   :  { %530 = vst [vmem:[#allocation2 + $0x730] sm:$0xff] %v529_v38  ;;  %532 = vst [vmem:[#allocation2 + $0x738] sm:$0xff] %v531_v39  ;;  %v535_v41 = vld [vmem:[%s27845_s7 + $0x748] sm:$0xff]  ;;  %v537_v42 = vld [vmem:[%s27845_s7 + $0x750] sm:$0xff] }
  0x76   :  { %534 = vst [vmem:[#allocation2 + $0x740] sm:$0xff] %v533_v40  ;;  %v539_v43 = vld [vmem:[%s27845_s7 + $0x758] sm:$0xff]  ;;  %536 = vst [vmem:[#allocation2 + $0x748] sm:$0xff] %v535_v41  ;;  %v541_v44 = vld [vmem:[%s27845_s7 + $0x760] sm:$0xff] }
  0x77   :  { %538 = vst [vmem:[#allocation2 + $0x750] sm:$0xff] %v537_v42  ;;  %540 = vst [vmem:[#allocation2 + $0x758] sm:$0xff] %v539_v43  ;;  %v543_v45 = vld [vmem:[%s27845_s7 + $0x768] sm:$0xff]  ;;  %v545_v46 = vld [vmem:[%s27845_s7 + $0x770] sm:$0xff] }
  0x78   :  { %542 = vst [vmem:[#allocation2 + $0x760] sm:$0xff] %v541_v44  ;;  %544 = vst [vmem:[#allocation2 + $0x768] sm:$0xff] %v543_v45  ;;  %v547_v47 = vld [vmem:[%s27845_s7 + $0x778] sm:$0xff]  ;;  %v549_v48 = vld [vmem:[%s27845_s7 + $0x780] sm:$0xff] }
  0x79   :  { %546 = vst [vmem:[#allocation2 + $0x770] sm:$0xff] %v545_v46  ;;  %v551_v49 = vld [vmem:[%s27845_s7 + $0x788] sm:$0xff]  ;;  %548 = vst [vmem:[#allocation2 + $0x778] sm:$0xff] %v547_v47  ;;  %v553_v50 = vld [vmem:[%s27845_s7 + $0x790] sm:$0xff] }
  0x7a   :  { %550 = vst [vmem:[#allocation2 + $0x780] sm:$0xff] %v549_v48  ;;  %552 = vst [vmem:[#allocation2 + $0x788] sm:$0xff] %v551_v49  ;;  %v555_v51 = vld [vmem:[%s27845_s7 + $0x798] sm:$0xff]  ;;  %v557_v52 = vld [vmem:[%s27845_s7 + $0x7a0] sm:$0xff] }
  0x7b   :  { %554 = vst [vmem:[#allocation2 + $0x790] sm:$0xff] %v553_v50  ;;  %556 = vst [vmem:[#allocation2 + $0x798] sm:$0xff] %v555_v51  ;;  %v559_v53 = vld [vmem:[%s27845_s7 + $0x7a8] sm:$0xff]  ;;  %v561_v54 = vld [vmem:[%s27845_s7 + $0x7b0] sm:$0xff] }
  0x7c   :  { %558 = vst [vmem:[#allocation2 + $0x7a0] sm:$0xff] %v557_v52  ;;  %v563_v55 = vld [vmem:[%s27845_s7 + $0x7b8] sm:$0xff]  ;;  %560 = vst [vmem:[#allocation2 + $0x7a8] sm:$0xff] %v559_v53  ;;  %v565_v56 = vld [vmem:[%s27845_s7 + $0x7c0] sm:$0xff] }
  0x7d   :  { %562 = vst [vmem:[#allocation2 + $0x7b0] sm:$0xff] %v561_v54  ;;  %564 = vst [vmem:[#allocation2 + $0x7b8] sm:$0xff] %v563_v55  ;;  %v567_v57 = vld [vmem:[%s27845_s7 + $0x7c8] sm:$0xff]  ;;  %v569_v58 = vld [vmem:[%s27845_s7 + $0x7d0] sm:$0xff] }
  0x7e   :  { %566 = vst [vmem:[#allocation2 + $0x7c0] sm:$0xff] %v565_v56  ;;  %568 = vst [vmem:[#allocation2 + $0x7c8] sm:$0xff] %v567_v57  ;;  %v571_v59 = vld [vmem:[%s27845_s7 + $0x7d8] sm:$0xff]  ;;  %v573_v60 = vld [vmem:[%s27845_s7 + $0x7e0] sm:$0xff] }
  0x7f   :  { %570 = vst [vmem:[#allocation2 + $0x7d0] sm:$0xff] %v569_v58  ;;  %v575_v61 = vld [vmem:[%s27845_s7 + $0x7e8] sm:$0xff]  ;;  %572 = vst [vmem:[#allocation2 + $0x7d8] sm:$0xff] %v571_v59  ;;  %v577_v62 = vld [vmem:[%s27845_s7 + $0x7f0] sm:$0xff] }
  0x80   :  { %574 = vst [vmem:[#allocation2 + $0x7e0] sm:$0xff] %v573_v60  ;;  %576 = vst [vmem:[#allocation2 + $0x7e8] sm:$0xff] %v575_v61  ;;  %v579_v63 = vld [vmem:[%s27845_s7 + $0x7f8] sm:$0xff]  ;;  %v581_v0 = vld [vmem:[%s27845_s7 + $0x800] sm:$0xff] }
  0x81   :  { %578 = vst [vmem:[#allocation2 + $0x7f0] sm:$0xff] %v577_v62  ;;  %580 = vst [vmem:[#allocation2 + $0x7f8] sm:$0xff] %v579_v63  ;;  %v583_v1 = vld [vmem:[%s27845_s7 + $0x808] sm:$0xff]  ;;  %v585_v2 = vld [vmem:[%s27845_s7 + $0x810] sm:$0xff] }
  0x82   :  { %582 = vst [vmem:[#allocation2 + $0x800] sm:$0xff] %v581_v0  ;;  %v587_v3 = vld [vmem:[%s27845_s7 + $0x818] sm:$0xff]  ;;  %584 = vst [vmem:[#allocation2 + $0x808] sm:$0xff] %v583_v1  ;;  %v589_v4 = vld [vmem:[%s27845_s7 + $0x820] sm:$0xff] }
  0x83   :  { %586 = vst [vmem:[#allocation2 + $0x810] sm:$0xff] %v585_v2  ;;  %588 = vst [vmem:[#allocation2 + $0x818] sm:$0xff] %v587_v3  ;;  %v591_v5 = vld [vmem:[%s27845_s7 + $0x828] sm:$0xff]  ;;  %v593_v6 = vld [vmem:[%s27845_s7 + $0x830] sm:$0xff] }
  0x84   :  { %590 = vst [vmem:[#allocation2 + $0x820] sm:$0xff] %v589_v4  ;;  %592 = vst [vmem:[#allocation2 + $0x828] sm:$0xff] %v591_v5  ;;  %v595_v7 = vld [vmem:[%s27845_s7 + $0x838] sm:$0xff]  ;;  %v597_v8 = vld [vmem:[%s27845_s7 + $0x840] sm:$0xff] }
  0x85   :  { %594 = vst [vmem:[#allocation2 + $0x830] sm:$0xff] %v593_v6  ;;  %v599_v9 = vld [vmem:[%s27845_s7 + $0x848] sm:$0xff]  ;;  %596 = vst [vmem:[#allocation2 + $0x838] sm:$0xff] %v595_v7  ;;  %v601_v10 = vld [vmem:[%s27845_s7 + $0x850] sm:$0xff] }
  0x86   :  { %598 = vst [vmem:[#allocation2 + $0x840] sm:$0xff] %v597_v8  ;;  %600 = vst [vmem:[#allocation2 + $0x848] sm:$0xff] %v599_v9  ;;  %v603_v11 = vld [vmem:[%s27845_s7 + $0x858] sm:$0xff]  ;;  %v605_v12 = vld [vmem:[%s27845_s7 + $0x860] sm:$0xff] }
  0x87   :  { %602 = vst [vmem:[#allocation2 + $0x850] sm:$0xff] %v601_v10  ;;  %604 = vst [vmem:[#allocation2 + $0x858] sm:$0xff] %v603_v11  ;;  %v607_v13 = vld [vmem:[%s27845_s7 + $0x868] sm:$0xff]  ;;  %v609_v14 = vld [vmem:[%s27845_s7 + $0x870] sm:$0xff] }
  0x88   :  { %606 = vst [vmem:[#allocation2 + $0x860] sm:$0xff] %v605_v12  ;;  %v611_v15 = vld [vmem:[%s27845_s7 + $0x878] sm:$0xff]  ;;  %608 = vst [vmem:[#allocation2 + $0x868] sm:$0xff] %v607_v13  ;;  %v613_v16 = vld [vmem:[%s27845_s7 + $0x880] sm:$0xff] }
  0x89   :  { %610 = vst [vmem:[#allocation2 + $0x870] sm:$0xff] %v609_v14  ;;  %612 = vst [vmem:[#allocation2 + $0x878] sm:$0xff] %v611_v15  ;;  %v615_v17 = vld [vmem:[%s27845_s7 + $0x888] sm:$0xff]  ;;  %v617_v18 = vld [vmem:[%s27845_s7 + $0x890] sm:$0xff] }
  0x8a   :  { %614 = vst [vmem:[#allocation2 + $0x880] sm:$0xff] %v613_v16  ;;  %616 = vst [vmem:[#allocation2 + $0x888] sm:$0xff] %v615_v17  ;;  %v619_v19 = vld [vmem:[%s27845_s7 + $0x898] sm:$0xff]  ;;  %v621_v20 = vld [vmem:[%s27845_s7 + $0x8a0] sm:$0xff] }
  0x8b   :  { %618 = vst [vmem:[#allocation2 + $0x890] sm:$0xff] %v617_v18  ;;  %v623_v21 = vld [vmem:[%s27845_s7 + $0x8a8] sm:$0xff]  ;;  %620 = vst [vmem:[#allocation2 + $0x898] sm:$0xff] %v619_v19  ;;  %v625_v22 = vld [vmem:[%s27845_s7 + $0x8b0] sm:$0xff] }
  0x8c   :  { %622 = vst [vmem:[#allocation2 + $0x8a0] sm:$0xff] %v621_v20  ;;  %624 = vst [vmem:[#allocation2 + $0x8a8] sm:$0xff] %v623_v21  ;;  %v627_v23 = vld [vmem:[%s27845_s7 + $0x8b8] sm:$0xff]  ;;  %v629_v24 = vld [vmem:[%s27845_s7 + $0x8c0] sm:$0xff] }
  0x8d   :  { %626 = vst [vmem:[#allocation2 + $0x8b0] sm:$0xff] %v625_v22  ;;  %628 = vst [vmem:[#allocation2 + $0x8b8] sm:$0xff] %v627_v23  ;;  %v631_v25 = vld [vmem:[%s27845_s7 + $0x8c8] sm:$0xff]  ;;  %v633_v26 = vld [vmem:[%s27845_s7 + $0x8d0] sm:$0xff] }
  0x8e   :  { %630 = vst [vmem:[#allocation2 + $0x8c0] sm:$0xff] %v629_v24  ;;  %v635_v27 = vld [vmem:[%s27845_s7 + $0x8d8] sm:$0xff]  ;;  %632 = vst [vmem:[#allocation2 + $0x8c8] sm:$0xff] %v631_v25  ;;  %v637_v28 = vld [vmem:[%s27845_s7 + $0x8e0] sm:$0xff] }
  0x8f   :  { %634 = vst [vmem:[#allocation2 + $0x8d0] sm:$0xff] %v633_v26  ;;  %636 = vst [vmem:[#allocation2 + $0x8d8] sm:$0xff] %v635_v27  ;;  %v639_v29 = vld [vmem:[%s27845_s7 + $0x8e8] sm:$0xff]  ;;  %v641_v30 = vld [vmem:[%s27845_s7 + $0x8f0] sm:$0xff] }
  0x90   :  { %638 = vst [vmem:[#allocation2 + $0x8e0] sm:$0xff] %v637_v28  ;;  %640 = vst [vmem:[#allocation2 + $0x8e8] sm:$0xff] %v639_v29  ;;  %v643_v31 = vld [vmem:[%s27845_s7 + $0x8f8] sm:$0xff]  ;;  %v645_v32 = vld [vmem:[%s27845_s7 + $0x900] sm:$0xff] }
  0x91   :  { %642 = vst [vmem:[#allocation2 + $0x8f0] sm:$0xff] %v641_v30  ;;  %v647_v33 = vld [vmem:[%s27845_s7 + $0x908] sm:$0xff]  ;;  %644 = vst [vmem:[#allocation2 + $0x8f8] sm:$0xff] %v643_v31  ;;  %v649_v34 = vld [vmem:[%s27845_s7 + $0x910] sm:$0xff] }
  0x92   :  { %646 = vst [vmem:[#allocation2 + $0x900] sm:$0xff] %v645_v32  ;;  %648 = vst [vmem:[#allocation2 + $0x908] sm:$0xff] %v647_v33  ;;  %v651_v35 = vld [vmem:[%s27845_s7 + $0x918] sm:$0xff]  ;;  %v653_v36 = vld [vmem:[%s27845_s7 + $0x920] sm:$0xff] }
  0x93   :  { %650 = vst [vmem:[#allocation2 + $0x910] sm:$0xff] %v649_v34  ;;  %652 = vst [vmem:[#allocation2 + $0x918] sm:$0xff] %v651_v35  ;;  %v655_v37 = vld [vmem:[%s27845_s7 + $0x928] sm:$0xff]  ;;  %v657_v38 = vld [vmem:[%s27845_s7 + $0x930] sm:$0xff] }
  0x94   :  { %654 = vst [vmem:[#allocation2 + $0x920] sm:$0xff] %v653_v36  ;;  %v659_v39 = vld [vmem:[%s27845_s7 + $0x938] sm:$0xff]  ;;  %656 = vst [vmem:[#allocation2 + $0x928] sm:$0xff] %v655_v37  ;;  %v661_v40 = vld [vmem:[%s27845_s7 + $0x940] sm:$0xff] }
  0x95   :  { %658 = vst [vmem:[#allocation2 + $0x930] sm:$0xff] %v657_v38  ;;  %660 = vst [vmem:[#allocation2 + $0x938] sm:$0xff] %v659_v39  ;;  %v663_v41 = vld [vmem:[%s27845_s7 + $0x948] sm:$0xff]  ;;  %v665_v42 = vld [vmem:[%s27845_s7 + $0x950] sm:$0xff] }
  0x96   :  { %662 = vst [vmem:[#allocation2 + $0x940] sm:$0xff] %v661_v40  ;;  %664 = vst [vmem:[#allocation2 + $0x948] sm:$0xff] %v663_v41  ;;  %v667_v43 = vld [vmem:[%s27845_s7 + $0x958] sm:$0xff]  ;;  %v669_v44 = vld [vmem:[%s27845_s7 + $0x960] sm:$0xff] }
  0x97   :  { %666 = vst [vmem:[#allocation2 + $0x950] sm:$0xff] %v665_v42  ;;  %v671_v45 = vld [vmem:[%s27845_s7 + $0x968] sm:$0xff]  ;;  %668 = vst [vmem:[#allocation2 + $0x958] sm:$0xff] %v667_v43  ;;  %v673_v46 = vld [vmem:[%s27845_s7 + $0x970] sm:$0xff] }
  0x98   :  { %670 = vst [vmem:[#allocation2 + $0x960] sm:$0xff] %v669_v44  ;;  %672 = vst [vmem:[#allocation2 + $0x968] sm:$0xff] %v671_v45  ;;  %v675_v47 = vld [vmem:[%s27845_s7 + $0x978] sm:$0xff]  ;;  %v677_v48 = vld [vmem:[%s27845_s7 + $0x980] sm:$0xff] }
  0x99   :  { %674 = vst [vmem:[#allocation2 + $0x970] sm:$0xff] %v673_v46  ;;  %676 = vst [vmem:[#allocation2 + $0x978] sm:$0xff] %v675_v47  ;;  %v679_v49 = vld [vmem:[%s27845_s7 + $0x988] sm:$0xff]  ;;  %v681_v50 = vld [vmem:[%s27845_s7 + $0x990] sm:$0xff] }
  0x9a   :  { %678 = vst [vmem:[#allocation2 + $0x980] sm:$0xff] %v677_v48  ;;  %v683_v51 = vld [vmem:[%s27845_s7 + $0x998] sm:$0xff]  ;;  %680 = vst [vmem:[#allocation2 + $0x988] sm:$0xff] %v679_v49  ;;  %v685_v52 = vld [vmem:[%s27845_s7 + $0x9a0] sm:$0xff] }
  0x9b   :  { %682 = vst [vmem:[#allocation2 + $0x990] sm:$0xff] %v681_v50  ;;  %684 = vst [vmem:[#allocation2 + $0x998] sm:$0xff] %v683_v51  ;;  %v687_v53 = vld [vmem:[%s27845_s7 + $0x9a8] sm:$0xff]  ;;  %v689_v54 = vld [vmem:[%s27845_s7 + $0x9b0] sm:$0xff] }
  0x9c   :  { %686 = vst [vmem:[#allocation2 + $0x9a0] sm:$0xff] %v685_v52  ;;  %688 = vst [vmem:[#allocation2 + $0x9a8] sm:$0xff] %v687_v53  ;;  %v691_v55 = vld [vmem:[%s27845_s7 + $0x9b8] sm:$0xff]  ;;  %v693_v56 = vld [vmem:[%s27845_s7 + $0x9c0] sm:$0xff] }
  0x9d   :  { %690 = vst [vmem:[#allocation2 + $0x9b0] sm:$0xff] %v689_v54  ;;  %v695_v57 = vld [vmem:[%s27845_s7 + $0x9c8] sm:$0xff]  ;;  %692 = vst [vmem:[#allocation2 + $0x9b8] sm:$0xff] %v691_v55  ;;  %v697_v58 = vld [vmem:[%s27845_s7 + $0x9d0] sm:$0xff] }
  0x9e   :  { %694 = vst [vmem:[#allocation2 + $0x9c0] sm:$0xff] %v693_v56  ;;  %696 = vst [vmem:[#allocation2 + $0x9c8] sm:$0xff] %v695_v57  ;;  %v699_v59 = vld [vmem:[%s27845_s7 + $0x9d8] sm:$0xff]  ;;  %v701_v60 = vld [vmem:[%s27845_s7 + $0x9e0] sm:$0xff] }
  0x9f   :  { %698 = vst [vmem:[#allocation2 + $0x9d0] sm:$0xff] %v697_v58  ;;  %700 = vst [vmem:[#allocation2 + $0x9d8] sm:$0xff] %v699_v59  ;;  %v703_v61 = vld [vmem:[%s27845_s7 + $0x9e8] sm:$0xff]  ;;  %v705_v62 = vld [vmem:[%s27845_s7 + $0x9f0] sm:$0xff] }
  0xa0   :  { %702 = vst [vmem:[#allocation2 + $0x9e0] sm:$0xff] %v701_v60  ;;  %v707_v63 = vld [vmem:[%s27845_s7 + $0x9f8] sm:$0xff]  ;;  %704 = vst [vmem:[#allocation2 + $0x9e8] sm:$0xff] %v703_v61  ;;  %v709_v0 = vld [vmem:[%s27845_s7 + $0xa00] sm:$0xff] }
  0xa1   :  { %706 = vst [vmem:[#allocation2 + $0x9f0] sm:$0xff] %v705_v62  ;;  %708 = vst [vmem:[#allocation2 + $0x9f8] sm:$0xff] %v707_v63  ;;  %v711_v1 = vld [vmem:[%s27845_s7 + $0xa08] sm:$0xff]  ;;  %v713_v2 = vld [vmem:[%s27845_s7 + $0xa10] sm:$0xff] }
  0xa2   :  { %710 = vst [vmem:[#allocation2 + $0xa00] sm:$0xff] %v709_v0  ;;  %712 = vst [vmem:[#allocation2 + $0xa08] sm:$0xff] %v711_v1  ;;  %v715_v3 = vld [vmem:[%s27845_s7 + $0xa18] sm:$0xff]  ;;  %v717_v4 = vld [vmem:[%s27845_s7 + $0xa20] sm:$0xff] }
  0xa3   :  { %714 = vst [vmem:[#allocation2 + $0xa10] sm:$0xff] %v713_v2  ;;  %v719_v5 = vld [vmem:[%s27845_s7 + $0xa28] sm:$0xff]  ;;  %716 = vst [vmem:[#allocation2 + $0xa18] sm:$0xff] %v715_v3  ;;  %v721_v6 = vld [vmem:[%s27845_s7 + $0xa30] sm:$0xff] }
  0xa4   :  { %718 = vst [vmem:[#allocation2 + $0xa20] sm:$0xff] %v717_v4  ;;  %720 = vst [vmem:[#allocation2 + $0xa28] sm:$0xff] %v719_v5  ;;  %v723_v7 = vld [vmem:[%s27845_s7 + $0xa38] sm:$0xff]  ;;  %v725_v8 = vld [vmem:[%s27845_s7 + $0xa40] sm:$0xff] }
  0xa5   :  { %722 = vst [vmem:[#allocation2 + $0xa30] sm:$0xff] %v721_v6  ;;  %724 = vst [vmem:[#allocation2 + $0xa38] sm:$0xff] %v723_v7  ;;  %v727_v9 = vld [vmem:[%s27845_s7 + $0xa48] sm:$0xff]  ;;  %v729_v10 = vld [vmem:[%s27845_s7 + $0xa50] sm:$0xff] }
  0xa6   :  { %726 = vst [vmem:[#allocation2 + $0xa40] sm:$0xff] %v725_v8  ;;  %v731_v11 = vld [vmem:[%s27845_s7 + $0xa58] sm:$0xff]  ;;  %728 = vst [vmem:[#allocation2 + $0xa48] sm:$0xff] %v727_v9  ;;  %v733_v12 = vld [vmem:[%s27845_s7 + $0xa60] sm:$0xff] }
  0xa7   :  { %730 = vst [vmem:[#allocation2 + $0xa50] sm:$0xff] %v729_v10  ;;  %732 = vst [vmem:[#allocation2 + $0xa58] sm:$0xff] %v731_v11  ;;  %v735_v13 = vld [vmem:[%s27845_s7 + $0xa68] sm:$0xff]  ;;  %v737_v14 = vld [vmem:[%s27845_s7 + $0xa70] sm:$0xff] }
  0xa8   :  { %734 = vst [vmem:[#allocation2 + $0xa60] sm:$0xff] %v733_v12  ;;  %736 = vst [vmem:[#allocation2 + $0xa68] sm:$0xff] %v735_v13  ;;  %v739_v15 = vld [vmem:[%s27845_s7 + $0xa78] sm:$0xff]  ;;  %v741_v16 = vld [vmem:[%s27845_s7 + $0xa80] sm:$0xff] }
  0xa9   :  { %738 = vst [vmem:[#allocation2 + $0xa70] sm:$0xff] %v737_v14  ;;  %v743_v17 = vld [vmem:[%s27845_s7 + $0xa88] sm:$0xff]  ;;  %740 = vst [vmem:[#allocation2 + $0xa78] sm:$0xff] %v739_v15  ;;  %v745_v18 = vld [vmem:[%s27845_s7 + $0xa90] sm:$0xff] }
  0xaa   :  { %742 = vst [vmem:[#allocation2 + $0xa80] sm:$0xff] %v741_v16  ;;  %744 = vst [vmem:[#allocation2 + $0xa88] sm:$0xff] %v743_v17  ;;  %v747_v19 = vld [vmem:[%s27845_s7 + $0xa98] sm:$0xff]  ;;  %v749_v20 = vld [vmem:[%s27845_s7 + $0xaa0] sm:$0xff] }
  0xab   :  { %746 = vst [vmem:[#allocation2 + $0xa90] sm:$0xff] %v745_v18  ;;  %748 = vst [vmem:[#allocation2 + $0xa98] sm:$0xff] %v747_v19  ;;  %v751_v21 = vld [vmem:[%s27845_s7 + $0xaa8] sm:$0xff]  ;;  %v753_v22 = vld [vmem:[%s27845_s7 + $0xab0] sm:$0xff] }
  0xac   :  { %750 = vst [vmem:[#allocation2 + $0xaa0] sm:$0xff] %v749_v20  ;;  %v755_v23 = vld [vmem:[%s27845_s7 + $0xab8] sm:$0xff]  ;;  %752 = vst [vmem:[#allocation2 + $0xaa8] sm:$0xff] %v751_v21  ;;  %v757_v24 = vld [vmem:[%s27845_s7 + $0xac0] sm:$0xff] }
  0xad   :  { %754 = vst [vmem:[#allocation2 + $0xab0] sm:$0xff] %v753_v22  ;;  %756 = vst [vmem:[#allocation2 + $0xab8] sm:$0xff] %v755_v23  ;;  %v759_v25 = vld [vmem:[%s27845_s7 + $0xac8] sm:$0xff]  ;;  %v761_v26 = vld [vmem:[%s27845_s7 + $0xad0] sm:$0xff] }
  0xae   :  { %758 = vst [vmem:[#allocation2 + $0xac0] sm:$0xff] %v757_v24  ;;  %760 = vst [vmem:[#allocation2 + $0xac8] sm:$0xff] %v759_v25  ;;  %v763_v27 = vld [vmem:[%s27845_s7 + $0xad8] sm:$0xff]  ;;  %v765_v28 = vld [vmem:[%s27845_s7 + $0xae0] sm:$0xff] }
  0xaf   :  { %762 = vst [vmem:[#allocation2 + $0xad0] sm:$0xff] %v761_v26  ;;  %v767_v29 = vld [vmem:[%s27845_s7 + $0xae8] sm:$0xff]  ;;  %764 = vst [vmem:[#allocation2 + $0xad8] sm:$0xff] %v763_v27  ;;  %v769_v30 = vld [vmem:[%s27845_s7 + $0xaf0] sm:$0xff] }
  0xb0   :  { %766 = vst [vmem:[#allocation2 + $0xae0] sm:$0xff] %v765_v28  ;;  %768 = vst [vmem:[#allocation2 + $0xae8] sm:$0xff] %v767_v29  ;;  %v771_v31 = vld [vmem:[%s27845_s7 + $0xaf8] sm:$0xff]  ;;  %v773_v32 = vld [vmem:[%s27845_s7 + $0xb00] sm:$0xff] }
  0xb1   :  { %770 = vst [vmem:[#allocation2 + $0xaf0] sm:$0xff] %v769_v30  ;;  %772 = vst [vmem:[#allocation2 + $0xaf8] sm:$0xff] %v771_v31  ;;  %v775_v33 = vld [vmem:[%s27845_s7 + $0xb08] sm:$0xff]  ;;  %v777_v34 = vld [vmem:[%s27845_s7 + $0xb10] sm:$0xff] }
  0xb2   :  { %774 = vst [vmem:[#allocation2 + $0xb00] sm:$0xff] %v773_v32  ;;  %v779_v35 = vld [vmem:[%s27845_s7 + $0xb18] sm:$0xff]  ;;  %776 = vst [vmem:[#allocation2 + $0xb08] sm:$0xff] %v775_v33  ;;  %v781_v36 = vld [vmem:[%s27845_s7 + $0xb20] sm:$0xff] }
  0xb3   :  { %778 = vst [vmem:[#allocation2 + $0xb10] sm:$0xff] %v777_v34  ;;  %780 = vst [vmem:[#allocation2 + $0xb18] sm:$0xff] %v779_v35  ;;  %v783_v37 = vld [vmem:[%s27845_s7 + $0xb28] sm:$0xff]  ;;  %v785_v38 = vld [vmem:[%s27845_s7 + $0xb30] sm:$0xff] }
  0xb4   :  { %782 = vst [vmem:[#allocation2 + $0xb20] sm:$0xff] %v781_v36  ;;  %784 = vst [vmem:[#allocation2 + $0xb28] sm:$0xff] %v783_v37  ;;  %v787_v39 = vld [vmem:[%s27845_s7 + $0xb38] sm:$0xff]  ;;  %v789_v40 = vld [vmem:[%s27845_s7 + $0xb40] sm:$0xff] }
  0xb5   :  { %786 = vst [vmem:[#allocation2 + $0xb30] sm:$0xff] %v785_v38  ;;  %v791_v41 = vld [vmem:[%s27845_s7 + $0xb48] sm:$0xff]  ;;  %788 = vst [vmem:[#allocation2 + $0xb38] sm:$0xff] %v787_v39  ;;  %v793_v42 = vld [vmem:[%s27845_s7 + $0xb50] sm:$0xff] }
  0xb6   :  { %790 = vst [vmem:[#allocation2 + $0xb40] sm:$0xff] %v789_v40  ;;  %792 = vst [vmem:[#allocation2 + $0xb48] sm:$0xff] %v791_v41  ;;  %v795_v43 = vld [vmem:[%s27845_s7 + $0xb58] sm:$0xff]  ;;  %v797_v44 = vld [vmem:[%s27845_s7 + $0xb60] sm:$0xff] }
  0xb7   :  { %794 = vst [vmem:[#allocation2 + $0xb50] sm:$0xff] %v793_v42  ;;  %796 = vst [vmem:[#allocation2 + $0xb58] sm:$0xff] %v795_v43  ;;  %v799_v45 = vld [vmem:[%s27845_s7 + $0xb68] sm:$0xff]  ;;  %v801_v46 = vld [vmem:[%s27845_s7 + $0xb70] sm:$0xff] }
  0xb8   :  { %798 = vst [vmem:[#allocation2 + $0xb60] sm:$0xff] %v797_v44  ;;  %v803_v47 = vld [vmem:[%s27845_s7 + $0xb78] sm:$0xff]  ;;  %800 = vst [vmem:[#allocation2 + $0xb68] sm:$0xff] %v799_v45  ;;  %v805_v48 = vld [vmem:[%s27845_s7 + $0xb80] sm:$0xff] }
  0xb9   :  { %802 = vst [vmem:[#allocation2 + $0xb70] sm:$0xff] %v801_v46  ;;  %804 = vst [vmem:[#allocation2 + $0xb78] sm:$0xff] %v803_v47  ;;  %v807_v49 = vld [vmem:[%s27845_s7 + $0xb88] sm:$0xff]  ;;  %v809_v50 = vld [vmem:[%s27845_s7 + $0xb90] sm:$0xff] }
  0xba   :  { %806 = vst [vmem:[#allocation2 + $0xb80] sm:$0xff] %v805_v48  ;;  %808 = vst [vmem:[#allocation2 + $0xb88] sm:$0xff] %v807_v49  ;;  %v811_v51 = vld [vmem:[%s27845_s7 + $0xb98] sm:$0xff]  ;;  %v813_v52 = vld [vmem:[%s27845_s7 + $0xba0] sm:$0xff] }
  0xbb   :  { %810 = vst [vmem:[#allocation2 + $0xb90] sm:$0xff] %v809_v50  ;;  %v815_v53 = vld [vmem:[%s27845_s7 + $0xba8] sm:$0xff]  ;;  %812 = vst [vmem:[#allocation2 + $0xb98] sm:$0xff] %v811_v51  ;;  %v817_v54 = vld [vmem:[%s27845_s7 + $0xbb0] sm:$0xff] }
  0xbc   :  { %814 = vst [vmem:[#allocation2 + $0xba0] sm:$0xff] %v813_v52  ;;  %816 = vst [vmem:[#allocation2 + $0xba8] sm:$0xff] %v815_v53  ;;  %v819_v55 = vld [vmem:[%s27845_s7 + $0xbb8] sm:$0xff]  ;;  %v821_v56 = vld [vmem:[%s27845_s7 + $0xbc0] sm:$0xff] }
  0xbd   :  { %818 = vst [vmem:[#allocation2 + $0xbb0] sm:$0xff] %v817_v54  ;;  %820 = vst [vmem:[#allocation2 + $0xbb8] sm:$0xff] %v819_v55  ;;  %v823_v57 = vld [vmem:[%s27845_s7 + $0xbc8] sm:$0xff]  ;;  %v825_v58 = vld [vmem:[%s27845_s7 + $0xbd0] sm:$0xff] }
  0xbe   :  { %822 = vst [vmem:[#allocation2 + $0xbc0] sm:$0xff] %v821_v56  ;;  %v827_v59 = vld [vmem:[%s27845_s7 + $0xbd8] sm:$0xff]  ;;  %824 = vst [vmem:[#allocation2 + $0xbc8] sm:$0xff] %v823_v57  ;;  %v829_v60 = vld [vmem:[%s27845_s7 + $0xbe0] sm:$0xff] }
  0xbf   :  { %826 = vst [vmem:[#allocation2 + $0xbd0] sm:$0xff] %v825_v58  ;;  %828 = vst [vmem:[#allocation2 + $0xbd8] sm:$0xff] %v827_v59  ;;  %v831_v61 = vld [vmem:[%s27845_s7 + $0xbe8] sm:$0xff]  ;;  %v833_v62 = vld [vmem:[%s27845_s7 + $0xbf0] sm:$0xff] }
  0xc0   :  { %830 = vst [vmem:[#allocation2 + $0xbe0] sm:$0xff] %v829_v60  ;;  %832 = vst [vmem:[#allocation2 + $0xbe8] sm:$0xff] %v831_v61  ;;  %v835_v63 = vld [vmem:[%s27845_s7 + $0xbf8] sm:$0xff]  ;;  %v837_v0 = vld [vmem:[%s27845_s7 + $0xc00] sm:$0xff] }
  0xc1   :  { %834 = vst [vmem:[#allocation2 + $0xbf0] sm:$0xff] %v833_v62  ;;  %v839_v1 = vld [vmem:[%s27845_s7 + $0xc08] sm:$0xff]  ;;  %836 = vst [vmem:[#allocation2 + $0xbf8] sm:$0xff] %v835_v63  ;;  %v841_v2 = vld [vmem:[%s27845_s7 + $0xc10] sm:$0xff] }
  0xc2   :  { %838 = vst [vmem:[#allocation2 + $0xc00] sm:$0xff] %v837_v0  ;;  %840 = vst [vmem:[#allocation2 + $0xc08] sm:$0xff] %v839_v1  ;;  %v843_v3 = vld [vmem:[%s27845_s7 + $0xc18] sm:$0xff]  ;;  %v845_v4 = vld [vmem:[%s27845_s7 + $0xc20] sm:$0xff] }
  0xc3   :  { %842 = vst [vmem:[#allocation2 + $0xc10] sm:$0xff] %v841_v2  ;;  %844 = vst [vmem:[#allocation2 + $0xc18] sm:$0xff] %v843_v3  ;;  %v847_v5 = vld [vmem:[%s27845_s7 + $0xc28] sm:$0xff]  ;;  %v849_v6 = vld [vmem:[%s27845_s7 + $0xc30] sm:$0xff] }
  0xc4   :  { %846 = vst [vmem:[#allocation2 + $0xc20] sm:$0xff] %v845_v4  ;;  %v851_v7 = vld [vmem:[%s27845_s7 + $0xc38] sm:$0xff]  ;;  %848 = vst [vmem:[#allocation2 + $0xc28] sm:$0xff] %v847_v5  ;;  %v853_v8 = vld [vmem:[%s27845_s7 + $0xc40] sm:$0xff] }
  0xc5   :  { %850 = vst [vmem:[#allocation2 + $0xc30] sm:$0xff] %v849_v6  ;;  %852 = vst [vmem:[#allocation2 + $0xc38] sm:$0xff] %v851_v7  ;;  %v855_v9 = vld [vmem:[%s27845_s7 + $0xc48] sm:$0xff]  ;;  %v857_v10 = vld [vmem:[%s27845_s7 + $0xc50] sm:$0xff] }
  0xc6   :  { %854 = vst [vmem:[#allocation2 + $0xc40] sm:$0xff] %v853_v8  ;;  %856 = vst [vmem:[#allocation2 + $0xc48] sm:$0xff] %v855_v9  ;;  %v859_v11 = vld [vmem:[%s27845_s7 + $0xc58] sm:$0xff]  ;;  %v861_v12 = vld [vmem:[%s27845_s7 + $0xc60] sm:$0xff] }
  0xc7   :  { %858 = vst [vmem:[#allocation2 + $0xc50] sm:$0xff] %v857_v10  ;;  %v863_v13 = vld [vmem:[%s27845_s7 + $0xc68] sm:$0xff]  ;;  %860 = vst [vmem:[#allocation2 + $0xc58] sm:$0xff] %v859_v11  ;;  %v865_v14 = vld [vmem:[%s27845_s7 + $0xc70] sm:$0xff] }
  0xc8   :  { %862 = vst [vmem:[#allocation2 + $0xc60] sm:$0xff] %v861_v12  ;;  %864 = vst [vmem:[#allocation2 + $0xc68] sm:$0xff] %v863_v13  ;;  %v867_v15 = vld [vmem:[%s27845_s7 + $0xc78] sm:$0xff]  ;;  %v869_v16 = vld [vmem:[%s27845_s7 + $0xc80] sm:$0xff] }
  0xc9   :  { %866 = vst [vmem:[#allocation2 + $0xc70] sm:$0xff] %v865_v14  ;;  %868 = vst [vmem:[#allocation2 + $0xc78] sm:$0xff] %v867_v15  ;;  %v871_v17 = vld [vmem:[%s27845_s7 + $0xc88] sm:$0xff]  ;;  %v873_v18 = vld [vmem:[%s27845_s7 + $0xc90] sm:$0xff] }
  0xca   :  { %870 = vst [vmem:[#allocation2 + $0xc80] sm:$0xff] %v869_v16  ;;  %v875_v19 = vld [vmem:[%s27845_s7 + $0xc98] sm:$0xff]  ;;  %872 = vst [vmem:[#allocation2 + $0xc88] sm:$0xff] %v871_v17  ;;  %v877_v20 = vld [vmem:[%s27845_s7 + $0xca0] sm:$0xff] }
  0xcb   :  { %874 = vst [vmem:[#allocation2 + $0xc90] sm:$0xff] %v873_v18  ;;  %876 = vst [vmem:[#allocation2 + $0xc98] sm:$0xff] %v875_v19  ;;  %v879_v21 = vld [vmem:[%s27845_s7 + $0xca8] sm:$0xff]  ;;  %v881_v22 = vld [vmem:[%s27845_s7 + $0xcb0] sm:$0xff] }
  0xcc   :  { %878 = vst [vmem:[#allocation2 + $0xca0] sm:$0xff] %v877_v20  ;;  %880 = vst [vmem:[#allocation2 + $0xca8] sm:$0xff] %v879_v21  ;;  %v883_v23 = vld [vmem:[%s27845_s7 + $0xcb8] sm:$0xff]  ;;  %v885_v24 = vld [vmem:[%s27845_s7 + $0xcc0] sm:$0xff] }
  0xcd   :  { %882 = vst [vmem:[#allocation2 + $0xcb0] sm:$0xff] %v881_v22  ;;  %v887_v25 = vld [vmem:[%s27845_s7 + $0xcc8] sm:$0xff]  ;;  %884 = vst [vmem:[#allocation2 + $0xcb8] sm:$0xff] %v883_v23  ;;  %v889_v26 = vld [vmem:[%s27845_s7 + $0xcd0] sm:$0xff] }
  0xce   :  { %886 = vst [vmem:[#allocation2 + $0xcc0] sm:$0xff] %v885_v24  ;;  %888 = vst [vmem:[#allocation2 + $0xcc8] sm:$0xff] %v887_v25  ;;  %v891_v27 = vld [vmem:[%s27845_s7 + $0xcd8] sm:$0xff]  ;;  %v893_v28 = vld [vmem:[%s27845_s7 + $0xce0] sm:$0xff] }
  0xcf   :  { %890 = vst [vmem:[#allocation2 + $0xcd0] sm:$0xff] %v889_v26  ;;  %892 = vst [vmem:[#allocation2 + $0xcd8] sm:$0xff] %v891_v27  ;;  %v895_v29 = vld [vmem:[%s27845_s7 + $0xce8] sm:$0xff]  ;;  %v897_v30 = vld [vmem:[%s27845_s7 + $0xcf0] sm:$0xff] }
  0xd0   :  { %894 = vst [vmem:[#allocation2 + $0xce0] sm:$0xff] %v893_v28  ;;  %v899_v31 = vld [vmem:[%s27845_s7 + $0xcf8] sm:$0xff]  ;;  %896 = vst [vmem:[#allocation2 + $0xce8] sm:$0xff] %v895_v29  ;;  %v901_v32 = vld [vmem:[%s27845_s7 + $0xd00] sm:$0xff] }
  0xd1   :  { %898 = vst [vmem:[#allocation2 + $0xcf0] sm:$0xff] %v897_v30  ;;  %900 = vst [vmem:[#allocation2 + $0xcf8] sm:$0xff] %v899_v31  ;;  %v903_v33 = vld [vmem:[%s27845_s7 + $0xd08] sm:$0xff]  ;;  %v905_v34 = vld [vmem:[%s27845_s7 + $0xd10] sm:$0xff] }
  0xd2   :  { %902 = vst [vmem:[#allocation2 + $0xd00] sm:$0xff] %v901_v32  ;;  %904 = vst [vmem:[#allocation2 + $0xd08] sm:$0xff] %v903_v33  ;;  %v907_v35 = vld [vmem:[%s27845_s7 + $0xd18] sm:$0xff]  ;;  %v909_v36 = vld [vmem:[%s27845_s7 + $0xd20] sm:$0xff] }
  0xd3   :  { %906 = vst [vmem:[#allocation2 + $0xd10] sm:$0xff] %v905_v34  ;;  %v911_v37 = vld [vmem:[%s27845_s7 + $0xd28] sm:$0xff]  ;;  %908 = vst [vmem:[#allocation2 + $0xd18] sm:$0xff] %v907_v35  ;;  %v913_v38 = vld [vmem:[%s27845_s7 + $0xd30] sm:$0xff] }
  0xd4   :  { %910 = vst [vmem:[#allocation2 + $0xd20] sm:$0xff] %v909_v36  ;;  %912 = vst [vmem:[#allocation2 + $0xd28] sm:$0xff] %v911_v37  ;;  %v915_v39 = vld [vmem:[%s27845_s7 + $0xd38] sm:$0xff]  ;;  %v917_v40 = vld [vmem:[%s27845_s7 + $0xd40] sm:$0xff] }
  0xd5   :  { %914 = vst [vmem:[#allocation2 + $0xd30] sm:$0xff] %v913_v38  ;;  %916 = vst [vmem:[#allocation2 + $0xd38] sm:$0xff] %v915_v39  ;;  %v919_v41 = vld [vmem:[%s27845_s7 + $0xd48] sm:$0xff]  ;;  %v921_v42 = vld [vmem:[%s27845_s7 + $0xd50] sm:$0xff] }
  0xd6   :  { %918 = vst [vmem:[#allocation2 + $0xd40] sm:$0xff] %v917_v40  ;;  %v923_v43 = vld [vmem:[%s27845_s7 + $0xd58] sm:$0xff]  ;;  %920 = vst [vmem:[#allocation2 + $0xd48] sm:$0xff] %v919_v41  ;;  %v925_v44 = vld [vmem:[%s27845_s7 + $0xd60] sm:$0xff] }
  0xd7   :  { %922 = vst [vmem:[#allocation2 + $0xd50] sm:$0xff] %v921_v42  ;;  %924 = vst [vmem:[#allocation2 + $0xd58] sm:$0xff] %v923_v43  ;;  %v927_v45 = vld [vmem:[%s27845_s7 + $0xd68] sm:$0xff]  ;;  %v929_v46 = vld [vmem:[%s27845_s7 + $0xd70] sm:$0xff] }
  0xd8   :  { %926 = vst [vmem:[#allocation2 + $0xd60] sm:$0xff] %v925_v44  ;;  %928 = vst [vmem:[#allocation2 + $0xd68] sm:$0xff] %v927_v45  ;;  %v931_v47 = vld [vmem:[%s27845_s7 + $0xd78] sm:$0xff]  ;;  %v933_v48 = vld [vmem:[%s27845_s7 + $0xd80] sm:$0xff] }
  0xd9   :  { %930 = vst [vmem:[#allocation2 + $0xd70] sm:$0xff] %v929_v46  ;;  %v935_v49 = vld [vmem:[%s27845_s7 + $0xd88] sm:$0xff]  ;;  %932 = vst [vmem:[#allocation2 + $0xd78] sm:$0xff] %v931_v47  ;;  %v937_v50 = vld [vmem:[%s27845_s7 + $0xd90] sm:$0xff] }
  0xda   :  { %934 = vst [vmem:[#allocation2 + $0xd80] sm:$0xff] %v933_v48  ;;  %936 = vst [vmem:[#allocation2 + $0xd88] sm:$0xff] %v935_v49  ;;  %v939_v51 = vld [vmem:[%s27845_s7 + $0xd98] sm:$0xff]  ;;  %v941_v52 = vld [vmem:[%s27845_s7 + $0xda0] sm:$0xff] }
  0xdb   :  { %938 = vst [vmem:[#allocation2 + $0xd90] sm:$0xff] %v937_v50  ;;  %940 = vst [vmem:[#allocation2 + $0xd98] sm:$0xff] %v939_v51  ;;  %v943_v53 = vld [vmem:[%s27845_s7 + $0xda8] sm:$0xff]  ;;  %v945_v54 = vld [vmem:[%s27845_s7 + $0xdb0] sm:$0xff] }
  0xdc   :  { %942 = vst [vmem:[#allocation2 + $0xda0] sm:$0xff] %v941_v52  ;;  %v947_v55 = vld [vmem:[%s27845_s7 + $0xdb8] sm:$0xff]  ;;  %944 = vst [vmem:[#allocation2 + $0xda8] sm:$0xff] %v943_v53  ;;  %v949_v56 = vld [vmem:[%s27845_s7 + $0xdc0] sm:$0xff] }
  0xdd   :  { %946 = vst [vmem:[#allocation2 + $0xdb0] sm:$0xff] %v945_v54  ;;  %948 = vst [vmem:[#allocation2 + $0xdb8] sm:$0xff] %v947_v55  ;;  %v951_v57 = vld [vmem:[%s27845_s7 + $0xdc8] sm:$0xff]  ;;  %v953_v58 = vld [vmem:[%s27845_s7 + $0xdd0] sm:$0xff] }
  0xde   :  { %950 = vst [vmem:[#allocation2 + $0xdc0] sm:$0xff] %v949_v56  ;;  %952 = vst [vmem:[#allocation2 + $0xdc8] sm:$0xff] %v951_v57  ;;  %v955_v59 = vld [vmem:[%s27845_s7 + $0xdd8] sm:$0xff]  ;;  %v957_v60 = vld [vmem:[%s27845_s7 + $0xde0] sm:$0xff] }
  0xdf   :  { %954 = vst [vmem:[#allocation2 + $0xdd0] sm:$0xff] %v953_v58  ;;  %v959_v61 = vld [vmem:[%s27845_s7 + $0xde8] sm:$0xff]  ;;  %956 = vst [vmem:[#allocation2 + $0xdd8] sm:$0xff] %v955_v59  ;;  %v961_v62 = vld [vmem:[%s27845_s7 + $0xdf0] sm:$0xff] }
  0xe0   :  { %958 = vst [vmem:[#allocation2 + $0xde0] sm:$0xff] %v957_v60  ;;  %960 = vst [vmem:[#allocation2 + $0xde8] sm:$0xff] %v959_v61  ;;  %v963_v63 = vld [vmem:[%s27845_s7 + $0xdf8] sm:$0xff]  ;;  %v965_v0 = vld [vmem:[%s27845_s7 + $0xe00] sm:$0xff] }
  0xe1   :  { %962 = vst [vmem:[#allocation2 + $0xdf0] sm:$0xff] %v961_v62  ;;  %964 = vst [vmem:[#allocation2 + $0xdf8] sm:$0xff] %v963_v63  ;;  %v967_v1 = vld [vmem:[%s27845_s7 + $0xe08] sm:$0xff]  ;;  %v969_v2 = vld [vmem:[%s27845_s7 + $0xe10] sm:$0xff] }
  0xe2   :  { %966 = vst [vmem:[#allocation2 + $0xe00] sm:$0xff] %v965_v0  ;;  %v971_v3 = vld [vmem:[%s27845_s7 + $0xe18] sm:$0xff]  ;;  %968 = vst [vmem:[#allocation2 + $0xe08] sm:$0xff] %v967_v1  ;;  %v973_v4 = vld [vmem:[%s27845_s7 + $0xe20] sm:$0xff] }
  0xe3   :  { %970 = vst [vmem:[#allocation2 + $0xe10] sm:$0xff] %v969_v2  ;;  %972 = vst [vmem:[#allocation2 + $0xe18] sm:$0xff] %v971_v3  ;;  %v975_v5 = vld [vmem:[%s27845_s7 + $0xe28] sm:$0xff]  ;;  %v977_v6 = vld [vmem:[%s27845_s7 + $0xe30] sm:$0xff] }
  0xe4   :  { %974 = vst [vmem:[#allocation2 + $0xe20] sm:$0xff] %v973_v4  ;;  %976 = vst [vmem:[#allocation2 + $0xe28] sm:$0xff] %v975_v5  ;;  %v979_v7 = vld [vmem:[%s27845_s7 + $0xe38] sm:$0xff]  ;;  %v981_v8 = vld [vmem:[%s27845_s7 + $0xe40] sm:$0xff] }
  0xe5   :  { %978 = vst [vmem:[#allocation2 + $0xe30] sm:$0xff] %v977_v6  ;;  %v983_v9 = vld [vmem:[%s27845_s7 + $0xe48] sm:$0xff]  ;;  %980 = vst [vmem:[#allocation2 + $0xe38] sm:$0xff] %v979_v7  ;;  %v985_v10 = vld [vmem:[%s27845_s7 + $0xe50] sm:$0xff] }
  0xe6   :  { %982 = vst [vmem:[#allocation2 + $0xe40] sm:$0xff] %v981_v8  ;;  %984 = vst [vmem:[#allocation2 + $0xe48] sm:$0xff] %v983_v9  ;;  %v987_v11 = vld [vmem:[%s27845_s7 + $0xe58] sm:$0xff]  ;;  %v989_v12 = vld [vmem:[%s27845_s7 + $0xe60] sm:$0xff] }
  0xe7   :  { %986 = vst [vmem:[#allocation2 + $0xe50] sm:$0xff] %v985_v10  ;;  %988 = vst [vmem:[#allocation2 + $0xe58] sm:$0xff] %v987_v11  ;;  %v991_v13 = vld [vmem:[%s27845_s7 + $0xe68] sm:$0xff]  ;;  %v993_v14 = vld [vmem:[%s27845_s7 + $0xe70] sm:$0xff] }
  0xe8   :  { %990 = vst [vmem:[#allocation2 + $0xe60] sm:$0xff] %v989_v12  ;;  %v995_v15 = vld [vmem:[%s27845_s7 + $0xe78] sm:$0xff]  ;;  %992 = vst [vmem:[#allocation2 + $0xe68] sm:$0xff] %v991_v13  ;;  %v997_v16 = vld [vmem:[%s27845_s7 + $0xe80] sm:$0xff] }
  0xe9   :  { %994 = vst [vmem:[#allocation2 + $0xe70] sm:$0xff] %v993_v14  ;;  %996 = vst [vmem:[#allocation2 + $0xe78] sm:$0xff] %v995_v15  ;;  %v999_v17 = vld [vmem:[%s27845_s7 + $0xe88] sm:$0xff]  ;;  %v1001_v18 = vld [vmem:[%s27845_s7 + $0xe90] sm:$0xff] }
  0xea   :  { %998 = vst [vmem:[#allocation2 + $0xe80] sm:$0xff] %v997_v16  ;;  %1000 = vst [vmem:[#allocation2 + $0xe88] sm:$0xff] %v999_v17  ;;  %v1003_v19 = vld [vmem:[%s27845_s7 + $0xe98] sm:$0xff]  ;;  %v1005_v20 = vld [vmem:[%s27845_s7 + $0xea0] sm:$0xff] }
  0xeb   :  { %1002 = vst [vmem:[#allocation2 + $0xe90] sm:$0xff] %v1001_v18  ;;  %v1007_v21 = vld [vmem:[%s27845_s7 + $0xea8] sm:$0xff]  ;;  %1004 = vst [vmem:[#allocation2 + $0xe98] sm:$0xff] %v1003_v19  ;;  %v1009_v22 = vld [vmem:[%s27845_s7 + $0xeb0] sm:$0xff] }
  0xec   :  { %1006 = vst [vmem:[#allocation2 + $0xea0] sm:$0xff] %v1005_v20  ;;  %1008 = vst [vmem:[#allocation2 + $0xea8] sm:$0xff] %v1007_v21  ;;  %v1011_v23 = vld [vmem:[%s27845_s7 + $0xeb8] sm:$0xff]  ;;  %v1013_v24 = vld [vmem:[%s27845_s7 + $0xec0] sm:$0xff] }
  0xed   :  { %1010 = vst [vmem:[#allocation2 + $0xeb0] sm:$0xff] %v1009_v22  ;;  %1012 = vst [vmem:[#allocation2 + $0xeb8] sm:$0xff] %v1011_v23  ;;  %v1015_v25 = vld [vmem:[%s27845_s7 + $0xec8] sm:$0xff]  ;;  %v1017_v26 = vld [vmem:[%s27845_s7 + $0xed0] sm:$0xff] }
  0xee   :  { %1014 = vst [vmem:[#allocation2 + $0xec0] sm:$0xff] %v1013_v24  ;;  %v1019_v27 = vld [vmem:[%s27845_s7 + $0xed8] sm:$0xff]  ;;  %1016 = vst [vmem:[#allocation2 + $0xec8] sm:$0xff] %v1015_v25  ;;  %v1021_v28 = vld [vmem:[%s27845_s7 + $0xee0] sm:$0xff] }
  0xef   :  { %1018 = vst [vmem:[#allocation2 + $0xed0] sm:$0xff] %v1017_v26  ;;  %1020 = vst [vmem:[#allocation2 + $0xed8] sm:$0xff] %v1019_v27  ;;  %v1023_v29 = vld [vmem:[%s27845_s7 + $0xee8] sm:$0xff]  ;;  %v1025_v30 = vld [vmem:[%s27845_s7 + $0xef0] sm:$0xff] }
  0xf0   :  { %1022 = vst [vmem:[#allocation2 + $0xee0] sm:$0xff] %v1021_v28  ;;  %1024 = vst [vmem:[#allocation2 + $0xee8] sm:$0xff] %v1023_v29  ;;  %v1027_v31 = vld [vmem:[%s27845_s7 + $0xef8] sm:$0xff]  ;;  %v1029_v32 = vld [vmem:[%s27845_s7 + $0xf00] sm:$0xff] }
  0xf1   :  { %1026 = vst [vmem:[#allocation2 + $0xef0] sm:$0xff] %v1025_v30  ;;  %v1031_v33 = vld [vmem:[%s27845_s7 + $0xf08] sm:$0xff]  ;;  %1028 = vst [vmem:[#allocation2 + $0xef8] sm:$0xff] %v1027_v31  ;;  %v1033_v34 = vld [vmem:[%s27845_s7 + $0xf10] sm:$0xff] }
  0xf2   :  { %1030 = vst [vmem:[#allocation2 + $0xf00] sm:$0xff] %v1029_v32  ;;  %1032 = vst [vmem:[#allocation2 + $0xf08] sm:$0xff] %v1031_v33  ;;  %v1035_v35 = vld [vmem:[%s27845_s7 + $0xf18] sm:$0xff]  ;;  %v1037_v36 = vld [vmem:[%s27845_s7 + $0xf20] sm:$0xff] }
  0xf3   :  { %1034 = vst [vmem:[#allocation2 + $0xf10] sm:$0xff] %v1033_v34  ;;  %1036 = vst [vmem:[#allocation2 + $0xf18] sm:$0xff] %v1035_v35  ;;  %v1039_v37 = vld [vmem:[%s27845_s7 + $0xf28] sm:$0xff]  ;;  %v1041_v38 = vld [vmem:[%s27845_s7 + $0xf30] sm:$0xff] }
  0xf4   :  { %1038 = vst [vmem:[#allocation2 + $0xf20] sm:$0xff] %v1037_v36  ;;  %v1043_v39 = vld [vmem:[%s27845_s7 + $0xf38] sm:$0xff]  ;;  %1040 = vst [vmem:[#allocation2 + $0xf28] sm:$0xff] %v1039_v37  ;;  %v1045_v40 = vld [vmem:[%s27845_s7 + $0xf40] sm:$0xff] }
  0xf5   :  { %1042 = vst [vmem:[#allocation2 + $0xf30] sm:$0xff] %v1041_v38  ;;  %1044 = vst [vmem:[#allocation2 + $0xf38] sm:$0xff] %v1043_v39  ;;  %v1047_v41 = vld [vmem:[%s27845_s7 + $0xf48] sm:$0xff]  ;;  %v1049_v42 = vld [vmem:[%s27845_s7 + $0xf50] sm:$0xff] }
  0xf6   :  { %1046 = vst [vmem:[#allocation2 + $0xf40] sm:$0xff] %v1045_v40  ;;  %1048 = vst [vmem:[#allocation2 + $0xf48] sm:$0xff] %v1047_v41  ;;  %v1051_v43 = vld [vmem:[%s27845_s7 + $0xf58] sm:$0xff]  ;;  %v1053_v44 = vld [vmem:[%s27845_s7 + $0xf60] sm:$0xff] }
  0xf7   :  { %1050 = vst [vmem:[#allocation2 + $0xf50] sm:$0xff] %v1049_v42  ;;  %v1055_v45 = vld [vmem:[%s27845_s7 + $0xf68] sm:$0xff]  ;;  %1052 = vst [vmem:[#allocation2 + $0xf58] sm:$0xff] %v1051_v43  ;;  %v1057_v46 = vld [vmem:[%s27845_s7 + $0xf70] sm:$0xff] }
  0xf8   :  { %1054 = vst [vmem:[#allocation2 + $0xf60] sm:$0xff] %v1053_v44  ;;  %1056 = vst [vmem:[#allocation2 + $0xf68] sm:$0xff] %v1055_v45  ;;  %v1059_v47 = vld [vmem:[%s27845_s7 + $0xf78] sm:$0xff]  ;;  %v1061_v48 = vld [vmem:[%s27845_s7 + $0xf80] sm:$0xff] }
  0xf9   :  { %1058 = vst [vmem:[#allocation2 + $0xf70] sm:$0xff] %v1057_v46  ;;  %1060 = vst [vmem:[#allocation2 + $0xf78] sm:$0xff] %v1059_v47  ;;  %v1063_v49 = vld [vmem:[%s27845_s7 + $0xf88] sm:$0xff]  ;;  %v1065_v50 = vld [vmem:[%s27845_s7 + $0xf90] sm:$0xff] }
  0xfa   :  { %1062 = vst [vmem:[#allocation2 + $0xf80] sm:$0xff] %v1061_v48  ;;  %v1067_v51 = vld [vmem:[%s27845_s7 + $0xf98] sm:$0xff]  ;;  %1064 = vst [vmem:[#allocation2 + $0xf88] sm:$0xff] %v1063_v49  ;;  %v1069_v52 = vld [vmem:[%s27845_s7 + $0xfa0] sm:$0xff] }
  0xfb   :  { %1066 = vst [vmem:[#allocation2 + $0xf90] sm:$0xff] %v1065_v50  ;;  %1068 = vst [vmem:[#allocation2 + $0xf98] sm:$0xff] %v1067_v51  ;;  %v1071_v53 = vld [vmem:[%s27845_s7 + $0xfa8] sm:$0xff]  ;;  %v1073_v54 = vld [vmem:[%s27845_s7 + $0xfb0] sm:$0xff] }
  0xfc   :  { %1070 = vst [vmem:[#allocation2 + $0xfa0] sm:$0xff] %v1069_v52  ;;  %1072 = vst [vmem:[#allocation2 + $0xfa8] sm:$0xff] %v1071_v53  ;;  %v1075_v55 = vld [vmem:[%s27845_s7 + $0xfb8] sm:$0xff]  ;;  %v1077_v56 = vld [vmem:[%s27845_s7 + $0xfc0] sm:$0xff] }
  0xfd   :  { %1074 = vst [vmem:[#allocation2 + $0xfb0] sm:$0xff] %v1073_v54  ;;  %v1079_v57 = vld [vmem:[%s27845_s7 + $0xfc8] sm:$0xff]  ;;  %1076 = vst [vmem:[#allocation2 + $0xfb8] sm:$0xff] %v1075_v55  ;;  %v1081_v58 = vld [vmem:[%s27845_s7 + $0xfd0] sm:$0xff] }
  0xfe   :  { %1078 = vst [vmem:[#allocation2 + $0xfc0] sm:$0xff] %v1077_v56  ;;  %1080 = vst [vmem:[#allocation2 + $0xfc8] sm:$0xff] %v1079_v57  ;;  %v1083_v59 = vld [vmem:[%s27845_s7 + $0xfd8] sm:$0xff]  ;;  %v1085_v60 = vld [vmem:[%s27845_s7 + $0xfe0] sm:$0xff] }
  0xff   :  { %1082 = vst [vmem:[#allocation2 + $0xfd0] sm:$0xff] %v1081_v58  ;;  %1084 = vst [vmem:[#allocation2 + $0xfd8] sm:$0xff] %v1083_v59  ;;  %v1087_v61 = vld [vmem:[%s27845_s7 + $0xfe8] sm:$0xff]  ;;  %v1089_v62 = vld [vmem:[%s27845_s7 + $0xff0] sm:$0xff] }
 0x100   :  { %1086 = vst [vmem:[#allocation2 + $0xfe0] sm:$0xff] %v1085_v60  ;;  %v1091_v63 = vld [vmem:[%s27845_s7 + $0xff8] sm:$0xff]  ;;  %1088 = vst [vmem:[#allocation2 + $0xfe8] sm:$0xff] %v1087_v61  ;;  %v1093_v0 = vld [vmem:[%s27845_s7 + $0x1000] sm:$0xff] }
 0x101   :  { %1090 = vst [vmem:[#allocation2 + $0xff0] sm:$0xff] %v1089_v62  ;;  %1092 = vst [vmem:[#allocation2 + $0xff8] sm:$0xff] %v1091_v63  ;;  %v1095_v1 = vld [vmem:[%s27845_s7 + $0x1008] sm:$0xff]  ;;  %v1097_v2 = vld [vmem:[%s27845_s7 + $0x1010] sm:$0xff] }
 0x102   :  { %1094 = vst [vmem:[#allocation2 + $0x1000] sm:$0xff] %v1093_v0  ;;  %1096 = vst [vmem:[#allocation2 + $0x1008] sm:$0xff] %v1095_v1  ;;  %v1099_v3 = vld [vmem:[%s27845_s7 + $0x1018] sm:$0xff]  ;;  %v1101_v4 = vld [vmem:[%s27845_s7 + $0x1020] sm:$0xff] }
 0x103   :  { %1098 = vst [vmem:[#allocation2 + $0x1010] sm:$0xff] %v1097_v2  ;;  %v1103_v5 = vld [vmem:[%s27845_s7 + $0x1028] sm:$0xff]  ;;  %1100 = vst [vmem:[#allocation2 + $0x1018] sm:$0xff] %v1099_v3  ;;  %v1105_v6 = vld [vmem:[%s27845_s7 + $0x1030] sm:$0xff] }
 0x104   :  { %1102 = vst [vmem:[#allocation2 + $0x1020] sm:$0xff] %v1101_v4  ;;  %1104 = vst [vmem:[#allocation2 + $0x1028] sm:$0xff] %v1103_v5  ;;  %v1107_v7 = vld [vmem:[%s27845_s7 + $0x1038] sm:$0xff]  ;;  %v1109_v8 = vld [vmem:[%s27845_s7 + $0x1040] sm:$0xff] }
 0x105   :  { %1106 = vst [vmem:[#allocation2 + $0x1030] sm:$0xff] %v1105_v6  ;;  %1108 = vst [vmem:[#allocation2 + $0x1038] sm:$0xff] %v1107_v7  ;;  %v1111_v9 = vld [vmem:[%s27845_s7 + $0x1048] sm:$0xff]  ;;  %v1113_v10 = vld [vmem:[%s27845_s7 + $0x1050] sm:$0xff] }
 0x106   :  { %1110 = vst [vmem:[#allocation2 + $0x1040] sm:$0xff] %v1109_v8  ;;  %v1115_v11 = vld [vmem:[%s27845_s7 + $0x1058] sm:$0xff]  ;;  %1112 = vst [vmem:[#allocation2 + $0x1048] sm:$0xff] %v1111_v9  ;;  %v1117_v12 = vld [vmem:[%s27845_s7 + $0x1060] sm:$0xff] }
 0x107   :  { %1114 = vst [vmem:[#allocation2 + $0x1050] sm:$0xff] %v1113_v10  ;;  %1116 = vst [vmem:[#allocation2 + $0x1058] sm:$0xff] %v1115_v11  ;;  %v1119_v13 = vld [vmem:[%s27845_s7 + $0x1068] sm:$0xff]  ;;  %v1121_v14 = vld [vmem:[%s27845_s7 + $0x1070] sm:$0xff] }
 0x108   :  { %1118 = vst [vmem:[#allocation2 + $0x1060] sm:$0xff] %v1117_v12  ;;  %1120 = vst [vmem:[#allocation2 + $0x1068] sm:$0xff] %v1119_v13  ;;  %v1123_v15 = vld [vmem:[%s27845_s7 + $0x1078] sm:$0xff]  ;;  %v1125_v16 = vld [vmem:[%s27845_s7 + $0x1080] sm:$0xff] }
 0x109   :  { %1122 = vst [vmem:[#allocation2 + $0x1070] sm:$0xff] %v1121_v14  ;;  %v1127_v17 = vld [vmem:[%s27845_s7 + $0x1088] sm:$0xff]  ;;  %1124 = vst [vmem:[#allocation2 + $0x1078] sm:$0xff] %v1123_v15  ;;  %v1129_v18 = vld [vmem:[%s27845_s7 + $0x1090] sm:$0xff] }
 0x10a   :  { %1126 = vst [vmem:[#allocation2 + $0x1080] sm:$0xff] %v1125_v16  ;;  %1128 = vst [vmem:[#allocation2 + $0x1088] sm:$0xff] %v1127_v17  ;;  %v1131_v19 = vld [vmem:[%s27845_s7 + $0x1098] sm:$0xff]  ;;  %v1133_v20 = vld [vmem:[%s27845_s7 + $0x10a0] sm:$0xff] }
 0x10b   :  { %1130 = vst [vmem:[#allocation2 + $0x1090] sm:$0xff] %v1129_v18  ;;  %1132 = vst [vmem:[#allocation2 + $0x1098] sm:$0xff] %v1131_v19  ;;  %v1135_v21 = vld [vmem:[%s27845_s7 + $0x10a8] sm:$0xff]  ;;  %v1137_v22 = vld [vmem:[%s27845_s7 + $0x10b0] sm:$0xff] }
 0x10c   :  { %1134 = vst [vmem:[#allocation2 + $0x10a0] sm:$0xff] %v1133_v20  ;;  %v1139_v23 = vld [vmem:[%s27845_s7 + $0x10b8] sm:$0xff]  ;;  %1136 = vst [vmem:[#allocation2 + $0x10a8] sm:$0xff] %v1135_v21  ;;  %v1141_v24 = vld [vmem:[%s27845_s7 + $0x10c0] sm:$0xff] }
 0x10d   :  { %1138 = vst [vmem:[#allocation2 + $0x10b0] sm:$0xff] %v1137_v22  ;;  %1140 = vst [vmem:[#allocation2 + $0x10b8] sm:$0xff] %v1139_v23  ;;  %v1143_v25 = vld [vmem:[%s27845_s7 + $0x10c8] sm:$0xff]  ;;  %v1145_v26 = vld [vmem:[%s27845_s7 + $0x10d0] sm:$0xff] }
 0x10e   :  { %1142 = vst [vmem:[#allocation2 + $0x10c0] sm:$0xff] %v1141_v24  ;;  %1144 = vst [vmem:[#allocation2 + $0x10c8] sm:$0xff] %v1143_v25  ;;  %v1147_v27 = vld [vmem:[%s27845_s7 + $0x10d8] sm:$0xff]  ;;  %v1149_v28 = vld [vmem:[%s27845_s7 + $0x10e0] sm:$0xff] }
 0x10f   :  { %1146 = vst [vmem:[#allocation2 + $0x10d0] sm:$0xff] %v1145_v26  ;;  %v1151_v29 = vld [vmem:[%s27845_s7 + $0x10e8] sm:$0xff]  ;;  %1148 = vst [vmem:[#allocation2 + $0x10d8] sm:$0xff] %v1147_v27  ;;  %v1153_v30 = vld [vmem:[%s27845_s7 + $0x10f0] sm:$0xff] }
 0x110   :  { %1150 = vst [vmem:[#allocation2 + $0x10e0] sm:$0xff] %v1149_v28  ;;  %1152 = vst [vmem:[#allocation2 + $0x10e8] sm:$0xff] %v1151_v29  ;;  %v1155_v31 = vld [vmem:[%s27845_s7 + $0x10f8] sm:$0xff]  ;;  %v1157_v32 = vld [vmem:[%s27845_s7 + $0x1100] sm:$0xff] }
 0x111   :  { %1154 = vst [vmem:[#allocation2 + $0x10f0] sm:$0xff] %v1153_v30  ;;  %1156 = vst [vmem:[#allocation2 + $0x10f8] sm:$0xff] %v1155_v31  ;;  %v1159_v33 = vld [vmem:[%s27845_s7 + $0x1108] sm:$0xff]  ;;  %v1161_v34 = vld [vmem:[%s27845_s7 + $0x1110] sm:$0xff] }
 0x112   :  { %1158 = vst [vmem:[#allocation2 + $0x1100] sm:$0xff] %v1157_v32  ;;  %v1163_v35 = vld [vmem:[%s27845_s7 + $0x1118] sm:$0xff]  ;;  %1160 = vst [vmem:[#allocation2 + $0x1108] sm:$0xff] %v1159_v33  ;;  %v1165_v36 = vld [vmem:[%s27845_s7 + $0x1120] sm:$0xff] }
 0x113   :  { %1162 = vst [vmem:[#allocation2 + $0x1110] sm:$0xff] %v1161_v34  ;;  %1164 = vst [vmem:[#allocation2 + $0x1118] sm:$0xff] %v1163_v35  ;;  %v1167_v37 = vld [vmem:[%s27845_s7 + $0x1128] sm:$0xff]  ;;  %v1169_v38 = vld [vmem:[%s27845_s7 + $0x1130] sm:$0xff] }
 0x114   :  { %1166 = vst [vmem:[#allocation2 + $0x1120] sm:$0xff] %v1165_v36  ;;  %1168 = vst [vmem:[#allocation2 + $0x1128] sm:$0xff] %v1167_v37  ;;  %v1171_v39 = vld [vmem:[%s27845_s7 + $0x1138] sm:$0xff]  ;;  %v1173_v40 = vld [vmem:[%s27845_s7 + $0x1140] sm:$0xff] }
 0x115   :  { %1170 = vst [vmem:[#allocation2 + $0x1130] sm:$0xff] %v1169_v38  ;;  %v1175_v41 = vld [vmem:[%s27845_s7 + $0x1148] sm:$0xff]  ;;  %1172 = vst [vmem:[#allocation2 + $0x1138] sm:$0xff] %v1171_v39  ;;  %v1177_v42 = vld [vmem:[%s27845_s7 + $0x1150] sm:$0xff] }
 0x116   :  { %1174 = vst [vmem:[#allocation2 + $0x1140] sm:$0xff] %v1173_v40  ;;  %1176 = vst [vmem:[#allocation2 + $0x1148] sm:$0xff] %v1175_v41  ;;  %v1179_v43 = vld [vmem:[%s27845_s7 + $0x1158] sm:$0xff]  ;;  %v1181_v44 = vld [vmem:[%s27845_s7 + $0x1160] sm:$0xff] }
 0x117   :  { %1178 = vst [vmem:[#allocation2 + $0x1150] sm:$0xff] %v1177_v42  ;;  %1180 = vst [vmem:[#allocation2 + $0x1158] sm:$0xff] %v1179_v43  ;;  %v1183_v45 = vld [vmem:[%s27845_s7 + $0x1168] sm:$0xff]  ;;  %v1185_v46 = vld [vmem:[%s27845_s7 + $0x1170] sm:$0xff] }
 0x118   :  { %1182 = vst [vmem:[#allocation2 + $0x1160] sm:$0xff] %v1181_v44  ;;  %v1187_v47 = vld [vmem:[%s27845_s7 + $0x1178] sm:$0xff]  ;;  %1184 = vst [vmem:[#allocation2 + $0x1168] sm:$0xff] %v1183_v45  ;;  %v1189_v48 = vld [vmem:[%s27845_s7 + $0x1180] sm:$0xff] }
 0x119   :  { %1186 = vst [vmem:[#allocation2 + $0x1170] sm:$0xff] %v1185_v46  ;;  %1188 = vst [vmem:[#allocation2 + $0x1178] sm:$0xff] %v1187_v47  ;;  %v1191_v49 = vld [vmem:[%s27845_s7 + $0x1188] sm:$0xff]  ;;  %v1193_v50 = vld [vmem:[%s27845_s7 + $0x1190] sm:$0xff] }
 0x11a   :  { %1190 = vst [vmem:[#allocation2 + $0x1180] sm:$0xff] %v1189_v48  ;;  %1192 = vst [vmem:[#allocation2 + $0x1188] sm:$0xff] %v1191_v49  ;;  %v1195_v51 = vld [vmem:[%s27845_s7 + $0x1198] sm:$0xff]  ;;  %v1197_v52 = vld [vmem:[%s27845_s7 + $0x11a0] sm:$0xff] }
 0x11b   :  { %1194 = vst [vmem:[#allocation2 + $0x1190] sm:$0xff] %v1193_v50  ;;  %v1199_v53 = vld [vmem:[%s27845_s7 + $0x11a8] sm:$0xff]  ;;  %1196 = vst [vmem:[#allocation2 + $0x1198] sm:$0xff] %v1195_v51  ;;  %v1201_v54 = vld [vmem:[%s27845_s7 + $0x11b0] sm:$0xff] }
 0x11c   :  { %1198 = vst [vmem:[#allocation2 + $0x11a0] sm:$0xff] %v1197_v52  ;;  %1200 = vst [vmem:[#allocation2 + $0x11a8] sm:$0xff] %v1199_v53  ;;  %v1203_v55 = vld [vmem:[%s27845_s7 + $0x11b8] sm:$0xff]  ;;  %v1205_v56 = vld [vmem:[%s27845_s7 + $0x11c0] sm:$0xff] }
 0x11d   :  { %1202 = vst [vmem:[#allocation2 + $0x11b0] sm:$0xff] %v1201_v54  ;;  %1204 = vst [vmem:[#allocation2 + $0x11b8] sm:$0xff] %v1203_v55  ;;  %v1207_v57 = vld [vmem:[%s27845_s7 + $0x11c8] sm:$0xff]  ;;  %v1209_v58 = vld [vmem:[%s27845_s7 + $0x11d0] sm:$0xff] }
 0x11e   :  { %1206 = vst [vmem:[#allocation2 + $0x11c0] sm:$0xff] %v1205_v56  ;;  %v1211_v59 = vld [vmem:[%s27845_s7 + $0x11d8] sm:$0xff]  ;;  %1208 = vst [vmem:[#allocation2 + $0x11c8] sm:$0xff] %v1207_v57  ;;  %v1213_v60 = vld [vmem:[%s27845_s7 + $0x11e0] sm:$0xff] }
 0x11f   :  { %1210 = vst [vmem:[#allocation2 + $0x11d0] sm:$0xff] %v1209_v58  ;;  %1212 = vst [vmem:[#allocation2 + $0x11d8] sm:$0xff] %v1211_v59  ;;  %v1215_v61 = vld [vmem:[%s27845_s7 + $0x11e8] sm:$0xff]  ;;  %v1217_v62 = vld [vmem:[%s27845_s7 + $0x11f0] sm:$0xff] }
 0x120   :  { %1214 = vst [vmem:[#allocation2 + $0x11e0] sm:$0xff] %v1213_v60  ;;  %1216 = vst [vmem:[#allocation2 + $0x11e8] sm:$0xff] %v1215_v61  ;;  %v1219_v63 = vld [vmem:[%s27845_s7 + $0x11f8] sm:$0xff]  ;;  %v1221_v0 = vld [vmem:[%s27845_s7 + $0x1200] sm:$0xff] }
 0x121   :  { %1218 = vst [vmem:[#allocation2 + $0x11f0] sm:$0xff] %v1217_v62  ;;  %v1223_v1 = vld [vmem:[%s27845_s7 + $0x1208] sm:$0xff]  ;;  %1220 = vst [vmem:[#allocation2 + $0x11f8] sm:$0xff] %v1219_v63  ;;  %v1225_v2 = vld [vmem:[%s27845_s7 + $0x1210] sm:$0xff] }
 0x122   :  { %1222 = vst [vmem:[#allocation2 + $0x1200] sm:$0xff] %v1221_v0  ;;  %1224 = vst [vmem:[#allocation2 + $0x1208] sm:$0xff] %v1223_v1  ;;  %v1227_v3 = vld [vmem:[%s27845_s7 + $0x1218] sm:$0xff]  ;;  %v1229_v4 = vld [vmem:[%s27845_s7 + $0x1220] sm:$0xff] }
 0x123   :  { %1226 = vst [vmem:[#allocation2 + $0x1210] sm:$0xff] %v1225_v2  ;;  %1228 = vst [vmem:[#allocation2 + $0x1218] sm:$0xff] %v1227_v3  ;;  %v1231_v5 = vld [vmem:[%s27845_s7 + $0x1228] sm:$0xff]  ;;  %v1233_v6 = vld [vmem:[%s27845_s7 + $0x1230] sm:$0xff] }
 0x124   :  { %1230 = vst [vmem:[#allocation2 + $0x1220] sm:$0xff] %v1229_v4  ;;  %v1235_v7 = vld [vmem:[%s27845_s7 + $0x1238] sm:$0xff]  ;;  %1232 = vst [vmem:[#allocation2 + $0x1228] sm:$0xff] %v1231_v5  ;;  %v1237_v8 = vld [vmem:[%s27845_s7 + $0x1240] sm:$0xff] }
 0x125   :  { %1234 = vst [vmem:[#allocation2 + $0x1230] sm:$0xff] %v1233_v6  ;;  %1236 = vst [vmem:[#allocation2 + $0x1238] sm:$0xff] %v1235_v7  ;;  %v1239_v9 = vld [vmem:[%s27845_s7 + $0x1248] sm:$0xff]  ;;  %v1241_v10 = vld [vmem:[%s27845_s7 + $0x1250] sm:$0xff] }
 0x126   :  { %1238 = vst [vmem:[#allocation2 + $0x1240] sm:$0xff] %v1237_v8  ;;  %1240 = vst [vmem:[#allocation2 + $0x1248] sm:$0xff] %v1239_v9  ;;  %v1243_v11 = vld [vmem:[%s27845_s7 + $0x1258] sm:$0xff]  ;;  %v1245_v12 = vld [vmem:[%s27845_s7 + $0x1260] sm:$0xff] }
 0x127   :  { %1242 = vst [vmem:[#allocation2 + $0x1250] sm:$0xff] %v1241_v10  ;;  %v1247_v13 = vld [vmem:[%s27845_s7 + $0x1268] sm:$0xff]  ;;  %1244 = vst [vmem:[#allocation2 + $0x1258] sm:$0xff] %v1243_v11  ;;  %v1249_v14 = vld [vmem:[%s27845_s7 + $0x1270] sm:$0xff] }
 0x128   :  { %1246 = vst [vmem:[#allocation2 + $0x1260] sm:$0xff] %v1245_v12  ;;  %1248 = vst [vmem:[#allocation2 + $0x1268] sm:$0xff] %v1247_v13  ;;  %v1251_v15 = vld [vmem:[%s27845_s7 + $0x1278] sm:$0xff]  ;;  %v1253_v16 = vld [vmem:[%s27845_s7 + $0x1280] sm:$0xff] }
 0x129   :  { %1250 = vst [vmem:[#allocation2 + $0x1270] sm:$0xff] %v1249_v14  ;;  %1252 = vst [vmem:[#allocation2 + $0x1278] sm:$0xff] %v1251_v15  ;;  %v1255_v17 = vld [vmem:[%s27845_s7 + $0x1288] sm:$0xff]  ;;  %v1257_v18 = vld [vmem:[%s27845_s7 + $0x1290] sm:$0xff] }
 0x12a   :  { %1254 = vst [vmem:[#allocation2 + $0x1280] sm:$0xff] %v1253_v16  ;;  %v1259_v19 = vld [vmem:[%s27845_s7 + $0x1298] sm:$0xff]  ;;  %1256 = vst [vmem:[#allocation2 + $0x1288] sm:$0xff] %v1255_v17  ;;  %v1261_v20 = vld [vmem:[%s27845_s7 + $0x12a0] sm:$0xff] }
 0x12b   :  { %1258 = vst [vmem:[#allocation2 + $0x1290] sm:$0xff] %v1257_v18  ;;  %1260 = vst [vmem:[#allocation2 + $0x1298] sm:$0xff] %v1259_v19  ;;  %v1263_v21 = vld [vmem:[%s27845_s7 + $0x12a8] sm:$0xff]  ;;  %v1265_v22 = vld [vmem:[%s27845_s7 + $0x12b0] sm:$0xff] }
 0x12c   :  { %1262 = vst [vmem:[#allocation2 + $0x12a0] sm:$0xff] %v1261_v20  ;;  %1264 = vst [vmem:[#allocation2 + $0x12a8] sm:$0xff] %v1263_v21  ;;  %v1267_v23 = vld [vmem:[%s27845_s7 + $0x12b8] sm:$0xff]  ;;  %v1269_v24 = vld [vmem:[%s27845_s7 + $0x12c0] sm:$0xff] }
 0x12d   :  { %1266 = vst [vmem:[#allocation2 + $0x12b0] sm:$0xff] %v1265_v22  ;;  %v1271_v25 = vld [vmem:[%s27845_s7 + $0x12c8] sm:$0xff]  ;;  %1268 = vst [vmem:[#allocation2 + $0x12b8] sm:$0xff] %v1267_v23  ;;  %v1273_v26 = vld [vmem:[%s27845_s7 + $0x12d0] sm:$0xff] }
 0x12e   :  { %1270 = vst [vmem:[#allocation2 + $0x12c0] sm:$0xff] %v1269_v24  ;;  %1272 = vst [vmem:[#allocation2 + $0x12c8] sm:$0xff] %v1271_v25  ;;  %v1275_v27 = vld [vmem:[%s27845_s7 + $0x12d8] sm:$0xff]  ;;  %v1277_v28 = vld [vmem:[%s27845_s7 + $0x12e0] sm:$0xff] }
 0x12f   :  { %1274 = vst [vmem:[#allocation2 + $0x12d0] sm:$0xff] %v1273_v26  ;;  %1276 = vst [vmem:[#allocation2 + $0x12d8] sm:$0xff] %v1275_v27  ;;  %v1279_v29 = vld [vmem:[%s27845_s7 + $0x12e8] sm:$0xff]  ;;  %v1281_v30 = vld [vmem:[%s27845_s7 + $0x12f0] sm:$0xff] }
 0x130   :  { %1278 = vst [vmem:[#allocation2 + $0x12e0] sm:$0xff] %v1277_v28  ;;  %v1283_v31 = vld [vmem:[%s27845_s7 + $0x12f8] sm:$0xff]  ;;  %1280 = vst [vmem:[#allocation2 + $0x12e8] sm:$0xff] %v1279_v29  ;;  %v1285_v32 = vld [vmem:[%s27845_s7 + $0x1300] sm:$0xff] }
 0x131   :  { %1282 = vst [vmem:[#allocation2 + $0x12f0] sm:$0xff] %v1281_v30  ;;  %1284 = vst [vmem:[#allocation2 + $0x12f8] sm:$0xff] %v1283_v31  ;;  %v1287_v33 = vld [vmem:[%s27845_s7 + $0x1308] sm:$0xff]  ;;  %v1289_v34 = vld [vmem:[%s27845_s7 + $0x1310] sm:$0xff] }
 0x132   :  { %1286 = vst [vmem:[#allocation2 + $0x1300] sm:$0xff] %v1285_v32  ;;  %1288 = vst [vmem:[#allocation2 + $0x1308] sm:$0xff] %v1287_v33  ;;  %v1291_v35 = vld [vmem:[%s27845_s7 + $0x1318] sm:$0xff]  ;;  %v1293_v36 = vld [vmem:[%s27845_s7 + $0x1320] sm:$0xff] }
 0x133   :  { %1290 = vst [vmem:[#allocation2 + $0x1310] sm:$0xff] %v1289_v34  ;;  %v1295_v37 = vld [vmem:[%s27845_s7 + $0x1328] sm:$0xff]  ;;  %1292 = vst [vmem:[#allocation2 + $0x1318] sm:$0xff] %v1291_v35  ;;  %v1297_v38 = vld [vmem:[%s27845_s7 + $0x1330] sm:$0xff] }
 0x134   :  { %1294 = vst [vmem:[#allocation2 + $0x1320] sm:$0xff] %v1293_v36  ;;  %1296 = vst [vmem:[#allocation2 + $0x1328] sm:$0xff] %v1295_v37  ;;  %v1299_v39 = vld [vmem:[%s27845_s7 + $0x1338] sm:$0xff]  ;;  %v1301_v40 = vld [vmem:[%s27845_s7 + $0x1340] sm:$0xff] }
 0x135   :  { %1298 = vst [vmem:[#allocation2 + $0x1330] sm:$0xff] %v1297_v38  ;;  %1300 = vst [vmem:[#allocation2 + $0x1338] sm:$0xff] %v1299_v39  ;;  %v1303_v41 = vld [vmem:[%s27845_s7 + $0x1348] sm:$0xff]  ;;  %v1305_v42 = vld [vmem:[%s27845_s7 + $0x1350] sm:$0xff] }
 0x136   :  { %1302 = vst [vmem:[#allocation2 + $0x1340] sm:$0xff] %v1301_v40  ;;  %v1307_v43 = vld [vmem:[%s27845_s7 + $0x1358] sm:$0xff]  ;;  %1304 = vst [vmem:[#allocation2 + $0x1348] sm:$0xff] %v1303_v41  ;;  %v1309_v44 = vld [vmem:[%s27845_s7 + $0x1360] sm:$0xff] }
 0x137   :  { %1306 = vst [vmem:[#allocation2 + $0x1350] sm:$0xff] %v1305_v42  ;;  %1308 = vst [vmem:[#allocation2 + $0x1358] sm:$0xff] %v1307_v43  ;;  %v1311_v45 = vld [vmem:[%s27845_s7 + $0x1368] sm:$0xff]  ;;  %v1313_v46 = vld [vmem:[%s27845_s7 + $0x1370] sm:$0xff] }
 0x138   :  { %1310 = vst [vmem:[#allocation2 + $0x1360] sm:$0xff] %v1309_v44  ;;  %1312 = vst [vmem:[#allocation2 + $0x1368] sm:$0xff] %v1311_v45  ;;  %v1315_v47 = vld [vmem:[%s27845_s7 + $0x1378] sm:$0xff]  ;;  %v1317_v48 = vld [vmem:[%s27845_s7 + $0x1380] sm:$0xff] }
 0x139   :  { %1314 = vst [vmem:[#allocation2 + $0x1370] sm:$0xff] %v1313_v46  ;;  %v1319_v49 = vld [vmem:[%s27845_s7 + $0x1388] sm:$0xff]  ;;  %1316 = vst [vmem:[#allocation2 + $0x1378] sm:$0xff] %v1315_v47  ;;  %v1321_v50 = vld [vmem:[%s27845_s7 + $0x1390] sm:$0xff] }
 0x13a   :  { %1318 = vst [vmem:[#allocation2 + $0x1380] sm:$0xff] %v1317_v48  ;;  %1320 = vst [vmem:[#allocation2 + $0x1388] sm:$0xff] %v1319_v49  ;;  %v1323_v51 = vld [vmem:[%s27845_s7 + $0x1398] sm:$0xff]  ;;  %v1325_v52 = vld [vmem:[%s27845_s7 + $0x13a0] sm:$0xff] }
 0x13b   :  { %1322 = vst [vmem:[#allocation2 + $0x1390] sm:$0xff] %v1321_v50  ;;  %1324 = vst [vmem:[#allocation2 + $0x1398] sm:$0xff] %v1323_v51  ;;  %v1327_v53 = vld [vmem:[%s27845_s7 + $0x13a8] sm:$0xff]  ;;  %v1329_v54 = vld [vmem:[%s27845_s7 + $0x13b0] sm:$0xff] }
 0x13c   :  { %1326 = vst [vmem:[#allocation2 + $0x13a0] sm:$0xff] %v1325_v52  ;;  %v1331_v55 = vld [vmem:[%s27845_s7 + $0x13b8] sm:$0xff]  ;;  %1328 = vst [vmem:[#allocation2 + $0x13a8] sm:$0xff] %v1327_v53  ;;  %v1333_v56 = vld [vmem:[%s27845_s7 + $0x13c0] sm:$0xff] }
 0x13d   :  { %1330 = vst [vmem:[#allocation2 + $0x13b0] sm:$0xff] %v1329_v54  ;;  %1332 = vst [vmem:[#allocation2 + $0x13b8] sm:$0xff] %v1331_v55  ;;  %v1335_v57 = vld [vmem:[%s27845_s7 + $0x13c8] sm:$0xff]  ;;  %v1337_v58 = vld [vmem:[%s27845_s7 + $0x13d0] sm:$0xff] }
 0x13e   :  { %1334 = vst [vmem:[#allocation2 + $0x13c0] sm:$0xff] %v1333_v56  ;;  %1336 = vst [vmem:[#allocation2 + $0x13c8] sm:$0xff] %v1335_v57  ;;  %v1339_v59 = vld [vmem:[%s27845_s7 + $0x13d8] sm:$0xff]  ;;  %v1341_v60 = vld [vmem:[%s27845_s7 + $0x13e0] sm:$0xff] }
 0x13f   :  { %1338 = vst [vmem:[#allocation2 + $0x13d0] sm:$0xff] %v1337_v58  ;;  %v1343_v61 = vld [vmem:[%s27845_s7 + $0x13e8] sm:$0xff]  ;;  %1340 = vst [vmem:[#allocation2 + $0x13d8] sm:$0xff] %v1339_v59  ;;  %v1345_v62 = vld [vmem:[%s27845_s7 + $0x13f0] sm:$0xff] }
 0x140   :  { %1342 = vst [vmem:[#allocation2 + $0x13e0] sm:$0xff] %v1341_v60  ;;  %1344 = vst [vmem:[#allocation2 + $0x13e8] sm:$0xff] %v1343_v61  ;;  %v1347_v63 = vld [vmem:[%s27845_s7 + $0x13f8] sm:$0xff]  ;;  %v1349_v0 = vld [vmem:[%s27845_s7 + $0x1400] sm:$0xff] }
 0x141   :  { %1346 = vst [vmem:[#allocation2 + $0x13f0] sm:$0xff] %v1345_v62  ;;  %1348 = vst [vmem:[#allocation2 + $0x13f8] sm:$0xff] %v1347_v63  ;;  %v1351_v1 = vld [vmem:[%s27845_s7 + $0x1408] sm:$0xff]  ;;  %v1353_v2 = vld [vmem:[%s27845_s7 + $0x1410] sm:$0xff] }
 0x142   :  { %1350 = vst [vmem:[#allocation2 + $0x1400] sm:$0xff] %v1349_v0  ;;  %v1355_v3 = vld [vmem:[%s27845_s7 + $0x1418] sm:$0xff]  ;;  %1352 = vst [vmem:[#allocation2 + $0x1408] sm:$0xff] %v1351_v1  ;;  %v1357_v4 = vld [vmem:[%s27845_s7 + $0x1420] sm:$0xff] }
 0x143   :  { %1354 = vst [vmem:[#allocation2 + $0x1410] sm:$0xff] %v1353_v2  ;;  %1356 = vst [vmem:[#allocation2 + $0x1418] sm:$0xff] %v1355_v3  ;;  %v1359_v5 = vld [vmem:[%s27845_s7 + $0x1428] sm:$0xff]  ;;  %v1361_v6 = vld [vmem:[%s27845_s7 + $0x1430] sm:$0xff] }
 0x144   :  { %1358 = vst [vmem:[#allocation2 + $0x1420] sm:$0xff] %v1357_v4  ;;  %1360 = vst [vmem:[#allocation2 + $0x1428] sm:$0xff] %v1359_v5  ;;  %v1363_v7 = vld [vmem:[%s27845_s7 + $0x1438] sm:$0xff]  ;;  %v1365_v8 = vld [vmem:[%s27845_s7 + $0x1440] sm:$0xff] }
 0x145   :  { %1362 = vst [vmem:[#allocation2 + $0x1430] sm:$0xff] %v1361_v6  ;;  %v1367_v9 = vld [vmem:[%s27845_s7 + $0x1448] sm:$0xff]  ;;  %1364 = vst [vmem:[#allocation2 + $0x1438] sm:$0xff] %v1363_v7  ;;  %v1369_v10 = vld [vmem:[%s27845_s7 + $0x1450] sm:$0xff] }
 0x146   :  { %1366 = vst [vmem:[#allocation2 + $0x1440] sm:$0xff] %v1365_v8  ;;  %1368 = vst [vmem:[#allocation2 + $0x1448] sm:$0xff] %v1367_v9  ;;  %v1371_v11 = vld [vmem:[%s27845_s7 + $0x1458] sm:$0xff]  ;;  %v1373_v12 = vld [vmem:[%s27845_s7 + $0x1460] sm:$0xff] }
 0x147   :  { %1370 = vst [vmem:[#allocation2 + $0x1450] sm:$0xff] %v1369_v10  ;;  %1372 = vst [vmem:[#allocation2 + $0x1458] sm:$0xff] %v1371_v11  ;;  %v1375_v13 = vld [vmem:[%s27845_s7 + $0x1468] sm:$0xff]  ;;  %v1377_v14 = vld [vmem:[%s27845_s7 + $0x1470] sm:$0xff] }
 0x148   :  { %1374 = vst [vmem:[#allocation2 + $0x1460] sm:$0xff] %v1373_v12  ;;  %v1379_v15 = vld [vmem:[%s27845_s7 + $0x1478] sm:$0xff]  ;;  %1376 = vst [vmem:[#allocation2 + $0x1468] sm:$0xff] %v1375_v13  ;;  %v1381_v16 = vld [vmem:[%s27845_s7 + $0x1480] sm:$0xff] }
 0x149   :  { %1378 = vst [vmem:[#allocation2 + $0x1470] sm:$0xff] %v1377_v14  ;;  %1380 = vst [vmem:[#allocation2 + $0x1478] sm:$0xff] %v1379_v15  ;;  %v1383_v17 = vld [vmem:[%s27845_s7 + $0x1488] sm:$0xff]  ;;  %v1385_v18 = vld [vmem:[%s27845_s7 + $0x1490] sm:$0xff] }
 0x14a   :  { %1382 = vst [vmem:[#allocation2 + $0x1480] sm:$0xff] %v1381_v16  ;;  %1384 = vst [vmem:[#allocation2 + $0x1488] sm:$0xff] %v1383_v17  ;;  %v1387_v19 = vld [vmem:[%s27845_s7 + $0x1498] sm:$0xff]  ;;  %v1389_v20 = vld [vmem:[%s27845_s7 + $0x14a0] sm:$0xff] }
 0x14b   :  { %1386 = vst [vmem:[#allocation2 + $0x1490] sm:$0xff] %v1385_v18  ;;  %v1391_v21 = vld [vmem:[%s27845_s7 + $0x14a8] sm:$0xff]  ;;  %1388 = vst [vmem:[#allocation2 + $0x1498] sm:$0xff] %v1387_v19  ;;  %v1393_v22 = vld [vmem:[%s27845_s7 + $0x14b0] sm:$0xff] }
 0x14c   :  { %1390 = vst [vmem:[#allocation2 + $0x14a0] sm:$0xff] %v1389_v20  ;;  %1392 = vst [vmem:[#allocation2 + $0x14a8] sm:$0xff] %v1391_v21  ;;  %v1395_v23 = vld [vmem:[%s27845_s7 + $0x14b8] sm:$0xff]  ;;  %v1397_v24 = vld [vmem:[%s27845_s7 + $0x14c0] sm:$0xff] }
 0x14d   :  { %1394 = vst [vmem:[#allocation2 + $0x14b0] sm:$0xff] %v1393_v22  ;;  %1396 = vst [vmem:[#allocation2 + $0x14b8] sm:$0xff] %v1395_v23  ;;  %v1399_v25 = vld [vmem:[%s27845_s7 + $0x14c8] sm:$0xff]  ;;  %v1401_v26 = vld [vmem:[%s27845_s7 + $0x14d0] sm:$0xff] }
 0x14e   :  { %1398 = vst [vmem:[#allocation2 + $0x14c0] sm:$0xff] %v1397_v24  ;;  %v1403_v27 = vld [vmem:[%s27845_s7 + $0x14d8] sm:$0xff]  ;;  %1400 = vst [vmem:[#allocation2 + $0x14c8] sm:$0xff] %v1399_v25  ;;  %v1405_v28 = vld [vmem:[%s27845_s7 + $0x14e0] sm:$0xff] }
 0x14f   :  { %1402 = vst [vmem:[#allocation2 + $0x14d0] sm:$0xff] %v1401_v26  ;;  %1404 = vst [vmem:[#allocation2 + $0x14d8] sm:$0xff] %v1403_v27  ;;  %v1407_v29 = vld [vmem:[%s27845_s7 + $0x14e8] sm:$0xff]  ;;  %v1409_v30 = vld [vmem:[%s27845_s7 + $0x14f0] sm:$0xff] }
 0x150   :  { %1406 = vst [vmem:[#allocation2 + $0x14e0] sm:$0xff] %v1405_v28  ;;  %1408 = vst [vmem:[#allocation2 + $0x14e8] sm:$0xff] %v1407_v29  ;;  %v1411_v31 = vld [vmem:[%s27845_s7 + $0x14f8] sm:$0xff]  ;;  %v1413_v32 = vld [vmem:[%s27845_s7 + $0x1500] sm:$0xff] }
 0x151   :  { %1410 = vst [vmem:[#allocation2 + $0x14f0] sm:$0xff] %v1409_v30  ;;  %v1415_v33 = vld [vmem:[%s27845_s7 + $0x1508] sm:$0xff]  ;;  %1412 = vst [vmem:[#allocation2 + $0x14f8] sm:$0xff] %v1411_v31  ;;  %v1417_v34 = vld [vmem:[%s27845_s7 + $0x1510] sm:$0xff] }
 0x152   :  { %1414 = vst [vmem:[#allocation2 + $0x1500] sm:$0xff] %v1413_v32  ;;  %1416 = vst [vmem:[#allocation2 + $0x1508] sm:$0xff] %v1415_v33  ;;  %v1419_v35 = vld [vmem:[%s27845_s7 + $0x1518] sm:$0xff]  ;;  %v1421_v36 = vld [vmem:[%s27845_s7 + $0x1520] sm:$0xff] }
 0x153   :  { %1418 = vst [vmem:[#allocation2 + $0x1510] sm:$0xff] %v1417_v34  ;;  %1420 = vst [vmem:[#allocation2 + $0x1518] sm:$0xff] %v1419_v35  ;;  %v1423_v37 = vld [vmem:[%s27845_s7 + $0x1528] sm:$0xff]  ;;  %v1425_v38 = vld [vmem:[%s27845_s7 + $0x1530] sm:$0xff] }
 0x154   :  { %1422 = vst [vmem:[#allocation2 + $0x1520] sm:$0xff] %v1421_v36  ;;  %v1427_v39 = vld [vmem:[%s27845_s7 + $0x1538] sm:$0xff]  ;;  %1424 = vst [vmem:[#allocation2 + $0x1528] sm:$0xff] %v1423_v37  ;;  %v1429_v40 = vld [vmem:[%s27845_s7 + $0x1540] sm:$0xff] }
 0x155   :  { %1426 = vst [vmem:[#allocation2 + $0x1530] sm:$0xff] %v1425_v38  ;;  %1428 = vst [vmem:[#allocation2 + $0x1538] sm:$0xff] %v1427_v39  ;;  %v1431_v41 = vld [vmem:[%s27845_s7 + $0x1548] sm:$0xff]  ;;  %v1433_v42 = vld [vmem:[%s27845_s7 + $0x1550] sm:$0xff] }
 0x156   :  { %1430 = vst [vmem:[#allocation2 + $0x1540] sm:$0xff] %v1429_v40  ;;  %1432 = vst [vmem:[#allocation2 + $0x1548] sm:$0xff] %v1431_v41  ;;  %v1435_v43 = vld [vmem:[%s27845_s7 + $0x1558] sm:$0xff]  ;;  %v1437_v44 = vld [vmem:[%s27845_s7 + $0x1560] sm:$0xff] }
 0x157   :  { %1434 = vst [vmem:[#allocation2 + $0x1550] sm:$0xff] %v1433_v42  ;;  %v1439_v45 = vld [vmem:[%s27845_s7 + $0x1568] sm:$0xff]  ;;  %1436 = vst [vmem:[#allocation2 + $0x1558] sm:$0xff] %v1435_v43  ;;  %v1441_v46 = vld [vmem:[%s27845_s7 + $0x1570] sm:$0xff] }
 0x158   :  { %1438 = vst [vmem:[#allocation2 + $0x1560] sm:$0xff] %v1437_v44  ;;  %1440 = vst [vmem:[#allocation2 + $0x1568] sm:$0xff] %v1439_v45  ;;  %v1443_v47 = vld [vmem:[%s27845_s7 + $0x1578] sm:$0xff]  ;;  %v1445_v48 = vld [vmem:[%s27845_s7 + $0x1580] sm:$0xff] }
 0x159   :  { %1442 = vst [vmem:[#allocation2 + $0x1570] sm:$0xff] %v1441_v46  ;;  %1444 = vst [vmem:[#allocation2 + $0x1578] sm:$0xff] %v1443_v47  ;;  %v1447_v49 = vld [vmem:[%s27845_s7 + $0x1588] sm:$0xff]  ;;  %v1449_v50 = vld [vmem:[%s27845_s7 + $0x1590] sm:$0xff] }
 0x15a   :  { %1446 = vst [vmem:[#allocation2 + $0x1580] sm:$0xff] %v1445_v48  ;;  %v1451_v51 = vld [vmem:[%s27845_s7 + $0x1598] sm:$0xff]  ;;  %1448 = vst [vmem:[#allocation2 + $0x1588] sm:$0xff] %v1447_v49  ;;  %v1453_v52 = vld [vmem:[%s27845_s7 + $0x15a0] sm:$0xff] }
 0x15b   :  { %1450 = vst [vmem:[#allocation2 + $0x1590] sm:$0xff] %v1449_v50  ;;  %1452 = vst [vmem:[#allocation2 + $0x1598] sm:$0xff] %v1451_v51  ;;  %v1455_v53 = vld [vmem:[%s27845_s7 + $0x15a8] sm:$0xff]  ;;  %v1457_v54 = vld [vmem:[%s27845_s7 + $0x15b0] sm:$0xff] }
 0x15c   :  { %1454 = vst [vmem:[#allocation2 + $0x15a0] sm:$0xff] %v1453_v52  ;;  %1456 = vst [vmem:[#allocation2 + $0x15a8] sm:$0xff] %v1455_v53  ;;  %v1459_v55 = vld [vmem:[%s27845_s7 + $0x15b8] sm:$0xff]  ;;  %v1461_v56 = vld [vmem:[%s27845_s7 + $0x15c0] sm:$0xff] }
 0x15d   :  { %1458 = vst [vmem:[#allocation2 + $0x15b0] sm:$0xff] %v1457_v54  ;;  %v1463_v57 = vld [vmem:[%s27845_s7 + $0x15c8] sm:$0xff]  ;;  %1460 = vst [vmem:[#allocation2 + $0x15b8] sm:$0xff] %v1459_v55  ;;  %v1465_v58 = vld [vmem:[%s27845_s7 + $0x15d0] sm:$0xff] }
 0x15e   :  { %1462 = vst [vmem:[#allocation2 + $0x15c0] sm:$0xff] %v1461_v56  ;;  %1464 = vst [vmem:[#allocation2 + $0x15c8] sm:$0xff] %v1463_v57  ;;  %v1467_v59 = vld [vmem:[%s27845_s7 + $0x15d8] sm:$0xff]  ;;  %v1469_v60 = vld [vmem:[%s27845_s7 + $0x15e0] sm:$0xff] }
 0x15f   :  { %1466 = vst [vmem:[#allocation2 + $0x15d0] sm:$0xff] %v1465_v58  ;;  %1468 = vst [vmem:[#allocation2 + $0x15d8] sm:$0xff] %v1467_v59  ;;  %v1471_v61 = vld [vmem:[%s27845_s7 + $0x15e8] sm:$0xff]  ;;  %v1473_v62 = vld [vmem:[%s27845_s7 + $0x15f0] sm:$0xff] }
 0x160   :  { %1470 = vst [vmem:[#allocation2 + $0x15e0] sm:$0xff] %v1469_v60  ;;  %v1475_v63 = vld [vmem:[%s27845_s7 + $0x15f8] sm:$0xff]  ;;  %1472 = vst [vmem:[#allocation2 + $0x15e8] sm:$0xff] %v1471_v61  ;;  %v1477_v0 = vld [vmem:[%s27845_s7 + $0x1600] sm:$0xff] }
 0x161   :  { %1474 = vst [vmem:[#allocation2 + $0x15f0] sm:$0xff] %v1473_v62  ;;  %1476 = vst [vmem:[#allocation2 + $0x15f8] sm:$0xff] %v1475_v63  ;;  %v1479_v1 = vld [vmem:[%s27845_s7 + $0x1608] sm:$0xff]  ;;  %v1481_v2 = vld [vmem:[%s27845_s7 + $0x1610] sm:$0xff] }
 0x162   :  { %1478 = vst [vmem:[#allocation2 + $0x1600] sm:$0xff] %v1477_v0  ;;  %1480 = vst [vmem:[#allocation2 + $0x1608] sm:$0xff] %v1479_v1  ;;  %v1483_v3 = vld [vmem:[%s27845_s7 + $0x1618] sm:$0xff]  ;;  %v1485_v4 = vld [vmem:[%s27845_s7 + $0x1620] sm:$0xff] }
 0x163   :  { %1482 = vst [vmem:[#allocation2 + $0x1610] sm:$0xff] %v1481_v2  ;;  %v1487_v5 = vld [vmem:[%s27845_s7 + $0x1628] sm:$0xff]  ;;  %1484 = vst [vmem:[#allocation2 + $0x1618] sm:$0xff] %v1483_v3  ;;  %v1489_v6 = vld [vmem:[%s27845_s7 + $0x1630] sm:$0xff] }
 0x164   :  { %1486 = vst [vmem:[#allocation2 + $0x1620] sm:$0xff] %v1485_v4  ;;  %1488 = vst [vmem:[#allocation2 + $0x1628] sm:$0xff] %v1487_v5  ;;  %v1491_v7 = vld [vmem:[%s27845_s7 + $0x1638] sm:$0xff]  ;;  %v1493_v8 = vld [vmem:[%s27845_s7 + $0x1640] sm:$0xff] }
 0x165   :  { %1490 = vst [vmem:[#allocation2 + $0x1630] sm:$0xff] %v1489_v6  ;;  %1492 = vst [vmem:[#allocation2 + $0x1638] sm:$0xff] %v1491_v7  ;;  %v1495_v9 = vld [vmem:[%s27845_s7 + $0x1648] sm:$0xff]  ;;  %v1497_v10 = vld [vmem:[%s27845_s7 + $0x1650] sm:$0xff] }
 0x166   :  { %1494 = vst [vmem:[#allocation2 + $0x1640] sm:$0xff] %v1493_v8  ;;  %v1499_v11 = vld [vmem:[%s27845_s7 + $0x1658] sm:$0xff]  ;;  %1496 = vst [vmem:[#allocation2 + $0x1648] sm:$0xff] %v1495_v9  ;;  %v1501_v12 = vld [vmem:[%s27845_s7 + $0x1660] sm:$0xff] }
 0x167   :  { %1498 = vst [vmem:[#allocation2 + $0x1650] sm:$0xff] %v1497_v10  ;;  %1500 = vst [vmem:[#allocation2 + $0x1658] sm:$0xff] %v1499_v11  ;;  %v1503_v13 = vld [vmem:[%s27845_s7 + $0x1668] sm:$0xff]  ;;  %v1505_v14 = vld [vmem:[%s27845_s7 + $0x1670] sm:$0xff] }
 0x168   :  { %1502 = vst [vmem:[#allocation2 + $0x1660] sm:$0xff] %v1501_v12  ;;  %1504 = vst [vmem:[#allocation2 + $0x1668] sm:$0xff] %v1503_v13  ;;  %v1507_v15 = vld [vmem:[%s27845_s7 + $0x1678] sm:$0xff]  ;;  %v1509_v16 = vld [vmem:[%s27845_s7 + $0x1680] sm:$0xff] }
 0x169   :  { %1506 = vst [vmem:[#allocation2 + $0x1670] sm:$0xff] %v1505_v14  ;;  %v1511_v17 = vld [vmem:[%s27845_s7 + $0x1688] sm:$0xff]  ;;  %1508 = vst [vmem:[#allocation2 + $0x1678] sm:$0xff] %v1507_v15  ;;  %v1513_v18 = vld [vmem:[%s27845_s7 + $0x1690] sm:$0xff] }
 0x16a   :  { %1510 = vst [vmem:[#allocation2 + $0x1680] sm:$0xff] %v1509_v16  ;;  %1512 = vst [vmem:[#allocation2 + $0x1688] sm:$0xff] %v1511_v17  ;;  %v1515_v19 = vld [vmem:[%s27845_s7 + $0x1698] sm:$0xff]  ;;  %v1517_v20 = vld [vmem:[%s27845_s7 + $0x16a0] sm:$0xff] }
 0x16b   :  { %1514 = vst [vmem:[#allocation2 + $0x1690] sm:$0xff] %v1513_v18  ;;  %1516 = vst [vmem:[#allocation2 + $0x1698] sm:$0xff] %v1515_v19  ;;  %v1519_v21 = vld [vmem:[%s27845_s7 + $0x16a8] sm:$0xff]  ;;  %v1521_v22 = vld [vmem:[%s27845_s7 + $0x16b0] sm:$0xff] }
 0x16c   :  { %1518 = vst [vmem:[#allocation2 + $0x16a0] sm:$0xff] %v1517_v20  ;;  %v1523_v23 = vld [vmem:[%s27845_s7 + $0x16b8] sm:$0xff]  ;;  %1520 = vst [vmem:[#allocation2 + $0x16a8] sm:$0xff] %v1519_v21  ;;  %v1525_v24 = vld [vmem:[%s27845_s7 + $0x16c0] sm:$0xff] }
 0x16d   :  { %1522 = vst [vmem:[#allocation2 + $0x16b0] sm:$0xff] %v1521_v22  ;;  %1524 = vst [vmem:[#allocation2 + $0x16b8] sm:$0xff] %v1523_v23  ;;  %v1527_v25 = vld [vmem:[%s27845_s7 + $0x16c8] sm:$0xff]  ;;  %v1529_v26 = vld [vmem:[%s27845_s7 + $0x16d0] sm:$0xff] }
 0x16e   :  { %1526 = vst [vmem:[#allocation2 + $0x16c0] sm:$0xff] %v1525_v24  ;;  %1528 = vst [vmem:[#allocation2 + $0x16c8] sm:$0xff] %v1527_v25  ;;  %v1531_v27 = vld [vmem:[%s27845_s7 + $0x16d8] sm:$0xff]  ;;  %v1533_v28 = vld [vmem:[%s27845_s7 + $0x16e0] sm:$0xff] }
 0x16f   :  { %1530 = vst [vmem:[#allocation2 + $0x16d0] sm:$0xff] %v1529_v26  ;;  %v1535_v29 = vld [vmem:[%s27845_s7 + $0x16e8] sm:$0xff]  ;;  %1532 = vst [vmem:[#allocation2 + $0x16d8] sm:$0xff] %v1531_v27  ;;  %v1537_v30 = vld [vmem:[%s27845_s7 + $0x16f0] sm:$0xff] }
 0x170   :  { %1534 = vst [vmem:[#allocation2 + $0x16e0] sm:$0xff] %v1533_v28  ;;  %1536 = vst [vmem:[#allocation2 + $0x16e8] sm:$0xff] %v1535_v29  ;;  %v1539_v31 = vld [vmem:[%s27845_s7 + $0x16f8] sm:$0xff]  ;;  %v1541_v32 = vld [vmem:[%s27845_s7 + $0x1700] sm:$0xff] }
 0x171   :  { %1538 = vst [vmem:[#allocation2 + $0x16f0] sm:$0xff] %v1537_v30  ;;  %1540 = vst [vmem:[#allocation2 + $0x16f8] sm:$0xff] %v1539_v31  ;;  %v1543_v33 = vld [vmem:[%s27845_s7 + $0x1708] sm:$0xff]  ;;  %v1545_v34 = vld [vmem:[%s27845_s7 + $0x1710] sm:$0xff] }
 0x172   :  { %1542 = vst [vmem:[#allocation2 + $0x1700] sm:$0xff] %v1541_v32  ;;  %v1547_v35 = vld [vmem:[%s27845_s7 + $0x1718] sm:$0xff]  ;;  %1544 = vst [vmem:[#allocation2 + $0x1708] sm:$0xff] %v1543_v33  ;;  %v1549_v36 = vld [vmem:[%s27845_s7 + $0x1720] sm:$0xff] }
 0x173   :  { %1546 = vst [vmem:[#allocation2 + $0x1710] sm:$0xff] %v1545_v34  ;;  %1548 = vst [vmem:[#allocation2 + $0x1718] sm:$0xff] %v1547_v35  ;;  %v1551_v37 = vld [vmem:[%s27845_s7 + $0x1728] sm:$0xff]  ;;  %v1553_v38 = vld [vmem:[%s27845_s7 + $0x1730] sm:$0xff] }
 0x174   :  { %1550 = vst [vmem:[#allocation2 + $0x1720] sm:$0xff] %v1549_v36  ;;  %1552 = vst [vmem:[#allocation2 + $0x1728] sm:$0xff] %v1551_v37  ;;  %v1555_v39 = vld [vmem:[%s27845_s7 + $0x1738] sm:$0xff]  ;;  %v1557_v40 = vld [vmem:[%s27845_s7 + $0x1740] sm:$0xff] }
 0x175   :  { %1554 = vst [vmem:[#allocation2 + $0x1730] sm:$0xff] %v1553_v38  ;;  %v1559_v41 = vld [vmem:[%s27845_s7 + $0x1748] sm:$0xff]  ;;  %1556 = vst [vmem:[#allocation2 + $0x1738] sm:$0xff] %v1555_v39  ;;  %v1561_v42 = vld [vmem:[%s27845_s7 + $0x1750] sm:$0xff] }
 0x176   :  { %1558 = vst [vmem:[#allocation2 + $0x1740] sm:$0xff] %v1557_v40  ;;  %1560 = vst [vmem:[#allocation2 + $0x1748] sm:$0xff] %v1559_v41  ;;  %v1563_v43 = vld [vmem:[%s27845_s7 + $0x1758] sm:$0xff]  ;;  %v1565_v44 = vld [vmem:[%s27845_s7 + $0x1760] sm:$0xff] }
 0x177   :  { %1562 = vst [vmem:[#allocation2 + $0x1750] sm:$0xff] %v1561_v42  ;;  %1564 = vst [vmem:[#allocation2 + $0x1758] sm:$0xff] %v1563_v43  ;;  %v1567_v45 = vld [vmem:[%s27845_s7 + $0x1768] sm:$0xff]  ;;  %v1569_v46 = vld [vmem:[%s27845_s7 + $0x1770] sm:$0xff] }
 0x178   :  { %1566 = vst [vmem:[#allocation2 + $0x1760] sm:$0xff] %v1565_v44  ;;  %v1571_v47 = vld [vmem:[%s27845_s7 + $0x1778] sm:$0xff]  ;;  %1568 = vst [vmem:[#allocation2 + $0x1768] sm:$0xff] %v1567_v45  ;;  %v1573_v48 = vld [vmem:[%s27845_s7 + $0x1780] sm:$0xff] }
 0x179   :  { %1570 = vst [vmem:[#allocation2 + $0x1770] sm:$0xff] %v1569_v46  ;;  %1572 = vst [vmem:[#allocation2 + $0x1778] sm:$0xff] %v1571_v47  ;;  %v1575_v49 = vld [vmem:[%s27845_s7 + $0x1788] sm:$0xff]  ;;  %v1577_v50 = vld [vmem:[%s27845_s7 + $0x1790] sm:$0xff] }
 0x17a   :  { %1574 = vst [vmem:[#allocation2 + $0x1780] sm:$0xff] %v1573_v48  ;;  %1576 = vst [vmem:[#allocation2 + $0x1788] sm:$0xff] %v1575_v49  ;;  %v1579_v51 = vld [vmem:[%s27845_s7 + $0x1798] sm:$0xff]  ;;  %v1581_v52 = vld [vmem:[%s27845_s7 + $0x17a0] sm:$0xff] }
 0x17b   :  { %1578 = vst [vmem:[#allocation2 + $0x1790] sm:$0xff] %v1577_v50  ;;  %v1583_v53 = vld [vmem:[%s27845_s7 + $0x17a8] sm:$0xff]  ;;  %1580 = vst [vmem:[#allocation2 + $0x1798] sm:$0xff] %v1579_v51  ;;  %v1585_v54 = vld [vmem:[%s27845_s7 + $0x17b0] sm:$0xff] }
 0x17c   :  { %1582 = vst [vmem:[#allocation2 + $0x17a0] sm:$0xff] %v1581_v52  ;;  %1584 = vst [vmem:[#allocation2 + $0x17a8] sm:$0xff] %v1583_v53  ;;  %v1587_v55 = vld [vmem:[%s27845_s7 + $0x17b8] sm:$0xff]  ;;  %v1589_v56 = vld [vmem:[%s27845_s7 + $0x17c0] sm:$0xff] }
 0x17d   :  { %1586 = vst [vmem:[#allocation2 + $0x17b0] sm:$0xff] %v1585_v54  ;;  %1588 = vst [vmem:[#allocation2 + $0x17b8] sm:$0xff] %v1587_v55  ;;  %v1591_v57 = vld [vmem:[%s27845_s7 + $0x17c8] sm:$0xff]  ;;  %v1593_v58 = vld [vmem:[%s27845_s7 + $0x17d0] sm:$0xff] }
 0x17e   :  { %1590 = vst [vmem:[#allocation2 + $0x17c0] sm:$0xff] %v1589_v56  ;;  %v1595_v59 = vld [vmem:[%s27845_s7 + $0x17d8] sm:$0xff]  ;;  %1592 = vst [vmem:[#allocation2 + $0x17c8] sm:$0xff] %v1591_v57  ;;  %v1597_v60 = vld [vmem:[%s27845_s7 + $0x17e0] sm:$0xff] }
 0x17f   :  { %1594 = vst [vmem:[#allocation2 + $0x17d0] sm:$0xff] %v1593_v58  ;;  %1596 = vst [vmem:[#allocation2 + $0x17d8] sm:$0xff] %v1595_v59  ;;  %v1599_v61 = vld [vmem:[%s27845_s7 + $0x17e8] sm:$0xff]  ;;  %v1601_v62 = vld [vmem:[%s27845_s7 + $0x17f0] sm:$0xff] }
 0x180   :  { %1598 = vst [vmem:[#allocation2 + $0x17e0] sm:$0xff] %v1597_v60  ;;  %1600 = vst [vmem:[#allocation2 + $0x17e8] sm:$0xff] %v1599_v61  ;;  %v1603_v63 = vld [vmem:[%s27845_s7 + $0x17f8] sm:$0xff]  ;;  %v1605_v0 = vld [vmem:[%s27845_s7 + $0x1800] sm:$0xff] }
 0x181   :  { %1602 = vst [vmem:[#allocation2 + $0x17f0] sm:$0xff] %v1601_v62  ;;  %v1607_v1 = vld [vmem:[%s27845_s7 + $0x1808] sm:$0xff]  ;;  %1604 = vst [vmem:[#allocation2 + $0x17f8] sm:$0xff] %v1603_v63  ;;  %v1609_v2 = vld [vmem:[%s27845_s7 + $0x1810] sm:$0xff] }
 0x182   :  { %1606 = vst [vmem:[#allocation2 + $0x1800] sm:$0xff] %v1605_v0  ;;  %1608 = vst [vmem:[#allocation2 + $0x1808] sm:$0xff] %v1607_v1  ;;  %v1611_v3 = vld [vmem:[%s27845_s7 + $0x1818] sm:$0xff]  ;;  %v1613_v4 = vld [vmem:[%s27845_s7 + $0x1820] sm:$0xff] }
 0x183   :  { %1610 = vst [vmem:[#allocation2 + $0x1810] sm:$0xff] %v1609_v2  ;;  %1612 = vst [vmem:[#allocation2 + $0x1818] sm:$0xff] %v1611_v3  ;;  %v1615_v5 = vld [vmem:[%s27845_s7 + $0x1828] sm:$0xff]  ;;  %v1617_v6 = vld [vmem:[%s27845_s7 + $0x1830] sm:$0xff] }
 0x184   :  { %1614 = vst [vmem:[#allocation2 + $0x1820] sm:$0xff] %v1613_v4  ;;  %v1619_v7 = vld [vmem:[%s27845_s7 + $0x1838] sm:$0xff]  ;;  %1616 = vst [vmem:[#allocation2 + $0x1828] sm:$0xff] %v1615_v5  ;;  %v1621_v8 = vld [vmem:[%s27845_s7 + $0x1840] sm:$0xff] }
 0x185   :  { %1618 = vst [vmem:[#allocation2 + $0x1830] sm:$0xff] %v1617_v6  ;;  %1620 = vst [vmem:[#allocation2 + $0x1838] sm:$0xff] %v1619_v7  ;;  %v1623_v9 = vld [vmem:[%s27845_s7 + $0x1848] sm:$0xff]  ;;  %v1625_v10 = vld [vmem:[%s27845_s7 + $0x1850] sm:$0xff] }
 0x186   :  { %1622 = vst [vmem:[#allocation2 + $0x1840] sm:$0xff] %v1621_v8  ;;  %1624 = vst [vmem:[#allocation2 + $0x1848] sm:$0xff] %v1623_v9  ;;  %v1627_v11 = vld [vmem:[%s27845_s7 + $0x1858] sm:$0xff]  ;;  %v1629_v12 = vld [vmem:[%s27845_s7 + $0x1860] sm:$0xff] }
 0x187   :  { %1626 = vst [vmem:[#allocation2 + $0x1850] sm:$0xff] %v1625_v10  ;;  %v1631_v13 = vld [vmem:[%s27845_s7 + $0x1868] sm:$0xff]  ;;  %1628 = vst [vmem:[#allocation2 + $0x1858] sm:$0xff] %v1627_v11  ;;  %v1633_v14 = vld [vmem:[%s27845_s7 + $0x1870] sm:$0xff] }
 0x188   :  { %1630 = vst [vmem:[#allocation2 + $0x1860] sm:$0xff] %v1629_v12  ;;  %1632 = vst [vmem:[#allocation2 + $0x1868] sm:$0xff] %v1631_v13  ;;  %v1635_v15 = vld [vmem:[%s27845_s7 + $0x1878] sm:$0xff]  ;;  %v1637_v16 = vld [vmem:[%s27845_s7 + $0x1880] sm:$0xff] }
 0x189   :  { %1634 = vst [vmem:[#allocation2 + $0x1870] sm:$0xff] %v1633_v14  ;;  %1636 = vst [vmem:[#allocation2 + $0x1878] sm:$0xff] %v1635_v15  ;;  %v1639_v17 = vld [vmem:[%s27845_s7 + $0x1888] sm:$0xff]  ;;  %v1641_v18 = vld [vmem:[%s27845_s7 + $0x1890] sm:$0xff] }
 0x18a   :  { %1638 = vst [vmem:[#allocation2 + $0x1880] sm:$0xff] %v1637_v16  ;;  %v1643_v19 = vld [vmem:[%s27845_s7 + $0x1898] sm:$0xff]  ;;  %1640 = vst [vmem:[#allocation2 + $0x1888] sm:$0xff] %v1639_v17  ;;  %v1645_v20 = vld [vmem:[%s27845_s7 + $0x18a0] sm:$0xff] }
 0x18b   :  { %1642 = vst [vmem:[#allocation2 + $0x1890] sm:$0xff] %v1641_v18  ;;  %1644 = vst [vmem:[#allocation2 + $0x1898] sm:$0xff] %v1643_v19  ;;  %v1647_v21 = vld [vmem:[%s27845_s7 + $0x18a8] sm:$0xff]  ;;  %v1649_v22 = vld [vmem:[%s27845_s7 + $0x18b0] sm:$0xff] }
 0x18c   :  { %1646 = vst [vmem:[#allocation2 + $0x18a0] sm:$0xff] %v1645_v20  ;;  %1648 = vst [vmem:[#allocation2 + $0x18a8] sm:$0xff] %v1647_v21  ;;  %v1651_v23 = vld [vmem:[%s27845_s7 + $0x18b8] sm:$0xff]  ;;  %v1653_v24 = vld [vmem:[%s27845_s7 + $0x18c0] sm:$0xff] }
 0x18d   :  { %1650 = vst [vmem:[#allocation2 + $0x18b0] sm:$0xff] %v1649_v22  ;;  %v1655_v25 = vld [vmem:[%s27845_s7 + $0x18c8] sm:$0xff]  ;;  %1652 = vst [vmem:[#allocation2 + $0x18b8] sm:$0xff] %v1651_v23  ;;  %v1657_v26 = vld [vmem:[%s27845_s7 + $0x18d0] sm:$0xff] }
 0x18e   :  { %1654 = vst [vmem:[#allocation2 + $0x18c0] sm:$0xff] %v1653_v24  ;;  %1656 = vst [vmem:[#allocation2 + $0x18c8] sm:$0xff] %v1655_v25  ;;  %v1659_v27 = vld [vmem:[%s27845_s7 + $0x18d8] sm:$0xff]  ;;  %v1661_v28 = vld [vmem:[%s27845_s7 + $0x18e0] sm:$0xff] }
 0x18f   :  { %1658 = vst [vmem:[#allocation2 + $0x18d0] sm:$0xff] %v1657_v26  ;;  %1660 = vst [vmem:[#allocation2 + $0x18d8] sm:$0xff] %v1659_v27  ;;  %v1663_v29 = vld [vmem:[%s27845_s7 + $0x18e8] sm:$0xff]  ;;  %v1665_v30 = vld [vmem:[%s27845_s7 + $0x18f0] sm:$0xff] }
 0x190   :  { %1662 = vst [vmem:[#allocation2 + $0x18e0] sm:$0xff] %v1661_v28  ;;  %v1667_v31 = vld [vmem:[%s27845_s7 + $0x18f8] sm:$0xff]  ;;  %1664 = vst [vmem:[#allocation2 + $0x18e8] sm:$0xff] %v1663_v29  ;;  %v1669_v32 = vld [vmem:[%s27845_s7 + $0x1900] sm:$0xff] }
 0x191   :  { %1666 = vst [vmem:[#allocation2 + $0x18f0] sm:$0xff] %v1665_v30  ;;  %1668 = vst [vmem:[#allocation2 + $0x18f8] sm:$0xff] %v1667_v31  ;;  %v1671_v33 = vld [vmem:[%s27845_s7 + $0x1908] sm:$0xff]  ;;  %v1673_v34 = vld [vmem:[%s27845_s7 + $0x1910] sm:$0xff] }
 0x192   :  { %1670 = vst [vmem:[#allocation2 + $0x1900] sm:$0xff] %v1669_v32  ;;  %1672 = vst [vmem:[#allocation2 + $0x1908] sm:$0xff] %v1671_v33  ;;  %v1675_v35 = vld [vmem:[%s27845_s7 + $0x1918] sm:$0xff]  ;;  %v1677_v36 = vld [vmem:[%s27845_s7 + $0x1920] sm:$0xff] }
 0x193   :  { %1674 = vst [vmem:[#allocation2 + $0x1910] sm:$0xff] %v1673_v34  ;;  %v1679_v37 = vld [vmem:[%s27845_s7 + $0x1928] sm:$0xff]  ;;  %1676 = vst [vmem:[#allocation2 + $0x1918] sm:$0xff] %v1675_v35  ;;  %v1681_v38 = vld [vmem:[%s27845_s7 + $0x1930] sm:$0xff] }
 0x194   :  { %1678 = vst [vmem:[#allocation2 + $0x1920] sm:$0xff] %v1677_v36  ;;  %1680 = vst [vmem:[#allocation2 + $0x1928] sm:$0xff] %v1679_v37  ;;  %v1683_v39 = vld [vmem:[%s27845_s7 + $0x1938] sm:$0xff]  ;;  %v1685_v40 = vld [vmem:[%s27845_s7 + $0x1940] sm:$0xff] }
 0x195   :  { %1682 = vst [vmem:[#allocation2 + $0x1930] sm:$0xff] %v1681_v38  ;;  %1684 = vst [vmem:[#allocation2 + $0x1938] sm:$0xff] %v1683_v39  ;;  %v1687_v41 = vld [vmem:[%s27845_s7 + $0x1948] sm:$0xff]  ;;  %v1689_v42 = vld [vmem:[%s27845_s7 + $0x1950] sm:$0xff] }
 0x196   :  { %1686 = vst [vmem:[#allocation2 + $0x1940] sm:$0xff] %v1685_v40  ;;  %v1691_v43 = vld [vmem:[%s27845_s7 + $0x1958] sm:$0xff]  ;;  %1688 = vst [vmem:[#allocation2 + $0x1948] sm:$0xff] %v1687_v41  ;;  %v1693_v44 = vld [vmem:[%s27845_s7 + $0x1960] sm:$0xff] }
 0x197   :  { %1690 = vst [vmem:[#allocation2 + $0x1950] sm:$0xff] %v1689_v42  ;;  %1692 = vst [vmem:[#allocation2 + $0x1958] sm:$0xff] %v1691_v43  ;;  %v1695_v45 = vld [vmem:[%s27845_s7 + $0x1968] sm:$0xff]  ;;  %v1697_v46 = vld [vmem:[%s27845_s7 + $0x1970] sm:$0xff] }
 0x198   :  { %1694 = vst [vmem:[#allocation2 + $0x1960] sm:$0xff] %v1693_v44  ;;  %1696 = vst [vmem:[#allocation2 + $0x1968] sm:$0xff] %v1695_v45  ;;  %v1699_v47 = vld [vmem:[%s27845_s7 + $0x1978] sm:$0xff]  ;;  %v1701_v48 = vld [vmem:[%s27845_s7 + $0x1980] sm:$0xff] }
 0x199   :  { %1698 = vst [vmem:[#allocation2 + $0x1970] sm:$0xff] %v1697_v46  ;;  %v1703_v49 = vld [vmem:[%s27845_s7 + $0x1988] sm:$0xff]  ;;  %1700 = vst [vmem:[#allocation2 + $0x1978] sm:$0xff] %v1699_v47  ;;  %v1705_v50 = vld [vmem:[%s27845_s7 + $0x1990] sm:$0xff] }
 0x19a   :  { %1702 = vst [vmem:[#allocation2 + $0x1980] sm:$0xff] %v1701_v48  ;;  %1704 = vst [vmem:[#allocation2 + $0x1988] sm:$0xff] %v1703_v49  ;;  %v1707_v51 = vld [vmem:[%s27845_s7 + $0x1998] sm:$0xff]  ;;  %v1709_v52 = vld [vmem:[%s27845_s7 + $0x19a0] sm:$0xff] }
 0x19b   :  { %1706 = vst [vmem:[#allocation2 + $0x1990] sm:$0xff] %v1705_v50  ;;  %1708 = vst [vmem:[#allocation2 + $0x1998] sm:$0xff] %v1707_v51  ;;  %v1711_v53 = vld [vmem:[%s27845_s7 + $0x19a8] sm:$0xff]  ;;  %v1713_v54 = vld [vmem:[%s27845_s7 + $0x19b0] sm:$0xff] }
 0x19c   :  { %1710 = vst [vmem:[#allocation2 + $0x19a0] sm:$0xff] %v1709_v52  ;;  %v1715_v55 = vld [vmem:[%s27845_s7 + $0x19b8] sm:$0xff]  ;;  %1712 = vst [vmem:[#allocation2 + $0x19a8] sm:$0xff] %v1711_v53  ;;  %v1717_v56 = vld [vmem:[%s27845_s7 + $0x19c0] sm:$0xff] }
 0x19d   :  { %1714 = vst [vmem:[#allocation2 + $0x19b0] sm:$0xff] %v1713_v54  ;;  %1716 = vst [vmem:[#allocation2 + $0x19b8] sm:$0xff] %v1715_v55  ;;  %v1719_v57 = vld [vmem:[%s27845_s7 + $0x19c8] sm:$0xff]  ;;  %v1721_v58 = vld [vmem:[%s27845_s7 + $0x19d0] sm:$0xff] }
 0x19e   :  { %1718 = vst [vmem:[#allocation2 + $0x19c0] sm:$0xff] %v1717_v56  ;;  %1720 = vst [vmem:[#allocation2 + $0x19c8] sm:$0xff] %v1719_v57  ;;  %v1723_v59 = vld [vmem:[%s27845_s7 + $0x19d8] sm:$0xff]  ;;  %v1725_v60 = vld [vmem:[%s27845_s7 + $0x19e0] sm:$0xff] }
 0x19f   :  { %1722 = vst [vmem:[#allocation2 + $0x19d0] sm:$0xff] %v1721_v58  ;;  %v1727_v61 = vld [vmem:[%s27845_s7 + $0x19e8] sm:$0xff]  ;;  %1724 = vst [vmem:[#allocation2 + $0x19d8] sm:$0xff] %v1723_v59  ;;  %v1729_v62 = vld [vmem:[%s27845_s7 + $0x19f0] sm:$0xff] }
 0x1a0   :  { %1726 = vst [vmem:[#allocation2 + $0x19e0] sm:$0xff] %v1725_v60  ;;  %1728 = vst [vmem:[#allocation2 + $0x19e8] sm:$0xff] %v1727_v61  ;;  %v1731_v63 = vld [vmem:[%s27845_s7 + $0x19f8] sm:$0xff]  ;;  %v1733_v0 = vld [vmem:[%s27845_s7 + $0x1a00] sm:$0xff] }
 0x1a1   :  { %1730 = vst [vmem:[#allocation2 + $0x19f0] sm:$0xff] %v1729_v62  ;;  %1732 = vst [vmem:[#allocation2 + $0x19f8] sm:$0xff] %v1731_v63  ;;  %v1735_v1 = vld [vmem:[%s27845_s7 + $0x1a08] sm:$0xff]  ;;  %v1737_v2 = vld [vmem:[%s27845_s7 + $0x1a10] sm:$0xff] }
 0x1a2   :  { %1734 = vst [vmem:[#allocation2 + $0x1a00] sm:$0xff] %v1733_v0  ;;  %v1739_v3 = vld [vmem:[%s27845_s7 + $0x1a18] sm:$0xff]  ;;  %1736 = vst [vmem:[#allocation2 + $0x1a08] sm:$0xff] %v1735_v1  ;;  %v1741_v4 = vld [vmem:[%s27845_s7 + $0x1a20] sm:$0xff] }
 0x1a3   :  { %1738 = vst [vmem:[#allocation2 + $0x1a10] sm:$0xff] %v1737_v2  ;;  %1740 = vst [vmem:[#allocation2 + $0x1a18] sm:$0xff] %v1739_v3  ;;  %v1743_v5 = vld [vmem:[%s27845_s7 + $0x1a28] sm:$0xff]  ;;  %v1745_v6 = vld [vmem:[%s27845_s7 + $0x1a30] sm:$0xff] }
 0x1a4   :  { %1742 = vst [vmem:[#allocation2 + $0x1a20] sm:$0xff] %v1741_v4  ;;  %1744 = vst [vmem:[#allocation2 + $0x1a28] sm:$0xff] %v1743_v5  ;;  %v1747_v7 = vld [vmem:[%s27845_s7 + $0x1a38] sm:$0xff]  ;;  %v1749_v8 = vld [vmem:[%s27845_s7 + $0x1a40] sm:$0xff] }
 0x1a5   :  { %1746 = vst [vmem:[#allocation2 + $0x1a30] sm:$0xff] %v1745_v6  ;;  %v1751_v9 = vld [vmem:[%s27845_s7 + $0x1a48] sm:$0xff]  ;;  %1748 = vst [vmem:[#allocation2 + $0x1a38] sm:$0xff] %v1747_v7  ;;  %v1753_v10 = vld [vmem:[%s27845_s7 + $0x1a50] sm:$0xff] }
 0x1a6   :  { %1750 = vst [vmem:[#allocation2 + $0x1a40] sm:$0xff] %v1749_v8  ;;  %1752 = vst [vmem:[#allocation2 + $0x1a48] sm:$0xff] %v1751_v9  ;;  %v1755_v11 = vld [vmem:[%s27845_s7 + $0x1a58] sm:$0xff]  ;;  %v1757_v12 = vld [vmem:[%s27845_s7 + $0x1a60] sm:$0xff] }
 0x1a7   :  { %1754 = vst [vmem:[#allocation2 + $0x1a50] sm:$0xff] %v1753_v10  ;;  %1756 = vst [vmem:[#allocation2 + $0x1a58] sm:$0xff] %v1755_v11  ;;  %v1759_v13 = vld [vmem:[%s27845_s7 + $0x1a68] sm:$0xff]  ;;  %v1761_v14 = vld [vmem:[%s27845_s7 + $0x1a70] sm:$0xff] }
 0x1a8   :  { %1758 = vst [vmem:[#allocation2 + $0x1a60] sm:$0xff] %v1757_v12  ;;  %v1763_v15 = vld [vmem:[%s27845_s7 + $0x1a78] sm:$0xff]  ;;  %1760 = vst [vmem:[#allocation2 + $0x1a68] sm:$0xff] %v1759_v13  ;;  %v1765_v16 = vld [vmem:[%s27845_s7 + $0x1a80] sm:$0xff] }
 0x1a9   :  { %1762 = vst [vmem:[#allocation2 + $0x1a70] sm:$0xff] %v1761_v14  ;;  %1764 = vst [vmem:[#allocation2 + $0x1a78] sm:$0xff] %v1763_v15  ;;  %v1767_v17 = vld [vmem:[%s27845_s7 + $0x1a88] sm:$0xff]  ;;  %v1769_v18 = vld [vmem:[%s27845_s7 + $0x1a90] sm:$0xff] }
 0x1aa   :  { %1766 = vst [vmem:[#allocation2 + $0x1a80] sm:$0xff] %v1765_v16  ;;  %1768 = vst [vmem:[#allocation2 + $0x1a88] sm:$0xff] %v1767_v17  ;;  %v1771_v19 = vld [vmem:[%s27845_s7 + $0x1a98] sm:$0xff]  ;;  %v1773_v20 = vld [vmem:[%s27845_s7 + $0x1aa0] sm:$0xff] }
 0x1ab   :  { %1770 = vst [vmem:[#allocation2 + $0x1a90] sm:$0xff] %v1769_v18  ;;  %v1775_v21 = vld [vmem:[%s27845_s7 + $0x1aa8] sm:$0xff]  ;;  %1772 = vst [vmem:[#allocation2 + $0x1a98] sm:$0xff] %v1771_v19  ;;  %v1777_v22 = vld [vmem:[%s27845_s7 + $0x1ab0] sm:$0xff] }
 0x1ac   :  { %1774 = vst [vmem:[#allocation2 + $0x1aa0] sm:$0xff] %v1773_v20  ;;  %1776 = vst [vmem:[#allocation2 + $0x1aa8] sm:$0xff] %v1775_v21  ;;  %v1779_v23 = vld [vmem:[%s27845_s7 + $0x1ab8] sm:$0xff]  ;;  %v1781_v24 = vld [vmem:[%s27845_s7 + $0x1ac0] sm:$0xff] }
 0x1ad   :  { %1778 = vst [vmem:[#allocation2 + $0x1ab0] sm:$0xff] %v1777_v22  ;;  %1780 = vst [vmem:[#allocation2 + $0x1ab8] sm:$0xff] %v1779_v23  ;;  %v1783_v25 = vld [vmem:[%s27845_s7 + $0x1ac8] sm:$0xff]  ;;  %v1785_v26 = vld [vmem:[%s27845_s7 + $0x1ad0] sm:$0xff] }
 0x1ae   :  { %1782 = vst [vmem:[#allocation2 + $0x1ac0] sm:$0xff] %v1781_v24  ;;  %v1787_v27 = vld [vmem:[%s27845_s7 + $0x1ad8] sm:$0xff]  ;;  %1784 = vst [vmem:[#allocation2 + $0x1ac8] sm:$0xff] %v1783_v25  ;;  %v1789_v28 = vld [vmem:[%s27845_s7 + $0x1ae0] sm:$0xff] }
 0x1af   :  { %1786 = vst [vmem:[#allocation2 + $0x1ad0] sm:$0xff] %v1785_v26  ;;  %1788 = vst [vmem:[#allocation2 + $0x1ad8] sm:$0xff] %v1787_v27  ;;  %v1791_v29 = vld [vmem:[%s27845_s7 + $0x1ae8] sm:$0xff]  ;;  %v1793_v30 = vld [vmem:[%s27845_s7 + $0x1af0] sm:$0xff] }
 0x1b0   :  { %1790 = vst [vmem:[#allocation2 + $0x1ae0] sm:$0xff] %v1789_v28  ;;  %1792 = vst [vmem:[#allocation2 + $0x1ae8] sm:$0xff] %v1791_v29  ;;  %v1795_v31 = vld [vmem:[%s27845_s7 + $0x1af8] sm:$0xff]  ;;  %v1797_v32 = vld [vmem:[%s27845_s7 + $0x1b00] sm:$0xff] }
 0x1b1   :  { %1794 = vst [vmem:[#allocation2 + $0x1af0] sm:$0xff] %v1793_v30  ;;  %v1799_v33 = vld [vmem:[%s27845_s7 + $0x1b08] sm:$0xff]  ;;  %1796 = vst [vmem:[#allocation2 + $0x1af8] sm:$0xff] %v1795_v31  ;;  %v1801_v34 = vld [vmem:[%s27845_s7 + $0x1b10] sm:$0xff] }
 0x1b2   :  { %1798 = vst [vmem:[#allocation2 + $0x1b00] sm:$0xff] %v1797_v32  ;;  %1800 = vst [vmem:[#allocation2 + $0x1b08] sm:$0xff] %v1799_v33  ;;  %v1803_v35 = vld [vmem:[%s27845_s7 + $0x1b18] sm:$0xff]  ;;  %v1805_v36 = vld [vmem:[%s27845_s7 + $0x1b20] sm:$0xff] }
 0x1b3   :  { %1802 = vst [vmem:[#allocation2 + $0x1b10] sm:$0xff] %v1801_v34  ;;  %1804 = vst [vmem:[#allocation2 + $0x1b18] sm:$0xff] %v1803_v35  ;;  %v1807_v37 = vld [vmem:[%s27845_s7 + $0x1b28] sm:$0xff]  ;;  %v1809_v38 = vld [vmem:[%s27845_s7 + $0x1b30] sm:$0xff] }
 0x1b4   :  { %1806 = vst [vmem:[#allocation2 + $0x1b20] sm:$0xff] %v1805_v36  ;;  %v1811_v39 = vld [vmem:[%s27845_s7 + $0x1b38] sm:$0xff]  ;;  %1808 = vst [vmem:[#allocation2 + $0x1b28] sm:$0xff] %v1807_v37  ;;  %v1813_v40 = vld [vmem:[%s27845_s7 + $0x1b40] sm:$0xff] }
 0x1b5   :  { %1810 = vst [vmem:[#allocation2 + $0x1b30] sm:$0xff] %v1809_v38  ;;  %1812 = vst [vmem:[#allocation2 + $0x1b38] sm:$0xff] %v1811_v39  ;;  %v1815_v41 = vld [vmem:[%s27845_s7 + $0x1b48] sm:$0xff]  ;;  %v1817_v42 = vld [vmem:[%s27845_s7 + $0x1b50] sm:$0xff] }
 0x1b6   :  { %1814 = vst [vmem:[#allocation2 + $0x1b40] sm:$0xff] %v1813_v40  ;;  %1816 = vst [vmem:[#allocation2 + $0x1b48] sm:$0xff] %v1815_v41  ;;  %v1819_v43 = vld [vmem:[%s27845_s7 + $0x1b58] sm:$0xff]  ;;  %v1821_v44 = vld [vmem:[%s27845_s7 + $0x1b60] sm:$0xff] }
 0x1b7   :  { %1818 = vst [vmem:[#allocation2 + $0x1b50] sm:$0xff] %v1817_v42  ;;  %v1823_v45 = vld [vmem:[%s27845_s7 + $0x1b68] sm:$0xff]  ;;  %1820 = vst [vmem:[#allocation2 + $0x1b58] sm:$0xff] %v1819_v43  ;;  %v1825_v46 = vld [vmem:[%s27845_s7 + $0x1b70] sm:$0xff] }
 0x1b8   :  { %1822 = vst [vmem:[#allocation2 + $0x1b60] sm:$0xff] %v1821_v44  ;;  %1824 = vst [vmem:[#allocation2 + $0x1b68] sm:$0xff] %v1823_v45  ;;  %v1827_v47 = vld [vmem:[%s27845_s7 + $0x1b78] sm:$0xff]  ;;  %v1829_v48 = vld [vmem:[%s27845_s7 + $0x1b80] sm:$0xff] }
 0x1b9   :  { %1826 = vst [vmem:[#allocation2 + $0x1b70] sm:$0xff] %v1825_v46  ;;  %1828 = vst [vmem:[#allocation2 + $0x1b78] sm:$0xff] %v1827_v47  ;;  %v1831_v49 = vld [vmem:[%s27845_s7 + $0x1b88] sm:$0xff]  ;;  %v1833_v50 = vld [vmem:[%s27845_s7 + $0x1b90] sm:$0xff] }
 0x1ba   :  { %1830 = vst [vmem:[#allocation2 + $0x1b80] sm:$0xff] %v1829_v48  ;;  %v1835_v51 = vld [vmem:[%s27845_s7 + $0x1b98] sm:$0xff]  ;;  %1832 = vst [vmem:[#allocation2 + $0x1b88] sm:$0xff] %v1831_v49  ;;  %v1837_v52 = vld [vmem:[%s27845_s7 + $0x1ba0] sm:$0xff] }
 0x1bb   :  { %1834 = vst [vmem:[#allocation2 + $0x1b90] sm:$0xff] %v1833_v50  ;;  %1836 = vst [vmem:[#allocation2 + $0x1b98] sm:$0xff] %v1835_v51  ;;  %v1839_v53 = vld [vmem:[%s27845_s7 + $0x1ba8] sm:$0xff]  ;;  %v1841_v54 = vld [vmem:[%s27845_s7 + $0x1bb0] sm:$0xff] }
 0x1bc   :  { %1838 = vst [vmem:[#allocation2 + $0x1ba0] sm:$0xff] %v1837_v52  ;;  %1840 = vst [vmem:[#allocation2 + $0x1ba8] sm:$0xff] %v1839_v53  ;;  %v1843_v55 = vld [vmem:[%s27845_s7 + $0x1bb8] sm:$0xff]  ;;  %v1845_v56 = vld [vmem:[%s27845_s7 + $0x1bc0] sm:$0xff] }
 0x1bd   :  { %1842 = vst [vmem:[#allocation2 + $0x1bb0] sm:$0xff] %v1841_v54  ;;  %v1847_v57 = vld [vmem:[%s27845_s7 + $0x1bc8] sm:$0xff]  ;;  %1844 = vst [vmem:[#allocation2 + $0x1bb8] sm:$0xff] %v1843_v55  ;;  %v1849_v58 = vld [vmem:[%s27845_s7 + $0x1bd0] sm:$0xff] }
 0x1be   :  { %1846 = vst [vmem:[#allocation2 + $0x1bc0] sm:$0xff] %v1845_v56  ;;  %1848 = vst [vmem:[#allocation2 + $0x1bc8] sm:$0xff] %v1847_v57  ;;  %v1851_v59 = vld [vmem:[%s27845_s7 + $0x1bd8] sm:$0xff]  ;;  %v1853_v60 = vld [vmem:[%s27845_s7 + $0x1be0] sm:$0xff] }
 0x1bf   :  { %1850 = vst [vmem:[#allocation2 + $0x1bd0] sm:$0xff] %v1849_v58  ;;  %1852 = vst [vmem:[#allocation2 + $0x1bd8] sm:$0xff] %v1851_v59  ;;  %v1855_v61 = vld [vmem:[%s27845_s7 + $0x1be8] sm:$0xff]  ;;  %v1857_v62 = vld [vmem:[%s27845_s7 + $0x1bf0] sm:$0xff] }
 0x1c0   :  { %1854 = vst [vmem:[#allocation2 + $0x1be0] sm:$0xff] %v1853_v60  ;;  %v1859_v63 = vld [vmem:[%s27845_s7 + $0x1bf8] sm:$0xff]  ;;  %1856 = vst [vmem:[#allocation2 + $0x1be8] sm:$0xff] %v1855_v61  ;;  %v1861_v0 = vld [vmem:[%s27845_s7 + $0x1c00] sm:$0xff] }
 0x1c1   :  { %1858 = vst [vmem:[#allocation2 + $0x1bf0] sm:$0xff] %v1857_v62  ;;  %1860 = vst [vmem:[#allocation2 + $0x1bf8] sm:$0xff] %v1859_v63  ;;  %v1863_v1 = vld [vmem:[%s27845_s7 + $0x1c08] sm:$0xff]  ;;  %v1865_v2 = vld [vmem:[%s27845_s7 + $0x1c10] sm:$0xff] }
 0x1c2   :  { %1862 = vst [vmem:[#allocation2 + $0x1c00] sm:$0xff] %v1861_v0  ;;  %1864 = vst [vmem:[#allocation2 + $0x1c08] sm:$0xff] %v1863_v1  ;;  %v1867_v3 = vld [vmem:[%s27845_s7 + $0x1c18] sm:$0xff]  ;;  %v1869_v4 = vld [vmem:[%s27845_s7 + $0x1c20] sm:$0xff] }
 0x1c3   :  { %1866 = vst [vmem:[#allocation2 + $0x1c10] sm:$0xff] %v1865_v2  ;;  %v1871_v5 = vld [vmem:[%s27845_s7 + $0x1c28] sm:$0xff]  ;;  %1868 = vst [vmem:[#allocation2 + $0x1c18] sm:$0xff] %v1867_v3  ;;  %v1873_v6 = vld [vmem:[%s27845_s7 + $0x1c30] sm:$0xff] }
 0x1c4   :  { %1870 = vst [vmem:[#allocation2 + $0x1c20] sm:$0xff] %v1869_v4  ;;  %1872 = vst [vmem:[#allocation2 + $0x1c28] sm:$0xff] %v1871_v5  ;;  %v1875_v7 = vld [vmem:[%s27845_s7 + $0x1c38] sm:$0xff]  ;;  %v1877_v8 = vld [vmem:[%s27845_s7 + $0x1c40] sm:$0xff] }
 0x1c5   :  { %1874 = vst [vmem:[#allocation2 + $0x1c30] sm:$0xff] %v1873_v6  ;;  %1876 = vst [vmem:[#allocation2 + $0x1c38] sm:$0xff] %v1875_v7  ;;  %v1879_v9 = vld [vmem:[%s27845_s7 + $0x1c48] sm:$0xff]  ;;  %v1881_v10 = vld [vmem:[%s27845_s7 + $0x1c50] sm:$0xff] }
 0x1c6   :  { %1878 = vst [vmem:[#allocation2 + $0x1c40] sm:$0xff] %v1877_v8  ;;  %v1883_v11 = vld [vmem:[%s27845_s7 + $0x1c58] sm:$0xff]  ;;  %1880 = vst [vmem:[#allocation2 + $0x1c48] sm:$0xff] %v1879_v9  ;;  %v1885_v12 = vld [vmem:[%s27845_s7 + $0x1c60] sm:$0xff] }
 0x1c7   :  { %1882 = vst [vmem:[#allocation2 + $0x1c50] sm:$0xff] %v1881_v10  ;;  %1884 = vst [vmem:[#allocation2 + $0x1c58] sm:$0xff] %v1883_v11  ;;  %v1887_v13 = vld [vmem:[%s27845_s7 + $0x1c68] sm:$0xff]  ;;  %v1889_v14 = vld [vmem:[%s27845_s7 + $0x1c70] sm:$0xff] }
 0x1c8   :  { %1886 = vst [vmem:[#allocation2 + $0x1c60] sm:$0xff] %v1885_v12  ;;  %1888 = vst [vmem:[#allocation2 + $0x1c68] sm:$0xff] %v1887_v13  ;;  %v1891_v15 = vld [vmem:[%s27845_s7 + $0x1c78] sm:$0xff]  ;;  %v1893_v16 = vld [vmem:[%s27845_s7 + $0x1c80] sm:$0xff] }
 0x1c9   :  { %1890 = vst [vmem:[#allocation2 + $0x1c70] sm:$0xff] %v1889_v14  ;;  %v1895_v17 = vld [vmem:[%s27845_s7 + $0x1c88] sm:$0xff]  ;;  %1892 = vst [vmem:[#allocation2 + $0x1c78] sm:$0xff] %v1891_v15  ;;  %v1897_v18 = vld [vmem:[%s27845_s7 + $0x1c90] sm:$0xff] }
 0x1ca   :  { %1894 = vst [vmem:[#allocation2 + $0x1c80] sm:$0xff] %v1893_v16  ;;  %1896 = vst [vmem:[#allocation2 + $0x1c88] sm:$0xff] %v1895_v17  ;;  %v1899_v19 = vld [vmem:[%s27845_s7 + $0x1c98] sm:$0xff]  ;;  %v1901_v20 = vld [vmem:[%s27845_s7 + $0x1ca0] sm:$0xff] }
 0x1cb   :  { %1898 = vst [vmem:[#allocation2 + $0x1c90] sm:$0xff] %v1897_v18  ;;  %1900 = vst [vmem:[#allocation2 + $0x1c98] sm:$0xff] %v1899_v19  ;;  %v1903_v21 = vld [vmem:[%s27845_s7 + $0x1ca8] sm:$0xff]  ;;  %v1905_v22 = vld [vmem:[%s27845_s7 + $0x1cb0] sm:$0xff] }
 0x1cc   :  { %1902 = vst [vmem:[#allocation2 + $0x1ca0] sm:$0xff] %v1901_v20  ;;  %v1907_v23 = vld [vmem:[%s27845_s7 + $0x1cb8] sm:$0xff]  ;;  %1904 = vst [vmem:[#allocation2 + $0x1ca8] sm:$0xff] %v1903_v21  ;;  %v1909_v24 = vld [vmem:[%s27845_s7 + $0x1cc0] sm:$0xff] }
 0x1cd   :  { %1906 = vst [vmem:[#allocation2 + $0x1cb0] sm:$0xff] %v1905_v22  ;;  %1908 = vst [vmem:[#allocation2 + $0x1cb8] sm:$0xff] %v1907_v23  ;;  %v1911_v25 = vld [vmem:[%s27845_s7 + $0x1cc8] sm:$0xff]  ;;  %v1913_v26 = vld [vmem:[%s27845_s7 + $0x1cd0] sm:$0xff] }
 0x1ce   :  { %1910 = vst [vmem:[#allocation2 + $0x1cc0] sm:$0xff] %v1909_v24  ;;  %1912 = vst [vmem:[#allocation2 + $0x1cc8] sm:$0xff] %v1911_v25  ;;  %v1915_v27 = vld [vmem:[%s27845_s7 + $0x1cd8] sm:$0xff]  ;;  %v1917_v28 = vld [vmem:[%s27845_s7 + $0x1ce0] sm:$0xff] }
 0x1cf   :  { %1914 = vst [vmem:[#allocation2 + $0x1cd0] sm:$0xff] %v1913_v26  ;;  %v1919_v29 = vld [vmem:[%s27845_s7 + $0x1ce8] sm:$0xff]  ;;  %1916 = vst [vmem:[#allocation2 + $0x1cd8] sm:$0xff] %v1915_v27  ;;  %v1921_v30 = vld [vmem:[%s27845_s7 + $0x1cf0] sm:$0xff] }
 0x1d0   :  { %1918 = vst [vmem:[#allocation2 + $0x1ce0] sm:$0xff] %v1917_v28  ;;  %1920 = vst [vmem:[#allocation2 + $0x1ce8] sm:$0xff] %v1919_v29  ;;  %v1923_v31 = vld [vmem:[%s27845_s7 + $0x1cf8] sm:$0xff] }
 0x1d1   :  { %1922 = vst [vmem:[#allocation2 + $0x1cf0] sm:$0xff] %v1921_v30  ;;  %1924 = vst [vmem:[#allocation2 + $0x1cf8] sm:$0xff] %v1923_v31 }
 0x1d2   :  { %1932 = vsyncadd [#allocation3], 118784  ;;  %v18699_v32 = vld [vmem:[%s27839_s1 + $0xe4] ss:$16 sps:$4 sm:$0xff]   ;;  %v18703_v34 = vld [vmem:[%s27839_s1 + $0xe0] ss:$16 sps:$4 sm:$0xff]   ;;  %v1953_v6 = vlaneseq }
 0x1d3   :  { %v18701_v33 = vld [vmem:[%s27839_s1 + $0x2e4] ss:$16 sps:$4 sm:$0xff]   ;;  %v18704_v35 = vld [vmem:[%s27839_s1 + $0x2e0] ss:$16 sps:$4 sm:$0xff]   ;;  %7584 = vmatprep.subr.bf16.mxu0 %v18699_v32  ;;  %v21543_v4 = vmov 1983009808  }
 0x1d4   :  { %v18705_v36 = vld [vmem:[%s27839_s1 + $0xc4] ss:$16 sps:$4 sm:$0xff]   ;;  %7625 = vmatprep.subr.bf16.mxu1 %v18701_v33  ;;  %7585 = vmatpush1.bf16.msra.mxu0 %v18703_v34  ;;  %v18709_v38 = vld [vmem:[%s27839_s1 + $0xc0] ss:$16 sps:$4 sm:$0xff]   ;;  %v1951_v5 = vunpack.c.l.s4 %v21543_v4  ;;  %v24497_v11 = vshrl.u32 %v1953_v6, 7  ;;  %vm7571_vm0 = vcmask 1042432  }
 0x1d5   :  { %v18707_v37 = vld [vmem:[%s27839_s1 + $0x2c4] ss:$16 sps:$4 sm:$0xff]   ;;  %7626 = vmatpush1.bf16.msra.mxu1 %v18704_v35  ;;  %7586 = vmatprep.subr.bf16.mxu0 %v18705_v36  ;;  %v18710_v39 = vld [vmem:[%s27839_s1 + $0x2c0] ss:$16 sps:$4 sm:$0xff]   ;;  %vm7567_vm1 = vcmask 179200  }
 0x1d6   :  { %7627 = vmatprep.subr.bf16.mxu1 %v18707_v37  ;;  %v18711_v40 = vld [vmem:[%s27839_s1 + $0xa4] ss:$16 sps:$4 sm:$0xff]   ;;  %v18715_v42 = vld [vmem:[%s27839_s1 + $0xa0] ss:$16 sps:$4 sm:$0xff]   ;;  %v1952_v10 = vunpack.c.0.s8 %v1951_v5 }
 0x1d7   :  { %v18713_v41 = vld [vmem:[%s27839_s1 + $0x2a4] ss:$16 sps:$4 sm:$0xff]   ;;  %v18716_v43 = vld [vmem:[%s27839_s1 + $0x2a0] ss:$16 sps:$4 sm:$0xff]  }
 0x1d8   :  { %7587 = vmatpush1.bf16.msra.mxu0 %v18709_v38  ;;  %v18717_v44 = vld [vmem:[%s27839_s1 + $0x84] ss:$16 sps:$4 sm:$0xff]   ;;  %v18721_v46 = vld [vmem:[%s27839_s1 + $0x80] ss:$16 sps:$4 sm:$0xff]   ;;  %v24515_v17 = vsub.s32 %v1952_v10, %v24497_v11  ;;  %v1934_v10 = vld [vmem:[%s27838_s0 + $0x8] sm:$0xff] }
 0x1d9   :  { %7628 = vmatpush1.bf16.msra.mxu1 %v18710_v39  ;;  %7588 = vmatprep.subr.bf16.mxu0 %v18711_v40  ;;  %v18719_v45 = vld [vmem:[%s27839_s1 + $0x284] ss:$16 sps:$4 sm:$0xff]   ;;  %v18722_v47 = vld [vmem:[%s27839_s1 + $0x280] ss:$16 sps:$4 sm:$0xff]  }
 0x1da   :  { %7629 = vmatprep.subr.bf16.mxu1 %v18713_v41  ;;  %v18723_v48 = vld [vmem:[%s27839_s1 + $0x64] ss:$16 sps:$4 sm:$0xff]   ;;  %v18727_v50 = vld [vmem:[%s27839_s1 + $0x60] ss:$16 sps:$4 sm:$0xff]  }
 0x1db   :  { %v18725_v49 = vld [vmem:[%s27839_s1 + $0x264] ss:$16 sps:$4 sm:$0xff]   ;;  %v18728_v51 = vld [vmem:[%s27839_s1 + $0x260] ss:$16 sps:$4 sm:$0xff]  }
 0x1dc   :  { %7589 = vmatpush1.bf16.msra.mxu0 %v18715_v42  ;;  %v18729_v52 = vld [vmem:[%s27839_s1 + $0x44] ss:$16 sps:$4 sm:$0xff]   ;;  %v18733_v54 = vld [vmem:[%s27839_s1 + $0x40] ss:$16 sps:$4 sm:$0xff]  }
 0x1dd   :  { %7630 = vmatpush1.bf16.msra.mxu1 %v18716_v43  ;;  %7590 = vmatprep.subr.bf16.mxu0 %v18717_v44  ;;  %v18731_v53 = vld [vmem:[%s27839_s1 + $0x244] ss:$16 sps:$4 sm:$0xff]   ;;  %v18734_v55 = vld [vmem:[%s27839_s1 + $0x240] ss:$16 sps:$4 sm:$0xff]  }
 0x1de   :  { %7631 = vmatprep.subr.bf16.mxu1 %v18719_v45  ;;  %v18735_v56 = vld [vmem:[%s27839_s1 + $0x24] ss:$16 sps:$4 sm:$0xff]   ;;  %v18739_v58 = vld [vmem:[%s27839_s1 + $0x20] ss:$16 sps:$4 sm:$0xff]  }
 0x1df   :  { %v18737_v57 = vld [vmem:[%s27839_s1 + $0x224] ss:$16 sps:$4 sm:$0xff]   ;;  %v18740_v59 = vld [vmem:[%s27839_s1 + $0x220] ss:$16 sps:$4 sm:$0xff]  }
 0x1e0   :  { %7591 = vmatpush1.bf16.msra.mxu0 %v18721_v46  ;;  %v18741_v60 = vld [vmem:[%s27839_s1 + $0x4] ss:$16 sps:$4 sm:$0xff]   ;;  %v18745_v62 = vld [vmem:[%s27839_s1] ss:$16 sps:$4 sm:$0xff]  }
 0x1e1   :  { %7632 = vmatpush1.bf16.msra.mxu1 %v18722_v47  ;;  %7592 = vmatprep.subr.bf16.mxu0 %v18723_v48  ;;  %v18743_v61 = vld [vmem:[%s27839_s1 + $0x204] ss:$16 sps:$4 sm:$0xff]   ;;  %v18746_v63 = vld [vmem:[%s27839_s1 + $0x200] ss:$16 sps:$4 sm:$0xff]  }
 0x1e2   :  { %7633 = vmatprep.subr.bf16.mxu1 %v18725_v49  ;;  %v18747_v0 = vld [vmem:[%s27839_s1 + $0x1e4] ss:$16 sps:$4 sm:$0xff]   ;;  %v18751_v2 = vld [vmem:[%s27839_s1 + $0x1e0] ss:$16 sps:$4 sm:$0xff]  }
 0x1e3   :  { %v18749_v1 = vld [vmem:[%s27839_s1 + $0x3e4] ss:$16 sps:$4 sm:$0xff]   ;;  %v18752_v3 = vld [vmem:[%s27839_s1 + $0x3e0] ss:$16 sps:$4 sm:$0xff]  }
 0x1e4   :  { %7593 = vmatpush1.bf16.msra.mxu0 %v18727_v50  ;;  %v18753_v7 = vld [vmem:[%s27839_s1 + $0x1c4] ss:$16 sps:$4 sm:$0xff]   ;;  %v18757_v9 = vld [vmem:[%s27839_s1 + $0x1c0] ss:$16 sps:$4 sm:$0xff]  }
 0x1e5   :  { %7634 = vmatpush1.bf16.msra.mxu1 %v18728_v51  ;;  %7594 = vmatprep.subr.bf16.mxu0 %v18729_v52  ;;  %v18755_v8 = vld [vmem:[%s27839_s1 + $0x3c4] ss:$16 sps:$4 sm:$0xff]   ;;  %v18758_v12 = vld [vmem:[%s27839_s1 + $0x3c0] ss:$16 sps:$4 sm:$0xff]  }
 0x1e6   :  { %7635 = vmatprep.subr.bf16.mxu1 %v18731_v53  ;;  %v18759_v13 = vld [vmem:[%s27839_s1 + $0x1a4] ss:$16 sps:$4 sm:$0xff]   ;;  %v18763_v15 = vld [vmem:[%s27839_s1 + $0x1a0] ss:$16 sps:$4 sm:$0xff]  }
 0x1e7   :  { %v18761_v14 = vld [vmem:[%s27839_s1 + $0x3a4] ss:$16 sps:$4 sm:$0xff]   ;;  %v18764_v16 = vld [vmem:[%s27839_s1 + $0x3a0] ss:$16 sps:$4 sm:$0xff]  }
 0x1e8   :  { %7595 = vmatpush1.bf16.msra.mxu0 %v18733_v54  ;;  %v18765_v18 = vld [vmem:[%s27839_s1 + $0x184] ss:$16 sps:$4 sm:$0xff]   ;;  %v18769_v21 = vld [vmem:[%s27839_s1 + $0x180] ss:$16 sps:$4 sm:$0xff]  }
 0x1e9   :  { %7636 = vmatpush1.bf16.msra.mxu1 %v18734_v55  ;;  %7596 = vmatprep.subr.bf16.mxu0 %v18735_v56  ;;  %v18767_v19 = vld [vmem:[%s27839_s1 + $0x384] ss:$16 sps:$4 sm:$0xff]   ;;  %v18770_v24 = vld [vmem:[%s27839_s1 + $0x380] ss:$16 sps:$4 sm:$0xff]  }
 0x1ea   :  { %7637 = vmatprep.subr.bf16.mxu1 %v18737_v57  ;;  %v1933_v20 = vld [vmem:[%s27838_s0] sm:$0xff] }
 0x1eb   :  { %v1956_v22 = vrot.slane %v1933_v20, %v24515_v17  ;;  %v1949_v23 = vcombine.high %v1933_v20, %v1933_v20  ;;  %v18771_v25 = vld [vmem:[%s27839_s1 + $0x164] ss:$16 sps:$4 sm:$0xff]   ;;  %v18775_v29 = vld [vmem:[%s27839_s1 + $0x160] ss:$16 sps:$4 sm:$0xff]  }
 0x1ec   :  { %7597 = vmatpush1.bf16.msra.mxu0 %v18739_v58  ;;  %v18773_v26 = vld [vmem:[%s27839_s1 + $0x364] ss:$16 sps:$4 sm:$0xff]   ;;  %v18776_v32 = vld [vmem:[%s27839_s1 + $0x360] ss:$16 sps:$4 sm:$0xff]  }
 0x1ed   :  { %7638 = vmatpush1.bf16.msra.mxu1 %v18740_v59  ;;  %7598 = vmatprep.subr.bf16.mxu0 %v18741_v60  ;;  %v1964_v27 = vcombine.high %v1956_v22, %v1956_v22  ;;  %v1963_v28 = vrot.slane %v1949_v23, %v24515_v17  ;;  %v18777_v33 = vld [vmem:[%s27839_s1 + $0x144] ss:$16 sps:$4 sm:$0xff]   ;;  %v18781_v36 = vld [vmem:[%s27839_s1 + $0x140] ss:$16 sps:$4 sm:$0xff]   ;;  %v24594_v48 = vpack.c.bf16 %v1956_v22, %v1956_v22 }
 0x1ee   :  { %7639 = vmatprep.subr.bf16.mxu1 %v18743_v61  ;;  %v18779_v34 = vld [vmem:[%s27839_s1 + $0x344] ss:$16 sps:$4 sm:$0xff]   ;;  %v18782_v37 = vld [vmem:[%s27839_s1 + $0x340] ss:$16 sps:$4 sm:$0xff]  }
 0x1ef   :  { %v24543_v30 = vpack.c.bf16 %v1964_v27, %v1964_v27  ;;  %v1965_v31 = vcombine.high %v1963_v28, %v1963_v28  ;;  %v18783_v38 = vld [vmem:[%s27839_s1 + $0x124] ss:$16 sps:$4 sm:$0xff]   ;;  %v18787_v40 = vld [vmem:[%s27839_s1 + $0x120] ss:$16 sps:$4 sm:$0xff]   ;;  %v24596_v49 = vpack.c.bf16 %v1963_v28, %v1963_v28 }
 0x1f0   :  { %7599 = vmatpush1.bf16.msra.mxu0 %v18745_v62  ;;  %v18785_v39 = vld [vmem:[%s27839_s1 + $0x324] ss:$16 sps:$4 sm:$0xff]   ;;  %v18788_v41 = vld [vmem:[%s27839_s1 + $0x320] ss:$16 sps:$4 sm:$0xff]  }
 0x1f1   :  { %7640 = vmatpush1.bf16.msra.mxu1 %v18746_v63  ;;  %7600 = vmatprep.subr.bf16.mxu0 %v18747_v0  ;;  %v24555_v35 = vpack.c.bf16 %v1965_v31, %v1965_v31  ;;  %v18789_v42 = vld [vmem:[%s27839_s1 + $0x104] ss:$16 sps:$4 sm:$0xff]   ;;  %v18793_v44 = vld [vmem:[%s27839_s1 + $0x100] ss:$16 sps:$4 sm:$0xff]  }
 0x1f2   :  { %7641 = vmatprep.subr.bf16.mxu1 %v18749_v1  ;;  %7616 = vmatprep.mubr.bf16.mxu0 %v24543_v30  ;;  %v18791_v43 = vld [vmem:[%s27839_s1 + $0x304] ss:$16 sps:$4 sm:$0xff]   ;;  %v18794_v45 = vld [vmem:[%s27839_s1 + $0x300] ss:$16 sps:$4 sm:$0xff]  }
 0x1f3   :  { %7657 = vmatprep.mubr.bf16.mxu1 %v24555_v35  ;;  %v18798_v46 = vld [vmem:[%s27839_s1 + $0x4e4] ss:$16 sps:$4 sm:$0xff]   ;;  %v18796_v50 = vld [vmem:[%s27839_s1 + $0x4e0] ss:$16 sps:$4 sm:$0xff]  }
 0x1f4   :  { %7601 = vmatpush2.bf16.msra.mxu0 %v18751_v2  ;;  %v18801_v47 = vld [vmem:[%s27839_s1 + $0x6e4] ss:$16 sps:$4 sm:$0xff]   ;;  %v18799_v51 = vld [vmem:[%s27839_s1 + $0x6e0] ss:$16 sps:$4 sm:$0xff]  }
 0x1f5   :  { %7642 = vmatpush2.bf16.msra.mxu1 %v18752_v3  ;;  %7602 = vmatprep.subr.bf16.mxu0 %v18753_v7  ;;  %v18804_v52 = vld [vmem:[%s27839_s1 + $0x4c4] ss:$16 sps:$4 sm:$0xff]   ;;  %v18802_v54 = vld [vmem:[%s27839_s1 + $0x4c0] ss:$16 sps:$4 sm:$0xff]  }
 0x1f6   :  { %7643 = vmatprep.subr.bf16.mxu1 %v18755_v8  ;;  %v18807_v53 = vld [vmem:[%s27839_s1 + $0x6c4] ss:$16 sps:$4 sm:$0xff]   ;;  %v18805_v55 = vld [vmem:[%s27839_s1 + $0x6c0] ss:$16 sps:$4 sm:$0xff]  }
 0x1f7   :  { %v18810_v56 = vld [vmem:[%s27839_s1 + $0x4a4] ss:$16 sps:$4 sm:$0xff]   ;;  %v18808_v58 = vld [vmem:[%s27839_s1 + $0x4a0] ss:$16 sps:$4 sm:$0xff]  }
 0x1f8   :  { %7603 = vmatpush2.bf16.msra.mxu0 %v18757_v9  ;;  %v18813_v57 = vld [vmem:[%s27839_s1 + $0x6a4] ss:$16 sps:$4 sm:$0xff]   ;;  %v18811_v59 = vld [vmem:[%s27839_s1 + $0x6a0] ss:$16 sps:$4 sm:$0xff]  }
 0x1f9   :  { %7644 = vmatpush2.bf16.msra.mxu1 %v18758_v12  ;;  %7604 = vmatprep.subr.bf16.mxu0 %v18759_v13  ;;  %v18816_v60 = vld [vmem:[%s27839_s1 + $0x484] ss:$16 sps:$4 sm:$0xff]   ;;  %v18814_v62 = vld [vmem:[%s27839_s1 + $0x480] ss:$16 sps:$4 sm:$0xff]   ;;  %v24676_v12 = vrot.slane %v1934_v10, %v24515_v17  ;;  %v1966_v13 = vcombine.high %v1934_v10, %v1934_v10 }
 0x1fa   :  { %7645 = vmatprep.subr.bf16.mxu1 %v18761_v14  ;;  %v18819_v61 = vld [vmem:[%s27839_s1 + $0x684] ss:$16 sps:$4 sm:$0xff]   ;;  %v18817_v63 = vld [vmem:[%s27839_s1 + $0x680] ss:$16 sps:$4 sm:$0xff]  }
 0x1fb   :  { %v18822_v0 = vld [vmem:[%s27839_s1 + $0x464] ss:$16 sps:$4 sm:$0xff]   ;;  %v18820_v2 = vld [vmem:[%s27839_s1 + $0x460] ss:$16 sps:$4 sm:$0xff]  }
 0x1fc   :  { %7605 = vmatpush2.bf16.msra.mxu0 %v18763_v15  ;;  %v18825_v1 = vld [vmem:[%s27839_s1 + $0x664] ss:$16 sps:$4 sm:$0xff]   ;;  %v18823_v3 = vld [vmem:[%s27839_s1 + $0x660] ss:$16 sps:$4 sm:$0xff]  }
 0x1fd   :  { %7646 = vmatpush2.bf16.msra.mxu1 %v18764_v16  ;;  %7606 = vmatprep.subr.bf16.mxu0 %v18765_v18  ;;  %v18828_v4 = vld [vmem:[%s27839_s1 + $0x444] ss:$16 sps:$4 sm:$0xff]   ;;  %v18826_v6 = vld [vmem:[%s27839_s1 + $0x440] ss:$16 sps:$4 sm:$0xff]   ;;  %v1981_v18 = vcombine.high %v24676_v12, %v24676_v12 }
 0x1fe   :  { %7647 = vmatprep.subr.bf16.mxu1 %v18767_v19  ;;  %v18831_v5 = vld [vmem:[%s27839_s1 + $0x644] ss:$16 sps:$4 sm:$0xff]   ;;  %v18829_v7 = vld [vmem:[%s27839_s1 + $0x640] ss:$16 sps:$4 sm:$0xff]   ;;  %v24690_v19 = vrot.slane %v1966_v13, %v24515_v17 }
 0x1ff   :  { %v18834_v8 = vld [vmem:[%s27839_s1 + $0x424] ss:$16 sps:$4 sm:$0xff]   ;;  %v18832_v14 = vld [vmem:[%s27839_s1 + $0x420] ss:$16 sps:$4 sm:$0xff]  }
 0x200   :  { %7607 = vmatpush2.bf16.msra.mxu0 %v18769_v21  ;;  %v18837_v9 = vld [vmem:[%s27839_s1 + $0x624] ss:$16 sps:$4 sm:$0xff]   ;;  %v18835_v15 = vld [vmem:[%s27839_s1 + $0x620] ss:$16 sps:$4 sm:$0xff]   ;;  %v24695_v21 = vpack.c.bf16 %v1981_v18, %v1981_v18  ;;  %v1982_v22 = vcombine.high %v24690_v19, %v24690_v19 }
 0x201   :  { %7648 = vmatpush2.bf16.msra.mxu1 %v18770_v24  ;;  %7608 = vmatprep.subr.bf16.mxu0 %v18771_v25  ;;  %v18840_v16 = vld [vmem:[%s27839_s1 + $0x404] ss:$16 sps:$4 sm:$0xff]   ;;  %v18838_v23 = vld [vmem:[%s27839_s1 + $0x400] ss:$16 sps:$4 sm:$0xff]  }
 0x202   :  { %7649 = vmatprep.subr.bf16.mxu1 %v18773_v26  ;;  %v18843_v20 = vld [vmem:[%s27839_s1 + $0x604] ss:$16 sps:$4 sm:$0xff]   ;;  %v18841_v24 = vld [vmem:[%s27839_s1 + $0x600] ss:$16 sps:$4 sm:$0xff]   ;;  %v24708_v26 = vpack.c.bf16 %v1982_v22, %v1982_v22 }
 0x203   :  { %v18846_v25 = vld [vmem:[%s27839_s1 + $0x5e4] ss:$16 sps:$4 sm:$0xff]   ;;  %v18844_v28 = vld [vmem:[%s27839_s1 + $0x5e0] ss:$16 sps:$4 sm:$0xff]  }
 0x204   :  { %7609 = vmatpush2.bf16.msra.mxu0 %v18775_v29  ;;  %v18849_v27 = vld [vmem:[%s27839_s1 + $0x7e4] ss:$16 sps:$4 sm:$0xff]   ;;  %v18847_v29 = vld [vmem:[%s27839_s1 + $0x7e0] ss:$16 sps:$4 sm:$0xff]  }
 0x205   :  { %7650 = vmatpush2.bf16.msra.mxu1 %v18776_v32  ;;  %7610 = vmatprep.subr.bf16.mxu0 %v18777_v33  ;;  %v18852_v31 = vld [vmem:[%s27839_s1 + $0x5c4] ss:$16 sps:$4 sm:$0xff]   ;;  %v18850_v33 = vld [vmem:[%s27839_s1 + $0x5c0] ss:$16 sps:$4 sm:$0xff]  }
 0x206   :  { %7651 = vmatprep.subr.bf16.mxu1 %v18779_v34  ;;  %v18855_v32 = vld [vmem:[%s27839_s1 + $0x7c4] ss:$16 sps:$4 sm:$0xff]   ;;  %v18853_v34 = vld [vmem:[%s27839_s1 + $0x7c0] ss:$16 sps:$4 sm:$0xff]  }
 0x207   :  { %v18902_v10 = vld [vmem:[%s27839_s1 + $0xac0] ss:$16 sps:$4 sm:$0xff]  }
 0x208   :  { %7611 = vmatpush2.bf16.msra.mxu0 %v18781_v36  ;;  %v18858_v36 = vld [vmem:[%s27839_s1 + $0x5a4] ss:$16 sps:$4 sm:$0xff]  }
 0x209   :  { %7652 = vmatpush2.bf16.msra.mxu1 %v18782_v37  ;;  %7612 = vmatprep.subr.bf16.mxu0 %v18783_v38  ;;  %v18861_v37 = vld [vmem:[%s27839_s1 + $0x7a4] ss:$16 sps:$4 sm:$0xff]   ;;  %v18856_v38 = vld [vmem:[%s27839_s1 + $0x5a0] ss:$16 sps:$4 sm:$0xff]  }
 0x20a   :  { %7653 = vmatprep.subr.bf16.mxu1 %v18785_v39  ;;  %v18859_v39 = vld [vmem:[%s27839_s1 + $0x7a0] ss:$16 sps:$4 sm:$0xff]  }
 0x20c   :  { %7613 = vmatpush2.bf16.msra.mxu0 %v18787_v40  ;;  %v18864_v40 = vld [vmem:[%s27839_s1 + $0x584] ss:$16 sps:$4 sm:$0xff]  }
 0x20d   :  { %7654 = vmatpush2.bf16.msra.mxu1 %v18788_v41  ;;  %7614 = vmatprep.subr.bf16.mxu0 %v18789_v42  ;;  %v18867_v41 = vld [vmem:[%s27839_s1 + $0x784] ss:$16 sps:$4 sm:$0xff]   ;;  %v18862_v42 = vld [vmem:[%s27839_s1 + $0x580] ss:$16 sps:$4 sm:$0xff]  }
 0x20e   :  { %7655 = vmatprep.subr.bf16.mxu1 %v18791_v43  ;;  %v18865_v43 = vld [vmem:[%s27839_s1 + $0x780] ss:$16 sps:$4 sm:$0xff]  }
 0x210   :  { %7615 = vmatpush2.bf16.msra.mxu0 %v18793_v44  ;;  %v18870_v44 = vld [vmem:[%s27839_s1 + $0x564] ss:$16 sps:$4 sm:$0xff]  }
 0x211   :  { %7656 = vmatpush2.bf16.msra.mxu1 %v18794_v45  ;;  %7666 = vmatprep.subr.bf16.mxu0 %v18798_v46  ;;  %v18873_v45 = vld [vmem:[%s27839_s1 + $0x764] ss:$16 sps:$4 sm:$0xff]   ;;  %v18868_v46 = vld [vmem:[%s27839_s1 + $0x560] ss:$16 sps:$4 sm:$0xff]  }
 0x212   :  { %7707 = vmatprep.subr.bf16.mxu1 %v18801_v47  ;;  %v18871_v47 = vld [vmem:[%s27839_s1 + $0x760] ss:$16 sps:$4 sm:$0xff]  }
 0x213   :  { %7617 = vmatmul.mubr.bf16.vlgmr.msra.gmra.mxu0 %v24594_v48 }
 0x214   :  { %7658 = vmatmul.mubr.bf16.vlgmr.msra.gmra.mxu1 %v24596_v49  ;;  %7667 = vmatpush1.bf16.msra.mxu0 %v18796_v50  ;;  %v18876_v50 = vld [vmem:[%s27839_s1 + $0x544] ss:$16 sps:$4 sm:$0xff]  }
 0x215   :  { %7708 = vmatpush1.bf16.msra.mxu1 %v18799_v51  ;;  %7668 = vmatprep.subr.bf16.mxu0 %v18804_v52  ;;  %v18879_v51 = vld [vmem:[%s27839_s1 + $0x744] ss:$16 sps:$4 sm:$0xff]   ;;  %v18874_v52 = vld [vmem:[%s27839_s1 + $0x540] ss:$16 sps:$4 sm:$0xff]  }
 0x216   :  { %7709 = vmatprep.subr.bf16.mxu1 %v18807_v53  ;;  %7698 = vmatprep.mubr.bf16.mxu0 %v24695_v21  ;;  %v18877_v53 = vld [vmem:[%s27839_s1 + $0x740] ss:$16 sps:$4 sm:$0xff]  }
 0x217   :  { %7739 = vmatprep.mubr.bf16.mxu1 %v24708_v26 }
 0x218   :  { %7669 = vmatpush1.bf16.msra.mxu0 %v18802_v54  ;;  %v18882_v54 = vld [vmem:[%s27839_s1 + $0x524] ss:$16 sps:$4 sm:$0xff]  }
 0x219   :  { %7710 = vmatpush1.bf16.msra.mxu1 %v18805_v55  ;;  %7670 = vmatprep.subr.bf16.mxu0 %v18810_v56  ;;  %v18885_v55 = vld [vmem:[%s27839_s1 + $0x724] ss:$16 sps:$4 sm:$0xff]   ;;  %v18880_v56 = vld [vmem:[%s27839_s1 + $0x520] ss:$16 sps:$4 sm:$0xff]  }
 0x21a   :  { %7711 = vmatprep.subr.bf16.mxu1 %v18813_v57  ;;  %v18883_v57 = vld [vmem:[%s27839_s1 + $0x720] ss:$16 sps:$4 sm:$0xff]  }
 0x21c   :  { %7671 = vmatpush1.bf16.msra.mxu0 %v18808_v58  ;;  %v18888_v58 = vld [vmem:[%s27839_s1 + $0x504] ss:$16 sps:$4 sm:$0xff]  }
 0x21d   :  { %7712 = vmatpush1.bf16.msra.mxu1 %v18811_v59  ;;  %7672 = vmatprep.subr.bf16.mxu0 %v18816_v60  ;;  %v18891_v59 = vld [vmem:[%s27839_s1 + $0x704] ss:$16 sps:$4 sm:$0xff]   ;;  %v18886_v60 = vld [vmem:[%s27839_s1 + $0x500] ss:$16 sps:$4 sm:$0xff]  }
 0x21e   :  { %7713 = vmatprep.subr.bf16.mxu1 %v18819_v61  ;;  %v18889_v61 = vld [vmem:[%s27839_s1 + $0x700] ss:$16 sps:$4 sm:$0xff]  }
 0x220   :  { %7673 = vmatpush1.bf16.msra.mxu0 %v18814_v62  ;;  %v18895_v62 = vld [vmem:[%s27839_s1 + $0x8e4] ss:$16 sps:$4 sm:$0xff]  }
 0x221   :  { %7714 = vmatpush1.bf16.msra.mxu1 %v18817_v63  ;;  %7674 = vmatprep.subr.bf16.mxu0 %v18822_v0  ;;  %v18898_v63 = vld [vmem:[%s27839_s1 + $0xae4] ss:$16 sps:$4 sm:$0xff]   ;;  %v24813_v0 = vpack.c.bf16 %v24676_v12, %v24676_v12 }
 0x222   :  { %7715 = vmatprep.subr.bf16.mxu1 %v18825_v1  ;;  %v18893_v1 = vld [vmem:[%s27839_s1 + $0x8e0] ss:$16 sps:$4 sm:$0xff]  }
 0x224   :  { %7675 = vmatpush1.bf16.msra.mxu0 %v18820_v2  ;;  %v24820_v2 = vpack.c.bf16 %v24690_v19, %v24690_v19  ;;  %v18905_v19 = vld [vmem:[%s27839_s1 + $0x8a0] ss:$16 sps:$4 sm:$0xff]  }
 0x225   :  { %7716 = vmatpush1.bf16.msra.mxu1 %v18823_v3  ;;  %7676 = vmatprep.subr.bf16.mxu0 %v18828_v4  ;;  %v18896_v3 = vld [vmem:[%s27839_s1 + $0xae0] ss:$16 sps:$4 sm:$0xff]   ;;  %v18901_v4 = vld [vmem:[%s27839_s1 + $0x8c4] ss:$16 sps:$4 sm:$0xff]  }
 0x226   :  { %7717 = vmatprep.subr.bf16.mxu1 %v18831_v5  ;;  %v1935_v5 = vld [vmem:[%s27838_s0 + $0x10] sm:$0xff] }
 0x228   :  { %7677 = vmatpush1.bf16.msra.mxu0 %v18826_v6  ;;  %v18904_v6 = vld [vmem:[%s27839_s1 + $0xac4] ss:$16 sps:$4 sm:$0xff]  }
 0x229   :  { %7718 = vmatpush1.bf16.msra.mxu1 %v18829_v7  ;;  %7678 = vmatprep.subr.bf16.mxu0 %v18834_v8  ;;  %v24835_v7 = vrot.slane %v1935_v5, %v24515_v17  ;;  %v1983_v8 = vcombine.high %v1935_v5, %v1935_v5  ;;  %v18968_v5 = vld [vmem:[%s27839_s1 + $0xb60] ss:$16 sps:$4 sm:$0xff]  }
 0x22a   :  { %7719 = vmatprep.subr.bf16.mxu1 %v18837_v9  ;;  %v18899_v9 = vld [vmem:[%s27839_s1 + $0x8c0] ss:$16 sps:$4 sm:$0xff]  }
 0x22b   :  { %v1998_v12 = vcombine.high %v24835_v7, %v24835_v7  ;;  %v24848_v13 = vrot.slane %v1983_v8, %v24515_v17  ;;  %v18976_v8 = vld [vmem:[%s27839_s1 + $0xb44] ss:$16 sps:$4 sm:$0xff]  }
 0x22c   :  { %7679 = vmatpush1.bf16.msra.mxu0 %v18832_v14  ;;  %v18907_v14 = vld [vmem:[%s27839_s1 + $0x8a4] ss:$16 sps:$4 sm:$0xff]  }
 0x22d   :  { %7720 = vmatpush1.bf16.msra.mxu1 %v18835_v15  ;;  %7680 = vmatprep.subr.bf16.mxu0 %v18840_v16  ;;  %v18910_v15 = vld [vmem:[%s27839_s1 + $0xaa4] ss:$16 sps:$4 sm:$0xff]   ;;  %v24856_v16 = vpack.c.bf16 %v1998_v12, %v1998_v12  ;;  %v1999_v18 = vcombine.high %v24848_v13, %v24848_v13  ;;  %v18974_v12 = vld [vmem:[%s27839_s1 + $0xb40] ss:$16 sps:$4 sm:$0xff]  }
 0x22e   :  { %7721 = vmatprep.subr.bf16.mxu1 %v18843_v20  ;;  %v18908_v20 = vld [vmem:[%s27839_s1 + $0xaa0] ss:$16 sps:$4 sm:$0xff]  }
 0x22f   :  { %v24867_v22 = vpack.c.bf16 %v1999_v18, %v1999_v18 }
 0x230   :  { %7681 = vmatpush1.bf16.msra.mxu0 %v18838_v23  ;;  %v18913_v23 = vld [vmem:[%s27839_s1 + $0x884] ss:$16 sps:$4 sm:$0xff]  }
 0x231   :  { %7722 = vmatpush1.bf16.msra.mxu1 %v18841_v24  ;;  %7682 = vmatprep.subr.bf16.mxu0 %v18846_v25  ;;  %v18916_v24 = vld [vmem:[%s27839_s1 + $0xa84] ss:$16 sps:$4 sm:$0xff]   ;;  %v18911_v25 = vld [vmem:[%s27839_s1 + $0x880] ss:$16 sps:$4 sm:$0xff]  }
 0x232   :  { %7723 = vmatprep.subr.bf16.mxu1 %v18849_v27  ;;  %v18914_v27 = vld [vmem:[%s27839_s1 + $0xa80] ss:$16 sps:$4 sm:$0xff]  }
 0x234   :  { %7683 = vmatpush2.bf16.msra.mxu0 %v18844_v28  ;;  %v18919_v28 = vld [vmem:[%s27839_s1 + $0x864] ss:$16 sps:$4 sm:$0xff]  }
 0x235   :  { %7724 = vmatpush2.bf16.msra.mxu1 %v18847_v29  ;;  %7684 = vmatprep.subr.bf16.mxu0 %v18852_v31  ;;  %v18922_v29 = vld [vmem:[%s27839_s1 + $0xa64] ss:$16 sps:$4 sm:$0xff]   ;;  %v18917_v31 = vld [vmem:[%s27839_s1 + $0x860] ss:$16 sps:$4 sm:$0xff]  }
 0x236   :  { %7725 = vmatprep.subr.bf16.mxu1 %v18855_v32  ;;  %v18920_v32 = vld [vmem:[%s27839_s1 + $0xa60] ss:$16 sps:$4 sm:$0xff]  }
 0x238   :  { %7685 = vmatpush2.bf16.msra.mxu0 %v18850_v33  ;;  %v18925_v33 = vld [vmem:[%s27839_s1 + $0x844] ss:$16 sps:$4 sm:$0xff]  }
 0x239   :  { %7726 = vmatpush2.bf16.msra.mxu1 %v18853_v34  ;;  %7686 = vmatprep.subr.bf16.mxu0 %v18858_v36  ;;  %v18928_v34 = vld [vmem:[%s27839_s1 + $0xa44] ss:$16 sps:$4 sm:$0xff]   ;;  %v18923_v36 = vld [vmem:[%s27839_s1 + $0x840] ss:$16 sps:$4 sm:$0xff]  }
 0x23a   :  { %7727 = vmatprep.subr.bf16.mxu1 %v18861_v37  ;;  %v18926_v37 = vld [vmem:[%s27839_s1 + $0xa40] ss:$16 sps:$4 sm:$0xff]  }
 0x23c   :  { %7687 = vmatpush2.bf16.msra.mxu0 %v18856_v38  ;;  %v18931_v38 = vld [vmem:[%s27839_s1 + $0x824] ss:$16 sps:$4 sm:$0xff]  }
 0x23d   :  { %7728 = vmatpush2.bf16.msra.mxu1 %v18859_v39  ;;  %7688 = vmatprep.subr.bf16.mxu0 %v18864_v40  ;;  %v18934_v39 = vld [vmem:[%s27839_s1 + $0xa24] ss:$16 sps:$4 sm:$0xff]   ;;  %v18929_v40 = vld [vmem:[%s27839_s1 + $0x820] ss:$16 sps:$4 sm:$0xff]  }
 0x23e   :  { %7729 = vmatprep.subr.bf16.mxu1 %v18867_v41  ;;  %v18932_v41 = vld [vmem:[%s27839_s1 + $0xa20] ss:$16 sps:$4 sm:$0xff]  }
 0x240   :  { %7689 = vmatpush2.bf16.msra.mxu0 %v18862_v42  ;;  %v18937_v42 = vld [vmem:[%s27839_s1 + $0x804] ss:$16 sps:$4 sm:$0xff]  }
 0x241   :  { %7730 = vmatpush2.bf16.msra.mxu1 %v18865_v43  ;;  %7690 = vmatprep.subr.bf16.mxu0 %v18870_v44  ;;  %v18940_v43 = vld [vmem:[%s27839_s1 + $0xa04] ss:$16 sps:$4 sm:$0xff]   ;;  %v18935_v44 = vld [vmem:[%s27839_s1 + $0x800] ss:$16 sps:$4 sm:$0xff]  }
 0x242   :  { %7731 = vmatprep.subr.bf16.mxu1 %v18873_v45  ;;  %v18938_v45 = vld [vmem:[%s27839_s1 + $0xa00] ss:$16 sps:$4 sm:$0xff]  }
 0x244   :  { %7691 = vmatpush2.bf16.msra.mxu0 %v18868_v46  ;;  %v18943_v46 = vld [vmem:[%s27839_s1 + $0x9e4] ss:$16 sps:$4 sm:$0xff]  }
 0x245   :  { %7732 = vmatpush2.bf16.msra.mxu1 %v18871_v47  ;;  %7692 = vmatprep.subr.bf16.mxu0 %v18876_v50  ;;  %v18946_v47 = vld [vmem:[%s27839_s1 + $0xbe4] ss:$16 sps:$4 sm:$0xff]   ;;  %v18941_v50 = vld [vmem:[%s27839_s1 + $0x9e0] ss:$16 sps:$4 sm:$0xff]  }
 0x246   :  { %7733 = vmatprep.subr.bf16.mxu1 %v18879_v51  ;;  %v18944_v51 = vld [vmem:[%s27839_s1 + $0xbe0] ss:$16 sps:$4 sm:$0xff]  }
 0x248   :  { %7693 = vmatpush2.bf16.msra.mxu0 %v18874_v52  ;;  %v18949_v52 = vld [vmem:[%s27839_s1 + $0x9c4] ss:$16 sps:$4 sm:$0xff]  }
 0x249   :  { %7734 = vmatpush2.bf16.msra.mxu1 %v18877_v53  ;;  %7694 = vmatprep.subr.bf16.mxu0 %v18882_v54  ;;  %v18952_v53 = vld [vmem:[%s27839_s1 + $0xbc4] ss:$16 sps:$4 sm:$0xff]   ;;  %v18947_v54 = vld [vmem:[%s27839_s1 + $0x9c0] ss:$16 sps:$4 sm:$0xff]  }
 0x24a   :  { %7735 = vmatprep.subr.bf16.mxu1 %v18885_v55  ;;  %v18950_v55 = vld [vmem:[%s27839_s1 + $0xbc0] ss:$16 sps:$4 sm:$0xff]  }
 0x24c   :  { %7695 = vmatpush2.bf16.msra.mxu0 %v18880_v56  ;;  %v18955_v56 = vld [vmem:[%s27839_s1 + $0x9a4] ss:$16 sps:$4 sm:$0xff]  }
 0x24d   :  { %7736 = vmatpush2.bf16.msra.mxu1 %v18883_v57  ;;  %7696 = vmatprep.subr.bf16.mxu0 %v18888_v58  ;;  %v18958_v57 = vld [vmem:[%s27839_s1 + $0xba4] ss:$16 sps:$4 sm:$0xff]   ;;  %v18953_v58 = vld [vmem:[%s27839_s1 + $0x9a0] ss:$16 sps:$4 sm:$0xff]  }
 0x24e   :  { %7737 = vmatprep.subr.bf16.mxu1 %v18891_v59  ;;  %v18956_v59 = vld [vmem:[%s27839_s1 + $0xba0] ss:$16 sps:$4 sm:$0xff]  }
 0x250   :  { %7697 = vmatpush2.bf16.msra.mxu0 %v18886_v60  ;;  %v18961_v60 = vld [vmem:[%s27839_s1 + $0x984] ss:$16 sps:$4 sm:$0xff]  }
 0x251   :  { %7738 = vmatpush2.bf16.msra.mxu1 %v18889_v61  ;;  %7748 = vmatprep.subr.bf16.mxu0 %v18895_v62  ;;  %v18964_v61 = vld [vmem:[%s27839_s1 + $0xb84] ss:$16 sps:$4 sm:$0xff]   ;;  %v18959_v62 = vld [vmem:[%s27839_s1 + $0x980] ss:$16 sps:$4 sm:$0xff]  }
 0x252   :  { %7789 = vmatprep.subr.bf16.mxu1 %v18898_v63  ;;  %v18962_v63 = vld [vmem:[%s27839_s1 + $0xb80] ss:$16 sps:$4 sm:$0xff]  }
 0x253   :  { %7699 = vmatmul.mubr.bf16.vlgmr.msra.gmra.mxu0 %v24813_v0 }
 0x254   :  { %7740 = vmatmul.mubr.bf16.vlgmr.msra.gmra.mxu1 %v24820_v2  ;;  %7749 = vmatpush1.bf16.msra.mxu0 %v18893_v1  ;;  %v18967_v1 = vld [vmem:[%s27839_s1 + $0x964] ss:$16 sps:$4 sm:$0xff]  }
 0x255   :  { %7790 = vmatpush1.bf16.msra.mxu1 %v18896_v3  ;;  %7750 = vmatprep.subr.bf16.mxu0 %v18901_v4  ;;  %v18970_v3 = vld [vmem:[%s27839_s1 + $0xb64] ss:$16 sps:$4 sm:$0xff]   ;;  %v18965_v4 = vld [vmem:[%s27839_s1 + $0x960] ss:$16 sps:$4 sm:$0xff]  }
 0x256   :  { %7791 = vmatprep.subr.bf16.mxu1 %v18904_v6  ;;  %7780 = vmatprep.mubr.bf16.mxu0 %v24856_v16  ;;  %v18973_v6 = vld [vmem:[%s27839_s1 + $0x944] ss:$16 sps:$4 sm:$0xff]  }
 0x257   :  { %7821 = vmatprep.mubr.bf16.mxu1 %v24867_v22 }
 0x258   :  { %7751 = vmatpush1.bf16.msra.mxu0 %v18899_v9  ;;  %v18971_v9 = vld [vmem:[%s27839_s1 + $0x940] ss:$16 sps:$4 sm:$0xff]  }
 0x259   :  { %7792 = vmatpush1.bf16.msra.mxu1 %v18902_v10  ;;  %7752 = vmatprep.subr.bf16.mxu0 %v18907_v14  ;;  %v1936_v10 = vld [vmem:[%s27838_s0 + $0x18] sm:$0xff]  ;;  %v18979_v14 = vld [vmem:[%s27839_s1 + $0x924] ss:$16 sps:$4 sm:$0xff]  }
 0x25a   :  { %7793 = vmatprep.subr.bf16.mxu1 %v18910_v15  ;;  %v18982_v15 = vld [vmem:[%s27839_s1 + $0xb24] ss:$16 sps:$4 sm:$0xff]   ;;  %v2000_v18 = vcombine.high %v1936_v10, %v1936_v10 }
 0x25c   :  { %7753 = vmatpush1.bf16.msra.mxu0 %v18905_v19  ;;  %v18977_v19 = vld [vmem:[%s27839_s1 + $0x920] ss:$16 sps:$4 sm:$0xff]  }
 0x25d   :  { %7794 = vmatpush1.bf16.msra.mxu1 %v18908_v20  ;;  %7754 = vmatprep.subr.bf16.mxu0 %v18913_v23  ;;  %v18980_v20 = vld [vmem:[%s27839_s1 + $0xb20] ss:$16 sps:$4 sm:$0xff]   ;;  %v18985_v23 = vld [vmem:[%s27839_s1 + $0x904] ss:$16 sps:$4 sm:$0xff]  }
 0x25e   :  { %7795 = vmatprep.subr.bf16.mxu1 %v18916_v24  ;;  %v18988_v24 = vld [vmem:[%s27839_s1 + $0xb04] ss:$16 sps:$4 sm:$0xff]  }
 0x260   :  { %7755 = vmatpush1.bf16.msra.mxu0 %v18911_v25  ;;  %v25024_v25 = vrot.slane %v1936_v10, %v24515_v17  ;;  %v19043_v10 = vld [vmem:[%s27839_s1 + $0xfe4] ss:$16 sps:$4 sm:$0xff]  }
 0x261   :  { %7796 = vmatpush1.bf16.msra.mxu1 %v18914_v27  ;;  %7756 = vmatprep.subr.bf16.mxu0 %v18919_v28  ;;  %v25027_v27 = vrot.slane %v2000_v18, %v24515_v17  ;;  %v18983_v28 = vld [vmem:[%s27839_s1 + $0x900] ss:$16 sps:$4 sm:$0xff]   ;;  %v19049_v18 = vld [vmem:[%s27839_s1 + $0xfc4] ss:$16 sps:$4 sm:$0xff]  }
 0x262   :  { %7797 = vmatprep.subr.bf16.mxu1 %v18922_v29  ;;  %v18986_v29 = vld [vmem:[%s27839_s1 + $0xb00] ss:$16 sps:$4 sm:$0xff]  }
 0x264   :  { %7757 = vmatpush1.bf16.msra.mxu0 %v18917_v31  ;;  %v18992_v31 = vld [vmem:[%s27839_s1 + $0xce4] ss:$16 sps:$4 sm:$0xff]  }
 0x265   :  { %7798 = vmatpush1.bf16.msra.mxu1 %v18920_v32  ;;  %7758 = vmatprep.subr.bf16.mxu0 %v18925_v33  ;;  %v18995_v32 = vld [vmem:[%s27839_s1 + $0xee4] ss:$16 sps:$4 sm:$0xff]   ;;  %v2015_v33 = vcombine.high %v25024_v25, %v25024_v25 }
 0x266   :  { %7799 = vmatprep.subr.bf16.mxu1 %v18928_v34  ;;  %v25045_v34 = vpack.c.bf16 %v24835_v7, %v24835_v7  ;;  %v18998_v7 = vld [vmem:[%s27839_s1 + $0xcc4] ss:$16 sps:$4 sm:$0xff]  }
 0x268   :  { %7759 = vmatpush1.bf16.msra.mxu0 %v18923_v36  ;;  %v2016_v36 = vcombine.high %v25027_v27, %v25027_v27 }
 0x269   :  { %7800 = vmatpush1.bf16.msra.mxu1 %v18926_v37  ;;  %7760 = vmatprep.subr.bf16.mxu0 %v18931_v38  ;;  %v25051_v37 = vpack.c.bf16 %v24848_v13, %v24848_v13  ;;  %v18990_v38 = vld [vmem:[%s27839_s1 + $0xce0] ss:$16 sps:$4 sm:$0xff]   ;;  %v19001_v13 = vld [vmem:[%s27839_s1 + $0xec4] ss:$16 sps:$4 sm:$0xff]  }
 0x26a   :  { %7801 = vmatprep.subr.bf16.mxu1 %v18934_v39  ;;  %v18993_v39 = vld [vmem:[%s27839_s1 + $0xee0] ss:$16 sps:$4 sm:$0xff]  }
 0x26c   :  { %7761 = vmatpush1.bf16.msra.mxu0 %v18929_v40  ;;  %v25065_v40 = vpack.c.bf16 %v2015_v33, %v2015_v33  ;;  %v19056_v33 = vld [vmem:[%s27839_s1 + $0xd80] ss:$16 sps:$4 sm:$0xff]  }
 0x26d   :  { %7802 = vmatpush1.bf16.msra.mxu1 %v18932_v41  ;;  %7762 = vmatprep.subr.bf16.mxu0 %v18937_v42  ;;  %v25068_v41 = vpack.c.bf16 %v2016_v36, %v2016_v36  ;;  %v18996_v42 = vld [vmem:[%s27839_s1 + $0xcc0] ss:$16 sps:$4 sm:$0xff]  }
 0x26e   :  { %7803 = vmatprep.subr.bf16.mxu1 %v18940_v43  ;;  %v18999_v43 = vld [vmem:[%s27839_s1 + $0xec0] ss:$16 sps:$4 sm:$0xff]  }
 0x26f   :  { %v19059_v36 = vld [vmem:[%s27839_s1 + $0xf80] ss:$16 sps:$4 sm:$0xff]  }
 0x270   :  { %7763 = vmatpush1.bf16.msra.mxu0 %v18935_v44  ;;  %v19004_v44 = vld [vmem:[%s27839_s1 + $0xca4] ss:$16 sps:$4 sm:$0xff]  }
 0x271   :  { %7804 = vmatpush1.bf16.msra.mxu1 %v18938_v45  ;;  %7764 = vmatprep.subr.bf16.mxu0 %v18943_v46  ;;  %v19007_v45 = vld [vmem:[%s27839_s1 + $0xea4] ss:$16 sps:$4 sm:$0xff]   ;;  %v19002_v46 = vld [vmem:[%s27839_s1 + $0xca0] ss:$16 sps:$4 sm:$0xff]  }
 0x272   :  { %7805 = vmatprep.subr.bf16.mxu1 %v18946_v47  ;;  %v19005_v47 = vld [vmem:[%s27839_s1 + $0xea0] ss:$16 sps:$4 sm:$0xff]  }
 0x274   :  { %7765 = vmatpush2.bf16.msra.mxu0 %v18941_v50  ;;  %v19010_v50 = vld [vmem:[%s27839_s1 + $0xc84] ss:$16 sps:$4 sm:$0xff]  }
 0x275   :  { %7806 = vmatpush2.bf16.msra.mxu1 %v18944_v51  ;;  %7766 = vmatprep.subr.bf16.mxu0 %v18949_v52  ;;  %v19013_v51 = vld [vmem:[%s27839_s1 + $0xe84] ss:$16 sps:$4 sm:$0xff]   ;;  %v19008_v52 = vld [vmem:[%s27839_s1 + $0xc80] ss:$16 sps:$4 sm:$0xff]  }
 0x276   :  { %7807 = vmatprep.subr.bf16.mxu1 %v18952_v53  ;;  %v19011_v53 = vld [vmem:[%s27839_s1 + $0xe80] ss:$16 sps:$4 sm:$0xff]  }
 0x278   :  { %7767 = vmatpush2.bf16.msra.mxu0 %v18947_v54  ;;  %v19016_v54 = vld [vmem:[%s27839_s1 + $0xc64] ss:$16 sps:$4 sm:$0xff]  }
 0x279   :  { %7808 = vmatpush2.bf16.msra.mxu1 %v18950_v55  ;;  %7768 = vmatprep.subr.bf16.mxu0 %v18955_v56  ;;  %v19019_v55 = vld [vmem:[%s27839_s1 + $0xe64] ss:$16 sps:$4 sm:$0xff]   ;;  %v19014_v56 = vld [vmem:[%s27839_s1 + $0xc60] ss:$16 sps:$4 sm:$0xff]  }
 0x27a   :  { %7809 = vmatprep.subr.bf16.mxu1 %v18958_v57  ;;  %v19017_v57 = vld [vmem:[%s27839_s1 + $0xe60] ss:$16 sps:$4 sm:$0xff]  }
 0x27c   :  { %7769 = vmatpush2.bf16.msra.mxu0 %v18953_v58  ;;  %v19022_v58 = vld [vmem:[%s27839_s1 + $0xc44] ss:$16 sps:$4 sm:$0xff]  }
 0x27d   :  { %7810 = vmatpush2.bf16.msra.mxu1 %v18956_v59  ;;  %7770 = vmatprep.subr.bf16.mxu0 %v18961_v60  ;;  %v19025_v59 = vld [vmem:[%s27839_s1 + $0xe44] ss:$16 sps:$4 sm:$0xff]   ;;  %v19020_v60 = vld [vmem:[%s27839_s1 + $0xc40] ss:$16 sps:$4 sm:$0xff]  }
 0x27e   :  { %7811 = vmatprep.subr.bf16.mxu1 %v18964_v61  ;;  %v19023_v61 = vld [vmem:[%s27839_s1 + $0xe40] ss:$16 sps:$4 sm:$0xff]  }
 0x280   :  { %7771 = vmatpush2.bf16.msra.mxu0 %v18959_v62  ;;  %v19028_v62 = vld [vmem:[%s27839_s1 + $0xc24] ss:$16 sps:$4 sm:$0xff]  }
 0x281   :  { %7812 = vmatpush2.bf16.msra.mxu1 %v18962_v63  ;;  %7772 = vmatprep.subr.bf16.mxu0 %v18967_v1  ;;  %v19031_v63 = vld [vmem:[%s27839_s1 + $0xe24] ss:$16 sps:$4 sm:$0xff]   ;;  %v19026_v1 = vld [vmem:[%s27839_s1 + $0xc20] ss:$16 sps:$4 sm:$0xff]  }
 0x282   :  { %7813 = vmatprep.subr.bf16.mxu1 %v18970_v3  ;;  %v19029_v3 = vld [vmem:[%s27839_s1 + $0xe20] ss:$16 sps:$4 sm:$0xff]  }
 0x284   :  { %7773 = vmatpush2.bf16.msra.mxu0 %v18965_v4  ;;  %v19034_v4 = vld [vmem:[%s27839_s1 + $0xc04] ss:$16 sps:$4 sm:$0xff]  }
 0x285   :  { %7814 = vmatpush2.bf16.msra.mxu1 %v18968_v5  ;;  %7774 = vmatprep.subr.bf16.mxu0 %v18973_v6  ;;  %v19037_v5 = vld [vmem:[%s27839_s1 + $0xe04] ss:$16 sps:$4 sm:$0xff]   ;;  %v19032_v6 = vld [vmem:[%s27839_s1 + $0xc00] ss:$16 sps:$4 sm:$0xff]  }
 0x286   :  { %7815 = vmatprep.subr.bf16.mxu1 %v18976_v8  ;;  %v19035_v8 = vld [vmem:[%s27839_s1 + $0xe00] ss:$16 sps:$4 sm:$0xff]  }
 0x288   :  { %7775 = vmatpush2.bf16.msra.mxu0 %v18971_v9  ;;  %v19040_v9 = vld [vmem:[%s27839_s1 + $0xde4] ss:$16 sps:$4 sm:$0xff]  }
 0x289   :  { %7816 = vmatpush2.bf16.msra.mxu1 %v18974_v12  ;;  %7776 = vmatprep.subr.bf16.mxu0 %v18979_v14  ;;  %v19038_v12 = vld [vmem:[%s27839_s1 + $0xde0] ss:$16 sps:$4 sm:$0xff]  }
 0x28a   :  { %7817 = vmatprep.subr.bf16.mxu1 %v18982_v15  ;;  %v19041_v14 = vld [vmem:[%s27839_s1 + $0xfe0] ss:$16 sps:$4 sm:$0xff]   ;;  %v19046_v15 = vld [vmem:[%s27839_s1 + $0xdc4] ss:$16 sps:$4 sm:$0xff]  }
 0x28c   :  { %7777 = vmatpush2.bf16.msra.mxu0 %v18977_v19  ;;  %v19044_v19 = vld [vmem:[%s27839_s1 + $0xdc0] ss:$16 sps:$4 sm:$0xff]  }
 0x28d   :  { %7818 = vmatpush2.bf16.msra.mxu1 %v18980_v20  ;;  %7778 = vmatprep.subr.bf16.mxu0 %v18985_v23  ;;  %v19047_v20 = vld [vmem:[%s27839_s1 + $0xfc0] ss:$16 sps:$4 sm:$0xff]   ;;  %v19052_v23 = vld [vmem:[%s27839_s1 + $0xda4] ss:$16 sps:$4 sm:$0xff]  }
 0x28e   :  { %7819 = vmatprep.subr.bf16.mxu1 %v18988_v24  ;;  %v19055_v24 = vld [vmem:[%s27839_s1 + $0xfa4] ss:$16 sps:$4 sm:$0xff]  }
 0x290   :  { %7779 = vmatpush2.bf16.msra.mxu0 %v18983_v28  ;;  %v19050_v28 = vld [vmem:[%s27839_s1 + $0xda0] ss:$16 sps:$4 sm:$0xff]  }
 0x291   :  { %7820 = vmatpush2.bf16.msra.mxu1 %v18986_v29  ;;  %7830 = vmatprep.subr.bf16.mxu0 %v18992_v31  ;;  %v19053_v29 = vld [vmem:[%s27839_s1 + $0xfa0] ss:$16 sps:$4 sm:$0xff]   ;;  %v19058_v31 = vld [vmem:[%s27839_s1 + $0xd84] ss:$16 sps:$4 sm:$0xff]  }
 0x292   :  { %7871 = vmatprep.subr.bf16.mxu1 %v18995_v32  ;;  %v19061_v32 = vld [vmem:[%s27839_s1 + $0xf84] ss:$16 sps:$4 sm:$0xff]  }
 0x293   :  { %7781 = vmatmul.mubr.bf16.vlgmr.msra.gmra.mxu0 %v25045_v34 }
 0x294   :  { %7822 = vmatmul.mubr.bf16.vlgmr.msra.gmra.mxu1 %v25051_v37  ;;  %7831 = vmatpush1.bf16.msra.mxu0 %v18990_v38  ;;  %v19064_v38 = vld [vmem:[%s27839_s1 + $0xd64] ss:$16 sps:$4 sm:$0xff]  }
 0x295   :  { %7872 = vmatpush1.bf16.msra.mxu1 %v18993_v39  ;;  %7832 = vmatprep.subr.bf16.mxu0 %v18998_v7  ;;  %v19067_v39 = vld [vmem:[%s27839_s1 + $0xf64] ss:$16 sps:$4 sm:$0xff]   ;;  %v19062_v7 = vld [vmem:[%s27839_s1 + $0xd60] ss:$16 sps:$4 sm:$0xff]  }
 0x296   :  { %7873 = vmatprep.subr.bf16.mxu1 %v19001_v13  ;;  %7862 = vmatprep.mubr.bf16.mxu0 %v25065_v40  ;;  %v19065_v13 = vld [vmem:[%s27839_s1 + $0xf60] ss:$16 sps:$4 sm:$0xff]  }
 0x297   :  { %7903 = vmatprep.mubr.bf16.mxu1 %v25068_v41 }
 0x298   :  { %7833 = vmatpush1.bf16.msra.mxu0 %v18996_v42  ;;  %v19070_v42 = vld [vmem:[%s27839_s1 + $0xd44] ss:$16 sps:$4 sm:$0xff]  }
 0x299   :  { %7874 = vmatpush1.bf16.msra.mxu1 %v18999_v43  ;;  %7834 = vmatprep.subr.bf16.mxu0 %v19004_v44  ;;  %v19073_v43 = vld [vmem:[%s27839_s1 + $0xf44] ss:$16 sps:$4 sm:$0xff]   ;;  %v19068_v44 = vld [vmem:[%s27839_s1 + $0xd40] ss:$16 sps:$4 sm:$0xff]  }
 0x29a   :  { %7875 = vmatprep.subr.bf16.mxu1 %v19007_v45  ;;  %v19071_v45 = vld [vmem:[%s27839_s1 + $0xf40] ss:$16 sps:$4 sm:$0xff]  }
 0x29c   :  { %7835 = vmatpush1.bf16.msra.mxu0 %v19002_v46  ;;  %v1937_v46 = vld [vmem:[%s27838_s0 + $0x20] sm:$0xff] }
 0x29d   :  { %7876 = vmatpush1.bf16.msra.mxu1 %v19005_v47  ;;  %7836 = vmatprep.subr.bf16.mxu0 %v19010_v50  ;;  %v19076_v47 = vld [vmem:[%s27839_s1 + $0xd24] ss:$16 sps:$4 sm:$0xff]  }
 0x29e   :  { %7877 = vmatprep.subr.bf16.mxu1 %v19013_v51  ;;  %v19079_v50 = vld [vmem:[%s27839_s1 + $0xf24] ss:$16 sps:$4 sm:$0xff]   ;;  %v2017_v51 = vcombine.high %v1937_v46, %v1937_v46 }
 0x2a0   :  { %7837 = vmatpush1.bf16.msra.mxu0 %v19008_v52  ;;  %v19074_v52 = vld [vmem:[%s27839_s1 + $0xd20] ss:$16 sps:$4 sm:$0xff]  }
 0x2a1   :  { %7878 = vmatpush1.bf16.msra.mxu1 %v19011_v53  ;;  %7838 = vmatprep.subr.bf16.mxu0 %v19016_v54  ;;  %v19077_v53 = vld [vmem:[%s27839_s1 + $0xf20] ss:$16 sps:$4 sm:$0xff]   ;;  %v19082_v54 = vld [vmem:[%s27839_s1 + $0xd04] ss:$16 sps:$4 sm:$0xff]  }
 0x2a2   :  { %7879 = vmatprep.subr.bf16.mxu1 %v19019_v55  ;;  %v19085_v55 = vld [vmem:[%s27839_s1 + $0xf04] ss:$16 sps:$4 sm:$0xff]  }
 0x2a4   :  { %7839 = vmatpush1.bf16.msra.mxu0 %v19014_v56  ;;  %v25245_v56 = vrot.slane %v1937_v46, %v24515_v17  ;;  %v19110_v46 = vld [vmem:[%s27839_s1 + $0x1284] ss:$16 sps:$4 sm:$0xff]  }
 0x2a5   :  { %7880 = vmatpush1.bf16.msra.mxu1 %v19017_v57  ;;  %7840 = vmatprep.subr.bf16.mxu0 %v19022_v58  ;;  %v19080_v57 = vld [vmem:[%s27839_s1 + $0xd00] ss:$16 sps:$4 sm:$0xff]   ;;  %v25251_v58 = vrot.slane %v2017_v51, %v24515_v17  ;;  %v19113_v51 = vld [vmem:[%s27839_s1 + $0x1064] ss:$16 sps:$4 sm:$0xff]  }
 0x2a6   :  { %7881 = vmatprep.subr.bf16.mxu1 %v19025_v59  ;;  %v19083_v59 = vld [vmem:[%s27839_s1 + $0xf00] ss:$16 sps:$4 sm:$0xff]  }
 0x2a8   :  { %7841 = vmatpush1.bf16.msra.mxu0 %v19020_v60  ;;  %v3035_v60 = vld [vmem:[%s27840_s2] sm:$0xf] }
 0x2a9   :  { %7882 = vmatpush1.bf16.msra.mxu1 %v19023_v61  ;;  %7842 = vmatprep.subr.bf16.mxu0 %v19028_v62  ;;  %v25260_v61 = vsub.s32 0, %v24497_v11  ;;  %v19089_v62 = vld [vmem:[%s27839_s1 + $0x10e4] ss:$16 sps:$4 sm:$0xff]  }
 0x2aa   :  { %7883 = vmatprep.subr.bf16.mxu1 %v19031_v63  ;;  %v19092_v63 = vld [vmem:[%s27839_s1 + $0x12e4] ss:$16 sps:$4 sm:$0xff]  }
 0x2ac   :  { %7843 = vmatpush1.bf16.msra.mxu0 %v19026_v1  ;;  %v25269_v1 = vsub.s32 1, %v24497_v11 }
 0x2ad   :  { %7884 = vmatpush1.bf16.msra.mxu1 %v19029_v3  ;;  %7844 = vmatprep.subr.bf16.mxu0 %v19034_v4  ;;  %v2032_v3 = vcombine.high %v25245_v56, %v25245_v56  ;;  %v25275_v4 = vpack.c.bf16 %v25024_v25, %v25024_v25  ;;  %v19095_v25 = vld [vmem:[%s27839_s1 + $0x10c4] ss:$16 sps:$4 sm:$0xff]  }
 0x2ae   :  { %7885 = vmatprep.subr.bf16.mxu1 %v19037_v5  ;;  %v2033_v5 = vcombine.high %v25251_v58, %v25251_v58 }
 0x2b0   :  { %7845 = vmatpush1.bf16.msra.mxu0 %v19032_v6  ;;  %v3040_v6 = vrot.slane %v3035_v60, %v25260_v61 }
 0x2b1   :  { %7886 = vmatpush1.bf16.msra.mxu1 %v19035_v8  ;;  %7846 = vmatprep.subr.bf16.mxu0 %v19040_v9  ;;  %v25282_v8 = vpack.c.bf16 %v25027_v27, %v25027_v27  ;;  %v19087_v9 = vld [vmem:[%s27839_s1 + $0x10e0] ss:$16 sps:$4 sm:$0xff]   ;;  %v19098_v27 = vld [vmem:[%s27839_s1 + $0x12c4] ss:$16 sps:$4 sm:$0xff]  }
 0x2b2   :  { %7887 = vmatprep.subr.bf16.mxu1 %v19043_v10  ;;  %v19090_v10 = vld [vmem:[%s27839_s1 + $0x12e0] ss:$16 sps:$4 sm:$0xff]  }
 0x2b4   :  { %7847 = vmatpush2.bf16.msra.mxu0 %v19038_v12  ;;  %v3044_v12 = vrot.slane %v3035_v60, %v25269_v1  ;;  %v19120_v60 = vld [vmem:[%s27839_s1 + $0x1240] ss:$16 sps:$4 sm:$0xff]  }
 0x2b5   :  { %7888 = vmatpush2.bf16.msra.mxu1 %v19041_v14  ;;  %7848 = vmatprep.subr.bf16.mxu0 %v19046_v15  ;;  %v25297_v14 = vpack.c.bf16 %v2032_v3, %v2032_v3  ;;  %v19128_v3 = vld [vmem:[%s27839_s1 + $0x1224] ss:$16 sps:$4 sm:$0xff]  }
 0x2b6   :  { %7889 = vmatprep.subr.bf16.mxu1 %v19049_v18  ;;  %v19093_v18 = vld [vmem:[%s27839_s1 + $0x10c0] ss:$16 sps:$4 sm:$0xff]  }
 0x2b8   :  { %7849 = vmatpush2.bf16.msra.mxu0 %v19044_v19  ;;  %v25303_v19 = vpack.c.bf16 %v2033_v5, %v2033_v5  ;;  %v19126_v5 = vld [vmem:[%s27839_s1 + $0x1220] ss:$16 sps:$4 sm:$0xff]  }
 0x2b9   :  { %7890 = vmatpush2.bf16.msra.mxu1 %v19047_v20  ;;  %7850 = vmatprep.subr.bf16.mxu0 %v19052_v23 }
 0x2ba   :  { %7891 = vmatprep.subr.bf16.mxu1 %v19055_v24  ;;  %v19096_v24 = vld [vmem:[%s27839_s1 + $0x12c0] ss:$16 sps:$4 sm:$0xff]  }
 0x2bc   :  { %7851 = vmatpush2.bf16.msra.mxu0 %v19050_v28 }
 0x2bd   :  { %7892 = vmatpush2.bf16.msra.mxu1 %v19053_v29  ;;  %7852 = vmatprep.subr.bf16.mxu0 %v19058_v31  ;;  %v19101_v29 = vld [vmem:[%s27839_s1 + $0x10a4] ss:$16 sps:$4 sm:$0xff]  }
 0x2be   :  { %7893 = vmatprep.subr.bf16.mxu1 %v19061_v32 }
 0x2c0   :  { %7853 = vmatpush2.bf16.msra.mxu0 %v19056_v33 }
 0x2c1   :  { %7894 = vmatpush2.bf16.msra.mxu1 %v19059_v36  ;;  %7854 = vmatprep.subr.bf16.mxu0 %v19064_v38  ;;  %v19104_v36 = vld [vmem:[%s27839_s1 + $0x12a4] ss:$16 sps:$4 sm:$0xff]  }
 0x2c2   :  { %7895 = vmatprep.subr.bf16.mxu1 %v19067_v39  ;;  %v19099_v39 = vld [vmem:[%s27839_s1 + $0x10a0] ss:$16 sps:$4 sm:$0xff]  }
 0x2c4   :  { %7855 = vmatpush2.bf16.msra.mxu0 %v19062_v7  ;;  %v19102_v7 = vld [vmem:[%s27839_s1 + $0x12a0] ss:$16 sps:$4 sm:$0xff]  }
 0x2c5   :  { %7896 = vmatpush2.bf16.msra.mxu1 %v19065_v13  ;;  %7856 = vmatprep.subr.bf16.mxu0 %v19070_v42  ;;  %v19107_v13 = vld [vmem:[%s27839_s1 + $0x1084] ss:$16 sps:$4 sm:$0xff]  }
 0x2c6   :  { %7897 = vmatprep.subr.bf16.mxu1 %v19073_v43 }
 0x2c8   :  { %7857 = vmatpush2.bf16.msra.mxu0 %v19068_v44 }
 0x2c9   :  { %7898 = vmatpush2.bf16.msra.mxu1 %v19071_v45  ;;  %7858 = vmatprep.subr.bf16.mxu0 %v19076_v47  ;;  %v19105_v47 = vld [vmem:[%s27839_s1 + $0x1080] ss:$16 sps:$4 sm:$0xff]  }
 0x2ca   :  { %7899 = vmatprep.subr.bf16.mxu1 %v19079_v50  ;;  %v19108_v50 = vld [vmem:[%s27839_s1 + $0x1280] ss:$16 sps:$4 sm:$0xff]  }
 0x2cc   :  { %7859 = vmatpush2.bf16.msra.mxu0 %v19074_v52  ;;  %v19111_v52 = vld [vmem:[%s27839_s1 + $0x1060] ss:$16 sps:$4 sm:$0xff]  }
 0x2cd   :  { %7900 = vmatpush2.bf16.msra.mxu1 %v19077_v53  ;;  %7860 = vmatprep.subr.bf16.mxu0 %v19082_v54  ;;  %v19116_v53 = vld [vmem:[%s27839_s1 + $0x1264] ss:$16 sps:$4 sm:$0xff]   ;;  %v19114_v54 = vld [vmem:[%s27839_s1 + $0x1260] ss:$16 sps:$4 sm:$0xff]  }
 0x2ce   :  { %7901 = vmatprep.subr.bf16.mxu1 %v19085_v55  ;;  %v19119_v55 = vld [vmem:[%s27839_s1 + $0x1044] ss:$16 sps:$4 sm:$0xff]  }
 0x2d0   :  { %7861 = vmatpush2.bf16.msra.mxu0 %v19080_v57  ;;  %v19117_v57 = vld [vmem:[%s27839_s1 + $0x1040] ss:$16 sps:$4 sm:$0xff]  }
 0x2d1   :  { %7902 = vmatpush2.bf16.msra.mxu1 %v19083_v59  ;;  %7912 = vmatprep.subr.bf16.mxu0 %v19089_v62  ;;  %v19122_v59 = vld [vmem:[%s27839_s1 + $0x1244] ss:$16 sps:$4 sm:$0xff]  }
 0x2d2   :  { %7953 = vmatprep.subr.bf16.mxu1 %v19092_v63  ;;  %v19125_v62 = vld [vmem:[%s27839_s1 + $0x1024] ss:$16 sps:$4 sm:$0xff]   ;;  %v19123_v63 = vld [vmem:[%s27839_s1 + $0x1020] ss:$16 sps:$4 sm:$0xff]  }
 0x2d3   :  { %v7618_v15 = vpop.f32.mrf.mxu0  ;;  %7863 = vmatmul.mubr.bf16.vlgmr.msra.gmra.mxu0 %v25275_v4 }
 0x2d4   :  { %v7619_v20 = vadd.f32 %v7618_v15, %v3040_v6  ;;  %v7659_v23 = vpop.f32.mrf.mxu1  ;;  %7904 = vmatmul.mubr.bf16.vlgmr.msra.gmra.mxu1 %v25282_v8  ;;  %7913 = vmatpush1.bf16.msra.mxu0 %v19087_v9  ;;  %v19131_v6 = vld [vmem:[%s27839_s1 + $0x1004] ss:$16 sps:$4 sm:$0xff]   ;;  %v19129_v9 = vld [vmem:[%s27839_s1 + $0x1000] ss:$16 sps:$4 sm:$0xff]  }
 0x2d5   :  { %7954 = vmatpush1.bf16.msra.mxu1 %v19090_v10  ;;  %v7620_v28 = vpop.f32.mrf.mxu0  ;;  %7914 = vmatprep.subr.bf16.mxu0 %v19095_v25  ;;  %v19134_v10 = vld [vmem:[%s27839_s1 + $0x1204] ss:$16 sps:$4 sm:$0xff]   ;;  %v19132_v25 = vld [vmem:[%s27839_s1 + $0x1200] ss:$16 sps:$4 sm:$0xff]  }
 0x2d6   :  { %v25312_v31 = vadd.f32 %v7659_v23, %v7619_v20  ;;  %v7621_v32 = vadd.f32 %v7620_v28, %v3044_v12  ;;  %v7661_v33 = vpop.f32.mrf.mxu1  ;;  %7955 = vmatprep.subr.bf16.mxu1 %v19098_v27  ;;  %7944 = vmatprep.mubr.bf16.mxu0 %v25297_v14  ;;  %v19137_v12 = vld [vmem:[%s27839_s1 + $0x11e4] ss:$16 sps:$4 sm:$0xff]   ;;  %v19135_v27 = vld [vmem:[%s27839_s1 + $0x11e0] ss:$16 sps:$4 sm:$0xff]  }
 0x2d7   :  { %v7622_v38 = vpop.f32.mrf.mxu0  ;;  %7985 = vmatprep.mubr.bf16.mxu1 %v25303_v19  ;;  %v19140_v15 = vld [vmem:[%s27839_s1 + $0x13e4] ss:$16 sps:$4 sm:$0xff]   ;;  %v19141_v23 = vld [vmem:[%s27839_s1 + $0x11c0] ss:$16 sps:$4 sm:$0xff]  }
 0x2d8   :  { %v25328_v42 = vadd.f32 %v7661_v33, %v7621_v32  ;;  %v7663_v43 = vpop.f32.mrf.mxu1  ;;  %7915 = vmatpush1.bf16.msra.mxu0 %v19093_v18  ;;  %v19138_v18 = vld [vmem:[%s27839_s1 + $0x13e0] ss:$16 sps:$4 sm:$0xff]   ;;  %v19143_v20 = vld [vmem:[%s27839_s1 + $0x11c4] ss:$16 sps:$4 sm:$0xff]  }
 0x2d9   :  { %7956 = vmatpush1.bf16.msra.mxu1 %v19096_v24  ;;  %v7623_v44 = vpop.f32.mrf.mxu0  ;;  %7916 = vmatprep.subr.bf16.mxu0 %v19101_v29  ;;  %v19146_v24 = vld [vmem:[%s27839_s1 + $0x13c4] ss:$16 sps:$4 sm:$0xff]   ;;  %v19144_v28 = vld [vmem:[%s27839_s1 + $0x13c0] ss:$16 sps:$4 sm:$0xff]  }
 0x2da   :  { %v7664_v45 = vpop.f32.mrf.mxu1  ;;  %7957 = vmatprep.subr.bf16.mxu1 %v19104_v36  ;;  %v19149_v29 = vld [vmem:[%s27839_s1 + $0x11a4] ss:$16 sps:$4 sm:$0xff]   ;;  %v19147_v32 = vld [vmem:[%s27839_s1 + $0x11a0] ss:$16 sps:$4 sm:$0xff]  }
 0x2db   :  { %v19152_v33 = vld [vmem:[%s27839_s1 + $0x13a4] ss:$16 sps:$4 sm:$0xff]   ;;  %v19150_v36 = vld [vmem:[%s27839_s1 + $0x13a0] ss:$16 sps:$4 sm:$0xff]  }
 0x2dc   :  { %7917 = vmatpush1.bf16.msra.mxu0 %v19099_v39  ;;  %v19155_v38 = vld [vmem:[%s27839_s1 + $0x1184] ss:$16 sps:$4 sm:$0xff]   ;;  %v19153_v39 = vld [vmem:[%s27839_s1 + $0x1180] ss:$16 sps:$4 sm:$0xff]  }
 0x2dd   :  { %7958 = vmatpush1.bf16.msra.mxu1 %v19102_v7  ;;  %7918 = vmatprep.subr.bf16.mxu0 %v19107_v13  ;;  %v19158_v7 = vld [vmem:[%s27839_s1 + $0x1384] ss:$16 sps:$4 sm:$0xff]   ;;  %v19156_v13 = vld [vmem:[%s27839_s1 + $0x1380] ss:$16 sps:$4 sm:$0xff]  }
 0x2de   :  { %7959 = vmatprep.subr.bf16.mxu1 %v19110_v46  ;;  %v19161_v43 = vld [vmem:[%s27839_s1 + $0x1164] ss:$16 sps:$4 sm:$0xff]   ;;  %v19159_v44 = vld [vmem:[%s27839_s1 + $0x1160] ss:$16 sps:$4 sm:$0xff]  }
 0x2df   :  { %v19164_v45 = vld [vmem:[%s27839_s1 + $0x1364] ss:$16 sps:$4 sm:$0xff]   ;;  %v19162_v46 = vld [vmem:[%s27839_s1 + $0x1360] ss:$16 sps:$4 sm:$0xff]  }
 0x2e0   :  { %7919 = vmatpush1.bf16.msra.mxu0 %v19105_v47  ;;  %v19167_v47 = vld [vmem:[%s27839_s1 + $0x1144] ss:$16 sps:$4 sm:$0xff]  }
 0x2e1   :  { %7960 = vmatpush1.bf16.msra.mxu1 %v19108_v50  ;;  %7920 = vmatprep.subr.bf16.mxu0 %v19113_v51  ;;  %v19170_v50 = vld [vmem:[%s27839_s1 + $0x1344] ss:$16 sps:$4 sm:$0xff]   ;;  %v19165_v51 = vld [vmem:[%s27839_s1 + $0x1140] ss:$16 sps:$4 sm:$0xff]  }
 0x2e2   :  { %7961 = vmatprep.subr.bf16.mxu1 %v19116_v53  ;;  %v19168_v53 = vld [vmem:[%s27839_s1 + $0x1340] ss:$16 sps:$4 sm:$0xff]  }
 0x2e4   :  { %7921 = vmatpush1.bf16.msra.mxu0 %v19111_v52  ;;  %v1938_v52 = vld [vmem:[%s27838_s0 + $0x28] sm:$0xff] }
 0x2e5   :  { %7962 = vmatpush1.bf16.msra.mxu1 %v19114_v54  ;;  %7922 = vmatprep.subr.bf16.mxu0 %v19119_v55  ;;  %v19173_v54 = vld [vmem:[%s27839_s1 + $0x1124] ss:$16 sps:$4 sm:$0xff]   ;;  %v19171_v55 = vld [vmem:[%s27839_s1 + $0x1120] ss:$16 sps:$4 sm:$0xff]  }
 0x2e6   :  { %7963 = vmatprep.subr.bf16.mxu1 %v19122_v59  ;;  %v2034_v59 = vcombine.high %v1938_v52, %v1938_v52 }
 0x2e8   :  { %7923 = vmatpush1.bf16.msra.mxu0 %v19117_v57  ;;  %v19176_v57 = vld [vmem:[%s27839_s1 + $0x1324] ss:$16 sps:$4 sm:$0xff]  }
 0x2e9   :  { %7964 = vmatpush1.bf16.msra.mxu1 %v19120_v60  ;;  %7924 = vmatprep.subr.bf16.mxu0 %v19125_v62  ;;  %v19174_v60 = vld [vmem:[%s27839_s1 + $0x1320] ss:$16 sps:$4 sm:$0xff]   ;;  %v19179_v62 = vld [vmem:[%s27839_s1 + $0x1104] ss:$16 sps:$4 sm:$0xff]  }
 0x2ea   :  { %7965 = vmatprep.subr.bf16.mxu1 %v19128_v3  ;;  %v19182_v3 = vld [vmem:[%s27839_s1 + $0x1304] ss:$16 sps:$4 sm:$0xff]  }
 0x2ec   :  { %7925 = vmatpush1.bf16.msra.mxu0 %v19123_v63  ;;  %v19177_v63 = vld [vmem:[%s27839_s1 + $0x1100] ss:$16 sps:$4 sm:$0xff]  }
 0x2ed   :  { %7966 = vmatpush1.bf16.msra.mxu1 %v19126_v5  ;;  %7926 = vmatprep.subr.bf16.mxu0 %v19131_v6  ;;  %v25484_v5 = vrot.slane %v1938_v52, %v24515_v17  ;;  %v25487_v6 = vrot.slane %v2034_v59, %v24515_v17  ;;  %v19204_v52 = vld [vmem:[%s27839_s1 + $0x1484] ss:$16 sps:$4 sm:$0xff]  }
 0x2ee   :  { %7967 = vmatprep.subr.bf16.mxu1 %v19134_v10  ;;  %v19186_v10 = vld [vmem:[%s27839_s1 + $0x14e4] ss:$16 sps:$4 sm:$0xff]  }
 0x2ef   :  { %v19210_v59 = vld [vmem:[%s27839_s1 + $0x1464] ss:$16 sps:$4 sm:$0xff]  }
 0x2f0   :  { %7927 = vmatpush1.bf16.msra.mxu0 %v19129_v9  ;;  %v19180_v9 = vld [vmem:[%s27839_s1 + $0x1300] ss:$16 sps:$4 sm:$0xff]  }
 0x2f1   :  { %7968 = vmatpush1.bf16.msra.mxu1 %v19132_v25  ;;  %7928 = vmatprep.subr.bf16.mxu0 %v19137_v12  ;;  %v19184_v25 = vld [vmem:[%s27839_s1 + $0x14e0] ss:$16 sps:$4 sm:$0xff]   ;;  %v19189_v12 = vld [vmem:[%s27839_s1 + $0x16e4] ss:$16 sps:$4 sm:$0xff]  }
 0x2f2   :  { %7969 = vmatprep.subr.bf16.mxu1 %v19140_v15  ;;  %v25505_v15 = vpack.c.bf16 %v25245_v56, %v25245_v56  ;;  %v19190_v56 = vld [vmem:[%s27839_s1 + $0x14c0] ss:$16 sps:$4 sm:$0xff]  }
 0x2f4   :  { %7929 = vmatpush2.bf16.msra.mxu0 %v19135_v27  ;;  %v2049_v27 = vcombine.high %v25484_v5, %v25484_v5 }
 0x2f5   :  { %7970 = vmatpush2.bf16.msra.mxu1 %v19138_v18  ;;  %7930 = vmatprep.subr.bf16.mxu0 %v19143_v20  ;;  %v19187_v18 = vld [vmem:[%s27839_s1 + $0x16e0] ss:$16 sps:$4 sm:$0xff]   ;;  %v2050_v20 = vcombine.high %v25487_v6, %v25487_v6 }
 0x2f6   :  { %7971 = vmatprep.subr.bf16.mxu1 %v19146_v24  ;;  %v19192_v24 = vld [vmem:[%s27839_s1 + $0x14c4] ss:$16 sps:$4 sm:$0xff]  }
 0x2f8   :  { %7931 = vmatpush2.bf16.msra.mxu0 %v19141_v23  ;;  %v25514_v23 = vpack.c.bf16 %v25251_v58, %v25251_v58  ;;  %v19193_v58 = vld [vmem:[%s27839_s1 + $0x16c0] ss:$16 sps:$4 sm:$0xff]  }
 0x2f9   :  { %7972 = vmatpush2.bf16.msra.mxu1 %v19144_v28  ;;  %7932 = vmatprep.subr.bf16.mxu0 %v19149_v29  ;;  %v19195_v28 = vld [vmem:[%s27839_s1 + $0x16c4] ss:$16 sps:$4 sm:$0xff]   ;;  %v25525_v29 = vpack.c.bf16 %v2049_v27, %v2049_v27  ;;  %v19220_v27 = vld [vmem:[%s27839_s1 + $0x1420] ss:$16 sps:$4 sm:$0xff]  }
 0x2fa   :  { %7973 = vmatprep.subr.bf16.mxu1 %v19152_v33  ;;  %v19198_v33 = vld [vmem:[%s27839_s1 + $0x14a4] ss:$16 sps:$4 sm:$0xff]  }
 0x2fc   :  { %7933 = vmatpush2.bf16.msra.mxu0 %v19147_v32 }
 0x2fd   :  { %7974 = vmatpush2.bf16.msra.mxu1 %v19150_v36  ;;  %7934 = vmatprep.subr.bf16.mxu0 %v19155_v38  ;;  %v25534_v36 = vpack.c.bf16 %v2050_v20, %v2050_v20  ;;  %v19223_v20 = vld [vmem:[%s27839_s1 + $0x1620] ss:$16 sps:$4 sm:$0xff]  }
 0x2fe   :  { %7975 = vmatprep.subr.bf16.mxu1 %v19158_v7 }
 0x300   :  { %7935 = vmatpush2.bf16.msra.mxu0 %v19153_v39 }
 0x301   :  { %7976 = vmatpush2.bf16.msra.mxu1 %v19156_v13  ;;  %7936 = vmatprep.subr.bf16.mxu0 %v19161_v43 }
 0x302   :  { %7977 = vmatprep.subr.bf16.mxu1 %v19164_v45  ;;  %v19201_v45 = vld [vmem:[%s27839_s1 + $0x16a4] ss:$16 sps:$4 sm:$0xff]  }
 0x304   :  { %7937 = vmatpush2.bf16.msra.mxu0 %v19159_v44 }
 0x305   :  { %7978 = vmatpush2.bf16.msra.mxu1 %v19162_v46  ;;  %7938 = vmatprep.subr.bf16.mxu0 %v19167_v47  ;;  %v19196_v46 = vld [vmem:[%s27839_s1 + $0x14a0] ss:$16 sps:$4 sm:$0xff]  }
 0x306   :  { %7979 = vmatprep.subr.bf16.mxu1 %v19170_v50  ;;  %v19199_v47 = vld [vmem:[%s27839_s1 + $0x16a0] ss:$16 sps:$4 sm:$0xff]  }
 0x308   :  { %7939 = vmatpush2.bf16.msra.mxu0 %v19165_v51 }
 0x309   :  { %7980 = vmatpush2.bf16.msra.mxu1 %v19168_v53  ;;  %7940 = vmatprep.subr.bf16.mxu0 %v19173_v54  ;;  %v19207_v54 = vld [vmem:[%s27839_s1 + $0x1684] ss:$16 sps:$4 sm:$0xff]  }
 0x30a   :  { %7981 = vmatprep.subr.bf16.mxu1 %v19176_v57  ;;  %v19205_v57 = vld [vmem:[%s27839_s1 + $0x1680] ss:$16 sps:$4 sm:$0xff]  }
 0x30c   :  { %7941 = vmatpush2.bf16.msra.mxu0 %v19171_v55  ;;  %v19202_v55 = vld [vmem:[%s27839_s1 + $0x1480] ss:$16 sps:$4 sm:$0xff]  }
 0x30d   :  { %7982 = vmatpush2.bf16.msra.mxu1 %v19174_v60  ;;  %7942 = vmatprep.subr.bf16.mxu0 %v19179_v62  ;;  %v19208_v60 = vld [vmem:[%s27839_s1 + $0x1460] ss:$16 sps:$4 sm:$0xff]   ;;  %v19213_v62 = vld [vmem:[%s27839_s1 + $0x1664] ss:$16 sps:$4 sm:$0xff]  }
 0x30e   :  { %7983 = vmatprep.subr.bf16.mxu1 %v19182_v3  ;;  %v19216_v3 = vld [vmem:[%s27839_s1 + $0x1444] ss:$16 sps:$4 sm:$0xff]  }
 0x310   :  { %7943 = vmatpush2.bf16.msra.mxu0 %v19177_v63  ;;  %v19211_v63 = vld [vmem:[%s27839_s1 + $0x1660] ss:$16 sps:$4 sm:$0xff]  }
 0x311   :  { %7984 = vmatpush2.bf16.msra.mxu1 %v19180_v9  ;;  %7994 = vmatprep.subr.bf16.mxu0 %v19186_v10  ;;  %v19214_v9 = vld [vmem:[%s27839_s1 + $0x1440] ss:$16 sps:$4 sm:$0xff]   ;;  %v19219_v10 = vld [vmem:[%s27839_s1 + $0x1644] ss:$16 sps:$4 sm:$0xff]  }
 0x312   :  { %8035 = vmatprep.subr.bf16.mxu1 %v19189_v12  ;;  %v19222_v12 = vld [vmem:[%s27839_s1 + $0x1424] ss:$16 sps:$4 sm:$0xff]  }
 0x313   :  { %v7700_v32 = vpop.f32.mrf.mxu0  ;;  %7945 = vmatmul.mubr.bf16.vlgmr.msra.gmra.mxu0 %v25505_v15 }
 0x314   :  { %v7701_v38 = vadd.f32 %v7700_v32, %v25312_v31  ;;  %v7741_v39 = vpop.f32.mrf.mxu1  ;;  %7986 = vmatmul.mubr.bf16.vlgmr.msra.gmra.mxu1 %v25514_v23  ;;  %7995 = vmatpush1.bf16.msra.mxu0 %v19184_v25  ;;  %v19217_v25 = vld [vmem:[%s27839_s1 + $0x1640] ss:$16 sps:$4 sm:$0xff]  }
 0x315   :  { %8036 = vmatpush1.bf16.msra.mxu1 %v19187_v18  ;;  %v7702_v7 = vpop.f32.mrf.mxu0  ;;  %7996 = vmatprep.subr.bf16.mxu0 %v19192_v24  ;;  %v19225_v18 = vld [vmem:[%s27839_s1 + $0x1624] ss:$16 sps:$4 sm:$0xff]   ;;  %v19229_v32 = vld [vmem:[%s27839_s1 + $0x1600] ss:$16 sps:$4 sm:$0xff]  }
 0x316   :  { %v25538_v13 = vadd.f32 %v7741_v39, %v7701_v38  ;;  %v7703_v43 = vadd.f32 %v7702_v7, %v25328_v42  ;;  %v7743_v44 = vpop.f32.mrf.mxu1  ;;  %8037 = vmatprep.subr.bf16.mxu1 %v19195_v28  ;;  %8026 = vmatprep.mubr.bf16.mxu0 %v25525_v29  ;;  %v19228_v24 = vld [vmem:[%s27839_s1 + $0x1404] ss:$16 sps:$4 sm:$0xff]   ;;  %v19235_v39 = vld [vmem:[%s27839_s1 + $0x17e0] ss:$16 sps:$4 sm:$0xff]  }
 0x317   :  { %v7704_v31 = vpop.f32.mrf.mxu0  ;;  %8067 = vmatprep.mubr.bf16.mxu1 %v25534_v36  ;;  %v19231_v28 = vld [vmem:[%s27839_s1 + $0x1604] ss:$16 sps:$4 sm:$0xff]  }
 0x318   :  { %v25552_v42 = vadd.f32 %v7743_v44, %v7703_v43  ;;  %v7745_v50 = vpop.f32.mrf.mxu1  ;;  %7997 = vmatpush1.bf16.msra.mxu0 %v19190_v56  ;;  %v19226_v56 = vld [vmem:[%s27839_s1 + $0x1400] ss:$16 sps:$4 sm:$0xff]   ;;  %v19237_v38 = vld [vmem:[%s27839_s1 + $0x17e4] ss:$16 sps:$4 sm:$0xff]  }
 0x319   :  { %8038 = vmatpush1.bf16.msra.mxu1 %v19193_v58  ;;  %v7705_v51 = vpop.f32.mrf.mxu0  ;;  %7998 = vmatprep.subr.bf16.mxu0 %v19198_v33  ;;  %v19234_v58 = vld [vmem:[%s27839_s1 + $0x15e4] ss:$16 sps:$4 sm:$0xff]   ;;  %v19232_v33 = vld [vmem:[%s27839_s1 + $0x15e0] ss:$16 sps:$4 sm:$0xff]  }
 0x31a   :  { %v7746_v53 = vpop.f32.mrf.mxu1  ;;  %8039 = vmatprep.subr.bf16.mxu1 %v19201_v45  ;;  %v19240_v7 = vld [vmem:[%s27839_s1 + $0x15c4] ss:$16 sps:$4 sm:$0xff]   ;;  %v19238_v43 = vld [vmem:[%s27839_s1 + $0x15c0] ss:$16 sps:$4 sm:$0xff]  }
 0x31b   :  { %v19243_v44 = vld [vmem:[%s27839_s1 + $0x17c4] ss:$16 sps:$4 sm:$0xff]   ;;  %v19241_v45 = vld [vmem:[%s27839_s1 + $0x17c0] ss:$16 sps:$4 sm:$0xff]  }
 0x31c   :  { %7999 = vmatpush1.bf16.msra.mxu0 %v19196_v46  ;;  %v19246_v31 = vld [vmem:[%s27839_s1 + $0x15a4] ss:$16 sps:$4 sm:$0xff]   ;;  %v19244_v46 = vld [vmem:[%s27839_s1 + $0x15a0] ss:$16 sps:$4 sm:$0xff]  }
 0x31d   :  { %8040 = vmatpush1.bf16.msra.mxu1 %v19199_v47  ;;  %8000 = vmatprep.subr.bf16.mxu0 %v19204_v52  ;;  %v19249_v47 = vld [vmem:[%s27839_s1 + $0x17a4] ss:$16 sps:$4 sm:$0xff]   ;;  %v19247_v50 = vld [vmem:[%s27839_s1 + $0x17a0] ss:$16 sps:$4 sm:$0xff]  }
 0x31e   :  { %8041 = vmatprep.subr.bf16.mxu1 %v19207_v54  ;;  %v19252_v51 = vld [vmem:[%s27839_s1 + $0x1584] ss:$16 sps:$4 sm:$0xff]   ;;  %v19250_v52 = vld [vmem:[%s27839_s1 + $0x1580] ss:$16 sps:$4 sm:$0xff]  }
 0x31f   :  { %v19255_v53 = vld [vmem:[%s27839_s1 + $0x1784] ss:$16 sps:$4 sm:$0xff]   ;;  %v19253_v54 = vld [vmem:[%s27839_s1 + $0x1780] ss:$16 sps:$4 sm:$0xff]  }
 0x320   :  { %8001 = vmatpush1.bf16.msra.mxu0 %v19202_v55  ;;  %v19258_v55 = vld [vmem:[%s27839_s1 + $0x1564] ss:$16 sps:$4 sm:$0xff]  }
 0x321   :  { %8042 = vmatpush1.bf16.msra.mxu1 %v19205_v57  ;;  %8002 = vmatprep.subr.bf16.mxu0 %v19210_v59  ;;  %v19256_v57 = vld [vmem:[%s27839_s1 + $0x1560] ss:$16 sps:$4 sm:$0xff]   ;;  %v19261_v59 = vld [vmem:[%s27839_s1 + $0x1764] ss:$16 sps:$4 sm:$0xff]  }
 0x322   :  { %8043 = vmatprep.subr.bf16.mxu1 %v19213_v62  ;;  %v19264_v62 = vld [vmem:[%s27839_s1 + $0x1544] ss:$16 sps:$4 sm:$0xff]  }
 0x324   :  { %8003 = vmatpush1.bf16.msra.mxu0 %v19208_v60  ;;  %v19259_v60 = vld [vmem:[%s27839_s1 + $0x1760] ss:$16 sps:$4 sm:$0xff]  }
 0x325   :  { %8044 = vmatpush1.bf16.msra.mxu1 %v19211_v63  ;;  %8004 = vmatprep.subr.bf16.mxu0 %v19216_v3  ;;  %v19262_v63 = vld [vmem:[%s27839_s1 + $0x1540] ss:$16 sps:$4 sm:$0xff]   ;;  %v19267_v3 = vld [vmem:[%s27839_s1 + $0x1744] ss:$16 sps:$4 sm:$0xff]  }
 0x326   :  { %8045 = vmatprep.subr.bf16.mxu1 %v19219_v10  ;;  %v19265_v10 = vld [vmem:[%s27839_s1 + $0x1740] ss:$16 sps:$4 sm:$0xff]  }
 0x328   :  { %8005 = vmatpush1.bf16.msra.mxu0 %v19214_v9  ;;  %v1939_v9 = vld [vmem:[%s27838_s0 + $0x30] sm:$0xff] }
 0x329   :  { %8046 = vmatpush1.bf16.msra.mxu1 %v19217_v25  ;;  %8006 = vmatprep.subr.bf16.mxu0 %v19222_v12  ;;  %v19270_v25 = vld [vmem:[%s27839_s1 + $0x1524] ss:$16 sps:$4 sm:$0xff]   ;;  %v19268_v12 = vld [vmem:[%s27839_s1 + $0x1520] ss:$16 sps:$4 sm:$0xff]  }
 0x32a   :  { %8047 = vmatprep.subr.bf16.mxu1 %v19225_v18  ;;  %v2051_v18 = vcombine.high %v1939_v9, %v1939_v9 }
 0x32c   :  { %8007 = vmatpush1.bf16.msra.mxu0 %v19220_v27  ;;  %v19273_v27 = vld [vmem:[%s27839_s1 + $0x1724] ss:$16 sps:$4 sm:$0xff]  }
 0x32d   :  { %8048 = vmatpush1.bf16.msra.mxu1 %v19223_v20  ;;  %8008 = vmatprep.subr.bf16.mxu0 %v19228_v24  ;;  %v19271_v20 = vld [vmem:[%s27839_s1 + $0x1720] ss:$16 sps:$4 sm:$0xff]   ;;  %v19276_v24 = vld [vmem:[%s27839_s1 + $0x1504] ss:$16 sps:$4 sm:$0xff]  }
 0x32e   :  { %8049 = vmatprep.subr.bf16.mxu1 %v19231_v28  ;;  %v19279_v28 = vld [vmem:[%s27839_s1 + $0x1704] ss:$16 sps:$4 sm:$0xff]  }
 0x330   :  { %8009 = vmatpush1.bf16.msra.mxu0 %v19226_v56  ;;  %v19274_v56 = vld [vmem:[%s27839_s1 + $0x1500] ss:$16 sps:$4 sm:$0xff]  }
 0x331   :  { %8050 = vmatpush1.bf16.msra.mxu1 %v19229_v32  ;;  %8010 = vmatprep.subr.bf16.mxu0 %v19234_v58  ;;  %v25711_v32 = vrot.slane %v1939_v9, %v24515_v17  ;;  %v25714_v58 = vrot.slane %v2051_v18, %v24515_v17 }
 0x332   :  { %8051 = vmatprep.subr.bf16.mxu1 %v19237_v38  ;;  %v19283_v38 = vld [vmem:[%s27839_s1 + $0x18e4] ss:$16 sps:$4 sm:$0xff]  }
 0x334   :  { %8011 = vmatpush2.bf16.msra.mxu0 %v19232_v33  ;;  %v19277_v33 = vld [vmem:[%s27839_s1 + $0x1700] ss:$16 sps:$4 sm:$0xff]  }
 0x335   :  { %8052 = vmatpush2.bf16.msra.mxu1 %v19235_v39  ;;  %8012 = vmatprep.subr.bf16.mxu0 %v19240_v7  ;;  %v19281_v39 = vld [vmem:[%s27839_s1 + $0x18e0] ss:$16 sps:$4 sm:$0xff]   ;;  %v19286_v7 = vld [vmem:[%s27839_s1 + $0x1ae4] ss:$16 sps:$4 sm:$0xff]  }
 0x336   :  { %8053 = vmatprep.subr.bf16.mxu1 %v19243_v44  ;;  %v25732_v44 = vpack.c.bf16 %v25484_v5, %v25484_v5  ;;  %v19287_v5 = vld [vmem:[%s27839_s1 + $0x18c0] ss:$16 sps:$4 sm:$0xff]  }
 0x338   :  { %8013 = vmatpush2.bf16.msra.mxu0 %v19238_v43  ;;  %v2066_v43 = vcombine.high %v25711_v32, %v25711_v32 }
 0x339   :  { %8054 = vmatpush2.bf16.msra.mxu1 %v19241_v45  ;;  %8014 = vmatprep.subr.bf16.mxu0 %v19246_v31  ;;  %v19284_v45 = vld [vmem:[%s27839_s1 + $0x1ae0] ss:$16 sps:$4 sm:$0xff]   ;;  %v19289_v31 = vld [vmem:[%s27839_s1 + $0x18c4] ss:$16 sps:$4 sm:$0xff]  }
 0x33a   :  { %8055 = vmatprep.subr.bf16.mxu1 %v19249_v47  ;;  %v25744_v47 = vpack.c.bf16 %v25487_v6, %v25487_v6  ;;  %v19290_v6 = vld [vmem:[%s27839_s1 + $0x1ac0] ss:$16 sps:$4 sm:$0xff]  }
 0x33c   :  { %8015 = vmatpush2.bf16.msra.mxu0 %v19244_v46  ;;  %v2067_v46 = vcombine.high %v25714_v58, %v25714_v58 }
 0x33d   :  { %8056 = vmatpush2.bf16.msra.mxu1 %v19247_v50  ;;  %8016 = vmatprep.subr.bf16.mxu0 %v19252_v51  ;;  %v19292_v50 = vld [vmem:[%s27839_s1 + $0x1ac4] ss:$16 sps:$4 sm:$0xff]   ;;  %v25752_v51 = vpack.c.bf16 %v2066_v43, %v2066_v43  ;;  %v19311_v43 = vld [vmem:[%s27839_s1 + $0x1840] ss:$16 sps:$4 sm:$0xff]  }
 0x33e   :  { %8057 = vmatprep.subr.bf16.mxu1 %v19255_v53  ;;  %v19295_v53 = vld [vmem:[%s27839_s1 + $0x18a4] ss:$16 sps:$4 sm:$0xff]  }
 0x340   :  { %8017 = vmatpush2.bf16.msra.mxu0 %v19250_v52 }
 0x341   :  { %8058 = vmatpush2.bf16.msra.mxu1 %v19253_v54  ;;  %8018 = vmatprep.subr.bf16.mxu0 %v19258_v55  ;;  %v25761_v54 = vpack.c.bf16 %v2067_v46, %v2067_v46  ;;  %v19319_v46 = vld [vmem:[%s27839_s1 + $0x1824] ss:$16 sps:$4 sm:$0xff]  }
 0x342   :  { %8059 = vmatprep.subr.bf16.mxu1 %v19261_v59 }
 0x344   :  { %8019 = vmatpush2.bf16.msra.mxu0 %v19256_v57 }
 0x345   :  { %8060 = vmatpush2.bf16.msra.mxu1 %v19259_v60  ;;  %8020 = vmatprep.subr.bf16.mxu0 %v19264_v62 }
 0x346   :  { %8061 = vmatprep.subr.bf16.mxu1 %v19267_v3  ;;  %v19293_v3 = vld [vmem:[%s27839_s1 + $0x18a0] ss:$16 sps:$4 sm:$0xff]  }
 0x348   :  { %8021 = vmatpush2.bf16.msra.mxu0 %v19262_v63 }
 0x349   :  { %8062 = vmatpush2.bf16.msra.mxu1 %v19265_v10  ;;  %8022 = vmatprep.subr.bf16.mxu0 %v19270_v25  ;;  %v19296_v10 = vld [vmem:[%s27839_s1 + $0x1aa0] ss:$16 sps:$4 sm:$0xff]  }
 0x34a   :  { %8063 = vmatprep.subr.bf16.mxu1 %v19273_v27 }
 0x34c   :  { %8023 = vmatpush2.bf16.msra.mxu0 %v19268_v12 }
 0x34d   :  { %8064 = vmatpush2.bf16.msra.mxu1 %v19271_v20  ;;  %8024 = vmatprep.subr.bf16.mxu0 %v19276_v24  ;;  %v19304_v20 = vld [vmem:[%s27839_s1 + $0x1a84] ss:$16 sps:$4 sm:$0xff]   ;;  %v19299_v24 = vld [vmem:[%s27839_s1 + $0x1880] ss:$16 sps:$4 sm:$0xff]  }
 0x34e   :  { %8065 = vmatprep.subr.bf16.mxu1 %v19279_v28  ;;  %v19307_v28 = vld [vmem:[%s27839_s1 + $0x1864] ss:$16 sps:$4 sm:$0xff]  }
 0x350   :  { %8025 = vmatpush2.bf16.msra.mxu0 %v19274_v56  ;;  %v19302_v56 = vld [vmem:[%s27839_s1 + $0x1a80] ss:$16 sps:$4 sm:$0xff]  }
 0x351   :  { %8066 = vmatpush2.bf16.msra.mxu1 %v19277_v33  ;;  %8076 = vmatprep.subr.bf16.mxu0 %v19283_v38  ;;  %v19305_v33 = vld [vmem:[%s27839_s1 + $0x1860] ss:$16 sps:$4 sm:$0xff]   ;;  %v19310_v38 = vld [vmem:[%s27839_s1 + $0x1a64] ss:$16 sps:$4 sm:$0xff]  }
 0x352   :  { %8117 = vmatprep.subr.bf16.mxu1 %v19286_v7  ;;  %v19313_v7 = vld [vmem:[%s27839_s1 + $0x1844] ss:$16 sps:$4 sm:$0xff]  }
 0x353   :  { %v7782_v52 = vpop.f32.mrf.mxu0  ;;  %8027 = vmatmul.mubr.bf16.vlgmr.msra.gmra.mxu0 %v25732_v44 }
 0x354   :  { %v7783_v55 = vadd.f32 %v7782_v52, %v25538_v13  ;;  %v7823_v57 = vpop.f32.mrf.mxu1  ;;  %8068 = vmatmul.mubr.bf16.vlgmr.msra.gmra.mxu1 %v25744_v47  ;;  %8077 = vmatpush1.bf16.msra.mxu0 %v19281_v39  ;;  %v19298_v13 = vld [vmem:[%s27839_s1 + $0x1aa4] ss:$16 sps:$4 sm:$0xff]   ;;  %v19308_v39 = vld [vmem:[%s27839_s1 + $0x1a60] ss:$16 sps:$4 sm:$0xff]  }
 0x355   :  { %8118 = vmatpush1.bf16.msra.mxu1 %v19284_v45  ;;  %v7784_v59 = vpop.f32.mrf.mxu0  ;;  %8078 = vmatprep.subr.bf16.mxu0 %v19289_v31  ;;  %v19316_v45 = vld [vmem:[%s27839_s1 + $0x1a44] ss:$16 sps:$4 sm:$0xff]   ;;  %v19314_v31 = vld [vmem:[%s27839_s1 + $0x1a40] ss:$16 sps:$4 sm:$0xff]  }
 0x356   :  { %v25765_v60 = vadd.f32 %v7823_v57, %v7783_v55  ;;  %v7785_v62 = vadd.f32 %v7784_v59, %v25552_v42  ;;  %v7825_v63 = vpop.f32.mrf.mxu1  ;;  %8119 = vmatprep.subr.bf16.mxu1 %v19292_v50  ;;  %8108 = vmatprep.mubr.bf16.mxu0 %v25752_v51  ;;  %v19301_v42 = vld [vmem:[%s27839_s1 + $0x1884] ss:$16 sps:$4 sm:$0xff]   ;;  %v19320_v52 = vld [vmem:[%s27839_s1 + $0x1a20] ss:$16 sps:$4 sm:$0xff]  }
 0x357   :  { %v7786_v9 = vpop.f32.mrf.mxu0  ;;  %8149 = vmatprep.mubr.bf16.mxu1 %v25761_v54  ;;  %v19322_v50 = vld [vmem:[%s27839_s1 + $0x1a24] ss:$16 sps:$4 sm:$0xff]   ;;  %v19326_v57 = vld [vmem:[%s27839_s1 + $0x1a00] ss:$16 sps:$4 sm:$0xff]  }
 0x358   :  { %v25782_v25 = vadd.f32 %v7825_v63, %v7785_v62  ;;  %v7827_v12 = vpop.f32.mrf.mxu1  ;;  %8079 = vmatpush1.bf16.msra.mxu0 %v19287_v5  ;;  %v19317_v5 = vld [vmem:[%s27839_s1 + $0x1820] ss:$16 sps:$4 sm:$0xff]   ;;  %v19328_v55 = vld [vmem:[%s27839_s1 + $0x1a04] ss:$16 sps:$4 sm:$0xff]  }
 0x359   :  { %8120 = vmatpush1.bf16.msra.mxu1 %v19290_v6  ;;  %v7787_v27 = vpop.f32.mrf.mxu0  ;;  %8080 = vmatprep.subr.bf16.mxu0 %v19295_v53  ;;  %v19325_v6 = vld [vmem:[%s27839_s1 + $0x1804] ss:$16 sps:$4 sm:$0xff]   ;;  %v19323_v53 = vld [vmem:[%s27839_s1 + $0x1800] ss:$16 sps:$4 sm:$0xff]  }
 0x35a   :  { %v7828_v18 = vpop.f32.mrf.mxu1  ;;  %8121 = vmatprep.subr.bf16.mxu1 %v19298_v13  ;;  %v19331_v59 = vld [vmem:[%s27839_s1 + $0x19e4] ss:$16 sps:$4 sm:$0xff]   ;;  %v19329_v62 = vld [vmem:[%s27839_s1 + $0x19e0] ss:$16 sps:$4 sm:$0xff]  }
 0x35b   :  { %v19334_v63 = vld [vmem:[%s27839_s1 + $0x1be4] ss:$16 sps:$4 sm:$0xff]   ;;  %v19335_v9 = vld [vmem:[%s27839_s1 + $0x19c0] ss:$16 sps:$4 sm:$0xff]  }
 0x35c   :  { %8081 = vmatpush1.bf16.msra.mxu0 %v19293_v3  ;;  %v19332_v3 = vld [vmem:[%s27839_s1 + $0x1be0] ss:$16 sps:$4 sm:$0xff]   ;;  %v19337_v13 = vld [vmem:[%s27839_s1 + $0x19c4] ss:$16 sps:$4 sm:$0xff]  }
 0x35d   :  { %8122 = vmatpush1.bf16.msra.mxu1 %v19296_v10  ;;  %8082 = vmatprep.subr.bf16.mxu0 %v19301_v42  ;;  %v19340_v10 = vld [vmem:[%s27839_s1 + $0x1bc4] ss:$16 sps:$4 sm:$0xff]   ;;  %v19338_v42 = vld [vmem:[%s27839_s1 + $0x1bc0] ss:$16 sps:$4 sm:$0xff]  }
 0x35e   :  { %8123 = vmatprep.subr.bf16.mxu1 %v19304_v20  ;;  %v19343_v12 = vld [vmem:[%s27839_s1 + $0x19a4] ss:$16 sps:$4 sm:$0xff]   ;;  %v19341_v27 = vld [vmem:[%s27839_s1 + $0x19a0] ss:$16 sps:$4 sm:$0xff]  }
 0x35f   :  { %v19346_v18 = vld [vmem:[%s27839_s1 + $0x1ba4] ss:$16 sps:$4 sm:$0xff]   ;;  %v19344_v20 = vld [vmem:[%s27839_s1 + $0x1ba0] ss:$16 sps:$4 sm:$0xff]  }
 0x360   :  { %8083 = vmatpush1.bf16.msra.mxu0 %v19299_v24  ;;  %v19349_v24 = vld [vmem:[%s27839_s1 + $0x1984] ss:$16 sps:$4 sm:$0xff]  }
 0x361   :  { %8124 = vmatpush1.bf16.msra.mxu1 %v19302_v56  ;;  %8084 = vmatprep.subr.bf16.mxu0 %v19307_v28  ;;  %v19347_v56 = vld [vmem:[%s27839_s1 + $0x1980] ss:$16 sps:$4 sm:$0xff]   ;;  %v19352_v28 = vld [vmem:[%s27839_s1 + $0x1b84] ss:$16 sps:$4 sm:$0xff]  }
 0x362   :  { %8125 = vmatprep.subr.bf16.mxu1 %v19310_v38  ;;  %v19355_v38 = vld [vmem:[%s27839_s1 + $0x1964] ss:$16 sps:$4 sm:$0xff]  }
 0x364   :  { %8085 = vmatpush1.bf16.msra.mxu0 %v19305_v33  ;;  %v19350_v33 = vld [vmem:[%s27839_s1 + $0x1b80] ss:$16 sps:$4 sm:$0xff]  }
 0x365   :  { %8126 = vmatpush1.bf16.msra.mxu1 %v19308_v39  ;;  %8086 = vmatprep.subr.bf16.mxu0 %v19313_v7  ;;  %v19353_v39 = vld [vmem:[%s27839_s1 + $0x1960] ss:$16 sps:$4 sm:$0xff]   ;;  %v19358_v7 = vld [vmem:[%s27839_s1 + $0x1b64] ss:$16 sps:$4 sm:$0xff]  }
 0x366   :  { %8127 = vmatprep.subr.bf16.mxu1 %v19316_v45  ;;  %v19361_v45 = vld [vmem:[%s27839_s1 + $0x1944] ss:$16 sps:$4 sm:$0xff]  }
 0x368   :  { %8087 = vmatpush1.bf16.msra.mxu0 %v19311_v43  ;;  %v19356_v43 = vld [vmem:[%s27839_s1 + $0x1b60] ss:$16 sps:$4 sm:$0xff]  }
 0x369   :  { %8128 = vmatpush1.bf16.msra.mxu1 %v19314_v31  ;;  %8088 = vmatprep.subr.bf16.mxu0 %v19319_v46  ;;  %v19359_v31 = vld [vmem:[%s27839_s1 + $0x1940] ss:$16 sps:$4 sm:$0xff]   ;;  %v19364_v46 = vld [vmem:[%s27839_s1 + $0x1b44] ss:$16 sps:$4 sm:$0xff]  }
 0x36a   :  { %8129 = vmatprep.subr.bf16.mxu1 %v19322_v50  ;;  %v19367_v50 = vld [vmem:[%s27839_s1 + $0x1924] ss:$16 sps:$4 sm:$0xff]  }
 0x36c   :  { %8089 = vmatpush1.bf16.msra.mxu0 %v19317_v5  ;;  %v19362_v5 = vld [vmem:[%s27839_s1 + $0x1b40] ss:$16 sps:$4 sm:$0xff]  }
 0x36d   :  { %8130 = vmatpush1.bf16.msra.mxu1 %v19320_v52  ;;  %8090 = vmatprep.subr.bf16.mxu0 %v19325_v6  ;;  %v19365_v52 = vld [vmem:[%s27839_s1 + $0x1920] ss:$16 sps:$4 sm:$0xff]   ;;  %v19370_v6 = vld [vmem:[%s27839_s1 + $0x1b24] ss:$16 sps:$4 sm:$0xff]  }
 0x36e   :  { %8131 = vmatprep.subr.bf16.mxu1 %v19328_v55  ;;  %v19373_v55 = vld [vmem:[%s27839_s1 + $0x1904] ss:$16 sps:$4 sm:$0xff]  }
 0x370   :  { %8091 = vmatpush1.bf16.msra.mxu0 %v19323_v53  ;;  %v19368_v53 = vld [vmem:[%s27839_s1 + $0x1b20] ss:$16 sps:$4 sm:$0xff]  }
 0x371   :  { %8132 = vmatpush1.bf16.msra.mxu1 %v19326_v57  ;;  %8092 = vmatprep.subr.bf16.mxu0 %v19331_v59  ;;  %v19371_v57 = vld [vmem:[%s27839_s1 + $0x1900] ss:$16 sps:$4 sm:$0xff]   ;;  %v19376_v59 = vld [vmem:[%s27839_s1 + $0x1b04] ss:$16 sps:$4 sm:$0xff]  }
 0x372   :  { %8133 = vmatprep.subr.bf16.mxu1 %v19334_v63  ;;  %v19374_v63 = vld [vmem:[%s27839_s1 + $0x1b00] ss:$16 sps:$4 sm:$0xff]  }
 0x374   :  { %8093 = vmatpush2.bf16.msra.mxu0 %v19329_v62  ;;  %v3033_v62 = vld [vmem:[%s27839_s1 + $0x1c20] sm:$0x77] }
 0x375   :  { %8134 = vmatpush2.bf16.msra.mxu1 %v19332_v3  ;;  %8094 = vmatprep.subr.bf16.mxu0 %v19337_v13  ;;  %v17607_v3 = vcombine.high %v3033_v62, %v3033_v62  ;;  %v17606_v13 = vcombine.low %v3033_v62, %v3033_v62  ;;  %v19395_v62 = vld [vmem:[%s27839_s1 + $0x88] ss:$16 sps:$4 sm:$0xff]  }
 0x376   :  { %8135 = vmatprep.subr.bf16.mxu1 %v19340_v10  ;;  %v25945_v10 = vpack.c.bf16 %v25711_v32, %v25711_v32 }
 0x377   :  { %v7573_v32 = vsel %vm7571_vm0, %v17606_v13, 0  ;;  %v19404_v13 = vld [vmem:[%s27839_s1 + $0x2a8] ss:$16 sps:$4 sm:$0xff]  }
 0x378   :  { %8095 = vmatpush2.bf16.msra.mxu0 %v19335_v9  ;;  %v19381_v9 = vld [vmem:[%s27839_s1 + $0xec] ss:$16 sps:$4 sm:$0xff]  }
 0x379   :  { %8136 = vmatpush2.bf16.msra.mxu1 %v19338_v42  ;;  %8096 = vmatprep.subr.bf16.mxu0 %v19343_v12  ;;  %v19379_v42 = vld [vmem:[%s27839_s1 + $0xe8] ss:$16 sps:$4 sm:$0xff]   ;;  %v19385_v12 = vld [vmem:[%s27839_s1 + $0x1c04] ss:$16 sps:$4 sm:$0xff]  }
 0x37a   :  { %8137 = vmatprep.subr.bf16.mxu1 %v19346_v18  ;;  %v19388_v18 = vld [vmem:[%s27839_s1 + $0xcc] ss:$16 sps:$4 sm:$0xff]  }
 0x37c   :  { %8097 = vmatpush2.bf16.msra.mxu0 %v19341_v27  ;;  %v25955_v27 = vpack.c.bf16 %v25714_v58, %v25714_v58 }
 0x37d   :  { %8138 = vmatpush2.bf16.msra.mxu1 %v19344_v20  ;;  %8098 = vmatprep.subr.bf16.mxu0 %v19349_v24  ;;  %v19383_v20 = vld [vmem:[%s27839_s1 + $0x1c00] ss:$16 sps:$4 sm:$0xff]   ;;  %v16705_v24 = vld.sshfl [vmem:[%s27838_s0 + $0x38] sm:$0x3 pattern:$0x76325410] }
 0x37e   :  { %8139 = vmatprep.subr.bf16.mxu1 %v19352_v28  ;;  %v19394_v28 = vld [vmem:[%s27839_s1 + $0x2ec] ss:$16 sps:$4 sm:$0xff]  }
 0x380   :  { %8099 = vmatpush2.bf16.msra.mxu0 %v19347_v56  ;;  %v19386_v56 = vld [vmem:[%s27839_s1 + $0xc8] ss:$16 sps:$4 sm:$0xff]  }
 0x381   :  { %8140 = vmatpush2.bf16.msra.mxu1 %v19350_v33  ;;  %8100 = vmatprep.subr.bf16.mxu0 %v19355_v38 }
 0x382   :  { %8141 = vmatprep.subr.bf16.mxu1 %v19358_v7 }
 0x384   :  { %8101 = vmatpush2.bf16.msra.mxu0 %v19353_v39 }
 0x385   :  { %8142 = vmatpush2.bf16.msra.mxu1 %v19356_v43  ;;  %8102 = vmatprep.subr.bf16.mxu0 %v19361_v45 }
 0x386   :  { %8143 = vmatprep.subr.bf16.mxu1 %v19364_v46 }
 0x388   :  { %8103 = vmatpush2.bf16.msra.mxu0 %v19359_v31  ;;  %v21544_v31 = vmov 0  }
 0x389   :  { %8144 = vmatpush2.bf16.msra.mxu1 %v19362_v5  ;;  %8104 = vmatprep.subr.bf16.mxu0 %v19367_v50  ;;  %v25984_v5 = vpack.c.bf16 %v16705_v24, %v16705_v24  ;;  %v19389_v50 = vld [vmem:[%s27839_s1 + $0xa8] ss:$16 sps:$4 sm:$0xff]  }
 0x38a   :  { %8145 = vmatprep.subr.bf16.mxu1 %v19370_v6  ;;  %v19416_v24 = vld [vmem:[%s27839_s1 + $0x268] ss:$16 sps:$4 sm:$0xff]  }
 0x38c   :  { %8105 = vmatpush2.bf16.msra.mxu0 %v19365_v52  ;;  %v19400_v52 = vld [vmem:[%s27839_s1 + $0x2cc] ss:$16 sps:$4 sm:$0xff]  }
 0x38d   :  { %8146 = vmatpush2.bf16.msra.mxu1 %v19368_v53  ;;  %8106 = vmatprep.subr.bf16.mxu0 %v19373_v55 }
 0x38e   :  { %8147 = vmatprep.subr.bf16.mxu1 %v19376_v59  ;;  %v19397_v59 = vld [vmem:[%s27839_s1 + $0x8c] ss:$16 sps:$4 sm:$0xff]  }
 0x390   :  { %8107 = vmatpush2.bf16.msra.mxu0 %v19371_v57 }
 0x391   :  { %8148 = vmatpush2.bf16.msra.mxu1 %v19374_v63  ;;  %17610 = vmatprep.subr.msk.bf16.mxu0 %vm7571_vm0, %v17607_v3  ;;  %v19406_v63 = vld [vmem:[%s27839_s1 + $0x2ac] ss:$16 sps:$4 sm:$0xff]  }
 0x392   :  { %8199 = vmatprep.subr.bf16.mxu1 %v19381_v9  ;;  %v19403_v3 = vld [vmem:[%s27839_s1 + $0x6c] ss:$16 sps:$4 sm:$0xff]  }
 0x393   :  { %v7864_v58 = vpop.f32.mrf.mxu0  ;;  %8109 = vmatmul.mubr.bf16.vlgmr.msra.gmra.mxu0 %v25945_v10  ;;  %v19412_v9 = vld [vmem:[%s27839_s1 + $0x28c] ss:$16 sps:$4 sm:$0xff]  }
 0x394   :  { %v7865_v33 = vadd.f32 %v7864_v58, %v25765_v60  ;;  %v7905_v38 = vpop.f32.mrf.mxu1  ;;  %8150 = vmatmul.mubr.bf16.vlgmr.msra.gmra.mxu1 %v25955_v27  ;;  %8171 = vmatpush1.bf16.msra.mxu0 %v7573_v32  ;;  %v19391_v60 = vld [vmem:[%s27839_s1 + $0xac] ss:$16 sps:$4 sm:$0xff]   ;;  %v19413_v58 = vld [vmem:[%s27839_s1 + $0x28] ss:$16 sps:$4 sm:$0xff]  }
 0x395   :  { %8200 = vmatpush1.bf16.msra.mxu1 %v19379_v42  ;;  %v7866_v39 = vpop.f32.mrf.mxu0  ;;  %8172 = vmatprep.subr.bf16.mxu0 %v19385_v12  ;;  %v19409_v42 = vld [vmem:[%s27839_s1 + $0x4c] ss:$16 sps:$4 sm:$0xff]   ;;  %v19410_v12 = vld [vmem:[%s27839_s1 + $0x288] ss:$16 sps:$4 sm:$0xff]  }
 0x396   :  { %v25977_v7 = vadd.f32 %v7905_v38, %v7865_v33  ;;  %v7867_v43 = vadd.f32 %v7866_v39, %v25782_v25  ;;  %v7907_v45 = vpop.f32.mrf.mxu1  ;;  %8201 = vmatprep.subr.bf16.mxu1 %v19388_v18  ;;  %8190 = vmatprep.mubr.bf16.mxu0 %v21544_v31  ;;  %v19392_v25 = vld [vmem:[%s27839_s1 + $0x2e8] ss:$16 sps:$4 sm:$0xff]   ;;  %v19418_v32 = vld [vmem:[%s27839_s1 + $0x26c] ss:$16 sps:$4 sm:$0xff]  }
 0x397   :  { %v7868_v46 = vpop.f32.mrf.mxu0  ;;  %8231 = vmatprep.mubr.bf16.mxu1 %v24543_v30  ;;  %v19398_v30 = vld [vmem:[%s27839_s1 + $0x2c8] ss:$16 sps:$4 sm:$0xff]   ;;  %v19430_v39 = vld [vmem:[%s27839_s1 + $0x22c] ss:$16 sps:$4 sm:$0xff]  }
 0x398   :  { %v25996_v6 = vadd.f32 %v7907_v45, %v7867_v43  ;;  %v7909_v53 = vpop.f32.mrf.mxu1  ;;  %8173 = vmatpush1.bf16.msra.mxu0 %v19383_v20  ;;  %v19407_v18 = vld [vmem:[%s27839_s1 + $0x48] ss:$16 sps:$4 sm:$0xff]   ;;  %v19415_v20 = vld [vmem:[%s27839_s1 + $0x2c] ss:$16 sps:$4 sm:$0xff]  }
 0x399   :  { %8202 = vmatpush1.bf16.msra.mxu1 %v19386_v56  ;;  %v7869_v55 = vpop.f32.mrf.mxu0  ;;  %8240 = vmatprep.subr.bf16.mxu0 %v19394_v28  ;;  %v19424_v56 = vld [vmem:[%s27839_s1 + $0x24c] ss:$16 sps:$4 sm:$0xff]   ;;  %v19422_v33 = vld [vmem:[%s27839_s1 + $0x248] ss:$16 sps:$4 sm:$0xff]  }
 0x39a   :  { %v7910_v57 = vpop.f32.mrf.mxu1  ;;  %8203 = vmatprep.subr.bf16.mxu1 %v19391_v60  ;;  %v19421_v28 = vld [vmem:[%s27839_s1 + $0xc] ss:$16 sps:$4 sm:$0xff]   ;;  %v19419_v38 = vld [vmem:[%s27839_s1 + $0x8] ss:$16 sps:$4 sm:$0xff]  }
 0x39b   :  { %17611 = vmatmul.mubr.msk.bf16.vlgmr.msra.gmra.mxu0 %vm7567_vm1, %v25984_v5  ;;  %v19427_v43 = vld [vmem:[%s27839_s1 + $0x1ec] ss:$16 sps:$4 sm:$0xff]   ;;  %v19428_v45 = vld [vmem:[%s27839_s1 + $0x228] ss:$16 sps:$4 sm:$0xff]  }
 0x39c   :  { %8241 = vmatpush1.bf16.msra.mxu0 %v19392_v25  ;;  %8272 = vmatprep.mubr.bf16.mxu0 %v24555_v35  ;;  %v19401_v35 = vld [vmem:[%s27839_s1 + $0x68] ss:$16 sps:$4 sm:$0xff]   ;;  %v19436_v46 = vld [vmem:[%s27839_s1 + $0x20c] ss:$16 sps:$4 sm:$0xff]  }
 0x39d   :  { %8204 = vmatpush1.bf16.msra.mxu1 %v19389_v50  ;;  %8242 = vmatprep.subr.bf16.mxu0 %v19400_v52  ;;  %v19425_v60 = vld [vmem:[%s27839_s1 + $0x1e8] ss:$16 sps:$4 sm:$0xff]   ;;  %v19433_v50 = vld [vmem:[%s27839_s1 + $0x1cc] ss:$16 sps:$4 sm:$0xff]  }
 0x39e   :  { %8205 = vmatprep.subr.bf16.mxu1 %v19397_v59  ;;  %v19434_v25 = vld [vmem:[%s27839_s1 + $0x208] ss:$16 sps:$4 sm:$0xff]   ;;  %v19442_v53 = vld [vmem:[%s27839_s1 + $0x3ec] ss:$16 sps:$4 sm:$0xff]  }
 0x39f   :  { %v19431_v52 = vld [vmem:[%s27839_s1 + $0x1c8] ss:$16 sps:$4 sm:$0xff]   ;;  %v19439_v55 = vld [vmem:[%s27839_s1 + $0x1ac] ss:$16 sps:$4 sm:$0xff]  }
 0x3a0   :  { %8243 = vmatpush1.bf16.msra.mxu0 %v19398_v30  ;;  %v19440_v57 = vld [vmem:[%s27839_s1 + $0x3e8] ss:$16 sps:$4 sm:$0xff]   ;;  %v19448_v30 = vld [vmem:[%s27839_s1 + $0x3cc] ss:$16 sps:$4 sm:$0xff]  }
 0x3a1   :  { %8206 = vmatpush1.bf16.msra.mxu1 %v19395_v62  ;;  %8244 = vmatprep.subr.bf16.mxu0 %v19406_v63  ;;  %v19437_v59 = vld [vmem:[%s27839_s1 + $0x1a8] ss:$16 sps:$4 sm:$0xff]   ;;  %v19445_v62 = vld [vmem:[%s27839_s1 + $0x18c] ss:$16 sps:$4 sm:$0xff]  }
 0x3a2   :  { %8207 = vmatprep.subr.bf16.mxu1 %v19403_v3  ;;  %v19446_v63 = vld [vmem:[%s27839_s1 + $0x3c8] ss:$16 sps:$4 sm:$0xff]  }
 0x3a3   :  { %v19443_v3 = vld [vmem:[%s27839_s1 + $0x188] ss:$16 sps:$4 sm:$0xff]  }
 0x3a4   :  { %8245 = vmatpush1.bf16.msra.mxu0 %v19404_v13  ;;  %v19454_v13 = vld [vmem:[%s27839_s1 + $0x3ac] ss:$16 sps:$4 sm:$0xff]  }
 0x3a5   :  { %8208 = vmatpush1.bf16.msra.mxu1 %v19401_v35  ;;  %8246 = vmatprep.subr.bf16.mxu0 %v19412_v9  ;;  %v19451_v35 = vld [vmem:[%s27839_s1 + $0x16c] ss:$16 sps:$4 sm:$0xff]   ;;  %v19452_v9 = vld [vmem:[%s27839_s1 + $0x3a8] ss:$16 sps:$4 sm:$0xff]  }
 0x3a6   :  { %8209 = vmatprep.subr.bf16.mxu1 %v19409_v42  ;;  %v19449_v42 = vld [vmem:[%s27839_s1 + $0x168] ss:$16 sps:$4 sm:$0xff]  }
 0x3a8   :  { %8247 = vmatpush1.bf16.msra.mxu0 %v19410_v12  ;;  %v19460_v12 = vld [vmem:[%s27839_s1 + $0x38c] ss:$16 sps:$4 sm:$0xff]  }
 0x3a9   :  { %8210 = vmatpush1.bf16.msra.mxu1 %v19407_v18  ;;  %8248 = vmatprep.subr.bf16.mxu0 %v19418_v32  ;;  %v19457_v18 = vld [vmem:[%s27839_s1 + $0x14c] ss:$16 sps:$4 sm:$0xff]   ;;  %v19458_v32 = vld [vmem:[%s27839_s1 + $0x388] ss:$16 sps:$4 sm:$0xff]  }
 0x3aa   :  { %8211 = vmatprep.subr.bf16.mxu1 %v19415_v20  ;;  %v19455_v20 = vld [vmem:[%s27839_s1 + $0x148] ss:$16 sps:$4 sm:$0xff]  }
 0x3ac   :  { %8249 = vmatpush1.bf16.msra.mxu0 %v19416_v24  ;;  %v19466_v24 = vld [vmem:[%s27839_s1 + $0x36c] ss:$16 sps:$4 sm:$0xff]  }
 0x3ad   :  { %8212 = vmatpush1.bf16.msra.mxu1 %v19413_v58  ;;  %8250 = vmatprep.subr.bf16.mxu0 %v19424_v56  ;;  %v19463_v58 = vld [vmem:[%s27839_s1 + $0x12c] ss:$16 sps:$4 sm:$0xff]   ;;  %v19464_v56 = vld [vmem:[%s27839_s1 + $0x368] ss:$16 sps:$4 sm:$0xff]  }
 0x3ae   :  { %8213 = vmatprep.subr.bf16.mxu1 %v19421_v28  ;;  %v19461_v28 = vld [vmem:[%s27839_s1 + $0x128] ss:$16 sps:$4 sm:$0xff]  }
 0x3b0   :  { %8251 = vmatpush1.bf16.msra.mxu0 %v19422_v33  ;;  %v19472_v33 = vld [vmem:[%s27839_s1 + $0x34c] ss:$16 sps:$4 sm:$0xff]  }
 0x3b1   :  { %8214 = vmatpush1.bf16.msra.mxu1 %v19419_v38  ;;  %8252 = vmatprep.subr.bf16.mxu0 %v19430_v39  ;;  %v19469_v38 = vld [vmem:[%s27839_s1 + $0x10c] ss:$16 sps:$4 sm:$0xff]   ;;  %v19470_v39 = vld [vmem:[%s27839_s1 + $0x348] ss:$16 sps:$4 sm:$0xff]  }
 0x3b2   :  { %8215 = vmatprep.subr.bf16.mxu1 %v19427_v43  ;;  %v19467_v43 = vld [vmem:[%s27839_s1 + $0x108] ss:$16 sps:$4 sm:$0xff]  }
 0x3b4   :  { %8253 = vmatpush1.bf16.msra.mxu0 %v19428_v45  ;;  %v19475_v45 = vld [vmem:[%s27839_s1 + $0x32c] ss:$16 sps:$4 sm:$0xff]  }
 0x3b5   :  { %8216 = vmatpush2.bf16.msra.mxu1 %v19425_v60  ;;  %8254 = vmatprep.subr.bf16.mxu0 %v19436_v46  ;;  %v19473_v60 = vld [vmem:[%s27839_s1 + $0x328] ss:$16 sps:$4 sm:$0xff]   ;;  %v19478_v46 = vld [vmem:[%s27839_s1 + $0x4ec] ss:$16 sps:$4 sm:$0xff]  }
 0x3b6   :  { %8217 = vmatprep.subr.bf16.mxu1 %v19433_v50  ;;  %v19476_v50 = vld [vmem:[%s27839_s1 + $0x4e8] ss:$16 sps:$4 sm:$0xff]  }
 0x3b8   :  { %8255 = vmatpush1.bf16.msra.mxu0 %v19434_v25  ;;  %v19481_v25 = vld [vmem:[%s27839_s1 + $0x30c] ss:$16 sps:$4 sm:$0xff]  }
 0x3b9   :  { %8218 = vmatpush2.bf16.msra.mxu1 %v19431_v52  ;;  %8256 = vmatprep.subr.bf16.mxu0 %v19442_v53  ;;  %v19479_v52 = vld [vmem:[%s27839_s1 + $0x308] ss:$16 sps:$4 sm:$0xff]   ;;  %v19484_v53 = vld [vmem:[%s27839_s1 + $0x4cc] ss:$16 sps:$4 sm:$0xff]  }
 0x3ba   :  { %8219 = vmatprep.subr.bf16.mxu1 %v19439_v55 }
 0x3bc   :  { %8257 = vmatpush2.bf16.msra.mxu0 %v19440_v57  ;;  %v19482_v57 = vld [vmem:[%s27839_s1 + $0x4c8] ss:$16 sps:$4 sm:$0xff]  }
 0x3bd   :  { %8220 = vmatpush2.bf16.msra.mxu1 %v19437_v59  ;;  %8258 = vmatprep.subr.bf16.mxu0 %v19448_v30  ;;  %v19490_v59 = vld [vmem:[%s27839_s1 + $0x6ec] ss:$16 sps:$4 sm:$0xff]  }
 0x3be   :  { %8221 = vmatprep.subr.bf16.mxu1 %v19445_v62 }
 0x3c0   :  { %8259 = vmatpush2.bf16.msra.mxu0 %v19446_v63 }
 0x3c1   :  { %8222 = vmatpush2.bf16.msra.mxu1 %v19443_v3  ;;  %8260 = vmatprep.subr.bf16.mxu0 %v19454_v13 }
 0x3c2   :  { %8223 = vmatprep.subr.bf16.mxu1 %v19451_v35 }
 0x3c4   :  { %8261 = vmatpush2.bf16.msra.mxu0 %v19452_v9  ;;  %v19487_v9 = vld [vmem:[%s27839_s1 + $0x4ac] ss:$16 sps:$4 sm:$0xff]  }
 0x3c5   :  { %8224 = vmatpush2.bf16.msra.mxu1 %v19449_v42  ;;  %8262 = vmatprep.subr.bf16.mxu0 %v19460_v12  ;;  %v19488_v42 = vld [vmem:[%s27839_s1 + $0x6e8] ss:$16 sps:$4 sm:$0xff]  }
 0x3c6   :  { %8225 = vmatprep.subr.bf16.mxu1 %v19457_v18 }
 0x3c8   :  { %8263 = vmatpush2.bf16.msra.mxu0 %v19458_v32 }
 0x3c9   :  { %8226 = vmatpush2.bf16.msra.mxu1 %v19455_v20  ;;  %8264 = vmatprep.subr.bf16.mxu0 %v19466_v24  ;;  %v19493_v20 = vld [vmem:[%s27839_s1 + $0x48c] ss:$16 sps:$4 sm:$0xff]   ;;  %v19491_v24 = vld [vmem:[%s27839_s1 + $0x488] ss:$16 sps:$4 sm:$0xff]  }
 0x3ca   :  { %8227 = vmatprep.subr.bf16.mxu1 %v19463_v58  ;;  %v19494_v58 = vld [vmem:[%s27839_s1 + $0x6c8] ss:$16 sps:$4 sm:$0xff]  }
 0x3cc   :  { %8265 = vmatpush2.bf16.msra.mxu0 %v19464_v56  ;;  %v19502_v56 = vld [vmem:[%s27839_s1 + $0x6ac] ss:$16 sps:$4 sm:$0xff]  }
 0x3cd   :  { %8228 = vmatpush2.bf16.msra.mxu1 %v19461_v28  ;;  %8266 = vmatprep.subr.bf16.mxu0 %v19472_v33  ;;  %v19500_v28 = vld [vmem:[%s27839_s1 + $0x6a8] ss:$16 sps:$4 sm:$0xff]  }
 0x3ce   :  { %8229 = vmatprep.subr.bf16.mxu1 %v19469_v38  ;;  %v19497_v33 = vld [vmem:[%s27839_s1 + $0x468] ss:$16 sps:$4 sm:$0xff]   ;;  %v19505_v38 = vld [vmem:[%s27839_s1 + $0x44c] ss:$16 sps:$4 sm:$0xff]  }
 0x3d0   :  { %8267 = vmatpush2.bf16.msra.mxu0 %v19470_v39  ;;  %v19506_v39 = vld [vmem:[%s27839_s1 + $0x688] ss:$16 sps:$4 sm:$0xff]  }
 0x3d1   :  { %8230 = vmatpush2.bf16.msra.mxu1 %v19467_v43  ;;  %8268 = vmatprep.subr.bf16.mxu0 %v19475_v45  ;;  %v19503_v43 = vld [vmem:[%s27839_s1 + $0x448] ss:$16 sps:$4 sm:$0xff]   ;;  %v19514_v45 = vld [vmem:[%s27839_s1 + $0x66c] ss:$16 sps:$4 sm:$0xff]  }
 0x3d2   :  { %8281 = vmatprep.subr.bf16.mxu1 %v19478_v46  ;;  %v19512_v46 = vld [vmem:[%s27839_s1 + $0x668] ss:$16 sps:$4 sm:$0xff]  }
 0x3d3   :  { %v7946_v55 = vpop.f32.mrf.mxu0 }
 0x3d4   :  { %v7947_v30 = vadd.f32 %v7946_v55, %v25977_v7  ;;  %v7987_v62 = vpop.f32.mrf.mxu1  ;;  %8232 = vmatmul.mubr.bf16.vlgmr.msra.gmra.mxu1 %v24594_v48  ;;  %8269 = vmatpush2.bf16.msra.mxu0 %v19473_v60  ;;  %v19485_v48 = vld [vmem:[%s27839_s1 + $0x4a8] ss:$16 sps:$4 sm:$0xff]   ;;  %v19511_v60 = vld [vmem:[%s27839_s1 + $0x42c] ss:$16 sps:$4 sm:$0xff]  }
 0x3d5   :  { %8282 = vmatpush1.bf16.msra.mxu1 %v19476_v50  ;;  %v7948_v63 = vpop.f32.mrf.mxu0  ;;  %8270 = vmatprep.subr.bf16.mxu0 %v19481_v25  ;;  %v19509_v50 = vld [vmem:[%s27839_s1 + $0x428] ss:$16 sps:$4 sm:$0xff]   ;;  %v19520_v25 = vld [vmem:[%s27839_s1 + $0x64c] ss:$16 sps:$4 sm:$0xff]  }
 0x3d6   :  { %v26183_v3 = vadd.f32 %v7987_v62, %v7947_v30  ;;  %v7949_v13 = vadd.f32 %v7948_v63, %v25996_v6  ;;  %v7989_v35 = vpop.f32.mrf.mxu1  ;;  %8283 = vmatprep.subr.bf16.mxu1 %v19484_v53  ;;  %8313 = vmatprep.mubr.bf16.mxu1 %v24695_v21  ;;  %v19496_v6 = vld [vmem:[%s27839_s1 + $0x6cc] ss:$16 sps:$4 sm:$0xff]   ;;  %v19518_v53 = vld [vmem:[%s27839_s1 + $0x648] ss:$16 sps:$4 sm:$0xff]  }
 0x3d7   :  { %v7950_v7 = vpop.f32.mrf.mxu0  ;;  %v19515_v55 = vld [vmem:[%s27839_s1 + $0x408] ss:$16 sps:$4 sm:$0xff]   ;;  %v19532_v63 = vld [vmem:[%s27839_s1 + $0x60c] ss:$16 sps:$4 sm:$0xff]  }
 0x3d8   :  { %v26199_v12 = vadd.f32 %v7989_v35, %v7949_v13  ;;  %v7991_v18 = vpop.f32.mrf.mxu1  ;;  %8271 = vmatpush2.bf16.msra.mxu0 %v19479_v52  ;;  %v19517_v52 = vld [vmem:[%s27839_s1 + $0x40c] ss:$16 sps:$4 sm:$0xff]   ;;  %v19524_v30 = vld [vmem:[%s27839_s1 + $0x628] ss:$16 sps:$4 sm:$0xff]  }
 0x3d9   :  { %8284 = vmatpush1.bf16.msra.mxu1 %v19482_v57  ;;  %v7951_v32 = vpop.f32.mrf.mxu0  ;;  %8322 = vmatprep.subr.bf16.mxu0 %v19490_v59  ;;  %v19526_v57 = vld [vmem:[%s27839_s1 + $0x62c] ss:$16 sps:$4 sm:$0xff]   ;;  %v19521_v62 = vld [vmem:[%s27839_s1 + $0x5e8] ss:$16 sps:$4 sm:$0xff]  }
 0x3da   :  { %v7992_v21 = vpop.f32.mrf.mxu1  ;;  %8285 = vmatprep.subr.bf16.mxu1 %v19487_v9  ;;  %v19523_v59 = vld [vmem:[%s27839_s1 + $0x5ec] ss:$16 sps:$4 sm:$0xff]   ;;  %v19530_v35 = vld [vmem:[%s27839_s1 + $0x608] ss:$16 sps:$4 sm:$0xff]  }
 0x3db   :  { %8273 = vmatmul.mubr.bf16.vlgmr.msra.gmra.mxu0 %v24596_v49  ;;  %v19499_v49 = vld [vmem:[%s27839_s1 + $0x46c] ss:$16 sps:$4 sm:$0xff]   ;;  %v19527_v9 = vld [vmem:[%s27839_s1 + $0x5c8] ss:$16 sps:$4 sm:$0xff]  }
 0x3dc   :  { %8323 = vmatpush1.bf16.msra.mxu0 %v19488_v42  ;;  %8354 = vmatprep.mubr.bf16.mxu0 %v24708_v26  ;;  %v19508_v26 = vld [vmem:[%s27839_s1 + $0x68c] ss:$16 sps:$4 sm:$0xff]   ;;  %v19536_v42 = vld [vmem:[%s27839_s1 + $0x7e8] ss:$16 sps:$4 sm:$0xff]  }
 0x3dd   :  { %8286 = vmatpush1.bf16.msra.mxu1 %v19485_v48  ;;  %8324 = vmatprep.subr.bf16.mxu0 %v19496_v6  ;;  %v19529_v13 = vld [vmem:[%s27839_s1 + $0x5cc] ss:$16 sps:$4 sm:$0xff]   ;;  %v19533_v6 = vld [vmem:[%s27839_s1 + $0x5a8] ss:$16 sps:$4 sm:$0xff]  }
 0x3de   :  { %8287 = vmatprep.subr.bf16.mxu1 %v19493_v20  ;;  %v19538_v7 = vld [vmem:[%s27839_s1 + $0x7ec] ss:$16 sps:$4 sm:$0xff]   ;;  %v19542_v21 = vld [vmem:[%s27839_s1 + $0x7c8] ss:$16 sps:$4 sm:$0xff]  }
 0x3df   :  { %v19535_v48 = vld [vmem:[%s27839_s1 + $0x5ac] ss:$16 sps:$4 sm:$0xff]   ;;  %v19539_v20 = vld [vmem:[%s27839_s1 + $0x588] ss:$16 sps:$4 sm:$0xff]  }
 0x3e0   :  { %8325 = vmatpush1.bf16.msra.mxu0 %v19494_v58  ;;  %v19544_v18 = vld [vmem:[%s27839_s1 + $0x7cc] ss:$16 sps:$4 sm:$0xff]  }
 0x3e1   :  { %8288 = vmatpush1.bf16.msra.mxu1 %v19491_v24  ;;  %8326 = vmatprep.subr.bf16.mxu0 %v19502_v56  ;;  %v19541_v32 = vld [vmem:[%s27839_s1 + $0x58c] ss:$16 sps:$4 sm:$0xff]   ;;  %v19548_v56 = vld [vmem:[%s27839_s1 + $0x7a8] ss:$16 sps:$4 sm:$0xff]  }
 0x3e2   :  { %8289 = vmatprep.subr.bf16.mxu1 %v19499_v49  ;;  %v19550_v24 = vld [vmem:[%s27839_s1 + $0x7ac] ss:$16 sps:$4 sm:$0xff]   ;;  %v19545_v49 = vld [vmem:[%s27839_s1 + $0x568] ss:$16 sps:$4 sm:$0xff]  }
 0x3e3   :  { %v19547_v58 = vld [vmem:[%s27839_s1 + $0x56c] ss:$16 sps:$4 sm:$0xff]  }
 0x3e4   :  { %8327 = vmatpush1.bf16.msra.mxu0 %v19500_v28  ;;  %v19556_v28 = vld [vmem:[%s27839_s1 + $0x78c] ss:$16 sps:$4 sm:$0xff]  }
 0x3e5   :  { %8290 = vmatpush1.bf16.msra.mxu1 %v19497_v33  ;;  %8328 = vmatprep.subr.bf16.mxu0 %v19508_v26  ;;  %v19553_v33 = vld [vmem:[%s27839_s1 + $0x54c] ss:$16 sps:$4 sm:$0xff]   ;;  %v19554_v26 = vld [vmem:[%s27839_s1 + $0x788] ss:$16 sps:$4 sm:$0xff]  }
 0x3e6   :  { %8291 = vmatprep.subr.bf16.mxu1 %v19505_v38  ;;  %v19551_v38 = vld [vmem:[%s27839_s1 + $0x548] ss:$16 sps:$4 sm:$0xff]  }
 0x3e8   :  { %8329 = vmatpush1.bf16.msra.mxu0 %v19506_v39  ;;  %v19562_v39 = vld [vmem:[%s27839_s1 + $0x76c] ss:$16 sps:$4 sm:$0xff]  }
 0x3e9   :  { %8292 = vmatpush1.bf16.msra.mxu1 %v19503_v43  ;;  %8330 = vmatprep.subr.bf16.mxu0 %v19514_v45  ;;  %v19559_v43 = vld [vmem:[%s27839_s1 + $0x52c] ss:$16 sps:$4 sm:$0xff]   ;;  %v19560_v45 = vld [vmem:[%s27839_s1 + $0x768] ss:$16 sps:$4 sm:$0xff]  }
 0x3ea   :  { %8293 = vmatprep.subr.bf16.mxu1 %v19511_v60  ;;  %v19557_v60 = vld [vmem:[%s27839_s1 + $0x528] ss:$16 sps:$4 sm:$0xff]  }
 0x3ec   :  { %8331 = vmatpush1.bf16.msra.mxu0 %v19512_v46  ;;  %v19568_v46 = vld [vmem:[%s27839_s1 + $0x74c] ss:$16 sps:$4 sm:$0xff]  }
 0x3ed   :  { %8294 = vmatpush1.bf16.msra.mxu1 %v19509_v50  ;;  %8332 = vmatprep.subr.bf16.mxu0 %v19520_v25  ;;  %v19565_v50 = vld [vmem:[%s27839_s1 + $0x50c] ss:$16 sps:$4 sm:$0xff]   ;;  %v19566_v25 = vld [vmem:[%s27839_s1 + $0x748] ss:$16 sps:$4 sm:$0xff]  }
 0x3ee   :  { %8295 = vmatprep.subr.bf16.mxu1 %v19517_v52  ;;  %v19563_v52 = vld [vmem:[%s27839_s1 + $0x508] ss:$16 sps:$4 sm:$0xff]  }
 0x3f0   :  { %8333 = vmatpush1.bf16.msra.mxu0 %v19518_v53  ;;  %v19571_v53 = vld [vmem:[%s27839_s1 + $0x72c] ss:$16 sps:$4 sm:$0xff]  }
 0x3f1   :  { %8296 = vmatpush1.bf16.msra.mxu1 %v19515_v55  ;;  %8334 = vmatprep.subr.bf16.mxu0 %v19526_v57  ;;  %v19574_v55 = vld [vmem:[%s27839_s1 + $0x8ec] ss:$16 sps:$4 sm:$0xff]   ;;  %v19569_v57 = vld [vmem:[%s27839_s1 + $0x728] ss:$16 sps:$4 sm:$0xff]  }
 0x3f2   :  { %8297 = vmatprep.subr.bf16.mxu1 %v19523_v59  ;;  %v19572_v59 = vld [vmem:[%s27839_s1 + $0x8e8] ss:$16 sps:$4 sm:$0xff]  }
 0x3f4   :  { %8335 = vmatpush1.bf16.msra.mxu0 %v19524_v30  ;;  %v19577_v30 = vld [vmem:[%s27839_s1 + $0x70c] ss:$16 sps:$4 sm:$0xff]  }
 0x3f5   :  { %8298 = vmatpush2.bf16.msra.mxu1 %v19521_v62  ;;  %8336 = vmatprep.subr.bf16.mxu0 %v19532_v63  ;;  %v19580_v62 = vld [vmem:[%s27839_s1 + $0x8cc] ss:$16 sps:$4 sm:$0xff]  }
 0x3f6   :  { %8299 = vmatprep.subr.bf16.mxu1 %v19529_v13 }
 0x3f8   :  { %8337 = vmatpush1.bf16.msra.mxu0 %v19530_v35 }
 0x3f9   :  { %8300 = vmatpush2.bf16.msra.mxu1 %v19527_v9  ;;  %8338 = vmatprep.subr.bf16.mxu0 %v19538_v7  ;;  %v19575_v9 = vld [vmem:[%s27839_s1 + $0x708] ss:$16 sps:$4 sm:$0xff]  }
 0x3fa   :  { %8301 = vmatprep.subr.bf16.mxu1 %v19535_v48  ;;  %v19578_v48 = vld [vmem:[%s27839_s1 + $0x8c8] ss:$16 sps:$4 sm:$0xff]  }
 0x3fc   :  { %8339 = vmatpush2.bf16.msra.mxu0 %v19536_v42  ;;  %v19586_v42 = vld [vmem:[%s27839_s1 + $0xaec] ss:$16 sps:$4 sm:$0xff]  }
 0x3fd   :  { %8302 = vmatpush2.bf16.msra.mxu1 %v19533_v6  ;;  %8340 = vmatprep.subr.bf16.mxu0 %v19544_v18  ;;  %v19583_v18 = vld [vmem:[%s27839_s1 + $0x8ac] ss:$16 sps:$4 sm:$0xff]  }
 0x3fe   :  { %8303 = vmatprep.subr.bf16.mxu1 %v19541_v32 }
 0x400   :  { %8341 = vmatpush2.bf16.msra.mxu0 %v19542_v21 }
 0x401   :  { %8304 = vmatpush2.bf16.msra.mxu1 %v19539_v20  ;;  %8342 = vmatprep.subr.bf16.mxu0 %v19550_v24  ;;  %v19584_v24 = vld [vmem:[%s27839_s1 + $0xae8] ss:$16 sps:$4 sm:$0xff]  }
 0x402   :  { %8305 = vmatprep.subr.bf16.mxu1 %v19547_v58 }
 0x404   :  { %8343 = vmatpush2.bf16.msra.mxu0 %v19548_v56 }
 0x405   :  { %8306 = vmatpush2.bf16.msra.mxu1 %v19545_v49  ;;  %8344 = vmatprep.subr.bf16.mxu0 %v19556_v28  ;;  %v19589_v49 = vld [vmem:[%s27839_s1 + $0x88c] ss:$16 sps:$4 sm:$0xff]   ;;  %v19590_v28 = vld [vmem:[%s27839_s1 + $0xac8] ss:$16 sps:$4 sm:$0xff]  }
 0x406   :  { %8307 = vmatprep.subr.bf16.mxu1 %v19553_v33  ;;  %v19587_v33 = vld [vmem:[%s27839_s1 + $0x888] ss:$16 sps:$4 sm:$0xff]  }
 0x408   :  { %8345 = vmatpush2.bf16.msra.mxu0 %v19554_v26  ;;  %v19598_v26 = vld [vmem:[%s27839_s1 + $0xaac] ss:$16 sps:$4 sm:$0xff]  }
 0x409   :  { %8308 = vmatpush2.bf16.msra.mxu1 %v19551_v38  ;;  %8346 = vmatprep.subr.bf16.mxu0 %v19562_v39  ;;  %v19593_v38 = vld [vmem:[%s27839_s1 + $0x868] ss:$16 sps:$4 sm:$0xff]   ;;  %v19604_v39 = vld [vmem:[%s27839_s1 + $0xa8c] ss:$16 sps:$4 sm:$0xff]  }
 0x40a   :  { %8309 = vmatprep.subr.bf16.mxu1 %v19559_v43  ;;  %v19601_v43 = vld [vmem:[%s27839_s1 + $0x84c] ss:$16 sps:$4 sm:$0xff]  }
 0x40c   :  { %8347 = vmatpush2.bf16.msra.mxu0 %v19560_v45  ;;  %v19602_v45 = vld [vmem:[%s27839_s1 + $0xa88] ss:$16 sps:$4 sm:$0xff]  }
 0x40d   :  { %8310 = vmatpush2.bf16.msra.mxu1 %v19557_v60  ;;  %8348 = vmatprep.subr.bf16.mxu0 %v19568_v46  ;;  %v19599_v60 = vld [vmem:[%s27839_s1 + $0x848] ss:$16 sps:$4 sm:$0xff]   ;;  %v19610_v46 = vld [vmem:[%s27839_s1 + $0xa6c] ss:$16 sps:$4 sm:$0xff]  }
 0x40e   :  { %8311 = vmatprep.subr.bf16.mxu1 %v19565_v50  ;;  %v19607_v50 = vld [vmem:[%s27839_s1 + $0x82c] ss:$16 sps:$4 sm:$0xff]  }
 0x410   :  { %8349 = vmatpush2.bf16.msra.mxu0 %v19566_v25  ;;  %v19608_v25 = vld [vmem:[%s27839_s1 + $0xa68] ss:$16 sps:$4 sm:$0xff]  }
 0x411   :  { %8312 = vmatpush2.bf16.msra.mxu1 %v19563_v52  ;;  %8350 = vmatprep.subr.bf16.mxu0 %v19571_v53  ;;  %v19605_v52 = vld [vmem:[%s27839_s1 + $0x828] ss:$16 sps:$4 sm:$0xff]   ;;  %v19616_v53 = vld [vmem:[%s27839_s1 + $0xa4c] ss:$16 sps:$4 sm:$0xff]  }
 0x412   :  { %8363 = vmatprep.subr.bf16.mxu1 %v19574_v55  ;;  %v19613_v55 = vld [vmem:[%s27839_s1 + $0x80c] ss:$16 sps:$4 sm:$0xff]  }
 0x413   :  { %v8028_v63 = vpop.f32.mrf.mxu0 }
 0x414   :  { %v8029_v13 = vadd.f32 %v8028_v63, %v26183_v3  ;;  %v8069_v35 = vpop.f32.mrf.mxu1  ;;  %8314 = vmatmul.mubr.bf16.vlgmr.msra.gmra.mxu1 %v24813_v0  ;;  %8351 = vmatpush2.bf16.msra.mxu0 %v19569_v57  ;;  %v19614_v57 = vld [vmem:[%s27839_s1 + $0xa48] ss:$16 sps:$4 sm:$0xff]  }
 0x415   :  { %8364 = vmatpush1.bf16.msra.mxu1 %v19572_v59  ;;  %v8030_v7 = vpop.f32.mrf.mxu0  ;;  %8352 = vmatprep.subr.bf16.mxu0 %v19577_v30  ;;  %v19611_v59 = vld [vmem:[%s27839_s1 + $0x808] ss:$16 sps:$4 sm:$0xff]   ;;  %v19622_v30 = vld [vmem:[%s27839_s1 + $0xa2c] ss:$16 sps:$4 sm:$0xff]  }
 0x416   :  { %v26385_v3 = vadd.f32 %v8069_v35, %v8029_v13  ;;  %v8031_v0 = vadd.f32 %v8030_v7, %v26199_v12  ;;  %v8071_v6 = vpop.f32.mrf.mxu1  ;;  %8365 = vmatprep.subr.bf16.mxu1 %v19580_v62  ;;  %8395 = vmatprep.mubr.bf16.mxu1 %v24856_v16  ;;  %v19581_v12 = vld [vmem:[%s27839_s1 + $0x8a8] ss:$16 sps:$4 sm:$0xff]   ;;  %v19592_v16 = vld [vmem:[%s27839_s1 + $0xacc] ss:$16 sps:$4 sm:$0xff]  }
 0x417   :  { %v8032_v32 = vpop.f32.mrf.mxu0  ;;  %v19619_v62 = vld [vmem:[%s27839_s1 + $0x9ec] ss:$16 sps:$4 sm:$0xff]   ;;  %v19620_v63 = vld [vmem:[%s27839_s1 + $0xa28] ss:$16 sps:$4 sm:$0xff]  }
 0x418   :  { %v26392_v21 = vadd.f32 %v8071_v6, %v8031_v0  ;;  %v8073_v20 = vpop.f32.mrf.mxu1  ;;  %8353 = vmatpush2.bf16.msra.mxu0 %v19575_v9  ;;  %v19617_v13 = vld [vmem:[%s27839_s1 + $0x9e8] ss:$16 sps:$4 sm:$0xff]   ;;  %v19628_v35 = vld [vmem:[%s27839_s1 + $0xa0c] ss:$16 sps:$4 sm:$0xff]  }
 0x419   :  { %8366 = vmatpush1.bf16.msra.mxu1 %v19578_v48  ;;  %v8033_v58 = vpop.f32.mrf.mxu0  ;;  %8404 = vmatprep.subr.bf16.mxu0 %v19586_v42  ;;  %v19625_v9 = vld [vmem:[%s27839_s1 + $0x9cc] ss:$16 sps:$4 sm:$0xff]   ;;  %v19626_v7 = vld [vmem:[%s27839_s1 + $0xa08] ss:$16 sps:$4 sm:$0xff]  }
 0x41a   :  { %v8074_v56 = vpop.f32.mrf.mxu1  ;;  %8367 = vmatprep.subr.bf16.mxu1 %v19583_v18  ;;  %v19623_v48 = vld [vmem:[%s27839_s1 + $0x9c8] ss:$16 sps:$4 sm:$0xff]   ;;  %v19634_v42 = vld [vmem:[%s27839_s1 + $0xbec] ss:$16 sps:$4 sm:$0xff]  }
 0x41b   :  { %8355 = vmatmul.mubr.bf16.vlgmr.msra.gmra.mxu0 %v24820_v2  ;;  %v19595_v2 = vld [vmem:[%s27839_s1 + $0x86c] ss:$16 sps:$4 sm:$0xff]   ;;  %v19632_v6 = vld [vmem:[%s27839_s1 + $0xbe8] ss:$16 sps:$4 sm:$0xff]  }
 0x41c   :  { %8405 = vmatpush1.bf16.msra.mxu0 %v19584_v24  ;;  %8436 = vmatprep.mubr.bf16.mxu0 %v24867_v22  ;;  %v19596_v22 = vld [vmem:[%s27839_s1 + $0xaa8] ss:$16 sps:$4 sm:$0xff]   ;;  %v19631_v0 = vld [vmem:[%s27839_s1 + $0x9ac] ss:$16 sps:$4 sm:$0xff]  }
 0x41d   :  { %8368 = vmatpush1.bf16.msra.mxu1 %v19581_v12  ;;  %8406 = vmatprep.subr.bf16.mxu0 %v19592_v16  ;;  %v19629_v18 = vld [vmem:[%s27839_s1 + $0x9a8] ss:$16 sps:$4 sm:$0xff]   ;;  %v19640_v32 = vld [vmem:[%s27839_s1 + $0xbcc] ss:$16 sps:$4 sm:$0xff]  }
 0x41e   :  { %8369 = vmatprep.subr.bf16.mxu1 %v19589_v49  ;;  %v19637_v20 = vld [vmem:[%s27839_s1 + $0x98c] ss:$16 sps:$4 sm:$0xff]   ;;  %v19638_v24 = vld [vmem:[%s27839_s1 + $0xbc8] ss:$16 sps:$4 sm:$0xff]  }
 0x41f   :  { %v19635_v58 = vld [vmem:[%s27839_s1 + $0x988] ss:$16 sps:$4 sm:$0xff]   ;;  %v19646_v12 = vld [vmem:[%s27839_s1 + $0xbac] ss:$16 sps:$4 sm:$0xff]  }
 0x420   :  { %8407 = vmatpush1.bf16.msra.mxu0 %v19590_v28  ;;  %v19643_v16 = vld [vmem:[%s27839_s1 + $0x96c] ss:$16 sps:$4 sm:$0xff]   ;;  %v19644_v56 = vld [vmem:[%s27839_s1 + $0xba8] ss:$16 sps:$4 sm:$0xff]  }
 0x421   :  { %8370 = vmatpush1.bf16.msra.mxu1 %v19587_v33  ;;  %8408 = vmatprep.subr.bf16.mxu0 %v19598_v26  ;;  %v19641_v49 = vld [vmem:[%s27839_s1 + $0x968] ss:$16 sps:$4 sm:$0xff]   ;;  %v19652_v28 = vld [vmem:[%s27839_s1 + $0xb8c] ss:$16 sps:$4 sm:$0xff]  }
 0x422   :  { %8371 = vmatprep.subr.bf16.mxu1 %v19595_v2  ;;  %v19649_v33 = vld [vmem:[%s27839_s1 + $0x94c] ss:$16 sps:$4 sm:$0xff]   ;;  %v19650_v26 = vld [vmem:[%s27839_s1 + $0xb88] ss:$16 sps:$4 sm:$0xff]  }
 0x423   :  { %v19647_v2 = vld [vmem:[%s27839_s1 + $0x948] ss:$16 sps:$4 sm:$0xff]  }
 0x424   :  { %8409 = vmatpush1.bf16.msra.mxu0 %v19596_v22  ;;  %v19658_v22 = vld [vmem:[%s27839_s1 + $0xb6c] ss:$16 sps:$4 sm:$0xff]  }
 0x425   :  { %8372 = vmatpush1.bf16.msra.mxu1 %v19593_v38  ;;  %8410 = vmatprep.subr.bf16.mxu0 %v19604_v39  ;;  %v19655_v38 = vld [vmem:[%s27839_s1 + $0x92c] ss:$16 sps:$4 sm:$0xff]   ;;  %v19656_v39 = vld [vmem:[%s27839_s1 + $0xb68] ss:$16 sps:$4 sm:$0xff]  }
 0x426   :  { %8373 = vmatprep.subr.bf16.mxu1 %v19601_v43  ;;  %v19653_v43 = vld [vmem:[%s27839_s1 + $0x928] ss:$16 sps:$4 sm:$0xff]  }
 0x428   :  { %8411 = vmatpush1.bf16.msra.mxu0 %v19602_v45  ;;  %v19664_v45 = vld [vmem:[%s27839_s1 + $0xb4c] ss:$16 sps:$4 sm:$0xff]  }
 0x429   :  { %8374 = vmatpush1.bf16.msra.mxu1 %v19599_v60  ;;  %8412 = vmatprep.subr.bf16.mxu0 %v19610_v46  ;;  %v19661_v60 = vld [vmem:[%s27839_s1 + $0x90c] ss:$16 sps:$4 sm:$0xff]   ;;  %v19662_v46 = vld [vmem:[%s27839_s1 + $0xb48] ss:$16 sps:$4 sm:$0xff]  }
 0x42a   :  { %8375 = vmatprep.subr.bf16.mxu1 %v19607_v50  ;;  %v19659_v50 = vld [vmem:[%s27839_s1 + $0x908] ss:$16 sps:$4 sm:$0xff]  }
 0x42c   :  { %8413 = vmatpush1.bf16.msra.mxu0 %v19608_v25  ;;  %v19667_v25 = vld [vmem:[%s27839_s1 + $0xb2c] ss:$16 sps:$4 sm:$0xff]  }
 0x42d   :  { %8376 = vmatpush1.bf16.msra.mxu1 %v19605_v52  ;;  %8414 = vmatprep.subr.bf16.mxu0 %v19616_v53  ;;  %v19670_v52 = vld [vmem:[%s27839_s1 + $0xcec] ss:$16 sps:$4 sm:$0xff]   ;;  %v19665_v53 = vld [vmem:[%s27839_s1 + $0xb28] ss:$16 sps:$4 sm:$0xff]  }
 0x42e   :  { %8377 = vmatprep.subr.bf16.mxu1 %v19613_v55  ;;  %v19668_v55 = vld [vmem:[%s27839_s1 + $0xce8] ss:$16 sps:$4 sm:$0xff]  }
 0x430   :  { %8415 = vmatpush1.bf16.msra.mxu0 %v19614_v57  ;;  %v19673_v57 = vld [vmem:[%s27839_s1 + $0xb0c] ss:$16 sps:$4 sm:$0xff]  }
 0x431   :  { %8378 = vmatpush1.bf16.msra.mxu1 %v19611_v59  ;;  %8416 = vmatprep.subr.bf16.mxu0 %v19622_v30  ;;  %v19676_v59 = vld [vmem:[%s27839_s1 + $0xccc] ss:$16 sps:$4 sm:$0xff]  }
 0x432   :  { %8379 = vmatprep.subr.bf16.mxu1 %v19619_v62 }
 0x434   :  { %8417 = vmatpush1.bf16.msra.mxu0 %v19620_v63 }
 0x435   :  { %8380 = vmatpush2.bf16.msra.mxu1 %v19617_v13  ;;  %8418 = vmatprep.subr.bf16.mxu0 %v19628_v35  ;;  %v19671_v13 = vld [vmem:[%s27839_s1 + $0xb08] ss:$16 sps:$4 sm:$0xff]  }
 0x436   :  { %8381 = vmatprep.subr.bf16.mxu1 %v19625_v9  ;;  %v19674_v9 = vld [vmem:[%s27839_s1 + $0xcc8] ss:$16 sps:$4 sm:$0xff]  }
 0x438   :  { %8419 = vmatpush1.bf16.msra.mxu0 %v19626_v7  ;;  %v19682_v7 = vld [vmem:[%s27839_s1 + $0xeec] ss:$16 sps:$4 sm:$0xff]  }
 0x439   :  { %8382 = vmatpush2.bf16.msra.mxu1 %v19623_v48  ;;  %8420 = vmatprep.subr.bf16.mxu0 %v19634_v42  ;;  %v19679_v42 = vld [vmem:[%s27839_s1 + $0xcac] ss:$16 sps:$4 sm:$0xff]  }
 0x43a   :  { %8383 = vmatprep.subr.bf16.mxu1 %v19631_v0 }
 0x43c   :  { %8421 = vmatpush2.bf16.msra.mxu0 %v19632_v6 }
 0x43d   :  { %8384 = vmatpush2.bf16.msra.mxu1 %v19629_v18  ;;  %8422 = vmatprep.subr.bf16.mxu0 %v19640_v32  ;;  %v19680_v32 = vld [vmem:[%s27839_s1 + $0xee8] ss:$16 sps:$4 sm:$0xff]  }
 0x43e   :  { %8385 = vmatprep.subr.bf16.mxu1 %v19637_v20 }
 0x440   :  { %8423 = vmatpush2.bf16.msra.mxu0 %v19638_v24  ;;  %v19688_v24 = vld [vmem:[%s27839_s1 + $0xecc] ss:$16 sps:$4 sm:$0xff]  }
 0x441   :  { %8386 = vmatpush2.bf16.msra.mxu1 %v19635_v58  ;;  %8424 = vmatprep.subr.bf16.mxu0 %v19646_v12  ;;  %v19685_v58 = vld [vmem:[%s27839_s1 + $0xc8c] ss:$16 sps:$4 sm:$0xff]  }
 0x442   :  { %8387 = vmatprep.subr.bf16.mxu1 %v19643_v16 }
 0x444   :  { %8425 = vmatpush2.bf16.msra.mxu0 %v19644_v56  ;;  %v19686_v56 = vld [vmem:[%s27839_s1 + $0xec8] ss:$16 sps:$4 sm:$0xff]  }
 0x445   :  { %8388 = vmatpush2.bf16.msra.mxu1 %v19641_v49  ;;  %8426 = vmatprep.subr.bf16.mxu0 %v19652_v28  ;;  %v19683_v28 = vld [vmem:[%s27839_s1 + $0xc88] ss:$16 sps:$4 sm:$0xff]  }
 0x446   :  { %8389 = vmatprep.subr.bf16.mxu1 %v19649_v33 }
 0x448   :  { %8427 = vmatpush2.bf16.msra.mxu0 %v19650_v26  ;;  %v19691_v26 = vld [vmem:[%s27839_s1 + $0xc6c] ss:$16 sps:$4 sm:$0xff]  }
 0x449   :  { %8390 = vmatpush2.bf16.msra.mxu1 %v19647_v2  ;;  %8428 = vmatprep.subr.bf16.mxu0 %v19658_v22 }
 0x44a   :  { %8391 = vmatprep.subr.bf16.mxu1 %v19655_v38  ;;  %v19689_v38 = vld [vmem:[%s27839_s1 + $0xc68] ss:$16 sps:$4 sm:$0xff]  }
 0x44c   :  { %8429 = vmatpush2.bf16.msra.mxu0 %v19656_v39  ;;  %v19700_v39 = vld [vmem:[%s27839_s1 + $0xe8c] ss:$16 sps:$4 sm:$0xff]  }
 0x44d   :  { %8392 = vmatpush2.bf16.msra.mxu1 %v19653_v43  ;;  %8430 = vmatprep.subr.bf16.mxu0 %v19664_v45  ;;  %v19697_v43 = vld [vmem:[%s27839_s1 + $0xc4c] ss:$16 sps:$4 sm:$0xff]   ;;  %v19698_v45 = vld [vmem:[%s27839_s1 + $0xe88] ss:$16 sps:$4 sm:$0xff]  }
 0x44e   :  { %8393 = vmatprep.subr.bf16.mxu1 %v19661_v60  ;;  %v19695_v60 = vld [vmem:[%s27839_s1 + $0xc48] ss:$16 sps:$4 sm:$0xff]  }
 0x450   :  { %8431 = vmatpush2.bf16.msra.mxu0 %v19662_v46  ;;  %v19706_v46 = vld [vmem:[%s27839_s1 + $0xe6c] ss:$16 sps:$4 sm:$0xff]  }
 0x451   :  { %8394 = vmatpush2.bf16.msra.mxu1 %v19659_v50  ;;  %8432 = vmatprep.subr.bf16.mxu0 %v19667_v25  ;;  %v19703_v50 = vld [vmem:[%s27839_s1 + $0xc2c] ss:$16 sps:$4 sm:$0xff]   ;;  %v19704_v25 = vld [vmem:[%s27839_s1 + $0xe68] ss:$16 sps:$4 sm:$0xff]  }
 0x452   :  { %8445 = vmatprep.subr.bf16.mxu1 %v19670_v52  ;;  %v19701_v52 = vld [vmem:[%s27839_s1 + $0xc28] ss:$16 sps:$4 sm:$0xff]  }
 0x453   :  { %v8110_v30 = vpop.f32.mrf.mxu0 }
 0x454   :  { %v8111_v62 = vadd.f32 %v8110_v30, %v26385_v3  ;;  %v8151_v63 = vpop.f32.mrf.mxu1  ;;  %8396 = vmatmul.mubr.bf16.vlgmr.msra.gmra.mxu1 %v25045_v34  ;;  %8433 = vmatpush2.bf16.msra.mxu0 %v19665_v53  ;;  %v19712_v53 = vld [vmem:[%s27839_s1 + $0xe4c] ss:$16 sps:$4 sm:$0xff]  }
 0x455   :  { %8446 = vmatpush1.bf16.msra.mxu1 %v19668_v55  ;;  %v8112_v35 = vpop.f32.mrf.mxu0  ;;  %8434 = vmatprep.subr.bf16.mxu0 %v19673_v57  ;;  %v19709_v55 = vld [vmem:[%s27839_s1 + $0xc0c] ss:$16 sps:$4 sm:$0xff]   ;;  %v19710_v57 = vld [vmem:[%s27839_s1 + $0xe48] ss:$16 sps:$4 sm:$0xff]  }
 0x456   :  { %v8152_v3 = vadd.f32 %v8151_v63, %v8111_v62  ;;  %v8113_v48 = vadd.f32 %v8112_v35, %v26392_v21  ;;  %v8153_v34 = vpop.f32.mrf.mxu1  ;;  %8447 = vmatprep.subr.bf16.mxu1 %v19676_v59  ;;  %8477 = vmatprep.mubr.bf16.mxu1 %v25065_v40  ;;  %v19677_v21 = vld [vmem:[%s27839_s1 + $0xca8] ss:$16 sps:$4 sm:$0xff]   ;;  %v19718_v30 = vld [vmem:[%s27839_s1 + $0xe2c] ss:$16 sps:$4 sm:$0xff]  }
 0x457   :  { %v8114_v0 = vpop.f32.mrf.mxu0  ;;  %v19707_v59 = vld [vmem:[%s27839_s1 + $0xc08] ss:$16 sps:$4 sm:$0xff]   ;;  %v19715_v62 = vld [vmem:[%s27839_s1 + $0xdec] ss:$16 sps:$4 sm:$0xff]  }
 0x458   :  { %v8154_v6 = vadd.f32 %v8153_v34, %v8113_v48  ;;  %v8155_v18 = vpop.f32.mrf.mxu1  ;;  %8435 = vmatpush2.bf16.msra.mxu0 %v19671_v13  ;;  %v19716_v63 = vld [vmem:[%s27839_s1 + $0xe28] ss:$16 sps:$4 sm:$0xff]   ;;  %v19724_v35 = vld [vmem:[%s27839_s1 + $0xe0c] ss:$16 sps:$4 sm:$0xff]  }
 0x459   :  { %8448 = vmatpush1.bf16.msra.mxu1 %v19674_v9  ;;  %v8115_v20 = vpop.f32.mrf.mxu0  ;;  %8486 = vmatprep.subr.bf16.mxu0 %v19682_v7  ;;  %v19713_v13 = vld [vmem:[%s27839_s1 + $0xde8] ss:$16 sps:$4 sm:$0xff]   ;;  %v19721_v9 = vld [vmem:[%s27839_s1 + $0xdcc] ss:$16 sps:$4 sm:$0xff]  }
 0x45a   :  { %v8156_v40 = vpop.f32.mrf.mxu1  ;;  %8449 = vmatprep.subr.bf16.mxu1 %v19679_v42  ;;  %v19722_v7 = vld [vmem:[%s27839_s1 + $0xe08] ss:$16 sps:$4 sm:$0xff]   ;;  %v19730_v48 = vld [vmem:[%s27839_s1 + $0xfec] ss:$16 sps:$4 sm:$0xff]  }
 0x45b   :  { %v8192_v12 = vpop.f32.mrf.mxu0  ;;  %8437 = vmatmul.mubr.bf16.vlgmr.msra.gmra.mxu0 %v25051_v37  ;;  %v19694_v37 = vld [vmem:[%s27839_s1 + $0xeac] ss:$16 sps:$4 sm:$0xff]   ;;  %v19728_v42 = vld [vmem:[%s27839_s1 + $0xfe8] ss:$16 sps:$4 sm:$0xff]  }
 0x45c   :  { %v26605_v16 = vadd.f32 %v8192_v12, %v8152_v3  ;;  %8487 = vmatpush1.bf16.msra.mxu0 %v19680_v32  ;;  %8518 = vmatprep.mubr.bf16.mxu0 %v25068_v41  ;;  %v19692_v41 = vld [vmem:[%s27839_s1 + $0xea8] ss:$16 sps:$4 sm:$0xff]   ;;  %v19727_v34 = vld [vmem:[%s27839_s1 + $0xdac] ss:$16 sps:$4 sm:$0xff]  }
 0x45d   :  { %8450 = vmatpush1.bf16.msra.mxu1 %v19677_v21  ;;  %v8194_v49 = vpop.f32.mrf.mxu0  ;;  %8488 = vmatprep.subr.bf16.mxu0 %v19688_v24  ;;  %v19719_v3 = vld [vmem:[%s27839_s1 + $0xdc8] ss:$16 sps:$4 sm:$0xff]   ;;  %v19733_v18 = vld [vmem:[%s27839_s1 + $0xd8c] ss:$16 sps:$4 sm:$0xff]  }
 0x45e   :  { %v26617_v33 = vadd.f32 %v8194_v49, %v8154_v6  ;;  %8451 = vmatprep.subr.bf16.mxu1 %v19685_v58  ;;  %v19725_v0 = vld [vmem:[%s27839_s1 + $0xda8] ss:$16 sps:$4 sm:$0xff]   ;;  %v19736_v6 = vld [vmem:[%s27839_s1 + $0xfcc] ss:$16 sps:$4 sm:$0xff]   ;;  %vm8814_vm3 = vcmp.gt.f32.partialorder %v26605_v16, 0.0 }
 0x45f   :  { %v8196_v2 = vpop.f32.mrf.mxu0  ;;  %v19734_v32 = vld [vmem:[%s27839_s1 + $0xfc8] ss:$16 sps:$4 sm:$0xff]   ;;  %v19742_v21 = vld [vmem:[%s27839_s1 + $0xfac] ss:$16 sps:$4 sm:$0xff]  }
 0x460   :  { %8489 = vmatpush1.bf16.msra.mxu0 %v19686_v56  ;;  %v19731_v20 = vld [vmem:[%s27839_s1 + $0xd88] ss:$16 sps:$4 sm:$0xff]   ;;  %v19739_v24 = vld [vmem:[%s27839_s1 + $0xd6c] ss:$16 sps:$4 sm:$0xff]   ;;  %vm8815_vm2 = vcmp.gt.f32.partialorder %v26617_v33, 0.0 }
 0x461   :  { %8452 = vmatpush1.bf16.msra.mxu1 %v19683_v28  ;;  %v8197_v22 = vpop.f32.mrf.mxu0  ;;  %8490 = vmatprep.subr.bf16.mxu0 %v19694_v37  ;;  %v19740_v40 = vld [vmem:[%s27839_s1 + $0xfa8] ss:$16 sps:$4 sm:$0xff]   ;;  %v19748_v12 = vld [vmem:[%s27839_s1 + $0xf8c] ss:$16 sps:$4 sm:$0xff]  }
 0x462   :  { %8453 = vmatprep.subr.bf16.mxu1 %v19691_v26  ;;  %v19737_v58 = vld [vmem:[%s27839_s1 + $0xd68] ss:$16 sps:$4 sm:$0xff]   ;;  %v19745_v56 = vld [vmem:[%s27839_s1 + $0xd4c] ss:$16 sps:$4 sm:$0xff]  }
 0x463   :  { %v19746_v49 = vld [vmem:[%s27839_s1 + $0xf88] ss:$16 sps:$4 sm:$0xff]   ;;  %v19754_v37 = vld [vmem:[%s27839_s1 + $0xf6c] ss:$16 sps:$4 sm:$0xff]  }
 0x464   :  { %8491 = vmatpush1.bf16.msra.mxu0 %v19692_v41  ;;  %v19743_v28 = vld [vmem:[%s27839_s1 + $0xd48] ss:$16 sps:$4 sm:$0xff]   ;;  %v19751_v26 = vld [vmem:[%s27839_s1 + $0xd2c] ss:$16 sps:$4 sm:$0xff]  }
 0x465   :  { %8454 = vmatpush1.bf16.msra.mxu1 %v19689_v38  ;;  %8492 = vmatprep.subr.bf16.mxu0 %v19700_v39  ;;  %v19752_v2 = vld [vmem:[%s27839_s1 + $0xf68] ss:$16 sps:$4 sm:$0xff]   ;;  %v19760_v22 = vld [vmem:[%s27839_s1 + $0xf4c] ss:$16 sps:$4 sm:$0xff]  }
 0x466   :  { %8455 = vmatprep.subr.bf16.mxu1 %v19697_v43  ;;  %v19749_v41 = vld [vmem:[%s27839_s1 + $0xd28] ss:$16 sps:$4 sm:$0xff]   ;;  %v19757_v38 = vld [vmem:[%s27839_s1 + $0xd0c] ss:$16 sps:$4 sm:$0xff]  }
 0x467   :  { %v19758_v39 = vld [vmem:[%s27839_s1 + $0xf48] ss:$16 sps:$4 sm:$0xff]  }
 0x468   :  { %8493 = vmatpush1.bf16.msra.mxu0 %v19698_v45  ;;  %v19755_v43 = vld [vmem:[%s27839_s1 + $0xd08] ss:$16 sps:$4 sm:$0xff]   ;;  %v19763_v45 = vld [vmem:[%s27839_s1 + $0xf2c] ss:$16 sps:$4 sm:$0xff]  }
 0x469   :  { %8456 = vmatpush1.bf16.msra.mxu1 %v19695_v60  ;;  %8494 = vmatprep.subr.bf16.mxu0 %v19706_v46  ;;  %v19766_v60 = vld [vmem:[%s27839_s1 + $0x10ec] ss:$16 sps:$4 sm:$0xff]   ;;  %v19761_v46 = vld [vmem:[%s27839_s1 + $0xf28] ss:$16 sps:$4 sm:$0xff]  }
 0x46a   :  { %8457 = vmatprep.subr.bf16.mxu1 %v19703_v50  ;;  %v19764_v50 = vld [vmem:[%s27839_s1 + $0x10e8] ss:$16 sps:$4 sm:$0xff]  }
 0x46c   :  { %8495 = vmatpush1.bf16.msra.mxu0 %v19704_v25  ;;  %v19769_v25 = vld [vmem:[%s27839_s1 + $0xf0c] ss:$16 sps:$4 sm:$0xff]  }
 0x46d   :  { %8458 = vmatpush1.bf16.msra.mxu1 %v19701_v52  ;;  %8496 = vmatprep.subr.bf16.mxu0 %v19712_v53  ;;  %v26776_v52 = vsub.s32 2, %v24497_v11  ;;  %v19772_v53 = vld [vmem:[%s27839_s1 + $0x10cc] ss:$16 sps:$4 sm:$0xff]  }
 0x46e   :  { %8459 = vmatprep.subr.bf16.mxu1 %v19709_v55 }
 0x470   :  { %8497 = vmatpush1.bf16.msra.mxu0 %v19710_v57  ;;  %v26783_v57 = vsub.s32 3, %v24497_v11 }
 0x471   :  { %8460 = vmatpush1.bf16.msra.mxu1 %v19707_v59  ;;  %8498 = vmatprep.subr.bf16.mxu0 %v19718_v30  ;;  %v19767_v59 = vld [vmem:[%s27839_s1 + $0xf08] ss:$16 sps:$4 sm:$0xff]  }
 0x472   :  { %8461 = vmatprep.subr.bf16.mxu1 %v19715_v62  ;;  %v19770_v30 = vld [vmem:[%s27839_s1 + $0x10c8] ss:$16 sps:$4 sm:$0xff]   ;;  %v19778_v62 = vld [vmem:[%s27839_s1 + $0x12ec] ss:$16 sps:$4 sm:$0xff]  }
 0x474   :  { %8499 = vmatpush1.bf16.msra.mxu0 %v19716_v63 }
 0x475   :  { %8462 = vmatpush2.bf16.msra.mxu1 %v19713_v13  ;;  %8500 = vmatprep.subr.bf16.mxu0 %v19724_v35  ;;  %v19775_v35 = vld [vmem:[%s27839_s1 + $0x10ac] ss:$16 sps:$4 sm:$0xff]  }
 0x476   :  { %8463 = vmatprep.subr.bf16.mxu1 %v19721_v9 }
 0x478   :  { %8501 = vmatpush1.bf16.msra.mxu0 %v19722_v7 }
 0x479   :  { %8464 = vmatpush2.bf16.msra.mxu1 %v19719_v3  ;;  %8502 = vmatprep.subr.bf16.mxu0 %v19730_v48  ;;  %v19776_v3 = vld [vmem:[%s27839_s1 + $0x12e8] ss:$16 sps:$4 sm:$0xff]  }
 0x47a   :  { %8465 = vmatprep.subr.bf16.mxu1 %v19727_v34  ;;  %v19773_v48 = vld [vmem:[%s27839_s1 + $0x10a8] ss:$16 sps:$4 sm:$0xff]   ;;  %v19784_v34 = vld [vmem:[%s27839_s1 + $0x12cc] ss:$16 sps:$4 sm:$0xff]  }
 0x47c   :  { %8503 = vmatpush2.bf16.msra.mxu0 %v19728_v42 }
 0x47d   :  { %8466 = vmatpush2.bf16.msra.mxu1 %v19725_v0  ;;  %8504 = vmatprep.subr.bf16.mxu0 %v19736_v6  ;;  %v19781_v0 = vld [vmem:[%s27839_s1 + $0x108c] ss:$16 sps:$4 sm:$0xff]  }
 0x47e   :  { %8467 = vmatprep.subr.bf16.mxu1 %v19733_v18 }
 0x480   :  { %8505 = vmatpush2.bf16.msra.mxu0 %v19734_v32 }
 0x481   :  { %8468 = vmatpush2.bf16.msra.mxu1 %v19731_v20  ;;  %8506 = vmatprep.subr.bf16.mxu0 %v19742_v21  ;;  %v19782_v20 = vld [vmem:[%s27839_s1 + $0x12c8] ss:$16 sps:$4 sm:$0xff]  }
 0x482   :  { %8469 = vmatprep.subr.bf16.mxu1 %v19739_v24  ;;  %v19779_v24 = vld [vmem:[%s27839_s1 + $0x1088] ss:$16 sps:$4 sm:$0xff]  }
 0x484   :  { %8507 = vmatpush2.bf16.msra.mxu0 %v19740_v40 }
 0x485   :  { %8470 = vmatpush2.bf16.msra.mxu1 %v19737_v58  ;;  %8508 = vmatprep.subr.bf16.mxu0 %v19748_v12  ;;  %v19787_v58 = vld [vmem:[%s27839_s1 + $0x106c] ss:$16 sps:$4 sm:$0xff]  }
 0x486   :  { %8471 = vmatprep.subr.bf16.mxu1 %v19745_v56 }
 0x488   :  { %8509 = vmatpush2.bf16.msra.mxu0 %v19746_v49  ;;  %v19785_v49 = vld [vmem:[%s27839_s1 + $0x1068] ss:$16 sps:$4 sm:$0xff]  }
 0x489   :  { %8472 = vmatpush2.bf16.msra.mxu1 %v19743_v28  ;;  %8510 = vmatprep.subr.bf16.mxu0 %v19754_v37  ;;  %v19796_v28 = vld [vmem:[%s27839_s1 + $0x128c] ss:$16 sps:$4 sm:$0xff]  }
 0x48a   :  { %8473 = vmatprep.subr.bf16.mxu1 %v19751_v26  ;;  %v19793_v37 = vld [vmem:[%s27839_s1 + $0x104c] ss:$16 sps:$4 sm:$0xff]   ;;  %v19794_v26 = vld [vmem:[%s27839_s1 + $0x1288] ss:$16 sps:$4 sm:$0xff]  }
 0x48c   :  { %8511 = vmatpush2.bf16.msra.mxu0 %v19752_v2  ;;  %v19791_v2 = vld [vmem:[%s27839_s1 + $0x1048] ss:$16 sps:$4 sm:$0xff]  }
 0x48d   :  { %8474 = vmatpush2.bf16.msra.mxu1 %v19749_v41  ;;  %8512 = vmatprep.subr.bf16.mxu0 %v19760_v22  ;;  %v19802_v41 = vld [vmem:[%s27839_s1 + $0x126c] ss:$16 sps:$4 sm:$0xff]  }
 0x48e   :  { %8475 = vmatprep.subr.bf16.mxu1 %v19757_v38  ;;  %v19799_v22 = vld [vmem:[%s27839_s1 + $0x102c] ss:$16 sps:$4 sm:$0xff]   ;;  %v19800_v38 = vld [vmem:[%s27839_s1 + $0x1268] ss:$16 sps:$4 sm:$0xff]  }
 0x490   :  { %8513 = vmatpush2.bf16.msra.mxu0 %v19758_v39  ;;  %v19797_v39 = vld [vmem:[%s27839_s1 + $0x1028] ss:$16 sps:$4 sm:$0xff]  }
 0x491   :  { %8476 = vmatpush2.bf16.msra.mxu1 %v19755_v43  ;;  %8514 = vmatprep.subr.bf16.mxu0 %v19763_v45  ;;  %v19808_v43 = vld [vmem:[%s27839_s1 + $0x124c] ss:$16 sps:$4 sm:$0xff]  }
 0x492   :  { %8527 = vmatprep.subr.bf16.mxu1 %v19766_v60  ;;  %v19805_v45 = vld [vmem:[%s27839_s1 + $0x100c] ss:$16 sps:$4 sm:$0xff]   ;;  %v19806_v60 = vld [vmem:[%s27839_s1 + $0x1248] ss:$16 sps:$4 sm:$0xff]  }
 0x494   :  { %v8233_v55 = vpop.f32.mrf.mxu1  ;;  %8478 = vmatmul.mubr.bf16.vlgmr.msra.gmra.mxu1 %v25275_v4  ;;  %8515 = vmatpush2.bf16.msra.mxu0 %v19761_v46  ;;  %v20142_v4 = vld [vmem:[%s27840_s2] sm:$0xf]  ;;  %v19803_v46 = vld [vmem:[%s27839_s1 + $0x1008] ss:$16 sps:$4 sm:$0xff]  }
 0x495   :  { %8528 = vmatpush1.bf16.msra.mxu1 %v19764_v50  ;;  %8516 = vmatprep.subr.bf16.mxu0 %v19769_v25  ;;  %v3048_v63 = vrot.slane %v20142_v4, %v26776_v52  ;;  %v3052_v9 = vrot.slane %v20142_v4, %v26783_v57  ;;  %v19814_v50 = vld [vmem:[%s27839_s1 + $0x122c] ss:$16 sps:$4 sm:$0xff]   ;;  %v19815_v4 = vld [vmem:[%s27839_s1 + $0x11c8] ss:$16 sps:$4 sm:$0xff]  }
 0x496   :  { %v8235_v13 = vpop.f32.mrf.mxu1  ;;  %8529 = vmatprep.subr.bf16.mxu1 %v19772_v53  ;;  %8559 = vmatprep.mubr.bf16.mxu1 %v25297_v14  ;;  %v19811_v25 = vld [vmem:[%s27839_s1 + $0x11ec] ss:$16 sps:$4 sm:$0xff]   ;;  %v19812_v53 = vld [vmem:[%s27839_s1 + $0x1228] ss:$16 sps:$4 sm:$0xff]  }
 0x497   :  { %v8234_v42 = vadd.f32 %v8233_v55, %v3048_v63  ;;  %v8236_v18 = vadd.f32 %v8235_v13, %v3052_v9  ;;  %v19809_v55 = vld [vmem:[%s27839_s1 + $0x11e8] ss:$16 sps:$4 sm:$0xff]   ;;  %v19826_v63 = vld [vmem:[%s27839_s1 + $0x13ec] ss:$16 sps:$4 sm:$0xff]  }
 0x498   :  { %v8237_v7 = vpop.f32.mrf.mxu1  ;;  %8517 = vmatpush2.bf16.msra.mxu0 %v19767_v59  ;;  %v19820_v59 = vld [vmem:[%s27839_s1 + $0x120c] ss:$16 sps:$4 sm:$0xff]   ;;  %v19821_v9 = vld [vmem:[%s27839_s1 + $0x11a8] ss:$16 sps:$4 sm:$0xff]  }
 0x499   :  { %8530 = vmatpush1.bf16.msra.mxu1 %v19770_v30  ;;  %8568 = vmatprep.subr.bf16.mxu0 %v19778_v62  ;;  %v19817_v30 = vld [vmem:[%s27839_s1 + $0x11cc] ss:$16 sps:$4 sm:$0xff]   ;;  %v19818_v62 = vld [vmem:[%s27839_s1 + $0x1208] ss:$16 sps:$4 sm:$0xff]  }
 0x49a   :  { %v8238_v14 = vpop.f32.mrf.mxu1  ;;  %8531 = vmatprep.subr.bf16.mxu1 %v19775_v35  ;;  %v19823_v13 = vld [vmem:[%s27839_s1 + $0x11ac] ss:$16 sps:$4 sm:$0xff]   ;;  %v19824_v35 = vld [vmem:[%s27839_s1 + $0x13e8] ss:$16 sps:$4 sm:$0xff]  }
 0x49b   :  { %v8274_v6 = vpop.f32.mrf.mxu0  ;;  %8519 = vmatmul.mubr.bf16.vlgmr.msra.gmra.mxu0 %v25282_v8  ;;  %v19790_v8 = vld [vmem:[%s27839_s1 + $0x12ac] ss:$16 sps:$4 sm:$0xff]  }
 0x49c   :  { %v26816_v32 = vadd.f32 %v8274_v6, %v8234_v42  ;;  %8569 = vmatpush1.bf16.msra.mxu0 %v19776_v3  ;;  %8600 = vmatprep.mubr.bf16.mxu0 %v25303_v19  ;;  %v19788_v19 = vld [vmem:[%s27839_s1 + $0x12a8] ss:$16 sps:$4 sm:$0xff]   ;;  %v19832_v7 = vld [vmem:[%s27839_s1 + $0x13cc] ss:$16 sps:$4 sm:$0xff]  }
 0x49d   :  { %8532 = vmatpush1.bf16.msra.mxu1 %v19773_v48  ;;  %v8276_v21 = vpop.f32.mrf.mxu0  ;;  %8570 = vmatprep.subr.bf16.mxu0 %v19784_v34  ;;  %v19829_v3 = vld [vmem:[%s27839_s1 + $0x118c] ss:$16 sps:$4 sm:$0xff]   ;;  %v19830_v48 = vld [vmem:[%s27839_s1 + $0x13c8] ss:$16 sps:$4 sm:$0xff]  }
 0x49e   :  { %v26828_v40 = vadd.f32 %v8276_v21, %v8236_v18  ;;  %8533 = vmatprep.subr.bf16.mxu1 %v19781_v0  ;;  %v19827_v34 = vld [vmem:[%s27839_s1 + $0x1188] ss:$16 sps:$4 sm:$0xff]   ;;  %v19838_v42 = vld [vmem:[%s27839_s1 + $0x13ac] ss:$16 sps:$4 sm:$0xff]  }
 0x49f   :  { %v8278_v12 = vpop.f32.mrf.mxu0  ;;  %v19835_v14 = vld [vmem:[%s27839_s1 + $0x116c] ss:$16 sps:$4 sm:$0xff]   ;;  %v19836_v0 = vld [vmem:[%s27839_s1 + $0x13a8] ss:$16 sps:$4 sm:$0xff]  }
 0x4a0   :  { %8571 = vmatpush1.bf16.msra.mxu0 %v19782_v20  ;;  %v19833_v6 = vld [vmem:[%s27839_s1 + $0x1168] ss:$16 sps:$4 sm:$0xff]   ;;  %v19844_v18 = vld [vmem:[%s27839_s1 + $0x138c] ss:$16 sps:$4 sm:$0xff]  }
 0x4a1   :  { %8534 = vmatpush1.bf16.msra.mxu1 %v19779_v24  ;;  %v8279_v56 = vpop.f32.mrf.mxu0  ;;  %8572 = vmatprep.subr.bf16.mxu0 %v19790_v8  ;;  %v19841_v20 = vld [vmem:[%s27839_s1 + $0x114c] ss:$16 sps:$4 sm:$0xff]   ;;  %v19842_v21 = vld [vmem:[%s27839_s1 + $0x1388] ss:$16 sps:$4 sm:$0xff]  }
 0x4a2   :  { %8535 = vmatprep.subr.bf16.mxu1 %v19787_v58  ;;  %v19839_v24 = vld [vmem:[%s27839_s1 + $0x1148] ss:$16 sps:$4 sm:$0xff]   ;;  %v19850_v8 = vld [vmem:[%s27839_s1 + $0x136c] ss:$16 sps:$4 sm:$0xff]  }
 0x4a3   :  { %v19847_v58 = vld [vmem:[%s27839_s1 + $0x112c] ss:$16 sps:$4 sm:$0xff]   ;;  %v19848_v12 = vld [vmem:[%s27839_s1 + $0x1368] ss:$16 sps:$4 sm:$0xff]  }
 0x4a4   :  { %8573 = vmatpush1.bf16.msra.mxu0 %v19788_v19  ;;  %v19845_v19 = vld [vmem:[%s27839_s1 + $0x1128] ss:$16 sps:$4 sm:$0xff]   ;;  %v19856_v56 = vld [vmem:[%s27839_s1 + $0x134c] ss:$16 sps:$4 sm:$0xff]  }
 0x4a5   :  { %8536 = vmatpush1.bf16.msra.mxu1 %v19785_v49  ;;  %8574 = vmatprep.subr.bf16.mxu0 %v19796_v28  ;;  %v19853_v49 = vld [vmem:[%s27839_s1 + $0x110c] ss:$16 sps:$4 sm:$0xff]   ;;  %v19854_v28 = vld [vmem:[%s27839_s1 + $0x1348] ss:$16 sps:$4 sm:$0xff]  }
 0x4a6   :  { %8537 = vmatprep.subr.bf16.mxu1 %v19793_v37  ;;  %v19851_v37 = vld [vmem:[%s27839_s1 + $0x1108] ss:$16 sps:$4 sm:$0xff]  }
 0x4a8   :  { %8575 = vmatpush1.bf16.msra.mxu0 %v19794_v26  ;;  %v19859_v26 = vld [vmem:[%s27839_s1 + $0x132c] ss:$16 sps:$4 sm:$0xff]  }
 0x4a9   :  { %8538 = vmatpush1.bf16.msra.mxu1 %v19791_v2  ;;  %8576 = vmatprep.subr.bf16.mxu0 %v19802_v41  ;;  %v19862_v2 = vld [vmem:[%s27839_s1 + $0x14ec] ss:$16 sps:$4 sm:$0xff]   ;;  %v19857_v41 = vld [vmem:[%s27839_s1 + $0x1328] ss:$16 sps:$4 sm:$0xff]  }
 0x4aa   :  { %8539 = vmatprep.subr.bf16.mxu1 %v19799_v22  ;;  %v19860_v22 = vld [vmem:[%s27839_s1 + $0x14e8] ss:$16 sps:$4 sm:$0xff]  }
 0x4ac   :  { %8577 = vmatpush1.bf16.msra.mxu0 %v19800_v38  ;;  %v19865_v38 = vld [vmem:[%s27839_s1 + $0x130c] ss:$16 sps:$4 sm:$0xff]  }
 0x4ad   :  { %8540 = vmatpush1.bf16.msra.mxu1 %v19797_v39  ;;  %8578 = vmatprep.subr.bf16.mxu0 %v19808_v43  ;;  %v19868_v39 = vld [vmem:[%s27839_s1 + $0x14cc] ss:$16 sps:$4 sm:$0xff]  }
 0x4ae   :  { %8541 = vmatprep.subr.bf16.mxu1 %v19805_v45  ;;  %v19863_v45 = vld [vmem:[%s27839_s1 + $0x1308] ss:$16 sps:$4 sm:$0xff]  }
 0x4b0   :  { %8579 = vmatpush1.bf16.msra.mxu0 %v19806_v60 }
 0x4b1   :  { %8542 = vmatpush1.bf16.msra.mxu1 %v19803_v46  ;;  %8580 = vmatprep.subr.bf16.mxu0 %v19814_v50  ;;  %v19866_v46 = vld [vmem:[%s27839_s1 + $0x14c8] ss:$16 sps:$4 sm:$0xff]   ;;  %v19874_v50 = vld [vmem:[%s27839_s1 + $0x16ec] ss:$16 sps:$4 sm:$0xff]  }
 0x4b2   :  { %8543 = vmatprep.subr.bf16.mxu1 %v19811_v25 }
 0x4b4   :  { %8581 = vmatpush1.bf16.msra.mxu0 %v19812_v53 }
 0x4b5   :  { %8544 = vmatpush2.bf16.msra.mxu1 %v19809_v55  ;;  %8582 = vmatprep.subr.bf16.mxu0 %v19820_v59  ;;  %v19872_v55 = vld [vmem:[%s27839_s1 + $0x16e8] ss:$16 sps:$4 sm:$0xff]  }
 0x4b6   :  { %8545 = vmatprep.subr.bf16.mxu1 %v19817_v30  ;;  %v19869_v59 = vld [vmem:[%s27839_s1 + $0x14a8] ss:$16 sps:$4 sm:$0xff]   ;;  %v19880_v30 = vld [vmem:[%s27839_s1 + $0x16cc] ss:$16 sps:$4 sm:$0xff]  }
 0x4b8   :  { %8583 = vmatpush1.bf16.msra.mxu0 %v19818_v62 }
 0x4b9   :  { %8546 = vmatpush2.bf16.msra.mxu1 %v19815_v4  ;;  %8584 = vmatprep.subr.bf16.mxu0 %v19826_v63  ;;  %v19878_v63 = vld [vmem:[%s27839_s1 + $0x16c8] ss:$16 sps:$4 sm:$0xff]  }
 0x4ba   :  { %8547 = vmatprep.subr.bf16.mxu1 %v19823_v13 }
 0x4bc   :  { %8585 = vmatpush2.bf16.msra.mxu0 %v19824_v35  ;;  %v19875_v35 = vld [vmem:[%s27839_s1 + $0x1488] ss:$16 sps:$4 sm:$0xff]  }
 0x4bd   :  { %8548 = vmatpush2.bf16.msra.mxu1 %v19821_v9  ;;  %8586 = vmatprep.subr.bf16.mxu0 %v19832_v7  ;;  %v19883_v7 = vld [vmem:[%s27839_s1 + $0x146c] ss:$16 sps:$4 sm:$0xff]  }
 0x4be   :  { %8549 = vmatprep.subr.bf16.mxu1 %v19829_v3 }
 0x4c0   :  { %8587 = vmatpush2.bf16.msra.mxu0 %v19830_v48 }
 0x4c1   :  { %8550 = vmatpush2.bf16.msra.mxu1 %v19827_v34  ;;  %8588 = vmatprep.subr.bf16.mxu0 %v19838_v42  ;;  %v19881_v34 = vld [vmem:[%s27839_s1 + $0x1468] ss:$16 sps:$4 sm:$0xff]   ;;  %v19892_v42 = vld [vmem:[%s27839_s1 + $0x168c] ss:$16 sps:$4 sm:$0xff]  }
 0x4c2   :  { %8551 = vmatprep.subr.bf16.mxu1 %v19835_v14  ;;  %v19889_v14 = vld [vmem:[%s27839_s1 + $0x144c] ss:$16 sps:$4 sm:$0xff]  }
 0x4c4   :  { %8589 = vmatpush2.bf16.msra.mxu0 %v19836_v0  ;;  %v19890_v0 = vld [vmem:[%s27839_s1 + $0x1688] ss:$16 sps:$4 sm:$0xff]  }
 0x4c5   :  { %8552 = vmatpush2.bf16.msra.mxu1 %v19833_v6  ;;  %8590 = vmatprep.subr.bf16.mxu0 %v19844_v18  ;;  %v19887_v6 = vld [vmem:[%s27839_s1 + $0x1448] ss:$16 sps:$4 sm:$0xff]   ;;  %v19898_v18 = vld [vmem:[%s27839_s1 + $0x166c] ss:$16 sps:$4 sm:$0xff]  }
 0x4c6   :  { %8553 = vmatprep.subr.bf16.mxu1 %v19841_v20  ;;  %v19895_v20 = vld [vmem:[%s27839_s1 + $0x142c] ss:$16 sps:$4 sm:$0xff]  }
 0x4c8   :  { %8591 = vmatpush2.bf16.msra.mxu0 %v19842_v21  ;;  %v19896_v21 = vld [vmem:[%s27839_s1 + $0x1668] ss:$16 sps:$4 sm:$0xff]  }
 0x4c9   :  { %8554 = vmatpush2.bf16.msra.mxu1 %v19839_v24  ;;  %8592 = vmatprep.subr.bf16.mxu0 %v19850_v8  ;;  %v19893_v24 = vld [vmem:[%s27839_s1 + $0x1428] ss:$16 sps:$4 sm:$0xff]   ;;  %v19904_v8 = vld [vmem:[%s27839_s1 + $0x164c] ss:$16 sps:$4 sm:$0xff]  }
 0x4ca   :  { %8555 = vmatprep.subr.bf16.mxu1 %v19847_v58  ;;  %v19901_v58 = vld [vmem:[%s27839_s1 + $0x140c] ss:$16 sps:$4 sm:$0xff]  }
 0x4cc   :  { %8593 = vmatpush2.bf16.msra.mxu0 %v19848_v12  ;;  %v19902_v12 = vld [vmem:[%s27839_s1 + $0x1648] ss:$16 sps:$4 sm:$0xff]  }
 0x4cd   :  { %8556 = vmatpush2.bf16.msra.mxu1 %v19845_v19  ;;  %8594 = vmatprep.subr.bf16.mxu0 %v19856_v56  ;;  %v19899_v19 = vld [vmem:[%s27839_s1 + $0x1408] ss:$16 sps:$4 sm:$0xff]   ;;  %v19910_v56 = vld [vmem:[%s27839_s1 + $0x162c] ss:$16 sps:$4 sm:$0xff]  }
 0x4ce   :  { %8557 = vmatprep.subr.bf16.mxu1 %v19853_v49  ;;  %v19907_v49 = vld [vmem:[%s27839_s1 + $0x15ec] ss:$16 sps:$4 sm:$0xff]  }
 0x4d0   :  { %8595 = vmatpush2.bf16.msra.mxu0 %v19854_v28  ;;  %v19908_v28 = vld [vmem:[%s27839_s1 + $0x1628] ss:$16 sps:$4 sm:$0xff]  }
 0x4d1   :  { %8558 = vmatpush2.bf16.msra.mxu1 %v19851_v37  ;;  %8596 = vmatprep.subr.bf16.mxu0 %v19859_v26  ;;  %v19905_v37 = vld [vmem:[%s27839_s1 + $0x15e8] ss:$16 sps:$4 sm:$0xff]   ;;  %v19916_v26 = vld [vmem:[%s27839_s1 + $0x160c] ss:$16 sps:$4 sm:$0xff]  }
 0x4d2   :  { %8609 = vmatprep.subr.bf16.mxu1 %v19862_v2  ;;  %v19913_v2 = vld [vmem:[%s27839_s1 + $0x15cc] ss:$16 sps:$4 sm:$0xff]  }
 0x4d4   :  { %v8315_v43 = vpop.f32.mrf.mxu1  ;;  %8560 = vmatmul.mubr.bf16.vlgmr.msra.gmra.mxu1 %v25505_v15  ;;  %8597 = vmatpush2.bf16.msra.mxu0 %v19857_v41  ;;  %v19871_v15 = vld [vmem:[%s27839_s1 + $0x14ac] ss:$16 sps:$4 sm:$0xff]   ;;  %v19914_v41 = vld [vmem:[%s27839_s1 + $0x1608] ss:$16 sps:$4 sm:$0xff]  }
 0x4d5   :  { %v8316_v60 = vadd.f32 %v8315_v43, %v26816_v32  ;;  %8610 = vmatpush1.bf16.msra.mxu1 %v19860_v22  ;;  %8598 = vmatprep.subr.bf16.mxu0 %v19865_v38  ;;  %v19911_v22 = vld [vmem:[%s27839_s1 + $0x15c8] ss:$16 sps:$4 sm:$0xff]   ;;  %v19922_v38 = vld [vmem:[%s27839_s1 + $0x17ec] ss:$16 sps:$4 sm:$0xff]  }
 0x4d6   :  { %v8317_v25 = vpop.f32.mrf.mxu1  ;;  %8611 = vmatprep.subr.bf16.mxu1 %v19868_v39  ;;  %8641 = vmatprep.mubr.bf16.mxu1 %v25525_v29  ;;  %v19877_v29 = vld [vmem:[%s27839_s1 + $0x148c] ss:$16 sps:$4 sm:$0xff]   ;;  %v19920_v43 = vld [vmem:[%s27839_s1 + $0x17e8] ss:$16 sps:$4 sm:$0xff]  }
 0x4d7   :  { %v8318_v32 = vadd.f32 %v8317_v25, %v26828_v40  ;;  %v19919_v39 = vld [vmem:[%s27839_s1 + $0x15ac] ss:$16 sps:$4 sm:$0xff]   ;;  %v19923_v25 = vld [vmem:[%s27839_s1 + $0x1588] ss:$16 sps:$4 sm:$0xff]  }
 0x4d8   :  { %v8319_v53 = vpop.f32.mrf.mxu1  ;;  %8599 = vmatpush2.bf16.msra.mxu0 %v19863_v45  ;;  %v19917_v45 = vld [vmem:[%s27839_s1 + $0x15a8] ss:$16 sps:$4 sm:$0xff]  }
 0x4d9   :  { %8612 = vmatpush1.bf16.msra.mxu1 %v19866_v46  ;;  %8650 = vmatprep.subr.bf16.mxu0 %v19874_v50  ;;  %v19925_v46 = vld [vmem:[%s27839_s1 + $0x158c] ss:$16 sps:$4 sm:$0xff]   ;;  %v19926_v50 = vld [vmem:[%s27839_s1 + $0x17c8] ss:$16 sps:$4 sm:$0xff]  }
 0x4da   :  { %v8320_v62 = vpop.f32.mrf.mxu1  ;;  %8613 = vmatprep.subr.bf16.mxu1 %v19871_v15  ;;  %v19934_v15 = vld [vmem:[%s27839_s1 + $0x17ac] ss:$16 sps:$4 sm:$0xff]   ;;  %v19932_v53 = vld [vmem:[%s27839_s1 + $0x17a8] ss:$16 sps:$4 sm:$0xff]  }
 0x4db   :  { %v8356_v40 = vpop.f32.mrf.mxu0  ;;  %8601 = vmatmul.mubr.bf16.vlgmr.msra.gmra.mxu0 %v25514_v23  ;;  %v19886_v23 = vld [vmem:[%s27839_s1 + $0x16ac] ss:$16 sps:$4 sm:$0xff]   ;;  %v19938_v62 = vld [vmem:[%s27839_s1 + $0x1788] ss:$16 sps:$4 sm:$0xff]  }
 0x4dc   :  { %v27018_v4 = vadd.f32 %v8356_v40, %v8316_v60  ;;  %8651 = vmatpush1.bf16.msra.mxu0 %v19872_v55  ;;  %8682 = vmatprep.mubr.bf16.mxu0 %v25534_v36  ;;  %v19884_v36 = vld [vmem:[%s27839_s1 + $0x16a8] ss:$16 sps:$4 sm:$0xff]   ;;  %v19928_v60 = vld [vmem:[%s27839_s1 + $0x17cc] ss:$16 sps:$4 sm:$0xff]  }
 0x4dd   :  { %8614 = vmatpush1.bf16.msra.mxu1 %v19869_v59  ;;  %v8358_v13 = vpop.f32.mrf.mxu0  ;;  %8652 = vmatprep.subr.bf16.mxu0 %v19880_v30  ;;  %v19929_v55 = vld [vmem:[%s27839_s1 + $0x1568] ss:$16 sps:$4 sm:$0xff]   ;;  %v19940_v59 = vld [vmem:[%s27839_s1 + $0x178c] ss:$16 sps:$4 sm:$0xff]  }
 0x4de   :  { %v27030_v9 = vadd.f32 %v8358_v13, %v8318_v32  ;;  %8615 = vmatprep.subr.bf16.mxu1 %v19877_v29  ;;  %v19931_v32 = vld [vmem:[%s27839_s1 + $0x156c] ss:$16 sps:$4 sm:$0xff]   ;;  %v19935_v29 = vld [vmem:[%s27839_s1 + $0x1548] ss:$16 sps:$4 sm:$0xff]  }
 0x4df   :  { %v8360_v3 = vpop.f32.mrf.mxu0  ;;  %v19937_v30 = vld [vmem:[%s27839_s1 + $0x154c] ss:$16 sps:$4 sm:$0xff]   ;;  %v19944_v13 = vld [vmem:[%s27839_s1 + $0x1768] ss:$16 sps:$4 sm:$0xff]  }
 0x4e0   :  { %8653 = vmatpush1.bf16.msra.mxu0 %v19878_v63  ;;  %v19946_v40 = vld [vmem:[%s27839_s1 + $0x176c] ss:$16 sps:$4 sm:$0xff]   ;;  %v19950_v3 = vld [vmem:[%s27839_s1 + $0x1748] ss:$16 sps:$4 sm:$0xff]  }
 0x4e1   :  { %8616 = vmatpush1.bf16.msra.mxu1 %v19875_v35  ;;  %v8361_v48 = vpop.f32.mrf.mxu0  ;;  %8654 = vmatprep.subr.bf16.mxu0 %v19886_v23  ;;  %v19943_v63 = vld [vmem:[%s27839_s1 + $0x152c] ss:$16 sps:$4 sm:$0xff]   ;;  %v19941_v35 = vld [vmem:[%s27839_s1 + $0x1528] ss:$16 sps:$4 sm:$0xff]  }
 0x4e2   :  { %8617 = vmatprep.subr.bf16.mxu1 %v19883_v7  ;;  %v19952_v23 = vld [vmem:[%s27839_s1 + $0x174c] ss:$16 sps:$4 sm:$0xff]  }
 0x4e3   :  { %v19949_v7 = vld [vmem:[%s27839_s1 + $0x150c] ss:$16 sps:$4 sm:$0xff]  }
 0x4e4   :  { %8655 = vmatpush1.bf16.msra.mxu0 %v19884_v36  ;;  %v19947_v36 = vld [vmem:[%s27839_s1 + $0x1508] ss:$16 sps:$4 sm:$0xff]   ;;  %v19955_v48 = vld [vmem:[%s27839_s1 + $0x172c] ss:$16 sps:$4 sm:$0xff]  }
 0x4e5   :  { %8618 = vmatpush1.bf16.msra.mxu1 %v19881_v34  ;;  %8656 = vmatprep.subr.bf16.mxu0 %v19892_v42  ;;  %v19958_v34 = vld [vmem:[%s27839_s1 + $0x18ec] ss:$16 sps:$4 sm:$0xff]   ;;  %v19953_v42 = vld [vmem:[%s27839_s1 + $0x1728] ss:$16 sps:$4 sm:$0xff]  }
 0x4e6   :  { %8619 = vmatprep.subr.bf16.mxu1 %v19889_v14  ;;  %v19956_v14 = vld [vmem:[%s27839_s1 + $0x18e8] ss:$16 sps:$4 sm:$0xff]  }
 0x4e8   :  { %8657 = vmatpush1.bf16.msra.mxu0 %v19890_v0  ;;  %v19961_v0 = vld [vmem:[%s27839_s1 + $0x170c] ss:$16 sps:$4 sm:$0xff]  }
 0x4e9   :  { %8620 = vmatpush1.bf16.msra.mxu1 %v19887_v6  ;;  %8658 = vmatprep.subr.bf16.mxu0 %v19898_v18  ;;  %v19964_v6 = vld [vmem:[%s27839_s1 + $0x18cc] ss:$16 sps:$4 sm:$0xff]  }
 0x4ea   :  { %8621 = vmatprep.subr.bf16.mxu1 %v19895_v20  ;;  %v19959_v20 = vld [vmem:[%s27839_s1 + $0x1708] ss:$16 sps:$4 sm:$0xff]  }
 0x4ec   :  { %8659 = vmatpush1.bf16.msra.mxu0 %v19896_v21 }
 0x4ed   :  { %8622 = vmatpush1.bf16.msra.mxu1 %v19893_v24  ;;  %8660 = vmatprep.subr.bf16.mxu0 %v19904_v8  ;;  %v19962_v24 = vld [vmem:[%s27839_s1 + $0x18c8] ss:$16 sps:$4 sm:$0xff]   ;;  %v19970_v8 = vld [vmem:[%s27839_s1 + $0x1aec] ss:$16 sps:$4 sm:$0xff]  }
 0x4ee   :  { %8623 = vmatprep.subr.bf16.mxu1 %v19901_v58 }
 0x4f0   :  { %8661 = vmatpush1.bf16.msra.mxu0 %v19902_v12 }
 0x4f1   :  { %8624 = vmatpush1.bf16.msra.mxu1 %v19899_v19  ;;  %8662 = vmatprep.subr.bf16.mxu0 %v19910_v56  ;;  %v19968_v19 = vld [vmem:[%s27839_s1 + $0x1ae8] ss:$16 sps:$4 sm:$0xff]  }
 0x4f2   :  { %8625 = vmatprep.subr.bf16.mxu1 %v19907_v49  ;;  %v19965_v56 = vld [vmem:[%s27839_s1 + $0x18a8] ss:$16 sps:$4 sm:$0xff]   ;;  %v19976_v49 = vld [vmem:[%s27839_s1 + $0x1acc] ss:$16 sps:$4 sm:$0xff]  }
 0x4f4   :  { %8663 = vmatpush1.bf16.msra.mxu0 %v19908_v28 }
 0x4f5   :  { %8626 = vmatpush2.bf16.msra.mxu1 %v19905_v37  ;;  %8664 = vmatprep.subr.bf16.mxu0 %v19916_v26  ;;  %v19974_v26 = vld [vmem:[%s27839_s1 + $0x1ac8] ss:$16 sps:$4 sm:$0xff]  }
 0x4f6   :  { %8627 = vmatprep.subr.bf16.mxu1 %v19913_v2 }
 0x4f8   :  { %8665 = vmatpush1.bf16.msra.mxu0 %v19914_v41  ;;  %v19971_v41 = vld [vmem:[%s27839_s1 + $0x1888] ss:$16 sps:$4 sm:$0xff]  }
 0x4f9   :  { %8628 = vmatpush2.bf16.msra.mxu1 %v19911_v22  ;;  %8666 = vmatprep.subr.bf16.mxu0 %v19922_v38  ;;  %v19979_v38 = vld [vmem:[%s27839_s1 + $0x186c] ss:$16 sps:$4 sm:$0xff]  }
 0x4fa   :  { %8629 = vmatprep.subr.bf16.mxu1 %v19919_v39 }
 0x4fc   :  { %8667 = vmatpush2.bf16.msra.mxu0 %v19920_v43 }
 0x4fd   :  { %8630 = vmatpush2.bf16.msra.mxu1 %v19917_v45  ;;  %8668 = vmatprep.subr.bf16.mxu0 %v19928_v60  ;;  %v19977_v45 = vld [vmem:[%s27839_s1 + $0x1868] ss:$16 sps:$4 sm:$0xff]   ;;  %v19988_v60 = vld [vmem:[%s27839_s1 + $0x1a8c] ss:$16 sps:$4 sm:$0xff]  }
 0x4fe   :  { %8631 = vmatprep.subr.bf16.mxu1 %v19925_v46  ;;  %v19985_v46 = vld [vmem:[%s27839_s1 + $0x184c] ss:$16 sps:$4 sm:$0xff]  }
 0x500   :  { %8669 = vmatpush2.bf16.msra.mxu0 %v19926_v50  ;;  %v19986_v50 = vld [vmem:[%s27839_s1 + $0x1a88] ss:$16 sps:$4 sm:$0xff]  }
 0x501   :  { %8632 = vmatpush2.bf16.msra.mxu1 %v19923_v25  ;;  %8670 = vmatprep.subr.bf16.mxu0 %v19934_v15  ;;  %v19983_v25 = vld [vmem:[%s27839_s1 + $0x1848] ss:$16 sps:$4 sm:$0xff]   ;;  %v19994_v15 = vld [vmem:[%s27839_s1 + $0x1a6c] ss:$16 sps:$4 sm:$0xff]  }
 0x502   :  { %8633 = vmatprep.subr.bf16.mxu1 %v19931_v32  ;;  %v19991_v32 = vld [vmem:[%s27839_s1 + $0x182c] ss:$16 sps:$4 sm:$0xff]  }
 0x504   :  { %8671 = vmatpush2.bf16.msra.mxu0 %v19932_v53  ;;  %v19992_v53 = vld [vmem:[%s27839_s1 + $0x1a68] ss:$16 sps:$4 sm:$0xff]  }
 0x505   :  { %8634 = vmatpush2.bf16.msra.mxu1 %v19929_v55  ;;  %8672 = vmatprep.subr.bf16.mxu0 %v19940_v59  ;;  %v19989_v55 = vld [vmem:[%s27839_s1 + $0x1828] ss:$16 sps:$4 sm:$0xff]   ;;  %v20000_v59 = vld [vmem:[%s27839_s1 + $0x1a4c] ss:$16 sps:$4 sm:$0xff]  }
 0x506   :  { %8635 = vmatprep.subr.bf16.mxu1 %v19937_v30  ;;  %v19997_v30 = vld [vmem:[%s27839_s1 + $0x180c] ss:$16 sps:$4 sm:$0xff]  }
 0x508   :  { %8673 = vmatpush2.bf16.msra.mxu0 %v19938_v62  ;;  %v19998_v62 = vld [vmem:[%s27839_s1 + $0x1a48] ss:$16 sps:$4 sm:$0xff]  }
 0x509   :  { %8636 = vmatpush2.bf16.msra.mxu1 %v19935_v29  ;;  %8674 = vmatprep.subr.bf16.mxu0 %v19946_v40  ;;  %v19995_v29 = vld [vmem:[%s27839_s1 + $0x1808] ss:$16 sps:$4 sm:$0xff]   ;;  %v20006_v40 = vld [vmem:[%s27839_s1 + $0x1a2c] ss:$16 sps:$4 sm:$0xff]  }
 0x50a   :  { %8637 = vmatprep.subr.bf16.mxu1 %v19943_v63  ;;  %v20003_v63 = vld [vmem:[%s27839_s1 + $0x19ec] ss:$16 sps:$4 sm:$0xff]  }
 0x50c   :  { %8675 = vmatpush2.bf16.msra.mxu0 %v19944_v13  ;;  %v20004_v13 = vld [vmem:[%s27839_s1 + $0x1a28] ss:$16 sps:$4 sm:$0xff]  }
 0x50d   :  { %8638 = vmatpush2.bf16.msra.mxu1 %v19941_v35  ;;  %8676 = vmatprep.subr.bf16.mxu0 %v19952_v23  ;;  %v20001_v35 = vld [vmem:[%s27839_s1 + $0x19e8] ss:$16 sps:$4 sm:$0xff]   ;;  %v20012_v23 = vld [vmem:[%s27839_s1 + $0x1a0c] ss:$16 sps:$4 sm:$0xff]  }
 0x50e   :  { %8639 = vmatprep.subr.bf16.mxu1 %v19949_v7  ;;  %v20009_v7 = vld [vmem:[%s27839_s1 + $0x19cc] ss:$16 sps:$4 sm:$0xff]  }
 0x510   :  { %8677 = vmatpush2.bf16.msra.mxu0 %v19950_v3  ;;  %v20010_v3 = vld [vmem:[%s27839_s1 + $0x1a08] ss:$16 sps:$4 sm:$0xff]  }
 0x511   :  { %8640 = vmatpush2.bf16.msra.mxu1 %v19947_v36  ;;  %8678 = vmatprep.subr.bf16.mxu0 %v19955_v48  ;;  %v20007_v36 = vld [vmem:[%s27839_s1 + $0x19c8] ss:$16 sps:$4 sm:$0xff]   ;;  %v20018_v48 = vld [vmem:[%s27839_s1 + $0x1bec] ss:$16 sps:$4 sm:$0xff]  }
 0x512   :  { %8691 = vmatprep.subr.bf16.mxu1 %v19958_v34  ;;  %v20015_v34 = vld [vmem:[%s27839_s1 + $0x19ac] ss:$16 sps:$4 sm:$0xff]  }
 0x514   :  { %v8397_v18 = vpop.f32.mrf.mxu1  ;;  %8642 = vmatmul.mubr.bf16.vlgmr.msra.gmra.mxu1 %v25732_v44  ;;  %8679 = vmatpush2.bf16.msra.mxu0 %v19953_v42  ;;  %v19967_v44 = vld [vmem:[%s27839_s1 + $0x18ac] ss:$16 sps:$4 sm:$0xff]   ;;  %v20016_v42 = vld [vmem:[%s27839_s1 + $0x1be8] ss:$16 sps:$4 sm:$0xff]  }
 0x515   :  { %v8398_v21 = vadd.f32 %v8397_v18, %v27018_v4  ;;  %8692 = vmatpush1.bf16.msra.mxu1 %v19956_v14  ;;  %8680 = vmatprep.subr.bf16.mxu0 %v19961_v0  ;;  %v20013_v14 = vld [vmem:[%s27839_s1 + $0x19a8] ss:$16 sps:$4 sm:$0xff]   ;;  %v20024_v0 = vld [vmem:[%s27839_s1 + $0x1bcc] ss:$16 sps:$4 sm:$0xff]  }
 0x516   :  { %v8399_v58 = vpop.f32.mrf.mxu1  ;;  %8693 = vmatprep.subr.bf16.mxu1 %v19964_v6  ;;  %8723 = vmatprep.mubr.bf16.mxu1 %v25752_v51  ;;  %v19973_v51 = vld [vmem:[%s27839_s1 + $0x188c] ss:$16 sps:$4 sm:$0xff]   ;;  %v20022_v18 = vld [vmem:[%s27839_s1 + $0x1bc8] ss:$16 sps:$4 sm:$0xff]  }
 0x517   :  { %v8400_v4 = vadd.f32 %v8399_v58, %v27030_v9  ;;  %v20021_v6 = vld [vmem:[%s27839_s1 + $0x198c] ss:$16 sps:$4 sm:$0xff]   ;;  %v20025_v58 = vld [vmem:[%s27839_s1 + $0x1968] ss:$16 sps:$4 sm:$0xff]  }
 0x518   :  { %v8401_v12 = vpop.f32.mrf.mxu1  ;;  %8681 = vmatpush2.bf16.msra.mxu0 %v19959_v20  ;;  %v20019_v20 = vld [vmem:[%s27839_s1 + $0x1988] ss:$16 sps:$4 sm:$0xff]  }
 0x519   :  { %8694 = vmatpush1.bf16.msra.mxu1 %v19962_v24  ;;  %8732 = vmatprep.subr.bf16.mxu0 %v19970_v8  ;;  %v20027_v24 = vld [vmem:[%s27839_s1 + $0x196c] ss:$16 sps:$4 sm:$0xff]   ;;  %v20028_v8 = vld [vmem:[%s27839_s1 + $0x1ba8] ss:$16 sps:$4 sm:$0xff]  }
 0x51a   :  { %v8402_v28 = vpop.f32.mrf.mxu1  ;;  %8695 = vmatprep.subr.bf16.mxu1 %v19967_v44  ;;  %v20036_v44 = vld [vmem:[%s27839_s1 + $0x1b8c] ss:$16 sps:$4 sm:$0xff]   ;;  %v20034_v12 = vld [vmem:[%s27839_s1 + $0x1b88] ss:$16 sps:$4 sm:$0xff]  }
 0x51b   :  { %v8438_v9 = vpop.f32.mrf.mxu0  ;;  %8683 = vmatmul.mubr.bf16.vlgmr.msra.gmra.mxu0 %v25744_v47  ;;  %v19982_v47 = vld [vmem:[%s27839_s1 + $0x1aac] ss:$16 sps:$4 sm:$0xff]   ;;  %v20040_v28 = vld [vmem:[%s27839_s1 + $0x1b68] ss:$16 sps:$4 sm:$0xff]  }
 0x51c   :  { %v27220_v37 = vadd.f32 %v8438_v9, %v8398_v21  ;;  %8733 = vmatpush1.bf16.msra.mxu0 %v19968_v19  ;;  %8764 = vmatprep.mubr.bf16.mxu0 %v25761_v54  ;;  %v19980_v54 = vld [vmem:[%s27839_s1 + $0x1aa8] ss:$16 sps:$4 sm:$0xff]   ;;  %v20030_v21 = vld [vmem:[%s27839_s1 + $0x1bac] ss:$16 sps:$4 sm:$0xff]  }
 0x51d   :  { %8696 = vmatpush1.bf16.msra.mxu1 %v19965_v56  ;;  %v8440_v2 = vpop.f32.mrf.mxu0  ;;  %8734 = vmatprep.subr.bf16.mxu0 %v19976_v49  ;;  %v20031_v19 = vld [vmem:[%s27839_s1 + $0x1948] ss:$16 sps:$4 sm:$0xff]   ;;  %v20042_v56 = vld [vmem:[%s27839_s1 + $0x1b6c] ss:$16 sps:$4 sm:$0xff]  }
 0x51e   :  { %v27232_v22 = vadd.f32 %v8440_v2, %v8400_v4  ;;  %8697 = vmatprep.subr.bf16.mxu1 %v19973_v51  ;;  %v20033_v4 = vld [vmem:[%s27839_s1 + $0x194c] ss:$16 sps:$4 sm:$0xff]   ;;  %v20037_v51 = vld [vmem:[%s27839_s1 + $0x1928] ss:$16 sps:$4 sm:$0xff]  }
 0x51f   :  { %v8442_v39 = vpop.f32.mrf.mxu0  ;;  %v20039_v49 = vld [vmem:[%s27839_s1 + $0x192c] ss:$16 sps:$4 sm:$0xff]  }
 0x520   :  { %8735 = vmatpush1.bf16.msra.mxu0 %v19974_v26  ;;  %v20048_v9 = vld [vmem:[%s27839_s1 + $0x1b4c] ss:$16 sps:$4 sm:$0xff]  }
 0x521   :  { %8698 = vmatpush1.bf16.msra.mxu1 %v19971_v41  ;;  %v8443_v43 = vpop.f32.mrf.mxu0  ;;  %8736 = vmatprep.subr.bf16.mxu0 %v19982_v47  ;;  %v20045_v26 = vld [vmem:[%s27839_s1 + $0x190c] ss:$16 sps:$4 sm:$0xff]   ;;  %v20046_v41 = vld [vmem:[%s27839_s1 + $0x1b48] ss:$16 sps:$4 sm:$0xff]  }
 0x522   :  { %8699 = vmatprep.subr.bf16.mxu1 %v19979_v38  ;;  %v3034_v2 = vld [vmem:[%s27839_s1 + $0x1c28] sm:$0x77] }
 0x523   :  { %v20043_v47 = vld [vmem:[%s27839_s1 + $0x1908] ss:$16 sps:$4 sm:$0xff]   ;;  %v20051_v38 = vld [vmem:[%s27839_s1 + $0x1b2c] ss:$16 sps:$4 sm:$0xff]   ;;  %v17609_v39 = vcombine.high %v3034_v2, %v3034_v2 }
 0x524   :  { %8737 = vmatpush1.bf16.msra.mxu0 %v19980_v54  ;;  %v17608_v54 = vcombine.low %v3034_v2, %v3034_v2  ;;  %v20049_v43 = vld [vmem:[%s27839_s1 + $0x1b28] ss:$16 sps:$4 sm:$0xff]  }
 0x525   :  { %8700 = vmatpush1.bf16.msra.mxu1 %v19977_v45  ;;  %8738 = vmatprep.subr.bf16.mxu0 %v19988_v60  ;;  %v20056_v45 = vld [vmem:[%s27839_s1 + $0x1b0c] ss:$16 sps:$4 sm:$0xff]  }
 0x526   :  { %8701 = vmatprep.subr.bf16.mxu1 %v19985_v46  ;;  %v7579_v60 = vsel %vm7571_vm0, %v17608_v54, 0  ;;  %v20059_v46 = vld [vmem:[%s27839_s1 + $0x1c0c] ss:$16 sps:$4 sm:$0xff]  }
 0x528   :  { %8739 = vmatpush1.bf16.msra.mxu0 %v19986_v50  ;;  %v8819_v50 = vmul.f32 0.2, %v26617_v33 }
 0x529   :  { %8702 = vmatpush1.bf16.msra.mxu1 %v19983_v25  ;;  %8740 = vmatprep.subr.bf16.mxu0 %v19994_v15  ;;  %v20054_v15 = vld [vmem:[%s27839_s1 + $0x1b08] ss:$16 sps:$4 sm:$0xff]  }
 0x52a   :  { %8703 = vmatprep.subr.bf16.mxu1 %v19991_v32 }
 0x52c   :  { %8741 = vmatpush1.bf16.msra.mxu0 %v19992_v53  ;;  %v20057_v53 = vld [vmem:[%s27839_s1 + $0x1c08] ss:$16 sps:$4 sm:$0xff]  }
 0x52d   :  { %8704 = vmatpush1.bf16.msra.mxu1 %v19989_v55  ;;  %8742 = vmatprep.subr.bf16.mxu0 %v20000_v59  ;;  %v20060_v55 = vld [vmem:[%s27841_s3 + $0x78] sm:$0xff]  }
 0x52e   :  { %8705 = vmatprep.subr.bf16.mxu1 %v19997_v30 }
 0x530   :  { %8743 = vmatpush1.bf16.msra.mxu0 %v19998_v62  ;;  %v8823_v62 = vsel %vm8815_vm2, %v26617_v33, %v8819_v50  ;;  %v20063_v33 = vld [vmem:[%s27841_s3 + $0x30] sm:$0xff]  }
 0x531   :  { %8706 = vmatpush1.bf16.msra.mxu1 %v19995_v29  ;;  %8744 = vmatprep.subr.bf16.mxu0 %v20006_v40  ;;  %v20062_v29 = vld [vmem:[%s27841_s3 + $0x70] sm:$0xff]  }
 0x532   :  { %8707 = vmatprep.subr.bf16.mxu1 %v20003_v63 }
 0x534   :  { %8745 = vmatpush1.bf16.msra.mxu0 %v20004_v13  ;;  %v8827_v13 = vpack.c.bf16 %v8823_v62, %v8823_v62  ;;  %v20100_v62 = vld [vmem:[%s27843_s5 + $0xc4] ss:$16 sps:$4 sm:$0xff]  }
 0x535   :  { %8708 = vmatpush2.bf16.msra.mxu1 %v20001_v35  ;;  %8746 = vmatprep.subr.bf16.mxu0 %v20012_v23  ;;  %v20064_v23 = vld [vmem:[%s27841_s3 + $0x68] sm:$0xff]  }
 0x536   :  { %8709 = vmatprep.subr.bf16.mxu1 %v20009_v7 }
 0x538   :  { %8747 = vmatpush1.bf16.msra.mxu0 %v20010_v3 }
 0x539   :  { %8710 = vmatpush2.bf16.msra.mxu1 %v20007_v36  ;;  %8748 = vmatprep.subr.bf16.mxu0 %v20018_v48  ;;  %v20076_v48 = vld [vmem:[%s27841_s3 + $0xf8] sm:$0xff]  }
 0x53a   :  { %8711 = vmatprep.subr.bf16.mxu1 %v20015_v34  ;;  %v20077_v34 = vld [vmem:[%s27841_s3 + $0xb8] sm:$0xff]  }
 0x53c   :  { %8749 = vmatpush2.bf16.msra.mxu0 %v20016_v42  ;;  %v20078_v42 = vld [vmem:[%s27841_s3 + $0xf0] sm:$0xff]  }
 0x53d   :  { %8712 = vmatpush2.bf16.msra.mxu1 %v20013_v14  ;;  %8750 = vmatprep.subr.bf16.mxu0 %v20024_v0  ;;  %v20067_v14 = vld [vmem:[%s27841_s3 + $0x20] sm:$0xff]   ;;  %v20079_v0 = vld [vmem:[%s27841_s3 + $0xb0] sm:$0xff]  }
 0x53e   :  { %8713 = vmatprep.subr.bf16.mxu1 %v20021_v6  ;;  %v20068_v6 = vld [vmem:[%s27841_s3 + $0x58] sm:$0xff]  }
 0x540   :  { %8751 = vmatpush2.bf16.msra.mxu0 %v20022_v18  ;;  %v20080_v18 = vld [vmem:[%s27841_s3 + $0xe8] sm:$0xff]  }
 0x541   :  { %8714 = vmatpush2.bf16.msra.mxu1 %v20019_v20  ;;  %8752 = vmatprep.subr.bf16.mxu0 %v20030_v21  ;;  %v20069_v20 = vld [vmem:[%s27841_s3 + $0x18] sm:$0xff]   ;;  %v20081_v21 = vld [vmem:[%s27841_s3 + $0xa8] sm:$0xff]  }
 0x542   :  { %8715 = vmatprep.subr.bf16.mxu1 %v20027_v24  ;;  %v20070_v24 = vld [vmem:[%s27841_s3 + $0x50] sm:$0xff]  }
 0x544   :  { %8753 = vmatpush2.bf16.msra.mxu0 %v20028_v8  ;;  %v20071_v8 = vld [vmem:[%s27841_s3 + $0x10] sm:$0xff]  }
 0x545   :  { %8716 = vmatpush2.bf16.msra.mxu1 %v20025_v58  ;;  %8754 = vmatprep.subr.bf16.mxu0 %v20036_v44  ;;  %v20072_v58 = vld [vmem:[%s27841_s3 + $0x48] sm:$0xff]  }
 0x546   :  { %8717 = vmatprep.subr.bf16.mxu1 %v20033_v4  ;;  %v20073_v44 = vld [vmem:[%s27841_s3 + $0x8] sm:$0xff]   ;;  %v20074_v4 = vld [vmem:[%s27841_s3 + $0x40] sm:$0xff]  }
 0x548   :  { %8755 = vmatpush2.bf16.msra.mxu0 %v20034_v12  ;;  %v8818_v12 = vmul.f32 0.2, %v26605_v16 }
 0x549   :  { %8718 = vmatpush2.bf16.msra.mxu1 %v20031_v19  ;;  %8756 = vmatprep.subr.bf16.mxu0 %v20042_v56  ;;  %v20075_v19 = vld [vmem:[%s27841_s3] sm:$0xff]  }
 0x54a   :  { %8719 = vmatprep.subr.bf16.mxu1 %v20039_v49  ;;  %v8822_v56 = vsel %vm8814_vm3, %v26605_v16, %v8818_v12  ;;  %v20084_v16 = vld [vmem:[%s27841_s3 + $0xd8] sm:$0xff]  }
 0x54b   :  { %v8826_v49 = vpack.c.bf16 %v8822_v56, %v8822_v56 }
 0x54c   :  { %8757 = vmatpush2.bf16.msra.mxu0 %v20040_v28  ;;  %v20082_v28 = vld [vmem:[%s27841_s3 + $0xe0] sm:$0xff]  }
 0x54d   :  { %8720 = vmatpush2.bf16.msra.mxu1 %v20037_v51  ;;  %8758 = vmatprep.subr.bf16.mxu0 %v20048_v9  ;;  %v20083_v9 = vld [vmem:[%s27841_s3 + $0xa0] sm:$0xff]  }
 0x54e   :  { %8721 = vmatprep.subr.bf16.mxu1 %v20045_v26 }
 0x550   :  { %8759 = vmatpush2.bf16.msra.mxu0 %v20046_v41 }
 0x551   :  { %8722 = vmatpush2.bf16.msra.mxu1 %v20043_v47  ;;  %8760 = vmatprep.subr.bf16.mxu0 %v20051_v38  ;;  %v20085_v38 = vld [vmem:[%s27841_s3 + $0x98] sm:$0xff]  }
 0x552   :  { %17612 = vmatprep.subr.msk.bf16.mxu1 %vm7571_vm0, %v17609_v39 }
 0x554   :  { %v8479_v25 = vpop.f32.mrf.mxu1  ;;  %8724 = vmatmul.mubr.bf16.vlgmr.msra.gmra.mxu1 %v25945_v10  ;;  %8761 = vmatpush2.bf16.msra.mxu0 %v20049_v43  ;;  %v20086_v43 = vld [vmem:[%s27841_s3 + $0xd0] sm:$0xff]  }
 0x555   :  { %v8480_v32 = vadd.f32 %v8479_v25, %v27220_v37  ;;  %8786 = vmatpush1.bf16.msra.mxu1 %v7579_v60  ;;  %8762 = vmatprep.subr.bf16.mxu0 %v20056_v45  ;;  %v20061_v37 = vld [vmem:[%s27841_s3 + $0x38] sm:$0xff]   ;;  %v20087_v60 = vld [vmem:[%s27841_s3 + $0x90] sm:$0xff]  }
 0x556   :  { %v8481_v10 = vpop.f32.mrf.mxu1  ;;  %8787 = vmatprep.subr.bf16.mxu1 %v20059_v46  ;;  %8805 = vmatprep.mubr.bf16.mxu1 %v21544_v31 }
 0x557   :  { %v8482_v59 = vadd.f32 %v8481_v10, %v27232_v22  ;;  %v20091_v10 = vld [vmem:[%s27841_s3 + $0x80] sm:$0xff]  }
 0x558   :  { %v8483_v30 = vpop.f32.mrf.mxu1  ;;  %8763 = vmatpush2.bf16.msra.mxu0 %v20054_v15  ;;  %v20088_v15 = vld [vmem:[%s27841_s3 + $0xc8] sm:$0xff]  }
 0x559   :  { %8788 = vmatpush1.bf16.msra.mxu1 %v20057_v53  ;;  %18608 = vmatprep.subr.bf16.mxu0 %v20060_v55  ;;  %v20090_v55 = vld [vmem:[%s27841_s3 + $0xc0] sm:$0xff]  }
 0x55a   :  { %v8484_v40 = vpop.f32.mrf.mxu1  ;;  %18630 = vmatprep.subr.bf16.mxu1 %v20076_v48  ;;  %v20094_v30 = vld [vmem:[%s27843_s5 + $0xe4] ss:$16 sps:$4 sm:$0xff]  }
 0x55b   :  { %v8520_v63 = vpop.f32.mrf.mxu0  ;;  %8765 = vmatmul.mubr.bf16.vlgmr.msra.gmra.mxu0 %v25955_v27  ;;  %v20065_v27 = vld [vmem:[%s27841_s3 + $0x28] sm:$0xff]   ;;  %v20106_v40 = vld [vmem:[%s27843_s5 + $0xa4] ss:$16 sps:$4 sm:$0xff]  }
 0x55c   :  { %v8521_v22 = vadd.f32 %v8520_v63, %v8480_v32  ;;  %17613 = vmatmul.mubr.msk.bf16.vlgmr.msra.gmra.mxu1 %vm7567_vm1, %v25984_v5  ;;  %18609 = vmatpush3.bf16.msra.mxu0 %v20061_v37  ;;  %v20066_v5 = vld [vmem:[%s27841_s3 + $0x60] sm:$0xff]   ;;  %v20089_v32 = vld [vmem:[%s27841_s3 + $0x88] sm:$0xff]  }
 0x55d   :  { %9125 = vmatprep.mubr.bf16.mxu0 %v8827_v13  ;;  %v8522_v35 = vpop.f32.mrf.mxu0  ;;  %18610 = vmatprep.subr.bf16.mxu0 %v20062_v29  ;;  %v20097_v37 = vld [vmem:[%s27843_s5 + $0xec] ss:$16 sps:$4 sm:$0xff]   ;;  %v20098_v29 = vld [vmem:[%s27843_s5 + $0xc0] ss:$16 sps:$4 sm:$0xff]  }
 0x55e   :  { %v8523_v7 = vadd.f32 %v8522_v35, %v8482_v59  ;;  %18631 = vmatpush3.bf16.msra.mxu1 %v20077_v34  ;;  %v20092_v59 = vld [vmem:[%s27843_s5 + $0xe0] ss:$16 sps:$4 sm:$0xff]  }
 0x55f   :  { %v8524_v3 = vpop.f32.mrf.mxu0  ;;  %18632 = vmatprep.subr.bf16.mxu1 %v20078_v42  ;;  %v20104_v63 = vld [vmem:[%s27843_s5 + $0xa0] ss:$16 sps:$4 sm:$0xff]  }
 0x560   :  { %18611 = vmatpush3.bf16.msra.mxu0 %v20063_v33 }
 0x561   :  { %v8525_v36 = vpop.f32.mrf.mxu0  ;;  %18612 = vmatprep.subr.bf16.mxu0 %v20064_v23 }
 0x562   :  { %18633 = vmatpush3.bf16.msra.mxu1 %v20079_v0 }
 0x563   :  { %18634 = vmatprep.subr.bf16.mxu1 %v20080_v18 }
 0x564   :  { %18613 = vmatpush3.bf16.msra.mxu0 %v20065_v27 }
 0x565   :  { %18614 = vmatprep.subr.bf16.mxu0 %v20066_v5 }
 0x566   :  { %18635 = vmatpush3.bf16.msra.mxu1 %v20081_v21 }
 0x567   :  { %18636 = vmatprep.subr.bf16.mxu1 %v20082_v28 }
 0x568   :  { %18615 = vmatpush3.bf16.msra.mxu0 %v20067_v14 }
 0x569   :  { %18616 = vmatprep.subr.bf16.mxu0 %v20068_v6 }
 0x56a   :  { %18637 = vmatpush3.bf16.msra.mxu1 %v20083_v9 }
 0x56b   :  { %18638 = vmatprep.subr.bf16.mxu1 %v20084_v16 }
 0x56c   :  { %18617 = vmatpush3.bf16.msra.mxu0 %v20069_v20 }
 0x56d   :  { %18618 = vmatprep.subr.bf16.mxu0 %v20070_v24 }
 0x56e   :  { %18639 = vmatpush3.bf16.msra.mxu1 %v20085_v38 }
 0x56f   :  { %18640 = vmatprep.subr.bf16.mxu1 %v20086_v43  ;;  %v20109_v43 = vld [vmem:[%s27843_s5 + $0xac] ss:$16 sps:$4 sm:$0xff]  }
 0x570   :  { %18619 = vmatpush3.bf16.msra.mxu0 %v20071_v8 }
 0x571   :  { %18620 = vmatprep.subr.bf16.mxu0 %v20072_v58 }
 0x572   :  { %18641 = vmatpush3.bf16.msra.mxu1 %v20087_v60 }
 0x573   :  { %18642 = vmatprep.subr.bf16.mxu1 %v20088_v15 }
 0x574   :  { %18621 = vmatpush3.bf16.msra.mxu0 %v20073_v44 }
 0x575   :  { %18622 = vmatprep.subr.bf16.mxu0 %v20074_v4 }
 0x576   :  { %18643 = vmatpush3.bf16.msra.mxu1 %v20089_v32  ;;  %v20115_v32 = vld [vmem:[%s27843_s5 + $0x8c] ss:$16 sps:$4 sm:$0xff]  }
 0x577   :  { %18644 = vmatprep.subr.bf16.mxu1 %v20090_v55  ;;  %v20113_v55 = vld [vmem:[%s27843_s5 + $0x88] ss:$16 sps:$4 sm:$0xff]  }
 0x578   :  { %18623 = vmatpush3.bf16.msra.mxu0 %v20075_v19 }
 0x579   :  { %9389 = vmatprep.subr.bf16.mxu0 %v20094_v30  ;;  %v20116_v30 = vld [vmem:[%s27843_s5 + $0x60] ss:$16 sps:$4 sm:$0xff]  }
 0x57a   :  { %18645 = vmatpush3.bf16.msra.mxu1 %v20091_v10  ;;  %v20118_v10 = vld [vmem:[%s27843_s5 + $0x64] ss:$16 sps:$4 sm:$0xff]  }
 0x57b   :  { %9126 = vmatmul.mubr.bf16.vlgmr.msra.gmra.mxu0 %v8826_v49  ;;  %9430 = vmatprep.subr.bf16.mxu1 %v20097_v37  ;;  %v20119_v37 = vld [vmem:[%s27843_s5 + $0x68] ss:$16 sps:$4 sm:$0xff]  }
 0x57c   :  { %9421 = vmatprep.mubr.bf16.mxu0 %v21544_v31  ;;  %9390 = vmatpush1.bf16.msra.mxu0 %v20092_v59  ;;  %v20121_v59 = vld [vmem:[%s27843_s5 + $0x6c] ss:$16 sps:$4 sm:$0xff]  }
 0x57d   :  { %9391 = vmatprep.subr.bf16.mxu0 %v20100_v62  ;;  %v20124_v62 = vld [vmem:[%s27843_s5 + $0x44] ss:$16 sps:$4 sm:$0xff]  }
 0x580   :  { %9392 = vmatpush1.bf16.msra.mxu0 %v20098_v29  ;;  %v20127_v29 = vld [vmem:[%s27843_s5 + $0x4c] ss:$16 sps:$4 sm:$0xff]  }
 0x581   :  { %9393 = vmatprep.subr.bf16.mxu0 %v20106_v40  ;;  %v20122_v40 = vld [vmem:[%s27843_s5 + $0x40] ss:$16 sps:$4 sm:$0xff]  }
 0x584   :  { %9394 = vmatpush1.bf16.msra.mxu0 %v20104_v63  ;;  %v20125_v63 = vld [vmem:[%s27843_s5 + $0x48] ss:$16 sps:$4 sm:$0xff]  }
 0x594   :  { %v8561_v51 = vpop.f32.mrf.mxu1 }
 0x595   :  { %v8562_v26 = vadd.f32 %v8561_v51, %v8521_v22 }
 0x596   :  { %v8563_v2 = vpop.f32.mrf.mxu1 }
 0x597   :  { %v8564_v41 = vadd.f32 %v8563_v2, %v8523_v7 }
 0x598   :  { %v8565_v47 = vpop.f32.mrf.mxu1 }
 0x599   :  { %v20095_v47 = vld [vmem:[%s27843_s5 + $0xe8] ss:$16 sps:$4 sm:$0xff]  }
 0x59a   :  { %v8566_v39 = vpop.f32.mrf.mxu1 }
 0x59b   :  { %v8602_v54 = vpop.f32.mrf.mxu0  ;;  %v20103_v39 = vld [vmem:[%s27843_s5 + $0xcc] ss:$16 sps:$4 sm:$0xff]  }
 0x59c   :  { %v8603_v45 = vadd.f32 %v8602_v54, %v8562_v26  ;;  %v20101_v54 = vld [vmem:[%s27843_s5 + $0xc8] ss:$16 sps:$4 sm:$0xff]  }
 0x59d   :  { %v8604_v46 = vpop.f32.mrf.mxu0 }
 0x59e   :  { %v8605_v50 = vadd.f32 %v8604_v46, %v8564_v41 }
 0x59f   :  { %v8606_v25 = vpop.f32.mrf.mxu0 }
 0x5a1   :  { %v8607_v53 = vpop.f32.mrf.mxu0 }
 0x5a2   :  { %v20110_v53 = vld [vmem:[%s27843_s5 + $0x80] ss:$16 sps:$4 sm:$0xff]  }
 0x5d4   :  { %v8643_v13 = vpop.f32.mrf.mxu1 }
 0x5d5   :  { %v8644_v22 = vadd.f32 %v8643_v13, %v8603_v45  ;;  %v20107_v45 = vld [vmem:[%s27843_s5 + $0xa8] ss:$16 sps:$4 sm:$0xff]   ;;  %v20130_v13 = vld [vmem:[%s27843_s5 + $0x24] ss:$16 sps:$4 sm:$0xff]  }
 0x5d6   :  { %v8645_v33 = vpop.f32.mrf.mxu1 }
 0x5d7   :  { %v8646_v35 = vadd.f32 %v8645_v33, %v8605_v50  ;;  %v20128_v33 = vld [vmem:[%s27843_s5 + $0x20] ss:$16 sps:$4 sm:$0xff]  }
 0x5d8   :  { %v8647_v23 = vpop.f32.mrf.mxu1 }
 0x5d9   :  { %v20136_v23 = vld [vmem:[%s27843_s5 + $0x4] ss:$16 sps:$4 sm:$0xff]  }
 0x5da   :  { %v8648_v7 = vpop.f32.mrf.mxu1 }
 0x5db   :  { %v8684_v3 = vpop.f32.mrf.mxu0  ;;  %v20139_v7 = vld [vmem:[%s27843_s5 + $0xc] ss:$16 sps:$4 sm:$0xff]  }
 0x5dc   :  { %v8685_v42 = vadd.f32 %v8684_v3, %v8644_v22  ;;  %v20133_v22 = vld [vmem:[%s27843_s5 + $0x2c] ss:$16 sps:$4 sm:$0xff]   ;;  %v20134_v3 = vld [vmem:[%s27843_s5] ss:$16 sps:$4 sm:$0xff]  }
 0x5dd   :  { %v8686_v27 = vpop.f32.mrf.mxu0 }
 0x5de   :  { %v8687_v0 = vadd.f32 %v8686_v27, %v8646_v35  ;;  %v20131_v35 = vld [vmem:[%s27843_s5 + $0x28] ss:$16 sps:$4 sm:$0xff]  }
 0x5df   :  { %v8688_v5 = vpop.f32.mrf.mxu0  ;;  %v20137_v27 = vld [vmem:[%s27843_s5 + $0x8] ss:$16 sps:$4 sm:$0xff]  }
 0x5e0   :  { %v17614_v5 = vld [vmem:[%s27842_s4] ss:$0 sm:$0xff] }
 0x5e1   :  { %v8689_v36 = vpop.f32.mrf.mxu0 }
 0x614   :  { %v8725_v48 = vpop.f32.mrf.mxu1 }
 0x615   :  { %v8726_v6 = vadd.f32 %v8725_v48, %v8685_v42 }
 0x616   :  { %v8727_v34 = vpop.f32.mrf.mxu1 }
 0x617   :  { %v8728_v21 = vadd.f32 %v8727_v34, %v8687_v0 }
 0x618   :  { %v8729_v14 = vpop.f32.mrf.mxu1 }
 0x61a   :  { %v8730_v18 = vpop.f32.mrf.mxu1 }
 0x61b   :  { %v8766_v20 = vpop.f32.mrf.mxu0 }
 0x61c   :  { %v8767_v24 = vadd.f32 %v8766_v20, %v8726_v6  ;;  %v8807_v8 = vpop.f32.mrf.mxu1 }
 0x61d   :  { %v8768_v58 = vpop.f32.mrf.mxu0 }
 0x61e   :  { %v8808_v44 = vadd.f32 %v8807_v8, %v8767_v24  ;;  %v8769_v4 = vadd.f32 %v8768_v58, %v8728_v21  ;;  %v8809_v12 = vpop.f32.mrf.mxu1  ;;  %v9207_v21 = vld [vmem:[%s27844_s6] sm:$0xf] }
 0x61f   :  { %v8770_v19 = vpop.f32.mrf.mxu0  ;;  %v9212_v24 = vrot.slane %v9207_v21, %v25260_v61  ;;  %v9220_v8 = vrot.slane %v9207_v21, %v26776_v52  ;;  %v9216_v58 = vrot.slane %v9207_v21, %v25269_v1 }
 0x620   :  { %vm8816_vm4 = vcmp.gt.f32.partialorder %v8808_v44, 0.0  ;;  %v8820_v56 = vmul.f32 0.2, %v8808_v44  ;;  %v8810_v49 = vadd.f32 %v8809_v12, %v8769_v4  ;;  %v8811_v28 = vpop.f32.mrf.mxu1 }
 0x621   :  { %v8771_v51 = vpop.f32.mrf.mxu0 }
 0x622   :  { %vm8817_vm5 = vcmp.gt.f32.partialorder %v8810_v49, 0.0  ;;  %v8821_v9 = vmul.f32 0.2, %v8810_v49  ;;  %v8812_v26 = vpop.f32.mrf.mxu1  ;;  %v8824_v2 = vsel %vm8816_vm4, %v8808_v44, %v8820_v56  ;;  %v9224_v44 = vrot.slane %v9207_v21, %v26783_v57 }
 0x623   :  { %v8828_v38 = vpack.c.bf16 %v8824_v2, %v8824_v2 }
 0x624   :  { %v8825_v41 = vsel %vm8817_vm5, %v8810_v49, %v8821_v9 }
 0x625   :  { %v8829_v16 = vpack.c.bf16 %v8825_v41, %v8825_v41 }
 0x627   :  { %9165 = vmatprep.mubr.bf16.mxu1 %v8829_v16 }
 0x628   :  { %9166 = vmatmul.mubr.bf16.vlgmr.msra.gmra.mxu1 %v8828_v38 }
 0x629   :  { %9431 = vmatpush1.bf16.msra.mxu1 %v20095_v47  ;;  %9462 = vmatprep.mubr.bf16.mxu1 %v21544_v31  ;;  %v20112_v31 = vld [vmem:[%s27843_s5 + $0x84] ss:$16 sps:$4 sm:$0xff]  }
 0x62a   :  { %9432 = vmatprep.subr.bf16.mxu1 %v20103_v39  ;;  %9395 = vmatprep.subr.bf16.mxu0 %v20112_v31 }
 0x62b   :  { %9396 = vmatpush1.bf16.msra.mxu0 %v20110_v53 }
 0x62c   :  { %9397 = vmatprep.subr.bf16.mxu0 %v20118_v10 }
 0x62d   :  { %9433 = vmatpush1.bf16.msra.mxu1 %v20101_v54 }
 0x62e   :  { %9434 = vmatprep.subr.bf16.mxu1 %v20109_v43 }
 0x62f   :  { %9398 = vmatpush1.bf16.msra.mxu0 %v20116_v30 }
 0x630   :  { %9399 = vmatprep.subr.bf16.mxu0 %v20124_v62 }
 0x631   :  { %9435 = vmatpush1.bf16.msra.mxu1 %v20107_v45 }
 0x632   :  { %9436 = vmatprep.subr.bf16.mxu1 %v20115_v32 }
 0x633   :  { %9400 = vmatpush1.bf16.msra.mxu0 %v20122_v40 }
 0x634   :  { %9401 = vmatprep.subr.bf16.mxu0 %v20130_v13 }
 0x635   :  { %9437 = vmatpush1.bf16.msra.mxu1 %v20113_v55 }
 0x636   :  { %9438 = vmatprep.subr.bf16.mxu1 %v20121_v59 }
 0x637   :  { %9402 = vmatpush1.bf16.msra.mxu0 %v20128_v33 }
 0x638   :  { %9403 = vmatprep.subr.bf16.mxu0 %v20136_v23 }
 0x639   :  { %9439 = vmatpush1.bf16.msra.mxu1 %v20119_v37 }
 0x63a   :  { %9440 = vmatprep.subr.bf16.mxu1 %v20127_v29 }
 0x63b   :  { %v18624_v60 = vpop.f32.mrf.mxu0  ;;  %9404 = vmatpush1.bf16.msra.mxu0 %v20134_v3 }
 0x63d   :  { %v18625_v46 = vpop.f32.mrf.mxu0  ;;  %9441 = vmatpush1.bf16.msra.mxu1 %v20125_v63 }
 0x63e   :  { %v18626_v50 = vadd.f32 %v18625_v46, %v18624_v60  ;;  %9442 = vmatprep.subr.bf16.mxu1 %v20133_v22 }
 0x63f   :  { %v18627_v25 = vpop.f32.mrf.mxu0 }
 0x640   :  { %v9128_v34 = vadd.f32 %v18626_v50, %v17614_v5 }
 0x641   :  { %v18628_v15 = vpop.f32.mrf.mxu0  ;;  %9443 = vmatpush1.bf16.msra.mxu1 %v20131_v35 }
 0x642   :  { %9444 = vmatprep.subr.bf16.mxu1 %v20139_v7 }
 0x645   :  { %9445 = vmatpush1.bf16.msra.mxu1 %v20137_v27 }
 0x6e8   :  { %v18646_v36 = vpop.f32.mrf.mxu1 }
 0x6ea   :  { %v18647_v48 = vpop.f32.mrf.mxu1 }
 0x6eb   :  { %v18648_v42 = vadd.f32 %v18647_v48, %v18646_v36 }
 0x6ec   :  { %v18649_v14 = vpop.f32.mrf.mxu1 }
 0x6ed   :  { %v9168_v0 = vadd.f32 %v18648_v42, %v9128_v34 }
 0x6ee   :  { %v18650_v6 = vpop.f32.mrf.mxu1 }
 0x6ef   :  { %20140 = vtanh.f32 %v9168_v0 }
 0x6fc   :  { %v20141_v18 = vpop.eup %20140 }
 0x6fd   :  { %v9174_v20 = vpack.c.bf16 %v20141_v18, %v20141_v18 }
 0x6ff   :  { %9422 = vmatmul.mubr.bf16.vlgmr.msra.gmra.mxu0 %v9174_v20  ;;  %9463 = vmatmul.mubr.bf16.vlgmr.msra.gmra.mxu1 %v9174_v20 }
 0x7bf   :  { %v9423_v4 = vpop.f32.mrf.mxu0  ;;  %v9464_v12 = vpop.f32.mrf.mxu1 }
 0x7c0   :  { %v9424_v19 = vadd.f32 %v9423_v4, %v9212_v24  ;;  %v9465_v56 = vadd.f32 %v9464_v12, %v9220_v8 }
 0x7c1   :  { %v9425_v49 = vpop.f32.mrf.mxu0  ;;  %v9466_v28 = vpop.f32.mrf.mxu1 }
 0x7c2   :  { %v9471_v51 = vmax.f32 %v9424_v19, 0.0  ;;  %v9473_v9 = vmax.f32 %v9465_v56, 0.0  ;;  %v9426_v26 = vadd.f32 %v9425_v49, %v9216_v58  ;;  %v9467_v2 = vadd.f32 %v9466_v28, %v9224_v44 }
 0x7c3   :  { %v9427_v41 = vpop.f32.mrf.mxu0  ;;  %v9468_v16 = vpop.f32.mrf.mxu1 }
 0x7c4   :  { %v27615_v47 = vpack.c.bf16 %v9471_v51, %v9471_v51  ;;  %v27617_v38 = vpack.c.bf16 %v9473_v9, %v9473_v9  ;;  %v9472_v39 = vmax.f32 %v9426_v26, 0.0  ;;  %v9474_v54 = vmax.f32 %v9467_v2, 0.0 }
 0x7c5   :  { %v9428_v43 = vpop.f32.mrf.mxu0  ;;  %v9469_v45 = vpop.f32.mrf.mxu1 }
 0x7c6   :  { %v27619_v60 = vpack.c.bf16 %v9472_v39, %v9472_v39  ;;  %v27621_v46 = vpack.c.bf16 %v9474_v54, %v9474_v54 }
 0x7c7   :  { %21539 = dma.done.wait [#allocation3], 118784 }
 0x7c8   :  { %21540 = vsyncadd [#allocation3], 4294848512  ;;  %10308 = vmatprep.mubr.bf16.mxu0 %v27619_v60  ;;  %10349 = vmatprep.mubr.bf16.mxu1 %v27621_v46  ;;  %v20143_v50 = vld [vmem:[#allocation2 + $0x65c] ss:$116 sps:$4 sm:$0xff]   ;;  %v20147_v15 = vld [vmem:[#allocation2 + $0x658] ss:$116 sps:$4 sm:$0xff]  }
 0x7c9   :  { %v20145_v25 = vld [vmem:[#allocation2 + $0x14dc] ss:$116 sps:$4 sm:$0xff]   ;;  %10276 = vmatprep.subr.bf16.mxu0 %v20143_v50  ;;  %v20148_v31 = vld [vmem:[#allocation2 + $0x14d8] ss:$116 sps:$4 sm:$0xff]   ;;  %v20149_v32 = vld [vmem:[#allocation2 + $0x574] ss:$116 sps:$4 sm:$0xff]  }
 0x7ca   :  { %10317 = vmatprep.subr.bf16.mxu1 %v20145_v25  ;;  %10277 = vmatpush1.bf16.msra.mxu0 %v20147_v15  ;;  %v20151_v53 = vld [vmem:[#allocation2 + $0x13f4] ss:$116 sps:$4 sm:$0xff]   ;;  %v20153_v55 = vld [vmem:[#allocation2 + $0x570] ss:$116 sps:$4 sm:$0xff]   ;;  %v20155_v59 = vld [vmem:[#allocation2 + $0x48c] ss:$116 sps:$4 sm:$0xff]  }
 0x7cb   :  { %10318 = vmatpush1.bf16.msra.mxu1 %v20148_v31  ;;  %10278 = vmatprep.subr.bf16.mxu0 %v20149_v32  ;;  %v20154_v10 = vld [vmem:[#allocation2 + $0x13f0] ss:$116 sps:$4 sm:$0xff]   ;;  %v20157_v30 = vld [vmem:[#allocation2 + $0x130c] ss:$116 sps:$4 sm:$0xff]   ;;  %v20159_v37 = vld [vmem:[#allocation2 + $0x488] ss:$116 sps:$4 sm:$0xff]  }
 0x7cc   :  { %10319 = vmatprep.subr.bf16.mxu1 %v20151_v53  ;;  %v20160_v62 = vld [vmem:[#allocation2 + $0x1308] ss:$116 sps:$4 sm:$0xff]   ;;  %v20161_v29 = vld [vmem:[#allocation2 + $0x3a4] ss:$116 sps:$4 sm:$0xff]   ;;  %v20165_v63 = vld [vmem:[#allocation2 + $0x3a0] ss:$116 sps:$4 sm:$0xff]  }
 0x7cd   :  { %v20163_v40 = vld [vmem:[#allocation2 + $0x1224] ss:$116 sps:$4 sm:$0xff]   ;;  %v20166_v13 = vld [vmem:[#allocation2 + $0x1220] ss:$116 sps:$4 sm:$0xff]   ;;  %v20167_v22 = vld [vmem:[#allocation2 + $0x2bc] ss:$116 sps:$4 sm:$0xff]  }
 0x7ce   :  { %10279 = vmatpush1.bf16.msra.mxu0 %v20153_v55  ;;  %v20169_v33 = vld [vmem:[#allocation2 + $0x113c] ss:$116 sps:$4 sm:$0xff]   ;;  %v20171_v35 = vld [vmem:[#allocation2 + $0x2b8] ss:$116 sps:$4 sm:$0xff]   ;;  %v20173_v7 = vld [vmem:[#allocation2 + $0x1d4] ss:$116 sps:$4 sm:$0xff]  }
 0x7cf   :  { %10320 = vmatpush1.bf16.msra.mxu1 %v20154_v10  ;;  %10280 = vmatprep.subr.bf16.mxu0 %v20155_v59  ;;  %v20172_v23 = vld [vmem:[#allocation2 + $0x1138] ss:$116 sps:$4 sm:$0xff]   ;;  %v20175_v3 = vld [vmem:[#allocation2 + $0x1054] ss:$116 sps:$4 sm:$0xff]   ;;  %v20177_v27 = vld [vmem:[#allocation2 + $0x1d0] ss:$116 sps:$4 sm:$0xff]  }
 0x7d0   :  { %10321 = vmatprep.subr.bf16.mxu1 %v20157_v30  ;;  %v20178_v5 = vld [vmem:[#allocation2 + $0x1050] ss:$116 sps:$4 sm:$0xff]   ;;  %v20179_v36 = vld [vmem:[#allocation2 + $0xec] ss:$116 sps:$4 sm:$0xff]   ;;  %v20183_v34 = vld [vmem:[#allocation2 + $0xe8] ss:$116 sps:$4 sm:$0xff]  }
 0x7d1   :  { %v20181_v48 = vld [vmem:[#allocation2 + $0xf6c] ss:$116 sps:$4 sm:$0xff]   ;;  %v20184_v42 = vld [vmem:[#allocation2 + $0xf68] ss:$116 sps:$4 sm:$0xff]   ;;  %v20185_v14 = vld [vmem:[#allocation2 + $0x4] ss:$116 sps:$4 sm:$0xff]  }
 0x7d2   :  { %10281 = vmatpush1.bf16.msra.mxu0 %v20159_v37  ;;  %v20187_v0 = vld [vmem:[#allocation2 + $0xe84] ss:$116 sps:$4 sm:$0xff]   ;;  %v20189_v6 = vld [vmem:[#allocation2] ss:$116 sps:$4 sm:$0xff]   ;;  %v20191_v20 = vld [vmem:[#allocation2 + $0xd9c] ss:$116 sps:$4 sm:$0xff]  }
 0x7d3   :  { %10322 = vmatpush1.bf16.msra.mxu1 %v20160_v62  ;;  %10282 = vmatprep.subr.bf16.mxu0 %v20161_v29  ;;  %v20190_v18 = vld [vmem:[#allocation2 + $0xe80] ss:$116 sps:$4 sm:$0xff]   ;;  %v20193_v21 = vld [vmem:[#allocation2 + $0x1c1c] ss:$116 sps:$4 sm:$0xff]   ;;  %v20195_v24 = vld [vmem:[#allocation2 + $0xd98] ss:$116 sps:$4 sm:$0xff]  }
 0x7d4   :  { %10323 = vmatprep.subr.bf16.mxu1 %v20163_v40  ;;  %v20196_v8 = vld [vmem:[#allocation2 + $0x1c18] ss:$116 sps:$4 sm:$0xff]   ;;  %v20197_v58 = vld [vmem:[#allocation2 + $0xcb4] ss:$116 sps:$4 sm:$0xff]   ;;  %v20201_v4 = vld [vmem:[#allocation2 + $0xcb0] ss:$116 sps:$4 sm:$0xff]  }
 0x7d5   :  { %v20199_v44 = vld [vmem:[#allocation2 + $0x1b34] ss:$116 sps:$4 sm:$0xff]   ;;  %v20202_v12 = vld [vmem:[#allocation2 + $0x1b30] ss:$116 sps:$4 sm:$0xff]   ;;  %v20203_v19 = vld [vmem:[#allocation2 + $0xbcc] ss:$116 sps:$4 sm:$0xff]  }
 0x7d6   :  { %10283 = vmatpush1.bf16.msra.mxu0 %v20165_v63  ;;  %v20205_v56 = vld [vmem:[#allocation2 + $0x1a4c] ss:$116 sps:$4 sm:$0xff]   ;;  %v20207_v49 = vld [vmem:[#allocation2 + $0xbc8] ss:$116 sps:$4 sm:$0xff]   ;;  %v20209_v51 = vld [vmem:[#allocation2 + $0xae4] ss:$116 sps:$4 sm:$0xff]  }
 0x7d7   :  { %10324 = vmatpush1.bf16.msra.mxu1 %v20166_v13  ;;  %10284 = vmatprep.subr.bf16.mxu0 %v20167_v22  ;;  %v20208_v28 = vld [vmem:[#allocation2 + $0x1a48] ss:$116 sps:$4 sm:$0xff]   ;;  %v20211_v9 = vld [vmem:[#allocation2 + $0x1964] ss:$116 sps:$4 sm:$0xff]   ;;  %v20213_v26 = vld [vmem:[#allocation2 + $0xae0] ss:$116 sps:$4 sm:$0xff]  }
 0x7d8   :  { %10325 = vmatprep.subr.bf16.mxu1 %v20169_v33  ;;  %v20214_v2 = vld [vmem:[#allocation2 + $0x1960] ss:$116 sps:$4 sm:$0xff]   ;;  %v20215_v41 = vld [vmem:[#allocation2 + $0x9fc] ss:$116 sps:$4 sm:$0xff]   ;;  %v20219_v39 = vld [vmem:[#allocation2 + $0x9f8] ss:$116 sps:$4 sm:$0xff]  }
 0x7d9   :  { %v20217_v16 = vld [vmem:[#allocation2 + $0x187c] ss:$116 sps:$4 sm:$0xff]   ;;  %v20220_v54 = vld [vmem:[#allocation2 + $0x1878] ss:$116 sps:$4 sm:$0xff]   ;;  %v20221_v43 = vld [vmem:[#allocation2 + $0x914] ss:$116 sps:$4 sm:$0xff]  }
 0x7da   :  { %10285 = vmatpush1.bf16.msra.mxu0 %v20171_v35  ;;  %v20223_v45 = vld [vmem:[#allocation2 + $0x1794] ss:$116 sps:$4 sm:$0xff]   ;;  %v20225_v50 = vld [vmem:[#allocation2 + $0x910] ss:$116 sps:$4 sm:$0xff]   ;;  %v20227_v15 = vld [vmem:[#allocation2 + $0x82c] ss:$116 sps:$4 sm:$0xff]  }
 0x7db   :  { %10326 = vmatpush1.bf16.msra.mxu1 %v20172_v23  ;;  %10286 = vmatprep.subr.bf16.mxu0 %v20173_v7  ;;  %v20226_v25 = vld [vmem:[#allocation2 + $0x1790] ss:$116 sps:$4 sm:$0xff]   ;;  %v20229_v31 = vld [vmem:[#allocation2 + $0x16ac] ss:$116 sps:$4 sm:$0xff]   ;;  %v20231_v32 = vld [vmem:[#allocation2 + $0x828] ss:$116 sps:$4 sm:$0xff]  }
 0x7dc   :  { %10327 = vmatprep.subr.bf16.mxu1 %v20175_v3  ;;  %v20232_v53 = vld [vmem:[#allocation2 + $0x16a8] ss:$116 sps:$4 sm:$0xff]   ;;  %v20233_v55 = vld [vmem:[#allocation2 + $0x744] ss:$116 sps:$4 sm:$0xff]   ;;  %v20237_v59 = vld [vmem:[#allocation2 + $0x740] ss:$116 sps:$4 sm:$0xff]  }
 0x7dd   :  { %v20235_v10 = vld [vmem:[#allocation2 + $0x15c4] ss:$116 sps:$4 sm:$0xff]   ;;  %v20238_v30 = vld [vmem:[#allocation2 + $0x15c0] ss:$116 sps:$4 sm:$0xff]   ;;  %v20247_v63 = vld [vmem:[#allocation2 + $0x57c] ss:$116 sps:$4 sm:$0xff]  }
 0x7de   :  { %10287 = vmatpush1.bf16.msra.mxu0 %v20177_v27  ;;  %v20241_v37 = vld [vmem:[#allocation2 + $0x664] ss:$116 sps:$4 sm:$0xff]   ;;  %v20239_v29 = vld [vmem:[#allocation2 + $0x660] ss:$116 sps:$4 sm:$0xff]   ;;  %v20250_v13 = vld [vmem:[#allocation2 + $0x13fc] ss:$116 sps:$4 sm:$0xff]  }
 0x7df   :  { %10328 = vmatpush1.bf16.msra.mxu1 %v20178_v5  ;;  %10288 = vmatprep.subr.bf16.mxu0 %v20179_v36  ;;  %v20244_v62 = vld [vmem:[#allocation2 + $0x14e4] ss:$116 sps:$4 sm:$0xff]   ;;  %v20242_v40 = vld [vmem:[#allocation2 + $0x14e0] ss:$116 sps:$4 sm:$0xff]   ;;  %v20257_v36 = vld [vmem:[#allocation2 + $0x3a8] ss:$116 sps:$4 sm:$0xff]  }
 0x7e0   :  { %10329 = vmatprep.subr.bf16.mxu1 %v20181_v48  ;;  %v20245_v22 = vld [vmem:[#allocation2 + $0x578] ss:$116 sps:$4 sm:$0xff]   ;;  %v20253_v35 = vld [vmem:[#allocation2 + $0x494] ss:$116 sps:$4 sm:$0xff]   ;;  %v20251_v7 = vld [vmem:[#allocation2 + $0x490] ss:$116 sps:$4 sm:$0xff]  }
 0x7e1   :  { %v20248_v33 = vld [vmem:[#allocation2 + $0x13f8] ss:$116 sps:$4 sm:$0xff]   ;;  %v20256_v23 = vld [vmem:[#allocation2 + $0x1314] ss:$116 sps:$4 sm:$0xff]   ;;  %v20254_v3 = vld [vmem:[#allocation2 + $0x1310] ss:$116 sps:$4 sm:$0xff]  }
 0x7e2   :  { %10289 = vmatpush1.bf16.msra.mxu0 %v20183_v34  ;;  %v20259_v27 = vld [vmem:[#allocation2 + $0x3ac] ss:$116 sps:$4 sm:$0xff]   ;;  %v20260_v48 = vld [vmem:[#allocation2 + $0x1228] ss:$116 sps:$4 sm:$0xff]   ;;  %v20265_v34 = vld [vmem:[#allocation2 + $0x2c4] ss:$116 sps:$4 sm:$0xff]  }
 0x7e3   :  { %10330 = vmatpush1.bf16.msra.mxu1 %v20184_v42  ;;  %10290 = vmatprep.subr.bf16.mxu0 %v20185_v14  ;;  %v20262_v5 = vld [vmem:[#allocation2 + $0x122c] ss:$116 sps:$4 sm:$0xff]   ;;  %v20268_v42 = vld [vmem:[#allocation2 + $0x1144] ss:$116 sps:$4 sm:$0xff]   ;;  %vm16675_vm6 = vcmask 173056  }
 0x7e4   :  { %10331 = vmatprep.subr.bf16.mxu1 %v20187_v0  ;;  %v20263_v14 = vld [vmem:[#allocation2 + $0x2c0] ss:$116 sps:$4 sm:$0xff]  }
 0x7e5   :  { %v20266_v0 = vld [vmem:[#allocation2 + $0x1140] ss:$116 sps:$4 sm:$0xff]  }
 0x7e6   :  { %10291 = vmatpush1.bf16.msra.mxu0 %v20189_v6  ;;  %v20271_v6 = vld [vmem:[#allocation2 + $0x1dc] ss:$116 sps:$4 sm:$0xff]  }
 0x7e7   :  { %10332 = vmatpush1.bf16.msra.mxu1 %v20190_v18  ;;  %10292 = vmatprep.subr.bf16.mxu0 %v20191_v20  ;;  %v20274_v18 = vld [vmem:[#allocation2 + $0x105c] ss:$116 sps:$4 sm:$0xff]   ;;  %v20269_v20 = vld [vmem:[#allocation2 + $0x1d8] ss:$116 sps:$4 sm:$0xff]  }
 0x7e8   :  { %10333 = vmatprep.subr.bf16.mxu1 %v20193_v21  ;;  %v20272_v21 = vld [vmem:[#allocation2 + $0x1058] ss:$116 sps:$4 sm:$0xff]  }
 0x7ea   :  { %10293 = vmatpush2.bf16.msra.mxu0 %v20195_v24  ;;  %v20277_v24 = vld [vmem:[#allocation2 + $0xf4] ss:$116 sps:$4 sm:$0xff]  }
 0x7eb   :  { %10334 = vmatpush2.bf16.msra.mxu1 %v20196_v8  ;;  %10294 = vmatprep.subr.bf16.mxu0 %v20197_v58  ;;  %v20280_v8 = vld [vmem:[#allocation2 + $0xf74] ss:$116 sps:$4 sm:$0xff]   ;;  %v20275_v58 = vld [vmem:[#allocation2 + $0xf0] ss:$116 sps:$4 sm:$0xff]  }
 0x7ec   :  { %10335 = vmatprep.subr.bf16.mxu1 %v20199_v44  ;;  %v20278_v44 = vld [vmem:[#allocation2 + $0xf70] ss:$116 sps:$4 sm:$0xff]  }
 0x7ee   :  { %10295 = vmatpush2.bf16.msra.mxu0 %v20201_v4  ;;  %v20283_v4 = vld [vmem:[#allocation2 + $0xc] ss:$116 sps:$4 sm:$0xff]  }
 0x7ef   :  { %10336 = vmatpush2.bf16.msra.mxu1 %v20202_v12  ;;  %10296 = vmatprep.subr.bf16.mxu0 %v20203_v19  ;;  %v20286_v12 = vld [vmem:[#allocation2 + $0xe8c] ss:$116 sps:$4 sm:$0xff]   ;;  %v20281_v19 = vld [vmem:[#allocation2 + $0x8] ss:$116 sps:$4 sm:$0xff]  }
 0x7f0   :  { %10337 = vmatprep.subr.bf16.mxu1 %v20205_v56  ;;  %v20284_v56 = vld [vmem:[#allocation2 + $0xe88] ss:$116 sps:$4 sm:$0xff]  }
 0x7f2   :  { %10297 = vmatpush2.bf16.msra.mxu0 %v20207_v49  ;;  %v20289_v49 = vld [vmem:[#allocation2 + $0xda4] ss:$116 sps:$4 sm:$0xff]  }
 0x7f3   :  { %10338 = vmatpush2.bf16.msra.mxu1 %v20208_v28  ;;  %10298 = vmatprep.subr.bf16.mxu0 %v20209_v51  ;;  %v20292_v28 = vld [vmem:[#allocation2 + $0x1c24] ss:$116 sps:$4 sm:$0xff]   ;;  %v20287_v51 = vld [vmem:[#allocation2 + $0xda0] ss:$116 sps:$4 sm:$0xff]  }
 0x7f4   :  { %10339 = vmatprep.subr.bf16.mxu1 %v20211_v9  ;;  %v20290_v9 = vld [vmem:[#allocation2 + $0x1c20] ss:$116 sps:$4 sm:$0xff]  }
 0x7f6   :  { %10299 = vmatpush2.bf16.msra.mxu0 %v20213_v26  ;;  %v20295_v26 = vld [vmem:[#allocation2 + $0xcbc] ss:$116 sps:$4 sm:$0xff]  }
 0x7f7   :  { %10340 = vmatpush2.bf16.msra.mxu1 %v20214_v2  ;;  %10300 = vmatprep.subr.bf16.mxu0 %v20215_v41  ;;  %v20298_v2 = vld [vmem:[#allocation2 + $0x1b3c] ss:$116 sps:$4 sm:$0xff]   ;;  %v20293_v41 = vld [vmem:[#allocation2 + $0xcb8] ss:$116 sps:$4 sm:$0xff]  }
 0x7f8   :  { %10341 = vmatprep.subr.bf16.mxu1 %v20217_v16  ;;  %v20296_v16 = vld [vmem:[#allocation2 + $0x1b38] ss:$116 sps:$4 sm:$0xff]  }
 0x7fa   :  { %10301 = vmatpush2.bf16.msra.mxu0 %v20219_v39  ;;  %v20301_v39 = vld [vmem:[#allocation2 + $0xbd4] ss:$116 sps:$4 sm:$0xff]  }
 0x7fb   :  { %10342 = vmatpush2.bf16.msra.mxu1 %v20220_v54  ;;  %10302 = vmatprep.subr.bf16.mxu0 %v20221_v43  ;;  %v20304_v54 = vld [vmem:[#allocation2 + $0x1a54] ss:$116 sps:$4 sm:$0xff]   ;;  %v20299_v43 = vld [vmem:[#allocation2 + $0xbd0] ss:$116 sps:$4 sm:$0xff]  }
 0x7fc   :  { %10343 = vmatprep.subr.bf16.mxu1 %v20223_v45  ;;  %v20302_v45 = vld [vmem:[#allocation2 + $0x1a50] ss:$116 sps:$4 sm:$0xff]  }
 0x7fe   :  { %10303 = vmatpush2.bf16.msra.mxu0 %v20225_v50  ;;  %v20307_v50 = vld [vmem:[#allocation2 + $0xaec] ss:$116 sps:$4 sm:$0xff]  }
 0x7ff   :  { %10344 = vmatpush2.bf16.msra.mxu1 %v20226_v25  ;;  %10304 = vmatprep.subr.bf16.mxu0 %v20227_v15  ;;  %v20310_v25 = vld [vmem:[#allocation2 + $0x196c] ss:$116 sps:$4 sm:$0xff]   ;;  %v20305_v15 = vld [vmem:[#allocation2 + $0xae8] ss:$116 sps:$4 sm:$0xff]  }
 0x800   :  { %10345 = vmatprep.subr.bf16.mxu1 %v20229_v31  ;;  %v20308_v31 = vld [vmem:[#allocation2 + $0x1968] ss:$116 sps:$4 sm:$0xff]  }
 0x802   :  { %10305 = vmatpush2.bf16.msra.mxu0 %v20231_v32  ;;  %v20313_v32 = vld [vmem:[#allocation2 + $0xa04] ss:$116 sps:$4 sm:$0xff]  }
 0x803   :  { %10346 = vmatpush2.bf16.msra.mxu1 %v20232_v53  ;;  %10306 = vmatprep.subr.bf16.mxu0 %v20233_v55  ;;  %v20316_v53 = vld [vmem:[#allocation2 + $0x1884] ss:$116 sps:$4 sm:$0xff]   ;;  %v20311_v55 = vld [vmem:[#allocation2 + $0xa00] ss:$116 sps:$4 sm:$0xff]  }
 0x804   :  { %10347 = vmatprep.subr.bf16.mxu1 %v20235_v10  ;;  %v20314_v10 = vld [vmem:[#allocation2 + $0x1880] ss:$116 sps:$4 sm:$0xff]  }
 0x806   :  { %10307 = vmatpush2.bf16.msra.mxu0 %v20237_v59  ;;  %v20319_v59 = vld [vmem:[#allocation2 + $0x91c] ss:$116 sps:$4 sm:$0xff]  }
 0x807   :  { %10348 = vmatpush2.bf16.msra.mxu1 %v20238_v30  ;;  %10358 = vmatprep.subr.bf16.mxu0 %v20241_v37  ;;  %v20322_v30 = vld [vmem:[#allocation2 + $0x179c] ss:$116 sps:$4 sm:$0xff]   ;;  %v20317_v37 = vld [vmem:[#allocation2 + $0x918] ss:$116 sps:$4 sm:$0xff]  }
 0x808   :  { %10399 = vmatprep.subr.bf16.mxu1 %v20244_v62  ;;  %v20320_v62 = vld [vmem:[#allocation2 + $0x1798] ss:$116 sps:$4 sm:$0xff]  }
 0x809   :  { %10309 = vmatmul.mubr.bf16.vlgmr.msra.gmra.mxu0 %v27615_v47 }
 0x80a   :  { %10350 = vmatmul.mubr.bf16.vlgmr.msra.gmra.mxu1 %v27617_v38  ;;  %10359 = vmatpush1.bf16.msra.mxu0 %v20239_v29  ;;  %v20325_v29 = vld [vmem:[#allocation2 + $0x834] ss:$116 sps:$4 sm:$0xff]  }
 0x80b   :  { %10400 = vmatpush1.bf16.msra.mxu1 %v20242_v40  ;;  %10360 = vmatprep.subr.bf16.mxu0 %v20247_v63  ;;  %v20328_v40 = vld [vmem:[#allocation2 + $0x16b4] ss:$116 sps:$4 sm:$0xff]   ;;  %v20323_v63 = vld [vmem:[#allocation2 + $0x830] ss:$116 sps:$4 sm:$0xff]  }
 0x80c   :  { %10401 = vmatprep.subr.bf16.mxu1 %v20250_v13  ;;  %10390 = vmatprep.mubr.bf16.mxu0 %v27619_v60  ;;  %v20326_v13 = vld [vmem:[#allocation2 + $0x16b0] ss:$116 sps:$4 sm:$0xff]  }
 0x80d   :  { %10431 = vmatprep.mubr.bf16.mxu1 %v27621_v46 }
 0x80e   :  { %10361 = vmatpush1.bf16.msra.mxu0 %v20245_v22  ;;  %v20331_v22 = vld [vmem:[#allocation2 + $0x74c] ss:$116 sps:$4 sm:$0xff]  }
 0x80f   :  { %10402 = vmatpush1.bf16.msra.mxu1 %v20248_v33  ;;  %10362 = vmatprep.subr.bf16.mxu0 %v20253_v35  ;;  %v20334_v33 = vld [vmem:[#allocation2 + $0x15cc] ss:$116 sps:$4 sm:$0xff]   ;;  %v20329_v35 = vld [vmem:[#allocation2 + $0x748] ss:$116 sps:$4 sm:$0xff]  }
 0x810   :  { %10403 = vmatprep.subr.bf16.mxu1 %v20256_v23  ;;  %v20332_v23 = vld [vmem:[#allocation2 + $0x15c8] ss:$116 sps:$4 sm:$0xff]  }
 0x812   :  { %10363 = vmatpush1.bf16.msra.mxu0 %v20251_v7  ;;  %v20337_v7 = vld [vmem:[#allocation2 + $0x66c] ss:$116 sps:$4 sm:$0xff]  }
 0x813   :  { %10404 = vmatpush1.bf16.msra.mxu1 %v20254_v3  ;;  %10364 = vmatprep.subr.bf16.mxu0 %v20259_v27  ;;  %v20340_v3 = vld [vmem:[#allocation2 + $0x14ec] ss:$116 sps:$4 sm:$0xff]   ;;  %v20335_v27 = vld [vmem:[#allocation2 + $0x668] ss:$116 sps:$4 sm:$0xff]  }
 0x814   :  { %10405 = vmatprep.subr.bf16.mxu1 %v20262_v5  ;;  %v20338_v5 = vld [vmem:[#allocation2 + $0x14e8] ss:$116 sps:$4 sm:$0xff]  }
 0x816   :  { %10365 = vmatpush1.bf16.msra.mxu0 %v20257_v36  ;;  %v20343_v36 = vld [vmem:[#allocation2 + $0x584] ss:$116 sps:$4 sm:$0xff]  }
 0x817   :  { %10406 = vmatpush1.bf16.msra.mxu1 %v20260_v48  ;;  %10366 = vmatprep.subr.bf16.mxu0 %v20265_v34  ;;  %v20346_v48 = vld [vmem:[#allocation2 + $0x1404] ss:$116 sps:$4 sm:$0xff]   ;;  %v20341_v34 = vld [vmem:[#allocation2 + $0x580] ss:$116 sps:$4 sm:$0xff]  }
 0x818   :  { %10407 = vmatprep.subr.bf16.mxu1 %v20268_v42  ;;  %v20344_v42 = vld [vmem:[#allocation2 + $0x1400] ss:$116 sps:$4 sm:$0xff]  }
 0x81a   :  { %10367 = vmatpush1.bf16.msra.mxu0 %v20263_v14  ;;  %v20349_v14 = vld [vmem:[#allocation2 + $0x49c] ss:$116 sps:$4 sm:$0xff]  }
 0x81b   :  { %10408 = vmatpush1.bf16.msra.mxu1 %v20266_v0  ;;  %10368 = vmatprep.subr.bf16.mxu0 %v20271_v6  ;;  %v20352_v0 = vld [vmem:[#allocation2 + $0x131c] ss:$116 sps:$4 sm:$0xff]   ;;  %v20347_v6 = vld [vmem:[#allocation2 + $0x498] ss:$116 sps:$4 sm:$0xff]  }
 0x81c   :  { %10409 = vmatprep.subr.bf16.mxu1 %v20274_v18  ;;  %v20350_v18 = vld [vmem:[#allocation2 + $0x1318] ss:$116 sps:$4 sm:$0xff]  }
 0x81e   :  { %10369 = vmatpush1.bf16.msra.mxu0 %v20269_v20  ;;  %v20355_v20 = vld [vmem:[#allocation2 + $0x3b4] ss:$116 sps:$4 sm:$0xff]  }
 0x81f   :  { %10410 = vmatpush1.bf16.msra.mxu1 %v20272_v21  ;;  %10370 = vmatprep.subr.bf16.mxu0 %v20277_v24  ;;  %v20358_v21 = vld [vmem:[#allocation2 + $0x1234] ss:$116 sps:$4 sm:$0xff]   ;;  %v20353_v24 = vld [vmem:[#allocation2 + $0x3b0] ss:$116 sps:$4 sm:$0xff]  }
 0x820   :  { %10411 = vmatprep.subr.bf16.mxu1 %v20280_v8  ;;  %v20356_v8 = vld [vmem:[#allocation2 + $0x1230] ss:$116 sps:$4 sm:$0xff]  }
 0x822   :  { %10371 = vmatpush1.bf16.msra.mxu0 %v20275_v58  ;;  %v20361_v58 = vld [vmem:[#allocation2 + $0x2cc] ss:$116 sps:$4 sm:$0xff]  }
 0x823   :  { %10412 = vmatpush1.bf16.msra.mxu1 %v20278_v44  ;;  %10372 = vmatprep.subr.bf16.mxu0 %v20283_v4  ;;  %v20364_v44 = vld [vmem:[#allocation2 + $0x114c] ss:$116 sps:$4 sm:$0xff]   ;;  %v20359_v4 = vld [vmem:[#allocation2 + $0x2c8] ss:$116 sps:$4 sm:$0xff]  }
 0x824   :  { %10413 = vmatprep.subr.bf16.mxu1 %v20286_v12  ;;  %v20362_v12 = vld [vmem:[#allocation2 + $0x1148] ss:$116 sps:$4 sm:$0xff]  }
 0x826   :  { %10373 = vmatpush1.bf16.msra.mxu0 %v20281_v19  ;;  %v20367_v19 = vld [vmem:[#allocation2 + $0x1e4] ss:$116 sps:$4 sm:$0xff]  }
 0x827   :  { %10414 = vmatpush1.bf16.msra.mxu1 %v20284_v56  ;;  %10374 = vmatprep.subr.bf16.mxu0 %v20289_v49  ;;  %v20370_v56 = vld [vmem:[#allocation2 + $0x1064] ss:$116 sps:$4 sm:$0xff]   ;;  %v20365_v49 = vld [vmem:[#allocation2 + $0x1e0] ss:$116 sps:$4 sm:$0xff]  }
 0x828   :  { %10415 = vmatprep.subr.bf16.mxu1 %v20292_v28  ;;  %v20368_v28 = vld [vmem:[#allocation2 + $0x1060] ss:$116 sps:$4 sm:$0xff]  }
 0x82a   :  { %10375 = vmatpush2.bf16.msra.mxu0 %v20287_v51  ;;  %v20373_v51 = vld [vmem:[#allocation2 + $0xfc] ss:$116 sps:$4 sm:$0xff]  }
 0x82b   :  { %10416 = vmatpush2.bf16.msra.mxu1 %v20290_v9  ;;  %10376 = vmatprep.subr.bf16.mxu0 %v20295_v26  ;;  %v20376_v9 = vld [vmem:[#allocation2 + $0xf7c] ss:$116 sps:$4 sm:$0xff]   ;;  %v20371_v26 = vld [vmem:[#allocation2 + $0xf8] ss:$116 sps:$4 sm:$0xff]  }
 0x82c   :  { %10417 = vmatprep.subr.bf16.mxu1 %v20298_v2  ;;  %v20374_v2 = vld [vmem:[#allocation2 + $0xf78] ss:$116 sps:$4 sm:$0xff]  }
 0x82e   :  { %10377 = vmatpush2.bf16.msra.mxu0 %v20293_v41  ;;  %v20379_v41 = vld [vmem:[#allocation2 + $0x14] ss:$116 sps:$4 sm:$0xff]  }
 0x82f   :  { %10418 = vmatpush2.bf16.msra.mxu1 %v20296_v16  ;;  %10378 = vmatprep.subr.bf16.mxu0 %v20301_v39  ;;  %v20382_v16 = vld [vmem:[#allocation2 + $0xe94] ss:$116 sps:$4 sm:$0xff]   ;;  %v20377_v39 = vld [vmem:[#allocation2 + $0x10] ss:$116 sps:$4 sm:$0xff]  }
 0x830   :  { %10419 = vmatprep.subr.bf16.mxu1 %v20304_v54  ;;  %v20380_v54 = vld [vmem:[#allocation2 + $0xe90] ss:$116 sps:$4 sm:$0xff]  }
 0x832   :  { %10379 = vmatpush2.bf16.msra.mxu0 %v20299_v43  ;;  %v20385_v43 = vld [vmem:[#allocation2 + $0xdac] ss:$116 sps:$4 sm:$0xff]  }
 0x833   :  { %10420 = vmatpush2.bf16.msra.mxu1 %v20302_v45  ;;  %10380 = vmatprep.subr.bf16.mxu0 %v20307_v50  ;;  %v20388_v45 = vld [vmem:[#allocation2 + $0x1c2c] ss:$116 sps:$4 sm:$0xff]   ;;  %v20383_v50 = vld [vmem:[#allocation2 + $0xda8] ss:$116 sps:$4 sm:$0xff]  }
 0x834   :  { %10421 = vmatprep.subr.bf16.mxu1 %v20310_v25  ;;  %v20386_v25 = vld [vmem:[#allocation2 + $0x1c28] ss:$116 sps:$4 sm:$0xff]  }
 0x836   :  { %10381 = vmatpush2.bf16.msra.mxu0 %v20305_v15  ;;  %v20391_v15 = vld [vmem:[#allocation2 + $0xcc4] ss:$116 sps:$4 sm:$0xff]  }
 0x837   :  { %10422 = vmatpush2.bf16.msra.mxu1 %v20308_v31  ;;  %10382 = vmatprep.subr.bf16.mxu0 %v20313_v32  ;;  %v20394_v31 = vld [vmem:[#allocation2 + $0x1b44] ss:$116 sps:$4 sm:$0xff]   ;;  %v20389_v32 = vld [vmem:[#allocation2 + $0xcc0] ss:$116 sps:$4 sm:$0xff]  }
 0x838   :  { %10423 = vmatprep.subr.bf16.mxu1 %v20316_v53  ;;  %v20392_v53 = vld [vmem:[#allocation2 + $0x1b40] ss:$116 sps:$4 sm:$0xff]  }
 0x83a   :  { %10383 = vmatpush2.bf16.msra.mxu0 %v20311_v55  ;;  %v20397_v55 = vld [vmem:[#allocation2 + $0xbdc] ss:$116 sps:$4 sm:$0xff]  }
 0x83b   :  { %10424 = vmatpush2.bf16.msra.mxu1 %v20314_v10  ;;  %10384 = vmatprep.subr.bf16.mxu0 %v20319_v59  ;;  %v20400_v10 = vld [vmem:[#allocation2 + $0x1a5c] ss:$116 sps:$4 sm:$0xff]   ;;  %v20395_v59 = vld [vmem:[#allocation2 + $0xbd8] ss:$116 sps:$4 sm:$0xff]  }
 0x83c   :  { %10425 = vmatprep.subr.bf16.mxu1 %v20322_v30  ;;  %v20398_v30 = vld [vmem:[#allocation2 + $0x1a58] ss:$116 sps:$4 sm:$0xff]  }
 0x83e   :  { %10385 = vmatpush2.bf16.msra.mxu0 %v20317_v37  ;;  %v20403_v37 = vld [vmem:[#allocation2 + $0xaf4] ss:$116 sps:$4 sm:$0xff]  }
 0x83f   :  { %10426 = vmatpush2.bf16.msra.mxu1 %v20320_v62  ;;  %10386 = vmatprep.subr.bf16.mxu0 %v20325_v29  ;;  %v20406_v62 = vld [vmem:[#allocation2 + $0x1974] ss:$116 sps:$4 sm:$0xff]   ;;  %v20401_v29 = vld [vmem:[#allocation2 + $0xaf0] ss:$116 sps:$4 sm:$0xff]  }
 0x840   :  { %10427 = vmatprep.subr.bf16.mxu1 %v20328_v40  ;;  %v20404_v40 = vld [vmem:[#allocation2 + $0x1970] ss:$116 sps:$4 sm:$0xff]  }
 0x842   :  { %10387 = vmatpush2.bf16.msra.mxu0 %v20323_v63  ;;  %v20409_v63 = vld [vmem:[#allocation2 + $0xa0c] ss:$116 sps:$4 sm:$0xff]  }
 0x843   :  { %10428 = vmatpush2.bf16.msra.mxu1 %v20326_v13  ;;  %10388 = vmatprep.subr.bf16.mxu0 %v20331_v22  ;;  %v20412_v13 = vld [vmem:[#allocation2 + $0x188c] ss:$116 sps:$4 sm:$0xff]   ;;  %v20407_v22 = vld [vmem:[#allocation2 + $0xa08] ss:$116 sps:$4 sm:$0xff]  }
 0x844   :  { %10429 = vmatprep.subr.bf16.mxu1 %v20334_v33  ;;  %v20410_v33 = vld [vmem:[#allocation2 + $0x1888] ss:$116 sps:$4 sm:$0xff]  }
 0x846   :  { %10389 = vmatpush2.bf16.msra.mxu0 %v20329_v35  ;;  %v20415_v35 = vld [vmem:[#allocation2 + $0x924] ss:$116 sps:$4 sm:$0xff]  }
 0x847   :  { %10430 = vmatpush2.bf16.msra.mxu1 %v20332_v23  ;;  %11253 = vmatprep.subr.bf16.mxu0 %v20337_v7  ;;  %v20418_v23 = vld [vmem:[#allocation2 + $0x17a4] ss:$116 sps:$4 sm:$0xff]   ;;  %v20413_v7 = vld [vmem:[#allocation2 + $0x920] ss:$116 sps:$4 sm:$0xff]  }
 0x848   :  { %11294 = vmatprep.subr.bf16.mxu1 %v20340_v3  ;;  %v20416_v3 = vld [vmem:[#allocation2 + $0x17a0] ss:$116 sps:$4 sm:$0xff]  }
 0x849   :  { %10391 = vmatmul.mubr.bf16.vlgmr.msra.gmra.mxu0 %v27615_v47 }
 0x84a   :  { %10432 = vmatmul.mubr.bf16.vlgmr.msra.gmra.mxu1 %v27617_v38  ;;  %11254 = vmatpush1.bf16.msra.mxu0 %v20335_v27  ;;  %v20421_v27 = vld [vmem:[#allocation2 + $0x83c] ss:$116 sps:$4 sm:$0xff]  }
 0x84b   :  { %11295 = vmatpush1.bf16.msra.mxu1 %v20338_v5  ;;  %11255 = vmatprep.subr.bf16.mxu0 %v20343_v36  ;;  %v20424_v5 = vld [vmem:[#allocation2 + $0x16bc] ss:$116 sps:$4 sm:$0xff]   ;;  %v20419_v36 = vld [vmem:[#allocation2 + $0x838] ss:$116 sps:$4 sm:$0xff]  }
 0x84c   :  { %11296 = vmatprep.subr.bf16.mxu1 %v20346_v48  ;;  %11285 = vmatprep.mubr.bf16.mxu0 %v27619_v60  ;;  %v20422_v48 = vld [vmem:[#allocation2 + $0x16b8] ss:$116 sps:$4 sm:$0xff]  }
 0x84d   :  { %11326 = vmatprep.mubr.bf16.mxu1 %v27621_v46 }
 0x84e   :  { %11256 = vmatpush1.bf16.msra.mxu0 %v20341_v34  ;;  %v20427_v34 = vld [vmem:[#allocation2 + $0x754] ss:$116 sps:$4 sm:$0xff]  }
 0x84f   :  { %11297 = vmatpush1.bf16.msra.mxu1 %v20344_v42  ;;  %11257 = vmatprep.subr.bf16.mxu0 %v20349_v14  ;;  %v20430_v42 = vld [vmem:[#allocation2 + $0x15d4] ss:$116 sps:$4 sm:$0xff]   ;;  %v20425_v14 = vld [vmem:[#allocation2 + $0x750] ss:$116 sps:$4 sm:$0xff]  }
 0x850   :  { %11298 = vmatprep.subr.bf16.mxu1 %v20352_v0  ;;  %v20428_v0 = vld [vmem:[#allocation2 + $0x15d0] ss:$116 sps:$4 sm:$0xff]  }
 0x852   :  { %11258 = vmatpush1.bf16.msra.mxu0 %v20347_v6  ;;  %v20433_v6 = vld [vmem:[#allocation2 + $0x674] ss:$116 sps:$4 sm:$0xff]  }
 0x853   :  { %11299 = vmatpush1.bf16.msra.mxu1 %v20350_v18  ;;  %11259 = vmatprep.subr.bf16.mxu0 %v20355_v20  ;;  %v20436_v18 = vld [vmem:[#allocation2 + $0x14f4] ss:$116 sps:$4 sm:$0xff]   ;;  %v20431_v20 = vld [vmem:[#allocation2 + $0x670] ss:$116 sps:$4 sm:$0xff]  }
 0x854   :  { %11300 = vmatprep.subr.bf16.mxu1 %v20358_v21  ;;  %v20434_v21 = vld [vmem:[#allocation2 + $0x14f0] ss:$116 sps:$4 sm:$0xff]  }
 0x856   :  { %11260 = vmatpush1.bf16.msra.mxu0 %v20353_v24  ;;  %v20439_v24 = vld [vmem:[#allocation2 + $0x58c] ss:$116 sps:$4 sm:$0xff]  }
 0x857   :  { %11301 = vmatpush1.bf16.msra.mxu1 %v20356_v8  ;;  %11261 = vmatprep.subr.bf16.mxu0 %v20361_v58  ;;  %v20442_v8 = vld [vmem:[#allocation2 + $0x140c] ss:$116 sps:$4 sm:$0xff]   ;;  %v20437_v58 = vld [vmem:[#allocation2 + $0x588] ss:$116 sps:$4 sm:$0xff]  }
 0x858   :  { %11302 = vmatprep.subr.bf16.mxu1 %v20364_v44  ;;  %v20440_v44 = vld [vmem:[#allocation2 + $0x1408] ss:$116 sps:$4 sm:$0xff]  }
 0x85a   :  { %11262 = vmatpush1.bf16.msra.mxu0 %v20359_v4  ;;  %v20445_v4 = vld [vmem:[#allocation2 + $0x4a4] ss:$116 sps:$4 sm:$0xff]  }
 0x85b   :  { %11303 = vmatpush1.bf16.msra.mxu1 %v20362_v12  ;;  %11263 = vmatprep.subr.bf16.mxu0 %v20367_v19  ;;  %v20448_v12 = vld [vmem:[#allocation2 + $0x1324] ss:$116 sps:$4 sm:$0xff]   ;;  %v20443_v19 = vld [vmem:[#allocation2 + $0x4a0] ss:$116 sps:$4 sm:$0xff]  }
 0x85c   :  { %11304 = vmatprep.subr.bf16.mxu1 %v20370_v56  ;;  %v20446_v56 = vld [vmem:[#allocation2 + $0x1320] ss:$116 sps:$4 sm:$0xff]  }
 0x85e   :  { %11264 = vmatpush1.bf16.msra.mxu0 %v20365_v49  ;;  %v20451_v49 = vld [vmem:[#allocation2 + $0x3bc] ss:$116 sps:$4 sm:$0xff]  }
 0x85f   :  { %11305 = vmatpush1.bf16.msra.mxu1 %v20368_v28  ;;  %11265 = vmatprep.subr.bf16.mxu0 %v20373_v51  ;;  %v20454_v28 = vld [vmem:[#allocation2 + $0x123c] ss:$116 sps:$4 sm:$0xff]   ;;  %v20449_v51 = vld [vmem:[#allocation2 + $0x3b8] ss:$116 sps:$4 sm:$0xff]  }
 0x860   :  { %11306 = vmatprep.subr.bf16.mxu1 %v20376_v9  ;;  %v20452_v9 = vld [vmem:[#allocation2 + $0x1238] ss:$116 sps:$4 sm:$0xff]  }
 0x862   :  { %11266 = vmatpush1.bf16.msra.mxu0 %v20371_v26  ;;  %v20457_v26 = vld [vmem:[#allocation2 + $0x2d4] ss:$116 sps:$4 sm:$0xff]  }
 0x863   :  { %11307 = vmatpush1.bf16.msra.mxu1 %v20374_v2  ;;  %11267 = vmatprep.subr.bf16.mxu0 %v20379_v41  ;;  %v20460_v2 = vld [vmem:[#allocation2 + $0x1154] ss:$116 sps:$4 sm:$0xff]   ;;  %v20455_v41 = vld [vmem:[#allocation2 + $0x2d0] ss:$116 sps:$4 sm:$0xff]  }
 0x864   :  { %11308 = vmatprep.subr.bf16.mxu1 %v20382_v16  ;;  %v20458_v16 = vld [vmem:[#allocation2 + $0x1150] ss:$116 sps:$4 sm:$0xff]  }
 0x866   :  { %11268 = vmatpush1.bf16.msra.mxu0 %v20377_v39  ;;  %v20463_v39 = vld [vmem:[#allocation2 + $0x1ec] ss:$116 sps:$4 sm:$0xff]  }
 0x867   :  { %11309 = vmatpush1.bf16.msra.mxu1 %v20380_v54  ;;  %11269 = vmatprep.subr.bf16.mxu0 %v20385_v43  ;;  %v20466_v54 = vld [vmem:[#allocation2 + $0x106c] ss:$116 sps:$4 sm:$0xff]   ;;  %v20461_v43 = vld [vmem:[#allocation2 + $0x1e8] ss:$116 sps:$4 sm:$0xff]  }
 0x868   :  { %11310 = vmatprep.subr.bf16.mxu1 %v20388_v45  ;;  %v20464_v45 = vld [vmem:[#allocation2 + $0x1068] ss:$116 sps:$4 sm:$0xff]  }
 0x86a   :  { %11270 = vmatpush2.bf16.msra.mxu0 %v20383_v50  ;;  %v20469_v50 = vld [vmem:[#allocation2 + $0x104] ss:$116 sps:$4 sm:$0xff]  }
 0x86b   :  { %11311 = vmatpush2.bf16.msra.mxu1 %v20386_v25  ;;  %11271 = vmatprep.subr.bf16.mxu0 %v20391_v15  ;;  %v20472_v25 = vld [vmem:[#allocation2 + $0xf84] ss:$116 sps:$4 sm:$0xff]   ;;  %v20467_v15 = vld [vmem:[#allocation2 + $0x100] ss:$116 sps:$4 sm:$0xff]  }
 0x86c   :  { %11312 = vmatprep.subr.bf16.mxu1 %v20394_v31  ;;  %v20470_v31 = vld [vmem:[#allocation2 + $0xf80] ss:$116 sps:$4 sm:$0xff]  }
 0x86e   :  { %11272 = vmatpush2.bf16.msra.mxu0 %v20389_v32  ;;  %v20475_v32 = vld [vmem:[#allocation2 + $0x1c] ss:$116 sps:$4 sm:$0xff]  }
 0x86f   :  { %11313 = vmatpush2.bf16.msra.mxu1 %v20392_v53  ;;  %11273 = vmatprep.subr.bf16.mxu0 %v20397_v55  ;;  %v20478_v53 = vld [vmem:[#allocation2 + $0xe9c] ss:$116 sps:$4 sm:$0xff]   ;;  %v20473_v55 = vld [vmem:[#allocation2 + $0x18] ss:$116 sps:$4 sm:$0xff]  }
 0x870   :  { %11314 = vmatprep.subr.bf16.mxu1 %v20400_v10  ;;  %v20476_v10 = vld [vmem:[#allocation2 + $0xe98] ss:$116 sps:$4 sm:$0xff]  }
 0x872   :  { %11274 = vmatpush2.bf16.msra.mxu0 %v20395_v59  ;;  %v20481_v59 = vld [vmem:[#allocation2 + $0xdb4] ss:$116 sps:$4 sm:$0xff]  }
 0x873   :  { %11315 = vmatpush2.bf16.msra.mxu1 %v20398_v30  ;;  %11275 = vmatprep.subr.bf16.mxu0 %v20403_v37  ;;  %v20484_v30 = vld [vmem:[#allocation2 + $0x1c34] ss:$116 sps:$4 sm:$0xff]   ;;  %v20479_v37 = vld [vmem:[#allocation2 + $0xdb0] ss:$116 sps:$4 sm:$0xff]  }
 0x874   :  { %11316 = vmatprep.subr.bf16.mxu1 %v20406_v62  ;;  %v20482_v62 = vld [vmem:[#allocation2 + $0x1c30] ss:$116 sps:$4 sm:$0xff]  }
 0x876   :  { %11276 = vmatpush2.bf16.msra.mxu0 %v20401_v29  ;;  %v20487_v29 = vld [vmem:[#allocation2 + $0xccc] ss:$116 sps:$4 sm:$0xff]  }
 0x877   :  { %11317 = vmatpush2.bf16.msra.mxu1 %v20404_v40  ;;  %11277 = vmatprep.subr.bf16.mxu0 %v20409_v63  ;;  %v20490_v40 = vld [vmem:[#allocation2 + $0x1b4c] ss:$116 sps:$4 sm:$0xff]   ;;  %v20485_v63 = vld [vmem:[#allocation2 + $0xcc8] ss:$116 sps:$4 sm:$0xff]  }
 0x878   :  { %11318 = vmatprep.subr.bf16.mxu1 %v20412_v13  ;;  %v20488_v13 = vld [vmem:[#allocation2 + $0x1b48] ss:$116 sps:$4 sm:$0xff]  }
 0x87a   :  { %11278 = vmatpush2.bf16.msra.mxu0 %v20407_v22  ;;  %v20493_v22 = vld [vmem:[#allocation2 + $0xbe4] ss:$116 sps:$4 sm:$0xff]  }
 0x87b   :  { %11319 = vmatpush2.bf16.msra.mxu1 %v20410_v33  ;;  %11279 = vmatprep.subr.bf16.mxu0 %v20415_v35  ;;  %v20496_v33 = vld [vmem:[#allocation2 + $0x1a64] ss:$116 sps:$4 sm:$0xff]   ;;  %v20491_v35 = vld [vmem:[#allocation2 + $0xbe0] ss:$116 sps:$4 sm:$0xff]  }
 0x87c   :  { %11320 = vmatprep.subr.bf16.mxu1 %v20418_v23  ;;  %v20494_v23 = vld [vmem:[#allocation2 + $0x1a60] ss:$116 sps:$4 sm:$0xff]  }
 0x87e   :  { %11280 = vmatpush2.bf16.msra.mxu0 %v20413_v7  ;;  %v20499_v7 = vld [vmem:[#allocation2 + $0xafc] ss:$116 sps:$4 sm:$0xff]  }
 0x87f   :  { %11321 = vmatpush2.bf16.msra.mxu1 %v20416_v3  ;;  %11281 = vmatprep.subr.bf16.mxu0 %v20421_v27  ;;  %v20502_v3 = vld [vmem:[#allocation2 + $0x197c] ss:$116 sps:$4 sm:$0xff]   ;;  %v20497_v27 = vld [vmem:[#allocation2 + $0xaf8] ss:$116 sps:$4 sm:$0xff]  }
 0x880   :  { %11322 = vmatprep.subr.bf16.mxu1 %v20424_v5  ;;  %v20500_v5 = vld [vmem:[#allocation2 + $0x1978] ss:$116 sps:$4 sm:$0xff]  }
 0x882   :  { %11282 = vmatpush2.bf16.msra.mxu0 %v20419_v36  ;;  %v20505_v36 = vld [vmem:[#allocation2 + $0xa14] ss:$116 sps:$4 sm:$0xff]  }
 0x883   :  { %11323 = vmatpush2.bf16.msra.mxu1 %v20422_v48  ;;  %11283 = vmatprep.subr.bf16.mxu0 %v20427_v34  ;;  %v20508_v48 = vld [vmem:[#allocation2 + $0x1894] ss:$116 sps:$4 sm:$0xff]   ;;  %v20503_v34 = vld [vmem:[#allocation2 + $0xa10] ss:$116 sps:$4 sm:$0xff]  }
 0x884   :  { %11324 = vmatprep.subr.bf16.mxu1 %v20430_v42  ;;  %v20506_v42 = vld [vmem:[#allocation2 + $0x1890] ss:$116 sps:$4 sm:$0xff]  }
 0x886   :  { %11284 = vmatpush2.bf16.msra.mxu0 %v20425_v14  ;;  %v20511_v14 = vld [vmem:[#allocation2 + $0x92c] ss:$116 sps:$4 sm:$0xff]  }
 0x887   :  { %11325 = vmatpush2.bf16.msra.mxu1 %v20428_v0  ;;  %11335 = vmatprep.subr.bf16.mxu0 %v20433_v6  ;;  %v20514_v0 = vld [vmem:[#allocation2 + $0x17ac] ss:$116 sps:$4 sm:$0xff]   ;;  %v20509_v6 = vld [vmem:[#allocation2 + $0x928] ss:$116 sps:$4 sm:$0xff]  }
 0x888   :  { %11376 = vmatprep.subr.bf16.mxu1 %v20436_v18  ;;  %v20512_v18 = vld [vmem:[#allocation2 + $0x17a8] ss:$116 sps:$4 sm:$0xff]  }
 0x889   :  { %11286 = vmatmul.mubr.bf16.vlgmr.msra.gmra.mxu0 %v27615_v47 }
 0x88a   :  { %11327 = vmatmul.mubr.bf16.vlgmr.msra.gmra.mxu1 %v27617_v38  ;;  %11336 = vmatpush1.bf16.msra.mxu0 %v20431_v20  ;;  %v20517_v20 = vld [vmem:[#allocation2 + $0x844] ss:$116 sps:$4 sm:$0xff]  }
 0x88b   :  { %11377 = vmatpush1.bf16.msra.mxu1 %v20434_v21  ;;  %11337 = vmatprep.subr.bf16.mxu0 %v20439_v24  ;;  %v20520_v21 = vld [vmem:[#allocation2 + $0x16c4] ss:$116 sps:$4 sm:$0xff]   ;;  %v20515_v24 = vld [vmem:[#allocation2 + $0x840] ss:$116 sps:$4 sm:$0xff]  }
 0x88c   :  { %11378 = vmatprep.subr.bf16.mxu1 %v20442_v8  ;;  %11367 = vmatprep.mubr.bf16.mxu0 %v27619_v60  ;;  %v20518_v8 = vld [vmem:[#allocation2 + $0x16c0] ss:$116 sps:$4 sm:$0xff]  }
 0x88d   :  { %11408 = vmatprep.mubr.bf16.mxu1 %v27621_v46 }
 0x88e   :  { %11338 = vmatpush1.bf16.msra.mxu0 %v20437_v58  ;;  %v20523_v58 = vld [vmem:[#allocation2 + $0x75c] ss:$116 sps:$4 sm:$0xff]  }
 0x88f   :  { %11379 = vmatpush1.bf16.msra.mxu1 %v20440_v44  ;;  %11339 = vmatprep.subr.bf16.mxu0 %v20445_v4  ;;  %v20526_v44 = vld [vmem:[#allocation2 + $0x15dc] ss:$116 sps:$4 sm:$0xff]   ;;  %v20521_v4 = vld [vmem:[#allocation2 + $0x758] ss:$116 sps:$4 sm:$0xff]  }
 0x890   :  { %11380 = vmatprep.subr.bf16.mxu1 %v20448_v12  ;;  %v20524_v12 = vld [vmem:[#allocation2 + $0x15d8] ss:$116 sps:$4 sm:$0xff]  }
 0x892   :  { %11340 = vmatpush1.bf16.msra.mxu0 %v20443_v19  ;;  %v27640_v19 = vld [vmem:[%s27846_s8] sm:$0xf] }
 0x893   :  { %11381 = vmatpush1.bf16.msra.mxu1 %v20446_v56  ;;  %11341 = vmatprep.subr.bf16.mxu0 %v20451_v49  ;;  %v20529_v56 = vld [vmem:[#allocation2 + $0x67c] ss:$116 sps:$4 sm:$0xff]  }
 0x894   :  { %11382 = vmatprep.subr.bf16.mxu1 %v20454_v28  ;;  %v20532_v49 = vld [vmem:[#allocation2 + $0x14fc] ss:$116 sps:$4 sm:$0xff]   ;;  %v20527_v28 = vld [vmem:[#allocation2 + $0x678] ss:$116 sps:$4 sm:$0xff]  }
 0x896   :  { %11342 = vmatpush1.bf16.msra.mxu0 %v20449_v51  ;;  %v9619_v51 = vrot.slane %v27640_v19, %v25260_v61 }
 0x897   :  { %11383 = vmatpush1.bf16.msra.mxu1 %v20452_v9  ;;  %11343 = vmatprep.subr.bf16.mxu0 %v20457_v26  ;;  %v20530_v9 = vld [vmem:[#allocation2 + $0x14f8] ss:$116 sps:$4 sm:$0xff]   ;;  %v20535_v26 = vld [vmem:[#allocation2 + $0x594] ss:$116 sps:$4 sm:$0xff]  }
 0x898   :  { %11384 = vmatprep.subr.bf16.mxu1 %v20460_v2  ;;  %v20538_v2 = vld [vmem:[#allocation2 + $0x1414] ss:$116 sps:$4 sm:$0xff]  }
 0x89a   :  { %11344 = vmatpush1.bf16.msra.mxu0 %v20455_v41  ;;  %v9623_v41 = vrot.slane %v27640_v19, %v25269_v1 }
 0x89b   :  { %11385 = vmatpush1.bf16.msra.mxu1 %v20458_v16  ;;  %11345 = vmatprep.subr.bf16.mxu0 %v20463_v39  ;;  %v20533_v16 = vld [vmem:[#allocation2 + $0x590] ss:$116 sps:$4 sm:$0xff]  }
 0x89c   :  { %11386 = vmatprep.subr.bf16.mxu1 %v20466_v54 }
 0x89e   :  { %11346 = vmatpush1.bf16.msra.mxu0 %v20461_v43  ;;  %v20536_v43 = vld [vmem:[#allocation2 + $0x1410] ss:$116 sps:$4 sm:$0xff]  }
 0x89f   :  { %11387 = vmatpush1.bf16.msra.mxu1 %v20464_v45  ;;  %11347 = vmatprep.subr.bf16.mxu0 %v20469_v50 }
 0x8a0   :  { %11388 = vmatprep.subr.bf16.mxu1 %v20472_v25 }
 0x8a2   :  { %11348 = vmatpush1.bf16.msra.mxu0 %v20467_v15  ;;  %v20541_v15 = vld [vmem:[#allocation2 + $0x4ac] ss:$116 sps:$4 sm:$0xff]  }
 0x8a3   :  { %11389 = vmatpush1.bf16.msra.mxu1 %v20470_v31  ;;  %11349 = vmatprep.subr.bf16.mxu0 %v20475_v32  ;;  %v20544_v31 = vld [vmem:[#allocation2 + $0x132c] ss:$116 sps:$4 sm:$0xff]  }
 0x8a4   :  { %11390 = vmatprep.subr.bf16.mxu1 %v20478_v53 }
 0x8a6   :  { %11350 = vmatpush1.bf16.msra.mxu0 %v20473_v55  ;;  %v20539_v55 = vld [vmem:[#allocation2 + $0x4a8] ss:$116 sps:$4 sm:$0xff]  }
 0x8a7   :  { %11391 = vmatpush1.bf16.msra.mxu1 %v20476_v10  ;;  %11351 = vmatprep.subr.bf16.mxu0 %v20481_v59  ;;  %v20542_v10 = vld [vmem:[#allocation2 + $0x1328] ss:$116 sps:$4 sm:$0xff]  }
 0x8a8   :  { %11392 = vmatprep.subr.bf16.mxu1 %v20484_v30 }
 0x8aa   :  { %11352 = vmatpush2.bf16.msra.mxu0 %v20479_v37 }
 0x8ab   :  { %11393 = vmatpush2.bf16.msra.mxu1 %v20482_v62  ;;  %11353 = vmatprep.subr.bf16.mxu0 %v20487_v29 }
 0x8ac   :  { %11394 = vmatprep.subr.bf16.mxu1 %v20490_v40  ;;  %v20547_v40 = vld [vmem:[#allocation2 + $0x3c4] ss:$116 sps:$4 sm:$0xff]  }
 0x8ae   :  { %11354 = vmatpush2.bf16.msra.mxu0 %v20485_v63  ;;  %v20550_v63 = vld [vmem:[#allocation2 + $0x1244] ss:$116 sps:$4 sm:$0xff]  }
 0x8af   :  { %11395 = vmatpush2.bf16.msra.mxu1 %v20488_v13  ;;  %11355 = vmatprep.subr.bf16.mxu0 %v20493_v22  ;;  %v20545_v22 = vld [vmem:[#allocation2 + $0x3c0] ss:$116 sps:$4 sm:$0xff]  }
 0x8b0   :  { %11396 = vmatprep.subr.bf16.mxu1 %v20496_v33  ;;  %v20548_v33 = vld [vmem:[#allocation2 + $0x1240] ss:$116 sps:$4 sm:$0xff]  }
 0x8b2   :  { %11356 = vmatpush2.bf16.msra.mxu0 %v20491_v35  ;;  %v20553_v35 = vld [vmem:[#allocation2 + $0x2dc] ss:$116 sps:$4 sm:$0xff]  }
 0x8b3   :  { %11397 = vmatpush2.bf16.msra.mxu1 %v20494_v23  ;;  %11357 = vmatprep.subr.bf16.mxu0 %v20499_v7  ;;  %v20556_v23 = vld [vmem:[#allocation2 + $0x115c] ss:$116 sps:$4 sm:$0xff]   ;;  %v20551_v7 = vld [vmem:[#allocation2 + $0x2d8] ss:$116 sps:$4 sm:$0xff]  }
 0x8b4   :  { %11398 = vmatprep.subr.bf16.mxu1 %v20502_v3  ;;  %v20554_v3 = vld [vmem:[#allocation2 + $0x1158] ss:$116 sps:$4 sm:$0xff]  }
 0x8b6   :  { %11358 = vmatpush2.bf16.msra.mxu0 %v20497_v27  ;;  %v20559_v27 = vld [vmem:[#allocation2 + $0x1f4] ss:$116 sps:$4 sm:$0xff]  }
 0x8b7   :  { %11399 = vmatpush2.bf16.msra.mxu1 %v20500_v5  ;;  %11359 = vmatprep.subr.bf16.mxu0 %v20505_v36  ;;  %v20562_v5 = vld [vmem:[#allocation2 + $0x1074] ss:$116 sps:$4 sm:$0xff]   ;;  %v20557_v36 = vld [vmem:[#allocation2 + $0x1f0] ss:$116 sps:$4 sm:$0xff]  }
 0x8b8   :  { %11400 = vmatprep.subr.bf16.mxu1 %v20508_v48  ;;  %v20560_v48 = vld [vmem:[#allocation2 + $0x1070] ss:$116 sps:$4 sm:$0xff]  }
 0x8ba   :  { %11360 = vmatpush2.bf16.msra.mxu0 %v20503_v34  ;;  %v20565_v34 = vld [vmem:[#allocation2 + $0x10c] ss:$116 sps:$4 sm:$0xff]  }
 0x8bb   :  { %11401 = vmatpush2.bf16.msra.mxu1 %v20506_v42  ;;  %11361 = vmatprep.subr.bf16.mxu0 %v20511_v14  ;;  %v20568_v42 = vld [vmem:[#allocation2 + $0xf8c] ss:$116 sps:$4 sm:$0xff]   ;;  %v20563_v14 = vld [vmem:[#allocation2 + $0x108] ss:$116 sps:$4 sm:$0xff]  }
 0x8bc   :  { %11402 = vmatprep.subr.bf16.mxu1 %v20514_v0  ;;  %v20566_v0 = vld [vmem:[#allocation2 + $0xf88] ss:$116 sps:$4 sm:$0xff]  }
 0x8be   :  { %11362 = vmatpush2.bf16.msra.mxu0 %v20509_v6  ;;  %v20571_v6 = vld [vmem:[#allocation2 + $0x24] ss:$116 sps:$4 sm:$0xff]  }
 0x8bf   :  { %11403 = vmatpush2.bf16.msra.mxu1 %v20512_v18  ;;  %11363 = vmatprep.subr.bf16.mxu0 %v20517_v20  ;;  %v20574_v18 = vld [vmem:[#allocation2 + $0xea4] ss:$116 sps:$4 sm:$0xff]   ;;  %v20569_v20 = vld [vmem:[#allocation2 + $0x20] ss:$116 sps:$4 sm:$0xff]  }
 0x8c0   :  { %11404 = vmatprep.subr.bf16.mxu1 %v20520_v21  ;;  %v20572_v21 = vld [vmem:[#allocation2 + $0xea0] ss:$116 sps:$4 sm:$0xff]  }
 0x8c2   :  { %11364 = vmatpush2.bf16.msra.mxu0 %v20515_v24  ;;  %v20577_v24 = vld [vmem:[#allocation2 + $0xdbc] ss:$116 sps:$4 sm:$0xff]  }
 0x8c3   :  { %11405 = vmatpush2.bf16.msra.mxu1 %v20518_v8  ;;  %11365 = vmatprep.subr.bf16.mxu0 %v20523_v58  ;;  %v20580_v8 = vld [vmem:[#allocation2 + $0x1c3c] ss:$116 sps:$4 sm:$0xff]   ;;  %v20575_v58 = vld [vmem:[#allocation2 + $0xdb8] ss:$116 sps:$4 sm:$0xff]  }
 0x8c4   :  { %11406 = vmatprep.subr.bf16.mxu1 %v20526_v44  ;;  %v20578_v44 = vld [vmem:[#allocation2 + $0x1c38] ss:$116 sps:$4 sm:$0xff]  }
 0x8c6   :  { %11366 = vmatpush2.bf16.msra.mxu0 %v20521_v4  ;;  %v20583_v4 = vld [vmem:[#allocation2 + $0xcd4] ss:$116 sps:$4 sm:$0xff]  }
 0x8c7   :  { %11407 = vmatpush2.bf16.msra.mxu1 %v20524_v12  ;;  %12230 = vmatprep.subr.bf16.mxu0 %v20529_v56  ;;  %v20586_v12 = vld [vmem:[#allocation2 + $0x1b54] ss:$116 sps:$4 sm:$0xff]   ;;  %v20581_v56 = vld [vmem:[#allocation2 + $0xcd0] ss:$116 sps:$4 sm:$0xff]  }
 0x8c8   :  { %12271 = vmatprep.subr.bf16.mxu1 %v20532_v49  ;;  %v20584_v49 = vld [vmem:[#allocation2 + $0x1b50] ss:$116 sps:$4 sm:$0xff]  }
 0x8c9   :  { %v10310_v39 = vpop.f32.mrf.mxu0  ;;  %11368 = vmatmul.mubr.bf16.vlgmr.msra.gmra.mxu0 %v27615_v47 }
 0x8ca   :  { %v10351_v54 = vpop.f32.mrf.mxu1  ;;  %11409 = vmatmul.mubr.bf16.vlgmr.msra.gmra.mxu1 %v27617_v38  ;;  %v10311_v45 = vadd.f32 %v10310_v39, %v9619_v51  ;;  %12231 = vmatpush1.bf16.msra.mxu0 %v20527_v28  ;;  %v20589_v28 = vld [vmem:[#allocation2 + $0xbec] ss:$116 sps:$4 sm:$0xff]  }
 0x8cb   :  { %12272 = vmatpush1.bf16.msra.mxu1 %v20530_v9  ;;  %v10312_v50 = vpop.f32.mrf.mxu0  ;;  %12232 = vmatprep.subr.bf16.mxu0 %v20535_v26  ;;  %v20592_v51 = vld [vmem:[#allocation2 + $0x1a6c] ss:$116 sps:$4 sm:$0xff]   ;;  %v20587_v9 = vld [vmem:[#allocation2 + $0xbe8] ss:$116 sps:$4 sm:$0xff]  }
 0x8cc   :  { %v10353_v25 = vpop.f32.mrf.mxu1  ;;  %12273 = vmatprep.subr.bf16.mxu1 %v20538_v2  ;;  %v27648_v32 = vadd.f32 %v10351_v54, %v10311_v45  ;;  %v10313_v53 = vadd.f32 %v10312_v50, %v9623_v41  ;;  %12262 = vmatprep.mubr.bf16.mxu0 %v27619_v60  ;;  %v20590_v26 = vld [vmem:[#allocation2 + $0x1a68] ss:$116 sps:$4 sm:$0xff]   ;;  %v20595_v2 = vld [vmem:[#allocation2 + $0xb04] ss:$116 sps:$4 sm:$0xff]   ;;  %v20596_v39 = vld [vmem:[#allocation2 + $0x1980] ss:$116 sps:$4 sm:$0xff]  }
 0x8cd   :  { %12303 = vmatprep.mubr.bf16.mxu1 %v27621_v46  ;;  %v10314_v59 = vpop.f32.mrf.mxu0  ;;  %v20598_v41 = vld [vmem:[#allocation2 + $0x1984] ss:$116 sps:$4 sm:$0xff]   ;;  %v20601_v54 = vld [vmem:[#allocation2 + $0xa1c] ss:$116 sps:$4 sm:$0xff]  }
 0x8ce   :  { %v10355_v30 = vpop.f32.mrf.mxu1  ;;  %v27652_v37 = vadd.f32 %v10353_v25, %v10313_v53  ;;  %12233 = vmatpush1.bf16.msra.mxu0 %v20533_v16  ;;  %v20593_v16 = vld [vmem:[#allocation2 + $0xb00] ss:$116 sps:$4 sm:$0xff]   ;;  %v20599_v45 = vld [vmem:[#allocation2 + $0xa18] ss:$116 sps:$4 sm:$0xff]   ;;  %v20608_v53 = vld [vmem:[#allocation2 + $0x17b0] ss:$116 sps:$4 sm:$0xff]  }
 0x8cf   :  { %12274 = vmatpush1.bf16.msra.mxu1 %v20536_v43  ;;  %v10315_v62 = vpop.f32.mrf.mxu0  ;;  %12234 = vmatprep.subr.bf16.mxu0 %v20541_v15  ;;  %v20604_v43 = vld [vmem:[#allocation2 + $0x189c] ss:$116 sps:$4 sm:$0xff]   ;;  %v20602_v50 = vld [vmem:[#allocation2 + $0x1898] ss:$116 sps:$4 sm:$0xff]   ;;  %v20607_v25 = vld [vmem:[#allocation2 + $0x934] ss:$116 sps:$4 sm:$0xff]  }
 0x8d0   :  { %v10356_v29 = vpop.f32.mrf.mxu1  ;;  %12275 = vmatprep.subr.bf16.mxu1 %v20544_v31  ;;  %v10444_v13 = vcombine.low %v27648_v32, %v27652_v37  ;;  %v20610_v15 = vld [vmem:[#allocation2 + $0x17b4] ss:$116 sps:$4 sm:$0xff]   ;;  %v20605_v31 = vld [vmem:[#allocation2 + $0x930] ss:$116 sps:$4 sm:$0xff]   ;;  %v20653_v32 = vld [vmem:[#allocation2 + $0x1f8] ss:$116 sps:$4 sm:$0xff]  }
 0x8d1   :  { %v20611_v59 = vld [vmem:[#allocation2 + $0x848] ss:$116 sps:$4 sm:$0xff]   ;;  %v20619_v62 = vld [vmem:[#allocation2 + $0x764] ss:$116 sps:$4 sm:$0xff]  }
 0x8d2   :  { %12235 = vmatpush1.bf16.msra.mxu0 %v20539_v55  ;;  %v20613_v55 = vld [vmem:[#allocation2 + $0x84c] ss:$116 sps:$4 sm:$0xff]   ;;  %v20614_v30 = vld [vmem:[#allocation2 + $0x16c8] ss:$116 sps:$4 sm:$0xff]   ;;  %v20622_v29 = vld [vmem:[#allocation2 + $0x15e4] ss:$116 sps:$4 sm:$0xff]  }
 0x8d3   :  { %12276 = vmatpush1.bf16.msra.mxu1 %v20542_v10  ;;  %12236 = vmatprep.subr.bf16.mxu0 %v20547_v40  ;;  %v20616_v10 = vld [vmem:[#allocation2 + $0x16cc] ss:$116 sps:$4 sm:$0xff]  }
 0x8d4   :  { %12277 = vmatprep.subr.bf16.mxu1 %v20550_v63  ;;  %v20617_v40 = vld [vmem:[#allocation2 + $0x760] ss:$116 sps:$4 sm:$0xff]   ;;  %v20656_v37 = vld [vmem:[#allocation2 + $0x1078] ss:$116 sps:$4 sm:$0xff]  }
 0x8d5   :  { %v20620_v63 = vld [vmem:[#allocation2 + $0x15e0] ss:$116 sps:$4 sm:$0xff]  }
 0x8d6   :  { %12237 = vmatpush1.bf16.msra.mxu0 %v20545_v22  ;;  %v20625_v22 = vld [vmem:[#allocation2 + $0x684] ss:$116 sps:$4 sm:$0xff]  }
 0x8d7   :  { %12278 = vmatpush1.bf16.msra.mxu1 %v20548_v33  ;;  %12238 = vmatprep.subr.bf16.mxu0 %v20553_v35  ;;  %v20628_v33 = vld [vmem:[#allocation2 + $0x1504] ss:$116 sps:$4 sm:$0xff]   ;;  %v20623_v35 = vld [vmem:[#allocation2 + $0x680] ss:$116 sps:$4 sm:$0xff]  }
 0x8d8   :  { %12279 = vmatprep.subr.bf16.mxu1 %v20556_v23  ;;  %v20626_v23 = vld [vmem:[#allocation2 + $0x1500] ss:$116 sps:$4 sm:$0xff]  }
 0x8da   :  { %12239 = vmatpush1.bf16.msra.mxu0 %v20551_v7  ;;  %v9627_v7 = vrot.slane %v27640_v19, %v26776_v52 }
 0x8db   :  { %12280 = vmatpush1.bf16.msra.mxu1 %v20554_v3  ;;  %12240 = vmatprep.subr.bf16.mxu0 %v20559_v27  ;;  %v20631_v3 = vld [vmem:[#allocation2 + $0x59c] ss:$116 sps:$4 sm:$0xff]  }
 0x8dc   :  { %12281 = vmatprep.subr.bf16.mxu1 %v20562_v5  ;;  %v20634_v27 = vld [vmem:[#allocation2 + $0x141c] ss:$116 sps:$4 sm:$0xff]   ;;  %v9631_v5 = vrot.slane %v27640_v19, %v26783_v57 }
 0x8dd   :  { %v20635_v19 = vld [vmem:[#allocation2 + $0x4b0] ss:$116 sps:$4 sm:$0xff]  }
 0x8de   :  { %12241 = vmatpush1.bf16.msra.mxu0 %v20557_v36  ;;  %v20629_v36 = vld [vmem:[#allocation2 + $0x598] ss:$116 sps:$4 sm:$0xff]  }
 0x8df   :  { %12282 = vmatpush1.bf16.msra.mxu1 %v20560_v48  ;;  %12242 = vmatprep.subr.bf16.mxu0 %v20565_v34  ;;  %v20632_v48 = vld [vmem:[#allocation2 + $0x1418] ss:$116 sps:$4 sm:$0xff]  }
 0x8e0   :  { %12283 = vmatprep.subr.bf16.mxu1 %v20568_v42 }
 0x8e2   :  { %12243 = vmatpush1.bf16.msra.mxu0 %v20563_v14 }
 0x8e3   :  { %12284 = vmatpush1.bf16.msra.mxu1 %v20566_v0  ;;  %12244 = vmatprep.subr.bf16.mxu0 %v20571_v6 }
 0x8e4   :  { %12285 = vmatprep.subr.bf16.mxu1 %v20574_v18  ;;  %v20637_v18 = vld [vmem:[#allocation2 + $0x4b4] ss:$116 sps:$4 sm:$0xff]  }
 0x8e6   :  { %12245 = vmatpush1.bf16.msra.mxu0 %v20569_v20  ;;  %v20640_v20 = vld [vmem:[#allocation2 + $0x1334] ss:$116 sps:$4 sm:$0xff]  }
 0x8e7   :  { %12286 = vmatpush1.bf16.msra.mxu1 %v20572_v21  ;;  %12246 = vmatprep.subr.bf16.mxu0 %v20577_v24 }
 0x8e8   :  { %12287 = vmatprep.subr.bf16.mxu1 %v20580_v8  ;;  %v20638_v8 = vld [vmem:[#allocation2 + $0x1330] ss:$116 sps:$4 sm:$0xff]  }
 0x8ea   :  { %12247 = vmatpush2.bf16.msra.mxu0 %v20575_v58 }
 0x8eb   :  { %12288 = vmatpush2.bf16.msra.mxu1 %v20578_v44  ;;  %12248 = vmatprep.subr.bf16.mxu0 %v20583_v4 }
 0x8ec   :  { %12289 = vmatprep.subr.bf16.mxu1 %v20586_v12 }
 0x8ee   :  { %12249 = vmatpush2.bf16.msra.mxu0 %v20581_v56 }
 0x8ef   :  { %12290 = vmatpush2.bf16.msra.mxu1 %v20584_v49  ;;  %12250 = vmatprep.subr.bf16.mxu0 %v20589_v28  ;;  %v20643_v49 = vld [vmem:[#allocation2 + $0x3cc] ss:$116 sps:$4 sm:$0xff]  }
 0x8f0   :  { %12291 = vmatprep.subr.bf16.mxu1 %v20592_v51  ;;  %v20646_v28 = vld [vmem:[#allocation2 + $0x124c] ss:$116 sps:$4 sm:$0xff]  }
 0x8f2   :  { %12251 = vmatpush2.bf16.msra.mxu0 %v20587_v9  ;;  %v20641_v9 = vld [vmem:[#allocation2 + $0x3c8] ss:$116 sps:$4 sm:$0xff]  }
 0x8f3   :  { %12292 = vmatpush2.bf16.msra.mxu1 %v20590_v26  ;;  %12252 = vmatprep.subr.bf16.mxu0 %v20595_v2  ;;  %v20644_v26 = vld [vmem:[#allocation2 + $0x1248] ss:$116 sps:$4 sm:$0xff]   ;;  %v10452_v2 = vrot.slane %v10444_v13, %v24515_v17 }
 0x8f4   :  { %12293 = vmatprep.subr.bf16.mxu1 %v20598_v41  ;;  %v20661_v13 = vld [vmem:[#allocation2 + $0x114] ss:$116 sps:$4 sm:$0xff]  }
 0x8f6   :  { %12253 = vmatpush2.bf16.msra.mxu0 %v20593_v16  ;;  %v20649_v16 = vld [vmem:[#allocation2 + $0x2e4] ss:$116 sps:$4 sm:$0xff]  }
 0x8f7   :  { %12294 = vmatpush2.bf16.msra.mxu1 %v20596_v39  ;;  %12254 = vmatprep.subr.bf16.mxu0 %v20601_v54  ;;  %v20652_v39 = vld [vmem:[#allocation2 + $0x1164] ss:$116 sps:$4 sm:$0xff]  }
 0x8f8   :  { %12295 = vmatprep.subr.bf16.mxu1 %v20604_v43  ;;  %v20647_v43 = vld [vmem:[#allocation2 + $0x2e0] ss:$116 sps:$4 sm:$0xff]  }
 0x8fa   :  { %12255 = vmatpush2.bf16.msra.mxu0 %v20599_v45  ;;  %v20650_v45 = vld [vmem:[#allocation2 + $0x1160] ss:$116 sps:$4 sm:$0xff]  }
 0x8fb   :  { %12296 = vmatpush2.bf16.msra.mxu1 %v20602_v50  ;;  %12256 = vmatprep.subr.bf16.mxu0 %v20607_v25  ;;  %v20655_v50 = vld [vmem:[#allocation2 + $0x1fc] ss:$116 sps:$4 sm:$0xff]  }
 0x8fc   :  { %12297 = vmatprep.subr.bf16.mxu1 %v20610_v15  ;;  %v20658_v25 = vld [vmem:[#allocation2 + $0x107c] ss:$116 sps:$4 sm:$0xff]   ;;  %v20664_v15 = vld [vmem:[#allocation2 + $0xf94] ss:$116 sps:$4 sm:$0xff]  }
 0x8fe   :  { %12257 = vmatpush2.bf16.msra.mxu0 %v20605_v31  ;;  %v20659_v31 = vld [vmem:[#allocation2 + $0x110] ss:$116 sps:$4 sm:$0xff]  }
 0x8ff   :  { %12298 = vmatpush2.bf16.msra.mxu1 %v20608_v53  ;;  %12258 = vmatprep.subr.bf16.mxu0 %v20613_v55  ;;  %v20662_v53 = vld [vmem:[#allocation2 + $0xf90] ss:$116 sps:$4 sm:$0xff]   ;;  %v20667_v55 = vld [vmem:[#allocation2 + $0x2c] ss:$116 sps:$4 sm:$0xff]  }
 0x900   :  { %12299 = vmatprep.subr.bf16.mxu1 %v20616_v10  ;;  %v20670_v10 = vld [vmem:[#allocation2 + $0xeac] ss:$116 sps:$4 sm:$0xff]  }
 0x902   :  { %12259 = vmatpush2.bf16.msra.mxu0 %v20611_v59  ;;  %v20665_v59 = vld [vmem:[#allocation2 + $0x28] ss:$116 sps:$4 sm:$0xff]  }
 0x903   :  { %12300 = vmatpush2.bf16.msra.mxu1 %v20614_v30  ;;  %12260 = vmatprep.subr.bf16.mxu0 %v20619_v62  ;;  %v20668_v30 = vld [vmem:[#allocation2 + $0xea8] ss:$116 sps:$4 sm:$0xff]   ;;  %v20673_v62 = vld [vmem:[#allocation2 + $0xdc4] ss:$116 sps:$4 sm:$0xff]  }
 0x904   :  { %12301 = vmatprep.subr.bf16.mxu1 %v20622_v29  ;;  %v20676_v29 = vld [vmem:[#allocation2 + $0x1c44] ss:$116 sps:$4 sm:$0xff]  }
 0x906   :  { %12261 = vmatpush2.bf16.msra.mxu0 %v20617_v40  ;;  %v20671_v40 = vld [vmem:[#allocation2 + $0xdc0] ss:$116 sps:$4 sm:$0xff]  }
 0x907   :  { %12302 = vmatpush2.bf16.msra.mxu1 %v20620_v63  ;;  %12312 = vmatprep.subr.bf16.mxu0 %v20625_v22  ;;  %v20674_v63 = vld [vmem:[#allocation2 + $0x1c40] ss:$116 sps:$4 sm:$0xff]   ;;  %v20679_v22 = vld [vmem:[#allocation2 + $0xcdc] ss:$116 sps:$4 sm:$0xff]  }
 0x908   :  { %12353 = vmatprep.subr.bf16.mxu1 %v20628_v33  ;;  %v20682_v33 = vld [vmem:[#allocation2 + $0x1b5c] ss:$116 sps:$4 sm:$0xff]  }
 0x909   :  { %v10392_v34 = vpop.f32.mrf.mxu0  ;;  %12263 = vmatmul.mubr.bf16.vlgmr.msra.gmra.mxu0 %v27615_v47 }
 0x90a   :  { %v10433_v42 = vpop.f32.mrf.mxu1  ;;  %12304 = vmatmul.mubr.bf16.vlgmr.msra.gmra.mxu1 %v27617_v38  ;;  %v10393_v14 = vadd.f32 %v10392_v34, %v9627_v7  ;;  %12313 = vmatpush1.bf16.msra.mxu0 %v20623_v35  ;;  %v20677_v35 = vld [vmem:[#allocation2 + $0xcd8] ss:$116 sps:$4 sm:$0xff]   ;;  %v20685_v7 = vld [vmem:[#allocation2 + $0xbf4] ss:$116 sps:$4 sm:$0xff]  }
 0x90b   :  { %12354 = vmatpush1.bf16.msra.mxu1 %v20626_v23  ;;  %v10394_v0 = vpop.f32.mrf.mxu0  ;;  %12314 = vmatprep.subr.bf16.mxu0 %v20631_v3  ;;  %v20680_v23 = vld [vmem:[#allocation2 + $0x1b58] ss:$116 sps:$4 sm:$0xff]   ;;  %v20688_v3 = vld [vmem:[#allocation2 + $0x1a74] ss:$116 sps:$4 sm:$0xff]  }
 0x90c   :  { %v10435_v6 = vpop.f32.mrf.mxu1  ;;  %12355 = vmatprep.subr.bf16.mxu1 %v20634_v27  ;;  %v10434_v21 = vadd.f32 %v10433_v42, %v10393_v14  ;;  %v10395_v24 = vadd.f32 %v10394_v0, %v9631_v5  ;;  %12344 = vmatprep.mubr.bf16.mxu0 %v27619_v60  ;;  %v20683_v27 = vld [vmem:[#allocation2 + $0xbf0] ss:$116 sps:$4 sm:$0xff]   ;;  %v20689_v34 = vld [vmem:[#allocation2 + $0xb08] ss:$116 sps:$4 sm:$0xff]  }
 0x90d   :  { %12385 = vmatprep.mubr.bf16.mxu1 %v27621_v46  ;;  %v10396_v58 = vpop.f32.mrf.mxu0  ;;  %v20686_v5 = vld [vmem:[#allocation2 + $0x1a70] ss:$116 sps:$4 sm:$0xff]   ;;  %v20692_v42 = vld [vmem:[#allocation2 + $0x1988] ss:$116 sps:$4 sm:$0xff]  }
 0x90e   :  { %v10437_v44 = vpop.f32.mrf.mxu1  ;;  %v10436_v4 = vadd.f32 %v10435_v6, %v10395_v24  ;;  %12315 = vmatpush1.bf16.msra.mxu0 %v20629_v36  ;;  %v20691_v36 = vld [vmem:[#allocation2 + $0xb0c] ss:$116 sps:$4 sm:$0xff]   ;;  %v20697_v14 = vld [vmem:[#allocation2 + $0xa24] ss:$116 sps:$4 sm:$0xff]   ;;  %v20712_v58 = vld [vmem:[#allocation2 + $0x16d4] ss:$116 sps:$4 sm:$0xff]  }
 0x90f   :  { %12356 = vmatpush1.bf16.msra.mxu1 %v20632_v48  ;;  %v10397_v12 = vpop.f32.mrf.mxu0  ;;  %12316 = vmatprep.subr.bf16.mxu0 %v20637_v18  ;;  %v20694_v48 = vld [vmem:[#allocation2 + $0x198c] ss:$116 sps:$4 sm:$0xff]   ;;  %v20700_v0 = vld [vmem:[#allocation2 + $0x18a4] ss:$116 sps:$4 sm:$0xff]  }
 0x910   :  { %v10438_v56 = vpop.f32.mrf.mxu1  ;;  %12357 = vmatprep.subr.bf16.mxu1 %v20640_v20  ;;  %v10445_v51 = vcombine.low %v10434_v21, %v10436_v4  ;;  %v20695_v6 = vld [vmem:[#allocation2 + $0xa20] ss:$116 sps:$4 sm:$0xff]   ;;  %v20703_v20 = vld [vmem:[#allocation2 + $0x93c] ss:$116 sps:$4 sm:$0xff]   ;;  %v20701_v24 = vld [vmem:[#allocation2 + $0x938] ss:$116 sps:$4 sm:$0xff]  }
 0x911   :  { %v20698_v18 = vld [vmem:[#allocation2 + $0x18a0] ss:$116 sps:$4 sm:$0xff]   ;;  %v20706_v21 = vld [vmem:[#allocation2 + $0x17bc] ss:$116 sps:$4 sm:$0xff]  }
 0x912   :  { %v10459_v41 = vrot.slane %v10445_v51, %v24515_v17  ;;  %12317 = vmatpush1.bf16.msra.mxu0 %v20635_v19  ;;  %v20704_v19 = vld [vmem:[#allocation2 + $0x17b8] ss:$116 sps:$4 sm:$0xff]   ;;  %v20707_v44 = vld [vmem:[#allocation2 + $0x850] ss:$116 sps:$4 sm:$0xff]  }
 0x913   :  { %12358 = vmatpush1.bf16.msra.mxu1 %v20638_v8  ;;  %12318 = vmatprep.subr.bf16.mxu0 %v20643_v49  ;;  %v20709_v8 = vld [vmem:[#allocation2 + $0x854] ss:$116 sps:$4 sm:$0xff]   ;;  %v20710_v4 = vld [vmem:[#allocation2 + $0x16d0] ss:$116 sps:$4 sm:$0xff]   ;;  %v20715_v12 = vld [vmem:[#allocation2 + $0x76c] ss:$116 sps:$4 sm:$0xff]  }
 0x914   :  { %12359 = vmatprep.subr.bf16.mxu1 %v20646_v28  ;;  %v10460_v54 = vcombine.low %v10452_v2, %v10459_v41  ;;  %v20718_v56 = vld [vmem:[#allocation2 + $0x15ec] ss:$116 sps:$4 sm:$0xff]   ;;  %v20713_v49 = vld [vmem:[#allocation2 + $0x768] ss:$116 sps:$4 sm:$0xff]   ;;  %v27672_v51 = vld [vmem:[%s27846_s8 + $0x4] sm:$0xf] }
 0x915   :  { %v20716_v28 = vld [vmem:[#allocation2 + $0x15e8] ss:$116 sps:$4 sm:$0xff]   ;;  %v10596_v41 = vrot.slane %v27672_v51, %v25260_v61 }
 0x916   :  { %10462 = vst [vmem:[#allocation4] sm:$0xff] %v10460_v54  ;;  %12319 = vmatpush1.bf16.msra.mxu0 %v20641_v9  ;;  %v20721_v9 = vld [vmem:[#allocation2 + $0x68c] ss:$116 sps:$4 sm:$0xff]   ;;  %v20719_v2 = vld [vmem:[#allocation2 + $0x688] ss:$116 sps:$4 sm:$0xff]  }
 0x917   :  { %12360 = vmatpush1.bf16.msra.mxu1 %v20644_v26  ;;  %12320 = vmatprep.subr.bf16.mxu0 %v20649_v16  ;;  %v20724_v26 = vld [vmem:[#allocation2 + $0x150c] ss:$116 sps:$4 sm:$0xff]   ;;  %v20722_v16 = vld [vmem:[#allocation2 + $0x1508] ss:$116 sps:$4 sm:$0xff]   ;;  %v20730_v54 = vld [vmem:[#allocation2 + $0x1424] ss:$116 sps:$4 sm:$0xff]  }
 0x918   :  { %12361 = vmatprep.subr.bf16.mxu1 %v20652_v39  ;;  %v20727_v39 = vld [vmem:[#allocation2 + $0x5a4] ss:$116 sps:$4 sm:$0xff]  }
 0x91a   :  { %12321 = vmatpush1.bf16.msra.mxu0 %v20647_v43  ;;  %v10600_v43 = vrot.slane %v27672_v51, %v25269_v1 }
 0x91b   :  { %12362 = vmatpush1.bf16.msra.mxu1 %v20650_v45  ;;  %12322 = vmatprep.subr.bf16.mxu0 %v20655_v50  ;;  %v20725_v45 = vld [vmem:[#allocation2 + $0x5a0] ss:$116 sps:$4 sm:$0xff]  }
 0x91c   :  { %12363 = vmatprep.subr.bf16.mxu1 %v20658_v25  ;;  %v20728_v50 = vld [vmem:[#allocation2 + $0x1420] ss:$116 sps:$4 sm:$0xff]  }
 0x91e   :  { %12323 = vmatpush1.bf16.msra.mxu0 %v20653_v32 }
 0x91f   :  { %12364 = vmatpush1.bf16.msra.mxu1 %v20656_v37  ;;  %12324 = vmatprep.subr.bf16.mxu0 %v20661_v13 }
 0x920   :  { %12365 = vmatprep.subr.bf16.mxu1 %v20664_v15 }
 0x922   :  { %12325 = vmatpush1.bf16.msra.mxu0 %v20659_v31  ;;  %v20733_v31 = vld [vmem:[#allocation2 + $0x4bc] ss:$116 sps:$4 sm:$0xff]  }
 0x923   :  { %12366 = vmatpush1.bf16.msra.mxu1 %v20662_v53  ;;  %12326 = vmatprep.subr.bf16.mxu0 %v20667_v55  ;;  %v20736_v53 = vld [vmem:[#allocation2 + $0x133c] ss:$116 sps:$4 sm:$0xff]  }
 0x924   :  { %12367 = vmatprep.subr.bf16.mxu1 %v20670_v10 }
 0x926   :  { %12327 = vmatpush1.bf16.msra.mxu0 %v20665_v59  ;;  %v20731_v59 = vld [vmem:[#allocation2 + $0x4b8] ss:$116 sps:$4 sm:$0xff]  }
 0x927   :  { %12368 = vmatpush1.bf16.msra.mxu1 %v20668_v30  ;;  %12328 = vmatprep.subr.bf16.mxu0 %v20673_v62  ;;  %v20734_v30 = vld [vmem:[#allocation2 + $0x1338] ss:$116 sps:$4 sm:$0xff]  }
 0x928   :  { %12369 = vmatprep.subr.bf16.mxu1 %v20676_v29 }
 0x92a   :  { %12329 = vmatpush2.bf16.msra.mxu0 %v20671_v40 }
 0x92b   :  { %12370 = vmatpush2.bf16.msra.mxu1 %v20674_v63  ;;  %12330 = vmatprep.subr.bf16.mxu0 %v20679_v22 }
 0x92c   :  { %12371 = vmatprep.subr.bf16.mxu1 %v20682_v33  ;;  %v20739_v33 = vld [vmem:[#allocation2 + $0x3d4] ss:$116 sps:$4 sm:$0xff]  }
 0x92e   :  { %12331 = vmatpush2.bf16.msra.mxu0 %v20677_v35  ;;  %v20742_v35 = vld [vmem:[#allocation2 + $0x1254] ss:$116 sps:$4 sm:$0xff]  }
 0x92f   :  { %12372 = vmatpush2.bf16.msra.mxu1 %v20680_v23  ;;  %12332 = vmatprep.subr.bf16.mxu0 %v20685_v7  ;;  %v20737_v7 = vld [vmem:[#allocation2 + $0x3d0] ss:$116 sps:$4 sm:$0xff]  }
 0x930   :  { %12373 = vmatprep.subr.bf16.mxu1 %v20688_v3  ;;  %v20740_v3 = vld [vmem:[#allocation2 + $0x1250] ss:$116 sps:$4 sm:$0xff]  }
 0x932   :  { %12333 = vmatpush2.bf16.msra.mxu0 %v20683_v27  ;;  %v20745_v27 = vld [vmem:[#allocation2 + $0x2ec] ss:$116 sps:$4 sm:$0xff]  }
 0x933   :  { %12374 = vmatpush2.bf16.msra.mxu1 %v20686_v5  ;;  %12334 = vmatprep.subr.bf16.mxu0 %v20691_v36  ;;  %v20748_v5 = vld [vmem:[#allocation2 + $0x116c] ss:$116 sps:$4 sm:$0xff]   ;;  %v20743_v36 = vld [vmem:[#allocation2 + $0x2e8] ss:$116 sps:$4 sm:$0xff]  }
 0x934   :  { %12375 = vmatprep.subr.bf16.mxu1 %v20694_v48  ;;  %v20746_v48 = vld [vmem:[#allocation2 + $0x1168] ss:$116 sps:$4 sm:$0xff]  }
 0x936   :  { %12335 = vmatpush2.bf16.msra.mxu0 %v20689_v34  ;;  %v20751_v34 = vld [vmem:[#allocation2 + $0x204] ss:$116 sps:$4 sm:$0xff]  }
 0x937   :  { %12376 = vmatpush2.bf16.msra.mxu1 %v20692_v42  ;;  %12336 = vmatprep.subr.bf16.mxu0 %v20697_v14  ;;  %v20754_v42 = vld [vmem:[#allocation2 + $0x1084] ss:$116 sps:$4 sm:$0xff]   ;;  %v20749_v14 = vld [vmem:[#allocation2 + $0x200] ss:$116 sps:$4 sm:$0xff]  }
 0x938   :  { %12377 = vmatprep.subr.bf16.mxu1 %v20700_v0  ;;  %v20752_v0 = vld [vmem:[#allocation2 + $0x1080] ss:$116 sps:$4 sm:$0xff]  }
 0x93a   :  { %12337 = vmatpush2.bf16.msra.mxu0 %v20695_v6  ;;  %v20757_v6 = vld [vmem:[#allocation2 + $0x11c] ss:$116 sps:$4 sm:$0xff]  }
 0x93b   :  { %12378 = vmatpush2.bf16.msra.mxu1 %v20698_v18  ;;  %12338 = vmatprep.subr.bf16.mxu0 %v20703_v20  ;;  %v20760_v18 = vld [vmem:[#allocation2 + $0xf9c] ss:$116 sps:$4 sm:$0xff]   ;;  %v20755_v20 = vld [vmem:[#allocation2 + $0x118] ss:$116 sps:$4 sm:$0xff]  }
 0x93c   :  { %12379 = vmatprep.subr.bf16.mxu1 %v20706_v21  ;;  %v20758_v21 = vld [vmem:[#allocation2 + $0xf98] ss:$116 sps:$4 sm:$0xff]  }
 0x93e   :  { %12339 = vmatpush2.bf16.msra.mxu0 %v20701_v24  ;;  %v20763_v24 = vld [vmem:[#allocation2 + $0x34] ss:$116 sps:$4 sm:$0xff]  }
 0x93f   :  { %12380 = vmatpush2.bf16.msra.mxu1 %v20704_v19  ;;  %12340 = vmatprep.subr.bf16.mxu0 %v20709_v8  ;;  %v20766_v19 = vld [vmem:[#allocation2 + $0xeb4] ss:$116 sps:$4 sm:$0xff]   ;;  %v20761_v8 = vld [vmem:[#allocation2 + $0x30] ss:$116 sps:$4 sm:$0xff]  }
 0x940   :  { %12381 = vmatprep.subr.bf16.mxu1 %v20712_v58  ;;  %v20764_v58 = vld [vmem:[#allocation2 + $0xeb0] ss:$116 sps:$4 sm:$0xff]  }
 0x942   :  { %12341 = vmatpush2.bf16.msra.mxu0 %v20707_v44  ;;  %v20769_v44 = vld [vmem:[#allocation2 + $0xdcc] ss:$116 sps:$4 sm:$0xff]  }
 0x943   :  { %12382 = vmatpush2.bf16.msra.mxu1 %v20710_v4  ;;  %12342 = vmatprep.subr.bf16.mxu0 %v20715_v12  ;;  %v20772_v4 = vld [vmem:[#allocation2 + $0x1c4c] ss:$116 sps:$4 sm:$0xff]   ;;  %v20767_v12 = vld [vmem:[#allocation2 + $0xdc8] ss:$116 sps:$4 sm:$0xff]  }
 0x944   :  { %12383 = vmatprep.subr.bf16.mxu1 %v20718_v56  ;;  %v20770_v56 = vld [vmem:[#allocation2 + $0x1c48] ss:$116 sps:$4 sm:$0xff]  }
 0x946   :  { %12343 = vmatpush2.bf16.msra.mxu0 %v20713_v49  ;;  %v20775_v49 = vld [vmem:[#allocation2 + $0xce4] ss:$116 sps:$4 sm:$0xff]  }
 0x947   :  { %12384 = vmatpush2.bf16.msra.mxu1 %v20716_v28  ;;  %13207 = vmatprep.subr.bf16.mxu0 %v20721_v9  ;;  %v20778_v28 = vld [vmem:[#allocation2 + $0x1b64] ss:$116 sps:$4 sm:$0xff]   ;;  %v20773_v9 = vld [vmem:[#allocation2 + $0xce0] ss:$116 sps:$4 sm:$0xff]  }
 0x948   :  { %13248 = vmatprep.subr.bf16.mxu1 %v20724_v26  ;;  %v20776_v26 = vld [vmem:[#allocation2 + $0x1b60] ss:$116 sps:$4 sm:$0xff]  }
 0x949   :  { %v11287_v25 = vpop.f32.mrf.mxu0  ;;  %12345 = vmatmul.mubr.bf16.vlgmr.msra.gmra.mxu0 %v27615_v47 }
 0x94a   :  { %v11328_v32 = vpop.f32.mrf.mxu1  ;;  %12386 = vmatmul.mubr.bf16.vlgmr.msra.gmra.mxu1 %v27617_v38  ;;  %v11288_v37 = vadd.f32 %v11287_v25, %v10596_v41  ;;  %13208 = vmatpush1.bf16.msra.mxu0 %v20719_v2  ;;  %v20781_v2 = vld [vmem:[#allocation2 + $0xbfc] ss:$116 sps:$4 sm:$0xff]   ;;  %v20793_v25 = vld [vmem:[#allocation2 + $0xa2c] ss:$116 sps:$4 sm:$0xff]  }
 0x94b   :  { %13249 = vmatpush1.bf16.msra.mxu1 %v20722_v16  ;;  %v11289_v13 = vpop.f32.mrf.mxu0  ;;  %13209 = vmatprep.subr.bf16.mxu0 %v20727_v39  ;;  %v20784_v41 = vld [vmem:[#allocation2 + $0x1a7c] ss:$116 sps:$4 sm:$0xff]   ;;  %v20779_v16 = vld [vmem:[#allocation2 + $0xbf8] ss:$116 sps:$4 sm:$0xff]  }
 0x94c   :  { %v11330_v15 = vpop.f32.mrf.mxu1  ;;  %13250 = vmatprep.subr.bf16.mxu1 %v20730_v54  ;;  %v27680_v55 = vadd.f32 %v11328_v32, %v11288_v37  ;;  %v11290_v10 = vadd.f32 %v11289_v13, %v10600_v43  ;;  %13239 = vmatprep.mubr.bf16.mxu0 %v27619_v60  ;;  %v20782_v39 = vld [vmem:[#allocation2 + $0x1a78] ss:$116 sps:$4 sm:$0xff]   ;;  %v20787_v54 = vld [vmem:[#allocation2 + $0xb14] ss:$116 sps:$4 sm:$0xff]  }
 0x94d   :  { %13280 = vmatprep.mubr.bf16.mxu1 %v27621_v46  ;;  %v11291_v62 = vpop.f32.mrf.mxu0  ;;  %v20790_v43 = vld [vmem:[#allocation2 + $0x1994] ss:$116 sps:$4 sm:$0xff]   ;;  %v20796_v32 = vld [vmem:[#allocation2 + $0x18ac] ss:$116 sps:$4 sm:$0xff]  }
 0x94e   :  { %v11332_v29 = vpop.f32.mrf.mxu1  ;;  %v27684_v40 = vadd.f32 %v11330_v15, %v11290_v10  ;;  %13210 = vmatpush1.bf16.msra.mxu0 %v20725_v45  ;;  %v20785_v45 = vld [vmem:[#allocation2 + $0xb10] ss:$116 sps:$4 sm:$0xff]   ;;  %v20791_v37 = vld [vmem:[#allocation2 + $0xa28] ss:$116 sps:$4 sm:$0xff]   ;;  %v20800_v10 = vld [vmem:[#allocation2 + $0x17c0] ss:$116 sps:$4 sm:$0xff]  }
 0x94f   :  { %13251 = vmatpush1.bf16.msra.mxu1 %v20728_v50  ;;  %v11292_v63 = vpop.f32.mrf.mxu0  ;;  %13211 = vmatprep.subr.bf16.mxu0 %v20733_v31  ;;  %v20788_v50 = vld [vmem:[#allocation2 + $0x1990] ss:$116 sps:$4 sm:$0xff]   ;;  %v20794_v13 = vld [vmem:[#allocation2 + $0x18a8] ss:$116 sps:$4 sm:$0xff]   ;;  %v20803_v62 = vld [vmem:[#allocation2 + $0x858] ss:$116 sps:$4 sm:$0xff]  }
 0x950   :  { %v11333_v22 = vpop.f32.mrf.mxu1  ;;  %13252 = vmatprep.subr.bf16.mxu1 %v20736_v53  ;;  %v11421_v23 = vcombine.low %v27680_v55, %v27684_v40  ;;  %v20799_v15 = vld [vmem:[#allocation2 + $0x944] ss:$116 sps:$4 sm:$0xff]   ;;  %v20797_v53 = vld [vmem:[#allocation2 + $0x940] ss:$116 sps:$4 sm:$0xff]   ;;  %v20845_v55 = vld [vmem:[#allocation2 + $0x208] ss:$116 sps:$4 sm:$0xff]  }
 0x951   :  { %v20802_v31 = vld [vmem:[#allocation2 + $0x17c4] ss:$116 sps:$4 sm:$0xff]   ;;  %v20811_v63 = vld [vmem:[#allocation2 + $0x774] ss:$116 sps:$4 sm:$0xff]  }
 0x952   :  { %13212 = vmatpush1.bf16.msra.mxu0 %v20731_v59  ;;  %v20805_v59 = vld [vmem:[#allocation2 + $0x85c] ss:$116 sps:$4 sm:$0xff]   ;;  %v20806_v29 = vld [vmem:[#allocation2 + $0x16d8] ss:$116 sps:$4 sm:$0xff]   ;;  %v20814_v22 = vld [vmem:[#allocation2 + $0x15f4] ss:$116 sps:$4 sm:$0xff]  }
 0x953   :  { %13253 = vmatpush1.bf16.msra.mxu1 %v20734_v30  ;;  %13213 = vmatprep.subr.bf16.mxu0 %v20739_v33  ;;  %v20808_v30 = vld [vmem:[#allocation2 + $0x16dc] ss:$116 sps:$4 sm:$0xff]  }
 0x954   :  { %13254 = vmatprep.subr.bf16.mxu1 %v20742_v35  ;;  %v20809_v33 = vld [vmem:[#allocation2 + $0x770] ss:$116 sps:$4 sm:$0xff]   ;;  %v20848_v40 = vld [vmem:[#allocation2 + $0x1088] ss:$116 sps:$4 sm:$0xff]  }
 0x955   :  { %v20812_v35 = vld [vmem:[#allocation2 + $0x15f0] ss:$116 sps:$4 sm:$0xff]  }
 0x956   :  { %13214 = vmatpush1.bf16.msra.mxu0 %v20737_v7  ;;  %v20817_v7 = vld [vmem:[#allocation2 + $0x694] ss:$116 sps:$4 sm:$0xff]  }
 0x957   :  { %13255 = vmatpush1.bf16.msra.mxu1 %v20740_v3  ;;  %13215 = vmatprep.subr.bf16.mxu0 %v20745_v27  ;;  %v20820_v3 = vld [vmem:[#allocation2 + $0x1514] ss:$116 sps:$4 sm:$0xff]   ;;  %v20815_v27 = vld [vmem:[#allocation2 + $0x690] ss:$116 sps:$4 sm:$0xff]  }
 0x958   :  { %13256 = vmatprep.subr.bf16.mxu1 %v20748_v5  ;;  %v20818_v5 = vld [vmem:[#allocation2 + $0x1510] ss:$116 sps:$4 sm:$0xff]  }
 0x95a   :  { %13216 = vmatpush1.bf16.msra.mxu0 %v20743_v36  ;;  %v10604_v36 = vrot.slane %v27672_v51, %v26776_v52 }
 0x95b   :  { %13257 = vmatpush1.bf16.msra.mxu1 %v20746_v48  ;;  %13217 = vmatprep.subr.bf16.mxu0 %v20751_v34  ;;  %v20823_v48 = vld [vmem:[#allocation2 + $0x5ac] ss:$116 sps:$4 sm:$0xff]  }
 0x95c   :  { %13258 = vmatprep.subr.bf16.mxu1 %v20754_v42  ;;  %v20826_v34 = vld [vmem:[#allocation2 + $0x142c] ss:$116 sps:$4 sm:$0xff]   ;;  %v10608_v42 = vrot.slane %v27672_v51, %v26783_v57 }
 0x95d   :  { %v20827_v51 = vld [vmem:[#allocation2 + $0x4c0] ss:$116 sps:$4 sm:$0xff]  }
 0x95e   :  { %13218 = vmatpush1.bf16.msra.mxu0 %v20749_v14  ;;  %v20821_v14 = vld [vmem:[#allocation2 + $0x5a8] ss:$116 sps:$4 sm:$0xff]  }
 0x95f   :  { %13259 = vmatpush1.bf16.msra.mxu1 %v20752_v0  ;;  %13219 = vmatprep.subr.bf16.mxu0 %v20757_v6  ;;  %v20824_v0 = vld [vmem:[#allocation2 + $0x1428] ss:$116 sps:$4 sm:$0xff]  }
 0x960   :  { %13260 = vmatprep.subr.bf16.mxu1 %v20760_v18 }
 0x962   :  { %13220 = vmatpush1.bf16.msra.mxu0 %v20755_v20 }
 0x963   :  { %13261 = vmatpush1.bf16.msra.mxu1 %v20758_v21  ;;  %13221 = vmatprep.subr.bf16.mxu0 %v20763_v24 }
 0x964   :  { %13262 = vmatprep.subr.bf16.mxu1 %v20766_v19  ;;  %v20829_v19 = vld [vmem:[#allocation2 + $0x4c4] ss:$116 sps:$4 sm:$0xff]  }
 0x966   :  { %13222 = vmatpush1.bf16.msra.mxu0 %v20761_v8  ;;  %v20832_v8 = vld [vmem:[#allocation2 + $0x1344] ss:$116 sps:$4 sm:$0xff]  }
 0x967   :  { %13263 = vmatpush1.bf16.msra.mxu1 %v20764_v58  ;;  %13223 = vmatprep.subr.bf16.mxu0 %v20769_v44 }
 0x968   :  { %13264 = vmatprep.subr.bf16.mxu1 %v20772_v4  ;;  %v20830_v4 = vld [vmem:[#allocation2 + $0x1340] ss:$116 sps:$4 sm:$0xff]  }
 0x96a   :  { %13224 = vmatpush2.bf16.msra.mxu0 %v20767_v12 }
 0x96b   :  { %13265 = vmatpush2.bf16.msra.mxu1 %v20770_v56  ;;  %13225 = vmatprep.subr.bf16.mxu0 %v20775_v49 }
 0x96c   :  { %13266 = vmatprep.subr.bf16.mxu1 %v20778_v28 }
 0x96e   :  { %13226 = vmatpush2.bf16.msra.mxu0 %v20773_v9 }
 0x96f   :  { %13267 = vmatpush2.bf16.msra.mxu1 %v20776_v26  ;;  %13227 = vmatprep.subr.bf16.mxu0 %v20781_v2  ;;  %v20835_v26 = vld [vmem:[#allocation2 + $0x3dc] ss:$116 sps:$4 sm:$0xff]  }
 0x970   :  { %13268 = vmatprep.subr.bf16.mxu1 %v20784_v41  ;;  %v20838_v2 = vld [vmem:[#allocation2 + $0x125c] ss:$116 sps:$4 sm:$0xff]  }
 0x972   :  { %13228 = vmatpush2.bf16.msra.mxu0 %v20779_v16  ;;  %v20833_v16 = vld [vmem:[#allocation2 + $0x3d8] ss:$116 sps:$4 sm:$0xff]  }
 0x973   :  { %13269 = vmatpush2.bf16.msra.mxu1 %v20782_v39  ;;  %13229 = vmatprep.subr.bf16.mxu0 %v20787_v54  ;;  %v20836_v39 = vld [vmem:[#allocation2 + $0x1258] ss:$116 sps:$4 sm:$0xff]   ;;  %v11429_v54 = vrot.slane %v11421_v23, %v24515_v17 }
 0x974   :  { %13270 = vmatprep.subr.bf16.mxu1 %v20790_v43  ;;  %v20853_v23 = vld [vmem:[#allocation2 + $0x124] ss:$116 sps:$4 sm:$0xff]  }
 0x976   :  { %13230 = vmatpush2.bf16.msra.mxu0 %v20785_v45  ;;  %v20841_v45 = vld [vmem:[#allocation2 + $0x2f4] ss:$116 sps:$4 sm:$0xff]  }
 0x977   :  { %13271 = vmatpush2.bf16.msra.mxu1 %v20788_v50  ;;  %13231 = vmatprep.subr.bf16.mxu0 %v20793_v25  ;;  %v20844_v50 = vld [vmem:[#allocation2 + $0x1174] ss:$116 sps:$4 sm:$0xff]  }
 0x978   :  { %13272 = vmatprep.subr.bf16.mxu1 %v20796_v32  ;;  %v20839_v32 = vld [vmem:[#allocation2 + $0x2f0] ss:$116 sps:$4 sm:$0xff]  }
 0x97a   :  { %13232 = vmatpush2.bf16.msra.mxu0 %v20791_v37  ;;  %v20842_v37 = vld [vmem:[#allocation2 + $0x1170] ss:$116 sps:$4 sm:$0xff]  }
 0x97b   :  { %13273 = vmatpush2.bf16.msra.mxu1 %v20794_v13  ;;  %13233 = vmatprep.subr.bf16.mxu0 %v20799_v15  ;;  %v20847_v13 = vld [vmem:[#allocation2 + $0x20c] ss:$116 sps:$4 sm:$0xff]  }
 0x97c   :  { %13274 = vmatprep.subr.bf16.mxu1 %v20802_v31  ;;  %v20850_v15 = vld [vmem:[#allocation2 + $0x108c] ss:$116 sps:$4 sm:$0xff]   ;;  %v20856_v31 = vld [vmem:[#allocation2 + $0xfa4] ss:$116 sps:$4 sm:$0xff]  }
 0x97e   :  { %13234 = vmatpush2.bf16.msra.mxu0 %v20797_v53  ;;  %v20851_v53 = vld [vmem:[#allocation2 + $0x120] ss:$116 sps:$4 sm:$0xff]  }
 0x97f   :  { %13275 = vmatpush2.bf16.msra.mxu1 %v20800_v10  ;;  %13235 = vmatprep.subr.bf16.mxu0 %v20805_v59  ;;  %v20854_v10 = vld [vmem:[#allocation2 + $0xfa0] ss:$116 sps:$4 sm:$0xff]   ;;  %v20859_v59 = vld [vmem:[#allocation2 + $0x3c] ss:$116 sps:$4 sm:$0xff]  }
 0x980   :  { %13276 = vmatprep.subr.bf16.mxu1 %v20808_v30  ;;  %v20862_v30 = vld [vmem:[#allocation2 + $0xebc] ss:$116 sps:$4 sm:$0xff]  }
 0x982   :  { %13236 = vmatpush2.bf16.msra.mxu0 %v20803_v62  ;;  %v20857_v62 = vld [vmem:[#allocation2 + $0x38] ss:$116 sps:$4 sm:$0xff]  }
 0x983   :  { %13277 = vmatpush2.bf16.msra.mxu1 %v20806_v29  ;;  %13237 = vmatprep.subr.bf16.mxu0 %v20811_v63  ;;  %v20860_v29 = vld [vmem:[#allocation2 + $0xeb8] ss:$116 sps:$4 sm:$0xff]   ;;  %v20865_v63 = vld [vmem:[#allocation2 + $0xdd4] ss:$116 sps:$4 sm:$0xff]  }
 0x984   :  { %13278 = vmatprep.subr.bf16.mxu1 %v20814_v22  ;;  %v20868_v22 = vld [vmem:[#allocation2 + $0x1c54] ss:$116 sps:$4 sm:$0xff]  }
 0x986   :  { %13238 = vmatpush2.bf16.msra.mxu0 %v20809_v33  ;;  %v20863_v33 = vld [vmem:[#allocation2 + $0xdd0] ss:$116 sps:$4 sm:$0xff]  }
 0x987   :  { %13279 = vmatpush2.bf16.msra.mxu1 %v20812_v35  ;;  %13289 = vmatprep.subr.bf16.mxu0 %v20817_v7  ;;  %v20866_v35 = vld [vmem:[#allocation2 + $0x1c50] ss:$116 sps:$4 sm:$0xff]   ;;  %v20871_v7 = vld [vmem:[#allocation2 + $0xcec] ss:$116 sps:$4 sm:$0xff]  }
 0x988   :  { %13330 = vmatprep.subr.bf16.mxu1 %v20820_v3  ;;  %v20874_v3 = vld [vmem:[#allocation2 + $0x1b6c] ss:$116 sps:$4 sm:$0xff]  }
 0x989   :  { %v11369_v6 = vpop.f32.mrf.mxu0  ;;  %13240 = vmatmul.mubr.bf16.vlgmr.msra.gmra.mxu0 %v27615_v47 }
 0x98a   :  { %v11410_v18 = vpop.f32.mrf.mxu1  ;;  %13281 = vmatmul.mubr.bf16.vlgmr.msra.gmra.mxu1 %v27617_v38  ;;  %v11370_v20 = vadd.f32 %v11369_v6, %v10604_v36  ;;  %13290 = vmatpush1.bf16.msra.mxu0 %v20815_v27  ;;  %v20869_v27 = vld [vmem:[#allocation2 + $0xce8] ss:$116 sps:$4 sm:$0xff]   ;;  %v20877_v36 = vld [vmem:[#allocation2 + $0xc04] ss:$116 sps:$4 sm:$0xff]  }
 0x98b   :  { %13331 = vmatpush1.bf16.msra.mxu1 %v20818_v5  ;;  %v11371_v21 = vpop.f32.mrf.mxu0  ;;  %13291 = vmatprep.subr.bf16.mxu0 %v20823_v48  ;;  %v20872_v5 = vld [vmem:[#allocation2 + $0x1b68] ss:$116 sps:$4 sm:$0xff]   ;;  %v20880_v48 = vld [vmem:[#allocation2 + $0x1a84] ss:$116 sps:$4 sm:$0xff]  }
 0x98c   :  { %v11412_v24 = vpop.f32.mrf.mxu1  ;;  %13332 = vmatprep.subr.bf16.mxu1 %v20826_v34  ;;  %v11411_v58 = vadd.f32 %v11410_v18, %v11370_v20  ;;  %v11372_v44 = vadd.f32 %v11371_v21, %v10608_v42  ;;  %13321 = vmatprep.mubr.bf16.mxu0 %v27619_v60  ;;  %v20875_v34 = vld [vmem:[#allocation2 + $0xc00] ss:$116 sps:$4 sm:$0xff]   ;;  %v20881_v6 = vld [vmem:[#allocation2 + $0xb18] ss:$116 sps:$4 sm:$0xff]  }
 0x98d   :  { %13362 = vmatprep.mubr.bf16.mxu1 %v27621_v46  ;;  %v11373_v12 = vpop.f32.mrf.mxu0  ;;  %v20878_v42 = vld [vmem:[#allocation2 + $0x1a80] ss:$116 sps:$4 sm:$0xff]   ;;  %v20884_v18 = vld [vmem:[#allocation2 + $0x1998] ss:$116 sps:$4 sm:$0xff]  }
 0x98e   :  { %v11414_v56 = vpop.f32.mrf.mxu1  ;;  %v11413_v49 = vadd.f32 %v11412_v24, %v11372_v44  ;;  %13292 = vmatpush1.bf16.msra.mxu0 %v20821_v14  ;;  %v20883_v14 = vld [vmem:[#allocation2 + $0xb1c] ss:$116 sps:$4 sm:$0xff]   ;;  %v20889_v20 = vld [vmem:[#allocation2 + $0xa34] ss:$116 sps:$4 sm:$0xff]   ;;  %v20904_v12 = vld [vmem:[#allocation2 + $0x16e4] ss:$116 sps:$4 sm:$0xff]  }
 0x98f   :  { %13333 = vmatpush1.bf16.msra.mxu1 %v20824_v0  ;;  %v11374_v28 = vpop.f32.mrf.mxu0  ;;  %13293 = vmatprep.subr.bf16.mxu0 %v20829_v19  ;;  %v20886_v0 = vld [vmem:[#allocation2 + $0x199c] ss:$116 sps:$4 sm:$0xff]   ;;  %v20892_v21 = vld [vmem:[#allocation2 + $0x18b4] ss:$116 sps:$4 sm:$0xff]  }
 0x990   :  { %v11415_v9 = vpop.f32.mrf.mxu1  ;;  %13334 = vmatprep.subr.bf16.mxu1 %v20832_v8  ;;  %v11422_v41 = vcombine.low %v11411_v58, %v11413_v49  ;;  %v20887_v24 = vld [vmem:[#allocation2 + $0xa30] ss:$116 sps:$4 sm:$0xff]   ;;  %v20895_v8 = vld [vmem:[#allocation2 + $0x94c] ss:$116 sps:$4 sm:$0xff]   ;;  %v20893_v44 = vld [vmem:[#allocation2 + $0x948] ss:$116 sps:$4 sm:$0xff]  }
 0x991   :  { %v20890_v19 = vld [vmem:[#allocation2 + $0x18b0] ss:$116 sps:$4 sm:$0xff]   ;;  %v20898_v58 = vld [vmem:[#allocation2 + $0x17cc] ss:$116 sps:$4 sm:$0xff]  }
 0x992   :  { %v11436_v43 = vrot.slane %v11422_v41, %v24515_v17  ;;  %13294 = vmatpush1.bf16.msra.mxu0 %v20827_v51  ;;  %v20896_v51 = vld [vmem:[#allocation2 + $0x17c8] ss:$116 sps:$4 sm:$0xff]   ;;  %v20899_v56 = vld [vmem:[#allocation2 + $0x860] ss:$116 sps:$4 sm:$0xff]  }
 0x993   :  { %13335 = vmatpush1.bf16.msra.mxu1 %v20830_v4  ;;  %13295 = vmatprep.subr.bf16.mxu0 %v20835_v26  ;;  %v20901_v4 = vld [vmem:[#allocation2 + $0x864] ss:$116 sps:$4 sm:$0xff]   ;;  %v20902_v49 = vld [vmem:[#allocation2 + $0x16e0] ss:$116 sps:$4 sm:$0xff]   ;;  %v20907_v28 = vld [vmem:[#allocation2 + $0x77c] ss:$116 sps:$4 sm:$0xff]  }
 0x994   :  { %13336 = vmatprep.subr.bf16.mxu1 %v20838_v2  ;;  %v11437_v25 = vcombine.low %v11429_v54, %v11436_v43  ;;  %v20910_v9 = vld [vmem:[#allocation2 + $0x15fc] ss:$116 sps:$4 sm:$0xff]   ;;  %v20905_v26 = vld [vmem:[#allocation2 + $0x778] ss:$116 sps:$4 sm:$0xff]   ;;  %v27704_v41 = vld [vmem:[%s27846_s8 + $0x8] sm:$0xf] }
 0x995   :  { %v20908_v2 = vld [vmem:[#allocation2 + $0x15f8] ss:$116 sps:$4 sm:$0xff]   ;;  %v11573_v43 = vrot.slane %v27704_v41, %v25260_v61 }
 0x996   :  { %11439 = vst [vmem:[#allocation4 + $0x8] sm:$0xff] %v11437_v25  ;;  %13296 = vmatpush1.bf16.msra.mxu0 %v20833_v16  ;;  %v20913_v16 = vld [vmem:[#allocation2 + $0x69c] ss:$116 sps:$4 sm:$0xff]   ;;  %v20911_v54 = vld [vmem:[#allocation2 + $0x698] ss:$116 sps:$4 sm:$0xff]  }
 0x997   :  { %13337 = vmatpush1.bf16.msra.mxu1 %v20836_v39  ;;  %13297 = vmatprep.subr.bf16.mxu0 %v20841_v45  ;;  %v20916_v39 = vld [vmem:[#allocation2 + $0x151c] ss:$116 sps:$4 sm:$0xff]   ;;  %v20914_v45 = vld [vmem:[#allocation2 + $0x1518] ss:$116 sps:$4 sm:$0xff]   ;;  %v20922_v25 = vld [vmem:[#allocation2 + $0x1434] ss:$116 sps:$4 sm:$0xff]  }
 0x998   :  { %13338 = vmatprep.subr.bf16.mxu1 %v20844_v50  ;;  %v20919_v50 = vld [vmem:[#allocation2 + $0x5b4] ss:$116 sps:$4 sm:$0xff]  }
 0x99a   :  { %13298 = vmatpush1.bf16.msra.mxu0 %v20839_v32  ;;  %v11577_v32 = vrot.slane %v27704_v41, %v25269_v1 }
 0x99b   :  { %13339 = vmatpush1.bf16.msra.mxu1 %v20842_v37  ;;  %13299 = vmatprep.subr.bf16.mxu0 %v20847_v13  ;;  %v20917_v37 = vld [vmem:[#allocation2 + $0x5b0] ss:$116 sps:$4 sm:$0xff]  }
 0x99c   :  { %13340 = vmatprep.subr.bf16.mxu1 %v20850_v15  ;;  %v20920_v13 = vld [vmem:[#allocation2 + $0x1430] ss:$116 sps:$4 sm:$0xff]  }
 0x99e   :  { %13300 = vmatpush1.bf16.msra.mxu0 %v20845_v55 }
 0x99f   :  { %13341 = vmatpush1.bf16.msra.mxu1 %v20848_v40  ;;  %13301 = vmatprep.subr.bf16.mxu0 %v20853_v23 }
 0x9a0   :  { %13342 = vmatprep.subr.bf16.mxu1 %v20856_v31 }
 0x9a2   :  { %13302 = vmatpush1.bf16.msra.mxu0 %v20851_v53  ;;  %v20925_v53 = vld [vmem:[#allocation2 + $0x4cc] ss:$116 sps:$4 sm:$0xff]  }
 0x9a3   :  { %13343 = vmatpush1.bf16.msra.mxu1 %v20854_v10  ;;  %13303 = vmatprep.subr.bf16.mxu0 %v20859_v59  ;;  %v20928_v10 = vld [vmem:[#allocation2 + $0x134c] ss:$116 sps:$4 sm:$0xff]  }
 0x9a4   :  { %13344 = vmatprep.subr.bf16.mxu1 %v20862_v30 }
 0x9a6   :  { %13304 = vmatpush1.bf16.msra.mxu0 %v20857_v62  ;;  %v20923_v62 = vld [vmem:[#allocation2 + $0x4c8] ss:$116 sps:$4 sm:$0xff]  }
 0x9a7   :  { %13345 = vmatpush1.bf16.msra.mxu1 %v20860_v29  ;;  %13305 = vmatprep.subr.bf16.mxu0 %v20865_v63  ;;  %v20926_v29 = vld [vmem:[#allocation2 + $0x1348] ss:$116 sps:$4 sm:$0xff]  }
 0x9a8   :  { %13346 = vmatprep.subr.bf16.mxu1 %v20868_v22 }
 0x9aa   :  { %13306 = vmatpush2.bf16.msra.mxu0 %v20863_v33 }
 0x9ab   :  { %13347 = vmatpush2.bf16.msra.mxu1 %v20866_v35  ;;  %13307 = vmatprep.subr.bf16.mxu0 %v20871_v7 }
 0x9ac   :  { %13348 = vmatprep.subr.bf16.mxu1 %v20874_v3  ;;  %v20931_v3 = vld [vmem:[#allocation2 + $0x3e4] ss:$116 sps:$4 sm:$0xff]  }
 0x9ae   :  { %13308 = vmatpush2.bf16.msra.mxu0 %v20869_v27  ;;  %v20934_v27 = vld [vmem:[#allocation2 + $0x1264] ss:$116 sps:$4 sm:$0xff]  }
 0x9af   :  { %13349 = vmatpush2.bf16.msra.mxu1 %v20872_v5  ;;  %13309 = vmatprep.subr.bf16.mxu0 %v20877_v36  ;;  %v20929_v36 = vld [vmem:[#allocation2 + $0x3e0] ss:$116 sps:$4 sm:$0xff]  }
 0x9b0   :  { %13350 = vmatprep.subr.bf16.mxu1 %v20880_v48  ;;  %v20932_v48 = vld [vmem:[#allocation2 + $0x1260] ss:$116 sps:$4 sm:$0xff]  }
 0x9b2   :  { %13310 = vmatpush2.bf16.msra.mxu0 %v20875_v34  ;;  %v20937_v34 = vld [vmem:[#allocation2 + $0x2fc] ss:$116 sps:$4 sm:$0xff]  }
 0x9b3   :  { %13351 = vmatpush2.bf16.msra.mxu1 %v20878_v42  ;;  %13311 = vmatprep.subr.bf16.mxu0 %v20883_v14  ;;  %v20940_v42 = vld [vmem:[#allocation2 + $0x117c] ss:$116 sps:$4 sm:$0xff]   ;;  %v20935_v14 = vld [vmem:[#allocation2 + $0x2f8] ss:$116 sps:$4 sm:$0xff]  }
 0x9b4   :  { %13352 = vmatprep.subr.bf16.mxu1 %v20886_v0  ;;  %v20938_v0 = vld [vmem:[#allocation2 + $0x1178] ss:$116 sps:$4 sm:$0xff]  }
 0x9b6   :  { %13312 = vmatpush2.bf16.msra.mxu0 %v20881_v6  ;;  %v20943_v6 = vld [vmem:[#allocation2 + $0x214] ss:$116 sps:$4 sm:$0xff]  }
 0x9b7   :  { %13353 = vmatpush2.bf16.msra.mxu1 %v20884_v18  ;;  %13313 = vmatprep.subr.bf16.mxu0 %v20889_v20  ;;  %v20946_v18 = vld [vmem:[#allocation2 + $0x1094] ss:$116 sps:$4 sm:$0xff]   ;;  %v20941_v20 = vld [vmem:[#allocation2 + $0x210] ss:$116 sps:$4 sm:$0xff]  }
 0x9b8   :  { %13354 = vmatprep.subr.bf16.mxu1 %v20892_v21  ;;  %v20944_v21 = vld [vmem:[#allocation2 + $0x1090] ss:$116 sps:$4 sm:$0xff]  }
 0x9ba   :  { %13314 = vmatpush2.bf16.msra.mxu0 %v20887_v24  ;;  %v20949_v24 = vld [vmem:[#allocation2 + $0x12c] ss:$116 sps:$4 sm:$0xff]  }
 0x9bb   :  { %13355 = vmatpush2.bf16.msra.mxu1 %v20890_v19  ;;  %13315 = vmatprep.subr.bf16.mxu0 %v20895_v8  ;;  %v20952_v19 = vld [vmem:[#allocation2 + $0xfac] ss:$116 sps:$4 sm:$0xff]   ;;  %v20947_v8 = vld [vmem:[#allocation2 + $0x128] ss:$116 sps:$4 sm:$0xff]  }
 0x9bc   :  { %13356 = vmatprep.subr.bf16.mxu1 %v20898_v58  ;;  %v20950_v58 = vld [vmem:[#allocation2 + $0xfa8] ss:$116 sps:$4 sm:$0xff]  }
 0x9be   :  { %13316 = vmatpush2.bf16.msra.mxu0 %v20893_v44  ;;  %v20955_v44 = vld [vmem:[#allocation2 + $0x44] ss:$116 sps:$4 sm:$0xff]  }
 0x9bf   :  { %13357 = vmatpush2.bf16.msra.mxu1 %v20896_v51  ;;  %13317 = vmatprep.subr.bf16.mxu0 %v20901_v4  ;;  %v20958_v51 = vld [vmem:[#allocation2 + $0xec4] ss:$116 sps:$4 sm:$0xff]   ;;  %v20953_v4 = vld [vmem:[#allocation2 + $0x40] ss:$116 sps:$4 sm:$0xff]  }
 0x9c0   :  { %13358 = vmatprep.subr.bf16.mxu1 %v20904_v12  ;;  %v20956_v12 = vld [vmem:[#allocation2 + $0xec0] ss:$116 sps:$4 sm:$0xff]  }
 0x9c2   :  { %13318 = vmatpush2.bf16.msra.mxu0 %v20899_v56  ;;  %v20961_v56 = vld [vmem:[#allocation2 + $0xddc] ss:$116 sps:$4 sm:$0xff]  }
 0x9c3   :  { %13359 = vmatpush2.bf16.msra.mxu1 %v20902_v49  ;;  %13319 = vmatprep.subr.bf16.mxu0 %v20907_v28  ;;  %v20964_v49 = vld [vmem:[#allocation2 + $0x1c5c] ss:$116 sps:$4 sm:$0xff]   ;;  %v20959_v28 = vld [vmem:[#allocation2 + $0xdd8] ss:$116 sps:$4 sm:$0xff]  }
 0x9c4   :  { %13360 = vmatprep.subr.bf16.mxu1 %v20910_v9  ;;  %v20962_v9 = vld [vmem:[#allocation2 + $0x1c58] ss:$116 sps:$4 sm:$0xff]  }
 0x9c6   :  { %13320 = vmatpush2.bf16.msra.mxu0 %v20905_v26  ;;  %v20967_v26 = vld [vmem:[#allocation2 + $0xcf4] ss:$116 sps:$4 sm:$0xff]  }
 0x9c7   :  { %13361 = vmatpush2.bf16.msra.mxu1 %v20908_v2  ;;  %14184 = vmatprep.subr.bf16.mxu0 %v20913_v16  ;;  %v20970_v2 = vld [vmem:[#allocation2 + $0x1b74] ss:$116 sps:$4 sm:$0xff]   ;;  %v20965_v16 = vld [vmem:[#allocation2 + $0xcf0] ss:$116 sps:$4 sm:$0xff]  }
 0x9c8   :  { %14225 = vmatprep.subr.bf16.mxu1 %v20916_v39  ;;  %v20968_v39 = vld [vmem:[#allocation2 + $0x1b70] ss:$116 sps:$4 sm:$0xff]  }
 0x9c9   :  { %v12264_v15 = vpop.f32.mrf.mxu0  ;;  %13322 = vmatmul.mubr.bf16.vlgmr.msra.gmra.mxu0 %v27615_v47 }
 0x9ca   :  { %v12305_v55 = vpop.f32.mrf.mxu1  ;;  %13363 = vmatmul.mubr.bf16.vlgmr.msra.gmra.mxu1 %v27617_v38  ;;  %v12265_v40 = vadd.f32 %v12264_v15, %v11573_v43  ;;  %14185 = vmatpush1.bf16.msra.mxu0 %v20911_v54  ;;  %v20973_v54 = vld [vmem:[#allocation2 + $0xc0c] ss:$116 sps:$4 sm:$0xff]   ;;  %v20985_v15 = vld [vmem:[#allocation2 + $0xa3c] ss:$116 sps:$4 sm:$0xff]  }
 0x9cb   :  { %14226 = vmatpush1.bf16.msra.mxu1 %v20914_v45  ;;  %v12266_v23 = vpop.f32.mrf.mxu0  ;;  %14186 = vmatprep.subr.bf16.mxu0 %v20919_v50  ;;  %v20976_v43 = vld [vmem:[#allocation2 + $0x1a8c] ss:$116 sps:$4 sm:$0xff]   ;;  %v20971_v45 = vld [vmem:[#allocation2 + $0xc08] ss:$116 sps:$4 sm:$0xff]  }
 0x9cc   :  { %v12307_v31 = vpop.f32.mrf.mxu1  ;;  %14227 = vmatprep.subr.bf16.mxu1 %v20922_v25  ;;  %v27712_v59 = vadd.f32 %v12305_v55, %v12265_v40  ;;  %v12267_v30 = vadd.f32 %v12266_v23, %v11577_v32  ;;  %14216 = vmatprep.mubr.bf16.mxu0 %v27619_v60  ;;  %v20974_v50 = vld [vmem:[#allocation2 + $0x1a88] ss:$116 sps:$4 sm:$0xff]   ;;  %v20979_v25 = vld [vmem:[#allocation2 + $0xb24] ss:$116 sps:$4 sm:$0xff]  }
 0x9cd   :  { %14257 = vmatprep.mubr.bf16.mxu1 %v27621_v46  ;;  %v12268_v63 = vpop.f32.mrf.mxu0  ;;  %v20982_v32 = vld [vmem:[#allocation2 + $0x19a4] ss:$116 sps:$4 sm:$0xff]   ;;  %v20988_v55 = vld [vmem:[#allocation2 + $0x18bc] ss:$116 sps:$4 sm:$0xff]  }
 0x9ce   :  { %v12309_v22 = vpop.f32.mrf.mxu1  ;;  %v27716_v33 = vadd.f32 %v12307_v31, %v12267_v30  ;;  %14187 = vmatpush1.bf16.msra.mxu0 %v20917_v37  ;;  %v20977_v37 = vld [vmem:[#allocation2 + $0xb20] ss:$116 sps:$4 sm:$0xff]   ;;  %v20983_v40 = vld [vmem:[#allocation2 + $0xa38] ss:$116 sps:$4 sm:$0xff]   ;;  %v20992_v30 = vld [vmem:[#allocation2 + $0x17d0] ss:$116 sps:$4 sm:$0xff]  }
 0x9cf   :  { %14228 = vmatpush1.bf16.msra.mxu1 %v20920_v13  ;;  %v12269_v35 = vpop.f32.mrf.mxu0  ;;  %14188 = vmatprep.subr.bf16.mxu0 %v20925_v53  ;;  %v20980_v13 = vld [vmem:[#allocation2 + $0x19a0] ss:$116 sps:$4 sm:$0xff]   ;;  %v20986_v23 = vld [vmem:[#allocation2 + $0x18b8] ss:$116 sps:$4 sm:$0xff]   ;;  %v20995_v63 = vld [vmem:[#allocation2 + $0x868] ss:$116 sps:$4 sm:$0xff]  }
 0x9d0   :  { %v12310_v7 = vpop.f32.mrf.mxu1  ;;  %14229 = vmatprep.subr.bf16.mxu1 %v20928_v10  ;;  %v12398_v5 = vcombine.low %v27712_v59, %v27716_v33  ;;  %v20991_v31 = vld [vmem:[#allocation2 + $0x954] ss:$116 sps:$4 sm:$0xff]   ;;  %v20989_v10 = vld [vmem:[#allocation2 + $0x950] ss:$116 sps:$4 sm:$0xff]  }
 0x9d1   :  { %v20994_v53 = vld [vmem:[#allocation2 + $0x17d4] ss:$116 sps:$4 sm:$0xff]   ;;  %v21003_v35 = vld [vmem:[#allocation2 + $0x784] ss:$116 sps:$4 sm:$0xff]   ;;  %v21039_v59 = vld [vmem:[#allocation2 + $0x21c] ss:$116 sps:$4 sm:$0xff]  }
 0x9d2   :  { %14189 = vmatpush1.bf16.msra.mxu0 %v20923_v62  ;;  %v20997_v62 = vld [vmem:[#allocation2 + $0x86c] ss:$116 sps:$4 sm:$0xff]   ;;  %v20998_v22 = vld [vmem:[#allocation2 + $0x16e8] ss:$116 sps:$4 sm:$0xff]   ;;  %v21006_v7 = vld [vmem:[#allocation2 + $0x1604] ss:$116 sps:$4 sm:$0xff]  }
 0x9d3   :  { %14230 = vmatpush1.bf16.msra.mxu1 %v20926_v29  ;;  %14190 = vmatprep.subr.bf16.mxu0 %v20931_v3  ;;  %v21000_v29 = vld [vmem:[#allocation2 + $0x16ec] ss:$116 sps:$4 sm:$0xff]   ;;  %v21042_v33 = vld [vmem:[#allocation2 + $0x109c] ss:$116 sps:$4 sm:$0xff]  }
 0x9d4   :  { %14231 = vmatprep.subr.bf16.mxu1 %v20934_v27  ;;  %v21001_v3 = vld [vmem:[#allocation2 + $0x780] ss:$116 sps:$4 sm:$0xff]  }
 0x9d5   :  { %v21004_v27 = vld [vmem:[#allocation2 + $0x1600] ss:$116 sps:$4 sm:$0xff]  }
 0x9d6   :  { %14191 = vmatpush1.bf16.msra.mxu0 %v20929_v36  ;;  %v21009_v36 = vld [vmem:[#allocation2 + $0x6a4] ss:$116 sps:$4 sm:$0xff]  }
 0x9d7   :  { %14232 = vmatpush1.bf16.msra.mxu1 %v20932_v48  ;;  %14192 = vmatprep.subr.bf16.mxu0 %v20937_v34  ;;  %v21012_v48 = vld [vmem:[#allocation2 + $0x1524] ss:$116 sps:$4 sm:$0xff]   ;;  %v11581_v34 = vrot.slane %v27704_v41, %v26776_v52 }
 0x9d8   :  { %14233 = vmatprep.subr.bf16.mxu1 %v20940_v42  ;;  %v21007_v42 = vld [vmem:[#allocation2 + $0x6a0] ss:$116 sps:$4 sm:$0xff]  }
 0x9da   :  { %14193 = vmatpush1.bf16.msra.mxu0 %v20935_v14  ;;  %v21010_v14 = vld [vmem:[#allocation2 + $0x1520] ss:$116 sps:$4 sm:$0xff]  }
 0x9db   :  { %14234 = vmatpush1.bf16.msra.mxu1 %v20938_v0  ;;  %14194 = vmatprep.subr.bf16.mxu0 %v20943_v6  ;;  %v21015_v0 = vld [vmem:[#allocation2 + $0x5bc] ss:$116 sps:$4 sm:$0xff]  }
 0x9dc   :  { %14235 = vmatprep.subr.bf16.mxu1 %v20946_v18  ;;  %v21018_v6 = vld [vmem:[#allocation2 + $0x143c] ss:$116 sps:$4 sm:$0xff]   ;;  %v11585_v18 = vrot.slane %v27704_v41, %v26783_v57 }
 0x9de   :  { %14195 = vmatpush1.bf16.msra.mxu0 %v20941_v20 }
 0x9df   :  { %14236 = vmatpush1.bf16.msra.mxu1 %v20944_v21  ;;  %14196 = vmatprep.subr.bf16.mxu0 %v20949_v24 }
 0x9e0   :  { %14237 = vmatprep.subr.bf16.mxu1 %v20952_v19  ;;  %v21013_v19 = vld [vmem:[#allocation2 + $0x5b8] ss:$116 sps:$4 sm:$0xff]  }
 0x9e2   :  { %14197 = vmatpush1.bf16.msra.mxu0 %v20947_v8  ;;  %v21016_v8 = vld [vmem:[#allocation2 + $0x1438] ss:$116 sps:$4 sm:$0xff]  }
 0x9e3   :  { %14238 = vmatpush1.bf16.msra.mxu1 %v20950_v58  ;;  %14198 = vmatprep.subr.bf16.mxu0 %v20955_v44 }
 0x9e4   :  { %14239 = vmatprep.subr.bf16.mxu1 %v20958_v51  ;;  %v21021_v51 = vld [vmem:[#allocation2 + $0x4d4] ss:$116 sps:$4 sm:$0xff]  }
 0x9e6   :  { %14199 = vmatpush1.bf16.msra.mxu0 %v20953_v4  ;;  %v21024_v4 = vld [vmem:[#allocation2 + $0x1354] ss:$116 sps:$4 sm:$0xff]  }
 0x9e7   :  { %14240 = vmatpush1.bf16.msra.mxu1 %v20956_v12  ;;  %14200 = vmatprep.subr.bf16.mxu0 %v20961_v56 }
 0x9e8   :  { %14241 = vmatprep.subr.bf16.mxu1 %v20964_v49 }
 0x9ea   :  { %14201 = vmatpush2.bf16.msra.mxu0 %v20959_v28 }
 0x9eb   :  { %14242 = vmatpush2.bf16.msra.mxu1 %v20962_v9  ;;  %14202 = vmatprep.subr.bf16.mxu0 %v20967_v26  ;;  %v21019_v9 = vld [vmem:[#allocation2 + $0x4d0] ss:$116 sps:$4 sm:$0xff]  }
 0x9ec   :  { %14243 = vmatprep.subr.bf16.mxu1 %v20970_v2  ;;  %v21022_v26 = vld [vmem:[#allocation2 + $0x1350] ss:$116 sps:$4 sm:$0xff]  }
 0x9ee   :  { %14203 = vmatpush2.bf16.msra.mxu0 %v20965_v16 }
 0x9ef   :  { %14244 = vmatpush2.bf16.msra.mxu1 %v20968_v39  ;;  %14204 = vmatprep.subr.bf16.mxu0 %v20973_v54  ;;  %v21027_v39 = vld [vmem:[#allocation2 + $0x3ec] ss:$116 sps:$4 sm:$0xff]  }
 0x9f0   :  { %14245 = vmatprep.subr.bf16.mxu1 %v20976_v43  ;;  %v21030_v54 = vld [vmem:[#allocation2 + $0x126c] ss:$116 sps:$4 sm:$0xff]  }
 0x9f2   :  { %14205 = vmatpush2.bf16.msra.mxu0 %v20971_v45  ;;  %v12406_v45 = vrot.slane %v12398_v5, %v24515_v17  ;;  %v21037_v5 = vld [vmem:[#allocation2 + $0x218] ss:$116 sps:$4 sm:$0xff]  }
 0x9f3   :  { %14246 = vmatpush2.bf16.msra.mxu1 %v20974_v50  ;;  %14206 = vmatprep.subr.bf16.mxu0 %v20979_v25  ;;  %v21025_v25 = vld [vmem:[#allocation2 + $0x3e8] ss:$116 sps:$4 sm:$0xff]  }
 0x9f4   :  { %14247 = vmatprep.subr.bf16.mxu1 %v20982_v32  ;;  %v21028_v32 = vld [vmem:[#allocation2 + $0x1268] ss:$116 sps:$4 sm:$0xff]  }
 0x9f6   :  { %14207 = vmatpush2.bf16.msra.mxu0 %v20977_v37  ;;  %v21033_v37 = vld [vmem:[#allocation2 + $0x304] ss:$116 sps:$4 sm:$0xff]  }
 0x9f7   :  { %14248 = vmatpush2.bf16.msra.mxu1 %v20980_v13  ;;  %14208 = vmatprep.subr.bf16.mxu0 %v20985_v15  ;;  %v21036_v13 = vld [vmem:[#allocation2 + $0x1184] ss:$116 sps:$4 sm:$0xff]  }
 0x9f8   :  { %14249 = vmatprep.subr.bf16.mxu1 %v20988_v55  ;;  %v21031_v55 = vld [vmem:[#allocation2 + $0x300] ss:$116 sps:$4 sm:$0xff]  }
 0x9fa   :  { %14209 = vmatpush2.bf16.msra.mxu0 %v20983_v40  ;;  %v21034_v40 = vld [vmem:[#allocation2 + $0x1180] ss:$116 sps:$4 sm:$0xff]  }
 0x9fb   :  { %14250 = vmatpush2.bf16.msra.mxu1 %v20986_v23  ;;  %14210 = vmatprep.subr.bf16.mxu0 %v20991_v31  ;;  %v21040_v23 = vld [vmem:[#allocation2 + $0x1098] ss:$116 sps:$4 sm:$0xff]   ;;  %v21045_v31 = vld [vmem:[#allocation2 + $0x134] ss:$116 sps:$4 sm:$0xff]  }
 0x9fc   :  { %14251 = vmatprep.subr.bf16.mxu1 %v20994_v53  ;;  %v21048_v53 = vld [vmem:[#allocation2 + $0xfb4] ss:$116 sps:$4 sm:$0xff]  }
 0x9fe   :  { %14211 = vmatpush2.bf16.msra.mxu0 %v20989_v10  ;;  %v21043_v10 = vld [vmem:[#allocation2 + $0x130] ss:$116 sps:$4 sm:$0xff]  }
 0x9ff   :  { %14252 = vmatpush2.bf16.msra.mxu1 %v20992_v30  ;;  %14212 = vmatprep.subr.bf16.mxu0 %v20997_v62  ;;  %v21046_v30 = vld [vmem:[#allocation2 + $0xfb0] ss:$116 sps:$4 sm:$0xff]   ;;  %v21051_v62 = vld [vmem:[#allocation2 + $0x4c] ss:$116 sps:$4 sm:$0xff]  }
 0xa00   :  { %14253 = vmatprep.subr.bf16.mxu1 %v21000_v29  ;;  %v21054_v29 = vld [vmem:[#allocation2 + $0xecc] ss:$116 sps:$4 sm:$0xff]  }
 0xa02   :  { %14213 = vmatpush2.bf16.msra.mxu0 %v20995_v63  ;;  %v21049_v63 = vld [vmem:[#allocation2 + $0x48] ss:$116 sps:$4 sm:$0xff]  }
 0xa03   :  { %14254 = vmatpush2.bf16.msra.mxu1 %v20998_v22  ;;  %14214 = vmatprep.subr.bf16.mxu0 %v21003_v35  ;;  %v21052_v22 = vld [vmem:[#allocation2 + $0xec8] ss:$116 sps:$4 sm:$0xff]   ;;  %v21057_v35 = vld [vmem:[#allocation2 + $0xde4] ss:$116 sps:$4 sm:$0xff]  }
 0xa04   :  { %14255 = vmatprep.subr.bf16.mxu1 %v21006_v7  ;;  %v21060_v7 = vld [vmem:[#allocation2 + $0x1c64] ss:$116 sps:$4 sm:$0xff]  }
 0xa06   :  { %14215 = vmatpush2.bf16.msra.mxu0 %v21001_v3  ;;  %v21055_v3 = vld [vmem:[#allocation2 + $0xde0] ss:$116 sps:$4 sm:$0xff]  }
 0xa07   :  { %14256 = vmatpush2.bf16.msra.mxu1 %v21004_v27  ;;  %14266 = vmatprep.subr.bf16.mxu0 %v21009_v36  ;;  %v21058_v27 = vld [vmem:[#allocation2 + $0x1c60] ss:$116 sps:$4 sm:$0xff]   ;;  %v21063_v36 = vld [vmem:[#allocation2 + $0xcfc] ss:$116 sps:$4 sm:$0xff]  }
 0xa08   :  { %14307 = vmatprep.subr.bf16.mxu1 %v21012_v48  ;;  %v21066_v48 = vld [vmem:[#allocation2 + $0x1b7c] ss:$116 sps:$4 sm:$0xff]  }
 0xa09   :  { %v12346_v20 = vpop.f32.mrf.mxu0  ;;  %14217 = vmatmul.mubr.bf16.vlgmr.msra.gmra.mxu0 %v27615_v47 }
 0xa0a   :  { %v12387_v21 = vpop.f32.mrf.mxu1  ;;  %14258 = vmatmul.mubr.bf16.vlgmr.msra.gmra.mxu1 %v27617_v38  ;;  %v12347_v24 = vadd.f32 %v12346_v20, %v11581_v34  ;;  %14267 = vmatpush1.bf16.msra.mxu0 %v21007_v42  ;;  %v21061_v34 = vld [vmem:[#allocation2 + $0xcf8] ss:$116 sps:$4 sm:$0xff]  }
 0xa0b   :  { %14308 = vmatpush1.bf16.msra.mxu1 %v21010_v14  ;;  %v12348_v58 = vpop.f32.mrf.mxu0  ;;  %14268 = vmatprep.subr.bf16.mxu0 %v21015_v0  ;;  %v21064_v42 = vld [vmem:[#allocation2 + $0x1b78] ss:$116 sps:$4 sm:$0xff]   ;;  %v21069_v14 = vld [vmem:[#allocation2 + $0xc14] ss:$116 sps:$4 sm:$0xff]  }
 0xa0c   :  { %v12389_v44 = vpop.f32.mrf.mxu1  ;;  %14309 = vmatprep.subr.bf16.mxu1 %v21018_v6  ;;  %v12388_v12 = vadd.f32 %v12387_v21, %v12347_v24  ;;  %v12349_v56 = vadd.f32 %v12348_v58, %v11585_v18  ;;  %14298 = vmatprep.mubr.bf16.mxu0 %v27619_v60  ;;  %v21072_v0 = vld [vmem:[#allocation2 + $0x1a94] ss:$116 sps:$4 sm:$0xff]   ;;  %v21067_v6 = vld [vmem:[#allocation2 + $0xc10] ss:$116 sps:$4 sm:$0xff]   ;;  %v21075_v20 = vld [vmem:[#allocation2 + $0xb2c] ss:$116 sps:$4 sm:$0xff]  }
 0xa0d   :  { %14339 = vmatprep.mubr.bf16.mxu1 %v27621_v46  ;;  %v12350_v41 = vpop.f32.mrf.mxu0  ;;  %v21070_v18 = vld [vmem:[#allocation2 + $0x1a90] ss:$116 sps:$4 sm:$0xff]   ;;  %v21078_v21 = vld [vmem:[#allocation2 + $0x19ac] ss:$116 sps:$4 sm:$0xff]   ;;  %v21073_v24 = vld [vmem:[#allocation2 + $0xb28] ss:$116 sps:$4 sm:$0xff]  }
 0xa0e   :  { %v12391_v49 = vpop.f32.mrf.mxu1  ;;  %v12390_v28 = vadd.f32 %v12389_v44, %v12349_v56  ;;  %14269 = vmatpush1.bf16.msra.mxu0 %v21013_v19  ;;  %v21076_v19 = vld [vmem:[#allocation2 + $0x19a8] ss:$116 sps:$4 sm:$0xff]   ;;  %v21084_v58 = vld [vmem:[#allocation2 + $0x18c4] ss:$116 sps:$4 sm:$0xff]   ;;  %v21079_v44 = vld [vmem:[#allocation2 + $0xa40] ss:$116 sps:$4 sm:$0xff]  }
 0xa0f   :  { %14310 = vmatpush1.bf16.msra.mxu1 %v21016_v8  ;;  %v12351_v2 = vpop.f32.mrf.mxu0  ;;  %14270 = vmatprep.subr.bf16.mxu0 %v21021_v51  ;;  %v21081_v8 = vld [vmem:[#allocation2 + $0xa44] ss:$116 sps:$4 sm:$0xff]   ;;  %v21082_v51 = vld [vmem:[#allocation2 + $0x18c0] ss:$116 sps:$4 sm:$0xff]  }
 0xa10   :  { %v12392_v16 = vpop.f32.mrf.mxu1  ;;  %14311 = vmatprep.subr.bf16.mxu1 %v21024_v4  ;;  %v12399_v43 = vcombine.low %v12388_v12, %v12390_v28  ;;  %v21087_v4 = vld [vmem:[#allocation2 + $0x95c] ss:$116 sps:$4 sm:$0xff]   ;;  %v21085_v56 = vld [vmem:[#allocation2 + $0x958] ss:$116 sps:$4 sm:$0xff]   ;;  %v21093_v49 = vld [vmem:[#allocation2 + $0x874] ss:$116 sps:$4 sm:$0xff]  }
 0xa11   :  { %v21090_v12 = vld [vmem:[#allocation2 + $0x17dc] ss:$116 sps:$4 sm:$0xff]   ;;  %v21088_v41 = vld [vmem:[#allocation2 + $0x17d8] ss:$116 sps:$4 sm:$0xff]   ;;  %v21096_v28 = vld [vmem:[#allocation2 + $0x16f4] ss:$116 sps:$4 sm:$0xff]  }
 0xa12   :  { %v12413_v50 = vrot.slane %v12399_v43, %v24515_v17  ;;  %14271 = vmatpush1.bf16.msra.mxu0 %v21019_v9  ;;  %v21091_v9 = vld [vmem:[#allocation2 + $0x870] ss:$116 sps:$4 sm:$0xff]   ;;  %v21099_v2 = vld [vmem:[#allocation2 + $0x78c] ss:$116 sps:$4 sm:$0xff]  }
 0xa13   :  { %14312 = vmatpush1.bf16.msra.mxu1 %v21022_v26  ;;  %14272 = vmatprep.subr.bf16.mxu0 %v21027_v39  ;;  %v21094_v26 = vld [vmem:[#allocation2 + $0x16f0] ss:$116 sps:$4 sm:$0xff]   ;;  %v21102_v16 = vld [vmem:[#allocation2 + $0x160c] ss:$116 sps:$4 sm:$0xff]   ;;  %v21097_v39 = vld [vmem:[#allocation2 + $0x788] ss:$116 sps:$4 sm:$0xff]  }
 0xa14   :  { %14313 = vmatprep.subr.bf16.mxu1 %v21030_v54  ;;  %v12414_v15 = vcombine.low %v12406_v45, %v12413_v50  ;;  %v21100_v54 = vld [vmem:[#allocation2 + $0x1608] ss:$116 sps:$4 sm:$0xff]   ;;  %v27736_v43 = vld [vmem:[%s27846_s8 + $0xc] sm:$0xf] }
 0xa15   :  { %v21105_v45 = vld [vmem:[#allocation2 + $0x6ac] ss:$116 sps:$4 sm:$0xff]  }
 0xa16   :  { %12416 = vst [vmem:[#allocation4 + $0x10] sm:$0xff] %v12414_v15  ;;  %14273 = vmatpush1.bf16.msra.mxu0 %v21025_v25  ;;  %v21108_v50 = vld [vmem:[#allocation2 + $0x152c] ss:$116 sps:$4 sm:$0xff]   ;;  %v12550_v25 = vrot.slane %v27736_v43, %v25260_v61  ;;  %v21114_v15 = vld [vmem:[#allocation2 + $0x1444] ss:$116 sps:$4 sm:$0xff]  }
 0xa17   :  { %14314 = vmatpush1.bf16.msra.mxu1 %v21028_v32  ;;  %14274 = vmatprep.subr.bf16.mxu0 %v21033_v37  ;;  %v21103_v32 = vld [vmem:[#allocation2 + $0x6a8] ss:$116 sps:$4 sm:$0xff]  }
 0xa18   :  { %14315 = vmatprep.subr.bf16.mxu1 %v21036_v13  ;;  %v21106_v37 = vld [vmem:[#allocation2 + $0x1528] ss:$116 sps:$4 sm:$0xff]   ;;  %v21111_v13 = vld [vmem:[#allocation2 + $0x5c4] ss:$116 sps:$4 sm:$0xff]  }
 0xa1a   :  { %14275 = vmatpush1.bf16.msra.mxu0 %v21031_v55  ;;  %v12554_v55 = vrot.slane %v27736_v43, %v25269_v1 }
 0xa1b   :  { %14316 = vmatpush1.bf16.msra.mxu1 %v21034_v40  ;;  %14276 = vmatprep.subr.bf16.mxu0 %v21039_v59 }
 0xa1c   :  { %14317 = vmatprep.subr.bf16.mxu1 %v21042_v33 }
 0xa1e   :  { %14277 = vmatpush1.bf16.msra.mxu0 %v21037_v5  ;;  %v21109_v5 = vld [vmem:[#allocation2 + $0x5c0] ss:$116 sps:$4 sm:$0xff]  }
 0xa1f   :  { %14318 = vmatpush1.bf16.msra.mxu1 %v21040_v23  ;;  %14278 = vmatprep.subr.bf16.mxu0 %v21045_v31  ;;  %v21112_v23 = vld [vmem:[#allocation2 + $0x1440] ss:$116 sps:$4 sm:$0xff]  }
 0xa20   :  { %14319 = vmatprep.subr.bf16.mxu1 %v21048_v53 }
 0xa22   :  { %14279 = vmatpush1.bf16.msra.mxu0 %v21043_v10  ;;  %v21117_v10 = vld [vmem:[#allocation2 + $0x4dc] ss:$116 sps:$4 sm:$0xff]  }
 0xa23   :  { %14320 = vmatpush1.bf16.msra.mxu1 %v21046_v30  ;;  %14280 = vmatprep.subr.bf16.mxu0 %v21051_v62  ;;  %v21120_v30 = vld [vmem:[#allocation2 + $0x135c] ss:$116 sps:$4 sm:$0xff]  }
 0xa24   :  { %14321 = vmatprep.subr.bf16.mxu1 %v21054_v29 }
 0xa26   :  { %14281 = vmatpush1.bf16.msra.mxu0 %v21049_v63 }
 0xa27   :  { %14322 = vmatpush1.bf16.msra.mxu1 %v21052_v22  ;;  %14282 = vmatprep.subr.bf16.mxu0 %v21057_v35 }
 0xa28   :  { %14323 = vmatprep.subr.bf16.mxu1 %v21060_v7  ;;  %v21115_v7 = vld [vmem:[#allocation2 + $0x4d8] ss:$116 sps:$4 sm:$0xff]  }
 0xa2a   :  { %14283 = vmatpush2.bf16.msra.mxu0 %v21055_v3  ;;  %v21118_v3 = vld [vmem:[#allocation2 + $0x1358] ss:$116 sps:$4 sm:$0xff]  }
 0xa2b   :  { %14324 = vmatpush2.bf16.msra.mxu1 %v21058_v27  ;;  %14284 = vmatprep.subr.bf16.mxu0 %v21063_v36 }
 0xa2c   :  { %14325 = vmatprep.subr.bf16.mxu1 %v21066_v48  ;;  %v21123_v48 = vld [vmem:[#allocation2 + $0x3f4] ss:$116 sps:$4 sm:$0xff]  }
 0xa2e   :  { %14285 = vmatpush2.bf16.msra.mxu0 %v21061_v34  ;;  %v21126_v34 = vld [vmem:[#allocation2 + $0x1274] ss:$116 sps:$4 sm:$0xff]  }
 0xa2f   :  { %14326 = vmatpush2.bf16.msra.mxu1 %v21064_v42  ;;  %14286 = vmatprep.subr.bf16.mxu0 %v21069_v14  ;;  %v21121_v14 = vld [vmem:[#allocation2 + $0x3f0] ss:$116 sps:$4 sm:$0xff]  }
 0xa30   :  { %14327 = vmatprep.subr.bf16.mxu1 %v21072_v0  ;;  %v21124_v0 = vld [vmem:[#allocation2 + $0x1270] ss:$116 sps:$4 sm:$0xff]  }
 0xa32   :  { %14287 = vmatpush2.bf16.msra.mxu0 %v21067_v6  ;;  %v21129_v6 = vld [vmem:[#allocation2 + $0x30c] ss:$116 sps:$4 sm:$0xff]  }
 0xa33   :  { %14328 = vmatpush2.bf16.msra.mxu1 %v21070_v18  ;;  %14288 = vmatprep.subr.bf16.mxu0 %v21075_v20  ;;  %v21132_v18 = vld [vmem:[#allocation2 + $0x118c] ss:$116 sps:$4 sm:$0xff]   ;;  %v21127_v20 = vld [vmem:[#allocation2 + $0x308] ss:$116 sps:$4 sm:$0xff]  }
 0xa34   :  { %14329 = vmatprep.subr.bf16.mxu1 %v21078_v21  ;;  %v21130_v21 = vld [vmem:[#allocation2 + $0x1188] ss:$116 sps:$4 sm:$0xff]  }
 0xa36   :  { %14289 = vmatpush2.bf16.msra.mxu0 %v21073_v24  ;;  %v21135_v24 = vld [vmem:[#allocation2 + $0x224] ss:$116 sps:$4 sm:$0xff]  }
 0xa37   :  { %14330 = vmatpush2.bf16.msra.mxu1 %v21076_v19  ;;  %14290 = vmatprep.subr.bf16.mxu0 %v21081_v8  ;;  %v21138_v19 = vld [vmem:[#allocation2 + $0x10a4] ss:$116 sps:$4 sm:$0xff]   ;;  %v21133_v8 = vld [vmem:[#allocation2 + $0x220] ss:$116 sps:$4 sm:$0xff]  }
 0xa38   :  { %14331 = vmatprep.subr.bf16.mxu1 %v21084_v58  ;;  %v21136_v58 = vld [vmem:[#allocation2 + $0x10a0] ss:$116 sps:$4 sm:$0xff]  }
 0xa3a   :  { %14291 = vmatpush2.bf16.msra.mxu0 %v21079_v44  ;;  %v21141_v44 = vld [vmem:[#allocation2 + $0x13c] ss:$116 sps:$4 sm:$0xff]  }
 0xa3b   :  { %14332 = vmatpush2.bf16.msra.mxu1 %v21082_v51  ;;  %14292 = vmatprep.subr.bf16.mxu0 %v21087_v4  ;;  %v21144_v51 = vld [vmem:[#allocation2 + $0xfbc] ss:$116 sps:$4 sm:$0xff]   ;;  %v21139_v4 = vld [vmem:[#allocation2 + $0x138] ss:$116 sps:$4 sm:$0xff]  }
 0xa3c   :  { %14333 = vmatprep.subr.bf16.mxu1 %v21090_v12  ;;  %v21142_v12 = vld [vmem:[#allocation2 + $0xfb8] ss:$116 sps:$4 sm:$0xff]  }
 0xa3e   :  { %14293 = vmatpush2.bf16.msra.mxu0 %v21085_v56  ;;  %v21147_v56 = vld [vmem:[#allocation2 + $0x54] ss:$116 sps:$4 sm:$0xff]  }
 0xa3f   :  { %14334 = vmatpush2.bf16.msra.mxu1 %v21088_v41  ;;  %14294 = vmatprep.subr.bf16.mxu0 %v21093_v49  ;;  %v21150_v41 = vld [vmem:[#allocation2 + $0xed4] ss:$116 sps:$4 sm:$0xff]   ;;  %v21145_v49 = vld [vmem:[#allocation2 + $0x50] ss:$116 sps:$4 sm:$0xff]  }
 0xa40   :  { %14335 = vmatprep.subr.bf16.mxu1 %v21096_v28  ;;  %v21148_v28 = vld [vmem:[#allocation2 + $0xed0] ss:$116 sps:$4 sm:$0xff]  }
 0xa42   :  { %14295 = vmatpush2.bf16.msra.mxu0 %v21091_v9  ;;  %v21153_v9 = vld [vmem:[#allocation2 + $0xdec] ss:$116 sps:$4 sm:$0xff]  }
 0xa43   :  { %14336 = vmatpush2.bf16.msra.mxu1 %v21094_v26  ;;  %14296 = vmatprep.subr.bf16.mxu0 %v21099_v2  ;;  %v21156_v26 = vld [vmem:[#allocation2 + $0x1c6c] ss:$116 sps:$4 sm:$0xff]   ;;  %v21151_v2 = vld [vmem:[#allocation2 + $0xde8] ss:$116 sps:$4 sm:$0xff]  }
 0xa44   :  { %14337 = vmatprep.subr.bf16.mxu1 %v21102_v16  ;;  %v21154_v16 = vld [vmem:[#allocation2 + $0x1c68] ss:$116 sps:$4 sm:$0xff]  }
 0xa46   :  { %14297 = vmatpush2.bf16.msra.mxu0 %v21097_v39  ;;  %v21159_v39 = vld [vmem:[#allocation2 + $0xd04] ss:$116 sps:$4 sm:$0xff]  }
 0xa47   :  { %14338 = vmatpush2.bf16.msra.mxu1 %v21100_v54  ;;  %15161 = vmatprep.subr.bf16.mxu0 %v21105_v45  ;;  %v21162_v54 = vld [vmem:[#allocation2 + $0x1b84] ss:$116 sps:$4 sm:$0xff]   ;;  %v21157_v45 = vld [vmem:[#allocation2 + $0xd00] ss:$116 sps:$4 sm:$0xff]  }
 0xa48   :  { %15202 = vmatprep.subr.bf16.mxu1 %v21108_v50  ;;  %v21160_v50 = vld [vmem:[#allocation2 + $0x1b80] ss:$116 sps:$4 sm:$0xff]  }
 0xa49   :  { %v13241_v40 = vpop.f32.mrf.mxu0  ;;  %14299 = vmatmul.mubr.bf16.vlgmr.msra.gmra.mxu0 %v27615_v47 }
 0xa4a   :  { %v13282_v59 = vpop.f32.mrf.mxu1  ;;  %14340 = vmatmul.mubr.bf16.vlgmr.msra.gmra.mxu1 %v27617_v38  ;;  %v13242_v33 = vadd.f32 %v13241_v40, %v12550_v25  ;;  %15162 = vmatpush1.bf16.msra.mxu0 %v21103_v32  ;;  %v21165_v25 = vld [vmem:[#allocation2 + $0xc1c] ss:$116 sps:$4 sm:$0xff]  }
 0xa4b   :  { %15203 = vmatpush1.bf16.msra.mxu1 %v21106_v37  ;;  %v13243_v31 = vpop.f32.mrf.mxu0  ;;  %15163 = vmatprep.subr.bf16.mxu0 %v21111_v13  ;;  %v21168_v32 = vld [vmem:[#allocation2 + $0x1a9c] ss:$116 sps:$4 sm:$0xff]   ;;  %v21163_v37 = vld [vmem:[#allocation2 + $0xc18] ss:$116 sps:$4 sm:$0xff]  }
 0xa4c   :  { %v13284_v53 = vpop.f32.mrf.mxu1  ;;  %15204 = vmatprep.subr.bf16.mxu1 %v21114_v15  ;;  %v27744_v62 = vadd.f32 %v13282_v59, %v13242_v33  ;;  %v13244_v29 = vadd.f32 %v13243_v31, %v12554_v55  ;;  %15193 = vmatprep.mubr.bf16.mxu0 %v27619_v60  ;;  %v21166_v13 = vld [vmem:[#allocation2 + $0x1a98] ss:$116 sps:$4 sm:$0xff]   ;;  %v21171_v15 = vld [vmem:[#allocation2 + $0xb34] ss:$116 sps:$4 sm:$0xff]   ;;  %v21169_v40 = vld [vmem:[#allocation2 + $0xb30] ss:$116 sps:$4 sm:$0xff]  }
 0xa4d   :  { %15234 = vmatprep.mubr.bf16.mxu1 %v27621_v46  ;;  %v13245_v63 = vpop.f32.mrf.mxu0  ;;  %v21174_v55 = vld [vmem:[#allocation2 + $0x19b4] ss:$116 sps:$4 sm:$0xff]   ;;  %v21172_v59 = vld [vmem:[#allocation2 + $0x19b0] ss:$116 sps:$4 sm:$0xff]   ;;  %v21177_v33 = vld [vmem:[#allocation2 + $0xa4c] ss:$116 sps:$4 sm:$0xff]  }
 0xa4e   :  { %v13286_v22 = vpop.f32.mrf.mxu1  ;;  %v27748_v35 = vadd.f32 %v13284_v53, %v13244_v29  ;;  %15164 = vmatpush1.bf16.msra.mxu0 %v21109_v5  ;;  %v21180_v5 = vld [vmem:[#allocation2 + $0x18cc] ss:$116 sps:$4 sm:$0xff]   ;;  %v21178_v31 = vld [vmem:[#allocation2 + $0x18c8] ss:$116 sps:$4 sm:$0xff]   ;;  %v21183_v53 = vld [vmem:[#allocation2 + $0x964] ss:$116 sps:$4 sm:$0xff]  }
 0xa4f   :  { %15205 = vmatpush1.bf16.msra.mxu1 %v21112_v23  ;;  %v13246_v27 = vpop.f32.mrf.mxu0  ;;  %15165 = vmatprep.subr.bf16.mxu0 %v21117_v10  ;;  %v21175_v23 = vld [vmem:[#allocation2 + $0xa48] ss:$116 sps:$4 sm:$0xff]   ;;  %v21186_v10 = vld [vmem:[#allocation2 + $0x17e4] ss:$116 sps:$4 sm:$0xff]   ;;  %v21184_v29 = vld [vmem:[#allocation2 + $0x17e0] ss:$116 sps:$4 sm:$0xff]  }
 0xa50   :  { %v13287_v36 = vpop.f32.mrf.mxu1  ;;  %15206 = vmatprep.subr.bf16.mxu1 %v21120_v30  ;;  %v13375_v42 = vcombine.low %v27744_v62, %v27748_v35  ;;  %v21181_v30 = vld [vmem:[#allocation2 + $0x960] ss:$116 sps:$4 sm:$0xff]   ;;  %v21189_v63 = vld [vmem:[#allocation2 + $0x87c] ss:$116 sps:$4 sm:$0xff]  }
 0xa51   :  { %v21192_v22 = vld [vmem:[#allocation2 + $0x16fc] ss:$116 sps:$4 sm:$0xff]   ;;  %v21195_v27 = vld [vmem:[#allocation2 + $0x794] ss:$116 sps:$4 sm:$0xff]   ;;  %v21231_v62 = vld [vmem:[#allocation2 + $0x22c] ss:$116 sps:$4 sm:$0xff]  }
 0xa52   :  { %15166 = vmatpush1.bf16.msra.mxu0 %v21115_v7  ;;  %v21187_v7 = vld [vmem:[#allocation2 + $0x878] ss:$116 sps:$4 sm:$0xff]   ;;  %v21198_v36 = vld [vmem:[#allocation2 + $0x1614] ss:$116 sps:$4 sm:$0xff]  }
 0xa53   :  { %15207 = vmatpush1.bf16.msra.mxu1 %v21118_v3  ;;  %15167 = vmatprep.subr.bf16.mxu0 %v21123_v48  ;;  %v21190_v3 = vld [vmem:[#allocation2 + $0x16f8] ss:$116 sps:$4 sm:$0xff]   ;;  %v21193_v48 = vld [vmem:[#allocation2 + $0x790] ss:$116 sps:$4 sm:$0xff]  }
 0xa54   :  { %15208 = vmatprep.subr.bf16.mxu1 %v21126_v34  ;;  %v21196_v34 = vld [vmem:[#allocation2 + $0x1610] ss:$116 sps:$4 sm:$0xff]   ;;  %v21234_v35 = vld [vmem:[#allocation2 + $0x10ac] ss:$116 sps:$4 sm:$0xff]  }
 0xa56   :  { %15168 = vmatpush1.bf16.msra.mxu0 %v21121_v14  ;;  %v21201_v14 = vld [vmem:[#allocation2 + $0x6b4] ss:$116 sps:$4 sm:$0xff]  }
 0xa57   :  { %15209 = vmatpush1.bf16.msra.mxu1 %v21124_v0  ;;  %15169 = vmatprep.subr.bf16.mxu0 %v21129_v6  ;;  %v21204_v0 = vld [vmem:[#allocation2 + $0x1534] ss:$116 sps:$4 sm:$0xff]   ;;  %v12558_v6 = vrot.slane %v27736_v43, %v26776_v52 }
 0xa58   :  { %15210 = vmatprep.subr.bf16.mxu1 %v21132_v18  ;;  %v21199_v18 = vld [vmem:[#allocation2 + $0x6b0] ss:$116 sps:$4 sm:$0xff]  }
 0xa5a   :  { %15170 = vmatpush1.bf16.msra.mxu0 %v21127_v20  ;;  %v21202_v20 = vld [vmem:[#allocation2 + $0x1530] ss:$116 sps:$4 sm:$0xff]  }
 0xa5b   :  { %15211 = vmatpush1.bf16.msra.mxu1 %v21130_v21  ;;  %15171 = vmatprep.subr.bf16.mxu0 %v21135_v24  ;;  %v21207_v21 = vld [vmem:[#allocation2 + $0x5cc] ss:$116 sps:$4 sm:$0xff]  }
 0xa5c   :  { %15212 = vmatprep.subr.bf16.mxu1 %v21138_v19  ;;  %v21210_v24 = vld [vmem:[#allocation2 + $0x144c] ss:$116 sps:$4 sm:$0xff]   ;;  %v12562_v19 = vrot.slane %v27736_v43, %v26783_v57 }
 0xa5e   :  { %15172 = vmatpush1.bf16.msra.mxu0 %v21133_v8 }
 0xa5f   :  { %15213 = vmatpush1.bf16.msra.mxu1 %v21136_v58  ;;  %15173 = vmatprep.subr.bf16.mxu0 %v21141_v44 }
 0xa60   :  { %15214 = vmatprep.subr.bf16.mxu1 %v21144_v51  ;;  %v21205_v51 = vld [vmem:[#allocation2 + $0x5c8] ss:$116 sps:$4 sm:$0xff]  }
 0xa62   :  { %15174 = vmatpush1.bf16.msra.mxu0 %v21139_v4  ;;  %v21208_v4 = vld [vmem:[#allocation2 + $0x1448] ss:$116 sps:$4 sm:$0xff]  }
 0xa63   :  { %15215 = vmatpush1.bf16.msra.mxu1 %v21142_v12  ;;  %15175 = vmatprep.subr.bf16.mxu0 %v21147_v56 }
 0xa64   :  { %15216 = vmatprep.subr.bf16.mxu1 %v21150_v41  ;;  %v21213_v41 = vld [vmem:[#allocation2 + $0x4e4] ss:$116 sps:$4 sm:$0xff]  }
 0xa66   :  { %15176 = vmatpush1.bf16.msra.mxu0 %v21145_v49  ;;  %v21216_v49 = vld [vmem:[#allocation2 + $0x1364] ss:$116 sps:$4 sm:$0xff]  }
 0xa67   :  { %15217 = vmatpush1.bf16.msra.mxu1 %v21148_v28  ;;  %15177 = vmatprep.subr.bf16.mxu0 %v21153_v9 }
 0xa68   :  { %15218 = vmatprep.subr.bf16.mxu1 %v21156_v26 }
 0xa6a   :  { %15178 = vmatpush2.bf16.msra.mxu0 %v21151_v2 }
 0xa6b   :  { %15219 = vmatpush2.bf16.msra.mxu1 %v21154_v16  ;;  %15179 = vmatprep.subr.bf16.mxu0 %v21159_v39  ;;  %v21211_v16 = vld [vmem:[#allocation2 + $0x4e0] ss:$116 sps:$4 sm:$0xff]  }
 0xa6c   :  { %15220 = vmatprep.subr.bf16.mxu1 %v21162_v54  ;;  %v21214_v39 = vld [vmem:[#allocation2 + $0x1360] ss:$116 sps:$4 sm:$0xff]  }
 0xa6e   :  { %15180 = vmatpush2.bf16.msra.mxu0 %v21157_v45 }
 0xa6f   :  { %15221 = vmatpush2.bf16.msra.mxu1 %v21160_v50  ;;  %15181 = vmatprep.subr.bf16.mxu0 %v21165_v25  ;;  %v21219_v50 = vld [vmem:[#allocation2 + $0x3fc] ss:$116 sps:$4 sm:$0xff]  }
 0xa70   :  { %15222 = vmatprep.subr.bf16.mxu1 %v21168_v32  ;;  %v21222_v25 = vld [vmem:[#allocation2 + $0x127c] ss:$116 sps:$4 sm:$0xff]  }
 0xa72   :  { %15182 = vmatpush2.bf16.msra.mxu0 %v21163_v37  ;;  %v13383_v37 = vrot.slane %v13375_v42, %v24515_v17  ;;  %v21229_v42 = vld [vmem:[#allocation2 + $0x228] ss:$116 sps:$4 sm:$0xff]  }
 0xa73   :  { %15223 = vmatpush2.bf16.msra.mxu1 %v21166_v13  ;;  %15183 = vmatprep.subr.bf16.mxu0 %v21171_v15  ;;  %v21217_v15 = vld [vmem:[#allocation2 + $0x3f8] ss:$116 sps:$4 sm:$0xff]  }
 0xa74   :  { %15224 = vmatprep.subr.bf16.mxu1 %v21174_v55  ;;  %v21220_v55 = vld [vmem:[#allocation2 + $0x1278] ss:$116 sps:$4 sm:$0xff]  }
 0xa76   :  { %15184 = vmatpush2.bf16.msra.mxu0 %v21169_v40  ;;  %v21225_v40 = vld [vmem:[#allocation2 + $0x314] ss:$116 sps:$4 sm:$0xff]  }
 0xa77   :  { %15225 = vmatpush2.bf16.msra.mxu1 %v21172_v59  ;;  %15185 = vmatprep.subr.bf16.mxu0 %v21177_v33  ;;  %v21228_v59 = vld [vmem:[#allocation2 + $0x1194] ss:$116 sps:$4 sm:$0xff]  }
 0xa78   :  { %15226 = vmatprep.subr.bf16.mxu1 %v21180_v5  ;;  %v21223_v5 = vld [vmem:[#allocation2 + $0x310] ss:$116 sps:$4 sm:$0xff]  }
 0xa7a   :  { %15186 = vmatpush2.bf16.msra.mxu0 %v21175_v23  ;;  %v21226_v23 = vld [vmem:[#allocation2 + $0x1190] ss:$116 sps:$4 sm:$0xff]  }
 0xa7b   :  { %15227 = vmatpush2.bf16.msra.mxu1 %v21178_v31  ;;  %15187 = vmatprep.subr.bf16.mxu0 %v21183_v53  ;;  %v21232_v31 = vld [vmem:[#allocation2 + $0x10a8] ss:$116 sps:$4 sm:$0xff]   ;;  %v21237_v53 = vld [vmem:[#allocation2 + $0x144] ss:$116 sps:$4 sm:$0xff]  }
 0xa7c   :  { %15228 = vmatprep.subr.bf16.mxu1 %v21186_v10  ;;  %v21240_v10 = vld [vmem:[#allocation2 + $0xfc4] ss:$116 sps:$4 sm:$0xff]  }
 0xa7e   :  { %15188 = vmatpush2.bf16.msra.mxu0 %v21181_v30  ;;  %v21235_v30 = vld [vmem:[#allocation2 + $0x140] ss:$116 sps:$4 sm:$0xff]  }
 0xa7f   :  { %15229 = vmatpush2.bf16.msra.mxu1 %v21184_v29  ;;  %15189 = vmatprep.subr.bf16.mxu0 %v21189_v63  ;;  %v21238_v29 = vld [vmem:[#allocation2 + $0xfc0] ss:$116 sps:$4 sm:$0xff]   ;;  %v21243_v63 = vld [vmem:[#allocation2 + $0x5c] ss:$116 sps:$4 sm:$0xff]  }
 0xa80   :  { %15230 = vmatprep.subr.bf16.mxu1 %v21192_v22  ;;  %v21246_v22 = vld [vmem:[#allocation2 + $0xedc] ss:$116 sps:$4 sm:$0xff]  }
 0xa82   :  { %15190 = vmatpush2.bf16.msra.mxu0 %v21187_v7  ;;  %v21241_v7 = vld [vmem:[#allocation2 + $0x58] ss:$116 sps:$4 sm:$0xff]  }
 0xa83   :  { %15231 = vmatpush2.bf16.msra.mxu1 %v21190_v3  ;;  %15191 = vmatprep.subr.bf16.mxu0 %v21195_v27  ;;  %v21244_v3 = vld [vmem:[#allocation2 + $0xed8] ss:$116 sps:$4 sm:$0xff]   ;;  %v21249_v27 = vld [vmem:[#allocation2 + $0xdf4] ss:$116 sps:$4 sm:$0xff]  }
 0xa84   :  { %15232 = vmatprep.subr.bf16.mxu1 %v21198_v36  ;;  %v21252_v36 = vld [vmem:[#allocation2 + $0x1c74] ss:$116 sps:$4 sm:$0xff]  }
 0xa86   :  { %15192 = vmatpush2.bf16.msra.mxu0 %v21193_v48  ;;  %v21247_v48 = vld [vmem:[#allocation2 + $0xdf0] ss:$116 sps:$4 sm:$0xff]  }
 0xa87   :  { %15233 = vmatpush2.bf16.msra.mxu1 %v21196_v34  ;;  %15243 = vmatprep.subr.bf16.mxu0 %v21201_v14  ;;  %v21250_v34 = vld [vmem:[#allocation2 + $0x1c70] ss:$116 sps:$4 sm:$0xff]   ;;  %v21255_v14 = vld [vmem:[#allocation2 + $0xd0c] ss:$116 sps:$4 sm:$0xff]  }
 0xa88   :  { %15284 = vmatprep.subr.bf16.mxu1 %v21204_v0  ;;  %v21258_v0 = vld [vmem:[#allocation2 + $0x1b8c] ss:$116 sps:$4 sm:$0xff]  }
 0xa89   :  { %v13323_v8 = vpop.f32.mrf.mxu0  ;;  %15194 = vmatmul.mubr.bf16.vlgmr.msra.gmra.mxu0 %v27615_v47 }
 0xa8a   :  { %v13364_v58 = vpop.f32.mrf.mxu1  ;;  %15235 = vmatmul.mubr.bf16.vlgmr.msra.gmra.mxu1 %v27617_v38  ;;  %v13324_v44 = vadd.f32 %v13323_v8, %v12558_v6  ;;  %15244 = vmatpush1.bf16.msra.mxu0 %v21199_v18  ;;  %v21253_v6 = vld [vmem:[#allocation2 + $0xd08] ss:$116 sps:$4 sm:$0xff]  }
 0xa8b   :  { %15285 = vmatpush1.bf16.msra.mxu1 %v21202_v20  ;;  %v13325_v12 = vpop.f32.mrf.mxu0  ;;  %15245 = vmatprep.subr.bf16.mxu0 %v21207_v21  ;;  %v21256_v18 = vld [vmem:[#allocation2 + $0x1b88] ss:$116 sps:$4 sm:$0xff]   ;;  %v21261_v20 = vld [vmem:[#allocation2 + $0xc24] ss:$116 sps:$4 sm:$0xff]  }
 0xa8c   :  { %v13366_v56 = vpop.f32.mrf.mxu1  ;;  %15286 = vmatprep.subr.bf16.mxu1 %v21210_v24  ;;  %v13365_v28 = vadd.f32 %v13364_v58, %v13324_v44  ;;  %v13326_v9 = vadd.f32 %v13325_v12, %v12562_v19  ;;  %15275 = vmatprep.mubr.bf16.mxu0 %v27619_v60  ;;  %v21264_v21 = vld [vmem:[#allocation2 + $0x1aa4] ss:$116 sps:$4 sm:$0xff]   ;;  %v21259_v24 = vld [vmem:[#allocation2 + $0xc20] ss:$116 sps:$4 sm:$0xff]   ;;  %v21267_v8 = vld [vmem:[#allocation2 + $0xb3c] ss:$116 sps:$4 sm:$0xff]  }
 0xa8d   :  { %15316 = vmatprep.mubr.bf16.mxu1 %v27621_v46  ;;  %v13327_v43 = vpop.f32.mrf.mxu0  ;;  %v21262_v19 = vld [vmem:[#allocation2 + $0x1aa0] ss:$116 sps:$4 sm:$0xff]   ;;  %v21270_v58 = vld [vmem:[#allocation2 + $0x19bc] ss:$116 sps:$4 sm:$0xff]   ;;  %v21265_v44 = vld [vmem:[#allocation2 + $0xb38] ss:$116 sps:$4 sm:$0xff]  }
 0xa8e   :  { %v13368_v26 = vpop.f32.mrf.mxu1  ;;  %v13367_v2 = vadd.f32 %v13366_v56, %v13326_v9  ;;  %15246 = vmatpush1.bf16.msra.mxu0 %v21205_v51  ;;  %v21268_v51 = vld [vmem:[#allocation2 + $0x19b8] ss:$116 sps:$4 sm:$0xff]   ;;  %v21276_v12 = vld [vmem:[#allocation2 + $0x18d4] ss:$116 sps:$4 sm:$0xff]   ;;  %v21271_v56 = vld [vmem:[#allocation2 + $0xa50] ss:$116 sps:$4 sm:$0xff]  }
 0xa8f   :  { %15287 = vmatpush1.bf16.msra.mxu1 %v21208_v4  ;;  %v13328_v54 = vpop.f32.mrf.mxu0  ;;  %15247 = vmatprep.subr.bf16.mxu0 %v21213_v41  ;;  %v21273_v4 = vld [vmem:[#allocation2 + $0xa54] ss:$116 sps:$4 sm:$0xff]   ;;  %v21274_v41 = vld [vmem:[#allocation2 + $0x18d0] ss:$116 sps:$4 sm:$0xff]  }
 0xa90   :  { %v13369_v45 = vpop.f32.mrf.mxu1  ;;  %15288 = vmatprep.subr.bf16.mxu1 %v21216_v49  ;;  %v13376_v32 = vcombine.low %v13365_v28, %v13367_v2  ;;  %v21279_v49 = vld [vmem:[#allocation2 + $0x96c] ss:$116 sps:$4 sm:$0xff]   ;;  %v21277_v9 = vld [vmem:[#allocation2 + $0x968] ss:$116 sps:$4 sm:$0xff]   ;;  %v21285_v26 = vld [vmem:[#allocation2 + $0x884] ss:$116 sps:$4 sm:$0xff]  }
 0xa91   :  { %v21282_v28 = vld [vmem:[#allocation2 + $0x17ec] ss:$116 sps:$4 sm:$0xff]   ;;  %v21280_v43 = vld [vmem:[#allocation2 + $0x17e8] ss:$116 sps:$4 sm:$0xff]   ;;  %v21288_v2 = vld [vmem:[#allocation2 + $0x1704] ss:$116 sps:$4 sm:$0xff]  }
 0xa92   :  { %v13390_v13 = vrot.slane %v13376_v32, %v24515_v17  ;;  %15248 = vmatpush1.bf16.msra.mxu0 %v21211_v16  ;;  %v21283_v16 = vld [vmem:[#allocation2 + $0x880] ss:$116 sps:$4 sm:$0xff]   ;;  %v21291_v54 = vld [vmem:[#allocation2 + $0x79c] ss:$116 sps:$4 sm:$0xff]  }
 0xa93   :  { %15289 = vmatpush1.bf16.msra.mxu1 %v21214_v39  ;;  %15249 = vmatprep.subr.bf16.mxu0 %v21219_v50  ;;  %v21286_v39 = vld [vmem:[#allocation2 + $0x1700] ss:$116 sps:$4 sm:$0xff]   ;;  %v21294_v45 = vld [vmem:[#allocation2 + $0x161c] ss:$116 sps:$4 sm:$0xff]   ;;  %v21289_v50 = vld [vmem:[#allocation2 + $0x798] ss:$116 sps:$4 sm:$0xff]  }
 0xa94   :  { %15290 = vmatprep.subr.bf16.mxu1 %v21222_v25  ;;  %v13391_v33 = vcombine.low %v13383_v37, %v13390_v13  ;;  %v21292_v25 = vld [vmem:[#allocation2 + $0x1618] ss:$116 sps:$4 sm:$0xff]   ;;  %v27768_v32 = vld [vmem:[%s27846_s8 + $0x10] sm:$0xf] }
 0xa95   :  { %v21297_v37 = vld [vmem:[#allocation2 + $0x6bc] ss:$116 sps:$4 sm:$0xff]  }
 0xa96   :  { %13393 = vst [vmem:[#allocation4 + $0x18] sm:$0xff] %v13391_v33  ;;  %15250 = vmatpush1.bf16.msra.mxu0 %v21217_v15  ;;  %v21300_v13 = vld [vmem:[#allocation2 + $0x153c] ss:$116 sps:$4 sm:$0xff]   ;;  %v13527_v15 = vrot.slane %v27768_v32, %v25260_v61  ;;  %v21306_v33 = vld [vmem:[#allocation2 + $0x1454] ss:$116 sps:$4 sm:$0xff]  }
 0xa97   :  { %15291 = vmatpush1.bf16.msra.mxu1 %v21220_v55  ;;  %15251 = vmatprep.subr.bf16.mxu0 %v21225_v40  ;;  %v21295_v55 = vld [vmem:[#allocation2 + $0x6b8] ss:$116 sps:$4 sm:$0xff]  }
 0xa98   :  { %15292 = vmatprep.subr.bf16.mxu1 %v21228_v59  ;;  %v21298_v40 = vld [vmem:[#allocation2 + $0x1538] ss:$116 sps:$4 sm:$0xff]   ;;  %v21303_v59 = vld [vmem:[#allocation2 + $0x5d4] ss:$116 sps:$4 sm:$0xff]  }
 0xa9a   :  { %15252 = vmatpush1.bf16.msra.mxu0 %v21223_v5  ;;  %v13531_v5 = vrot.slane %v27768_v32, %v25269_v1 }
 0xa9b   :  { %15293 = vmatpush1.bf16.msra.mxu1 %v21226_v23  ;;  %15253 = vmatprep.subr.bf16.mxu0 %v21231_v62 }
 0xa9c   :  { %15294 = vmatprep.subr.bf16.mxu1 %v21234_v35 }
 0xa9e   :  { %15254 = vmatpush1.bf16.msra.mxu0 %v21229_v42  ;;  %v21301_v42 = vld [vmem:[#allocation2 + $0x5d0] ss:$116 sps:$4 sm:$0xff]  }
 0xa9f   :  { %15295 = vmatpush1.bf16.msra.mxu1 %v21232_v31  ;;  %15255 = vmatprep.subr.bf16.mxu0 %v21237_v53  ;;  %v21304_v31 = vld [vmem:[#allocation2 + $0x1450] ss:$116 sps:$4 sm:$0xff]  }
 0xaa0   :  { %15296 = vmatprep.subr.bf16.mxu1 %v21240_v10 }
 0xaa2   :  { %15256 = vmatpush1.bf16.msra.mxu0 %v21235_v30  ;;  %v21309_v30 = vld [vmem:[#allocation2 + $0x4ec] ss:$116 sps:$4 sm:$0xff]  }
 0xaa3   :  { %15297 = vmatpush1.bf16.msra.mxu1 %v21238_v29  ;;  %15257 = vmatprep.subr.bf16.mxu0 %v21243_v63  ;;  %v21312_v29 = vld [vmem:[#allocation2 + $0x136c] ss:$116 sps:$4 sm:$0xff]  }
 0xaa4   :  { %15298 = vmatprep.subr.bf16.mxu1 %v21246_v22 }
 0xaa6   :  { %15258 = vmatpush1.bf16.msra.mxu0 %v21241_v7 }
 0xaa7   :  { %15299 = vmatpush1.bf16.msra.mxu1 %v21244_v3  ;;  %15259 = vmatprep.subr.bf16.mxu0 %v21249_v27 }
 0xaa8   :  { %15300 = vmatprep.subr.bf16.mxu1 %v21252_v36  ;;  %v21307_v36 = vld [vmem:[#allocation2 + $0x4e8] ss:$116 sps:$4 sm:$0xff]  }
 0xaaa   :  { %15260 = vmatpush2.bf16.msra.mxu0 %v21247_v48  ;;  %v21310_v48 = vld [vmem:[#allocation2 + $0x1368] ss:$116 sps:$4 sm:$0xff]  }
 0xaab   :  { %15301 = vmatpush2.bf16.msra.mxu1 %v21250_v34  ;;  %15261 = vmatprep.subr.bf16.mxu0 %v21255_v14 }
 0xaac   :  { %15302 = vmatprep.subr.bf16.mxu1 %v21258_v0  ;;  %v21315_v0 = vld [vmem:[#allocation2 + $0x404] ss:$116 sps:$4 sm:$0xff]  }
 0xaae   :  { %15262 = vmatpush2.bf16.msra.mxu0 %v21253_v6  ;;  %v21318_v6 = vld [vmem:[#allocation2 + $0x1284] ss:$116 sps:$4 sm:$0xff]  }
 0xaaf   :  { %15303 = vmatpush2.bf16.msra.mxu1 %v21256_v18  ;;  %15263 = vmatprep.subr.bf16.mxu0 %v21261_v20  ;;  %v21313_v20 = vld [vmem:[#allocation2 + $0x400] ss:$116 sps:$4 sm:$0xff]  }
 0xab0   :  { %15304 = vmatprep.subr.bf16.mxu1 %v21264_v21  ;;  %v21316_v21 = vld [vmem:[#allocation2 + $0x1280] ss:$116 sps:$4 sm:$0xff]  }
 0xab2   :  { %15264 = vmatpush2.bf16.msra.mxu0 %v21259_v24  ;;  %v21321_v24 = vld [vmem:[#allocation2 + $0x31c] ss:$116 sps:$4 sm:$0xff]  }
 0xab3   :  { %15305 = vmatpush2.bf16.msra.mxu1 %v21262_v19  ;;  %15265 = vmatprep.subr.bf16.mxu0 %v21267_v8  ;;  %v21324_v19 = vld [vmem:[#allocation2 + $0x119c] ss:$116 sps:$4 sm:$0xff]   ;;  %v21319_v8 = vld [vmem:[#allocation2 + $0x318] ss:$116 sps:$4 sm:$0xff]  }
 0xab4   :  { %15306 = vmatprep.subr.bf16.mxu1 %v21270_v58  ;;  %v21322_v58 = vld [vmem:[#allocation2 + $0x1198] ss:$116 sps:$4 sm:$0xff]  }
 0xab6   :  { %15266 = vmatpush2.bf16.msra.mxu0 %v21265_v44  ;;  %v21327_v44 = vld [vmem:[#allocation2 + $0x234] ss:$116 sps:$4 sm:$0xff]  }
 0xab7   :  { %15307 = vmatpush2.bf16.msra.mxu1 %v21268_v51  ;;  %15267 = vmatprep.subr.bf16.mxu0 %v21273_v4  ;;  %v21330_v51 = vld [vmem:[#allocation2 + $0x10b4] ss:$116 sps:$4 sm:$0xff]   ;;  %v21325_v4 = vld [vmem:[#allocation2 + $0x230] ss:$116 sps:$4 sm:$0xff]  }
 0xab8   :  { %15308 = vmatprep.subr.bf16.mxu1 %v21276_v12  ;;  %v21328_v12 = vld [vmem:[#allocation2 + $0x10b0] ss:$116 sps:$4 sm:$0xff]  }
 0xaba   :  { %15268 = vmatpush2.bf16.msra.mxu0 %v21271_v56  ;;  %v21333_v56 = vld [vmem:[#allocation2 + $0x14c] ss:$116 sps:$4 sm:$0xff]  }
 0xabb   :  { %15309 = vmatpush2.bf16.msra.mxu1 %v21274_v41  ;;  %15269 = vmatprep.subr.bf16.mxu0 %v21279_v49  ;;  %v21336_v41 = vld [vmem:[#allocation2 + $0xfcc] ss:$116 sps:$4 sm:$0xff]   ;;  %v21331_v49 = vld [vmem:[#allocation2 + $0x148] ss:$116 sps:$4 sm:$0xff]  }
 0xabc   :  { %15310 = vmatprep.subr.bf16.mxu1 %v21282_v28  ;;  %v21334_v28 = vld [vmem:[#allocation2 + $0xfc8] ss:$116 sps:$4 sm:$0xff]  }
 0xabe   :  { %15270 = vmatpush2.bf16.msra.mxu0 %v21277_v9  ;;  %v21339_v9 = vld [vmem:[#allocation2 + $0x64] ss:$116 sps:$4 sm:$0xff]  }
 0xabf   :  { %15311 = vmatpush2.bf16.msra.mxu1 %v21280_v43  ;;  %15271 = vmatprep.subr.bf16.mxu0 %v21285_v26  ;;  %v21342_v43 = vld [vmem:[#allocation2 + $0xee4] ss:$116 sps:$4 sm:$0xff]   ;;  %v21337_v26 = vld [vmem:[#allocation2 + $0x60] ss:$116 sps:$4 sm:$0xff]  }
 0xac0   :  { %15312 = vmatprep.subr.bf16.mxu1 %v21288_v2  ;;  %v21340_v2 = vld [vmem:[#allocation2 + $0xee0] ss:$116 sps:$4 sm:$0xff]  }
 0xac2   :  { %15272 = vmatpush2.bf16.msra.mxu0 %v21283_v16  ;;  %v21345_v16 = vld [vmem:[#allocation2 + $0xdfc] ss:$116 sps:$4 sm:$0xff]  }
 0xac3   :  { %15313 = vmatpush2.bf16.msra.mxu1 %v21286_v39  ;;  %15273 = vmatprep.subr.bf16.mxu0 %v21291_v54  ;;  %v21348_v39 = vld [vmem:[#allocation2 + $0x1c7c] ss:$116 sps:$4 sm:$0xff]   ;;  %v21343_v54 = vld [vmem:[#allocation2 + $0xdf8] ss:$116 sps:$4 sm:$0xff]  }
 0xac4   :  { %15314 = vmatprep.subr.bf16.mxu1 %v21294_v45  ;;  %v21346_v45 = vld [vmem:[#allocation2 + $0x1c78] ss:$116 sps:$4 sm:$0xff]  }
 0xac6   :  { %15274 = vmatpush2.bf16.msra.mxu0 %v21289_v50  ;;  %v21351_v50 = vld [vmem:[#allocation2 + $0xd14] ss:$116 sps:$4 sm:$0xff]  }
 0xac7   :  { %15315 = vmatpush2.bf16.msra.mxu1 %v21292_v25  ;;  %16399 = vmatprep.subr.bf16.mxu0 %v21297_v37  ;;  %v21354_v25 = vld [vmem:[#allocation2 + $0x1b94] ss:$116 sps:$4 sm:$0xff]   ;;  %v21349_v37 = vld [vmem:[#allocation2 + $0xd10] ss:$116 sps:$4 sm:$0xff]  }
 0xac8   :  { %16440 = vmatprep.subr.bf16.mxu1 %v21300_v13  ;;  %v21352_v13 = vld [vmem:[#allocation2 + $0x1b90] ss:$116 sps:$4 sm:$0xff]  }
 0xac9   :  { %v14218_v23 = vpop.f32.mrf.mxu0  ;;  %15276 = vmatmul.mubr.bf16.vlgmr.msra.gmra.mxu0 %v27615_v47 }
 0xaca   :  { %v14259_v62 = vpop.f32.mrf.mxu1  ;;  %15317 = vmatmul.mubr.bf16.vlgmr.msra.gmra.mxu1 %v27617_v38  ;;  %v14219_v35 = vadd.f32 %v14218_v23, %v13527_v15  ;;  %16400 = vmatpush1.bf16.msra.mxu0 %v21295_v55  ;;  %v21357_v15 = vld [vmem:[#allocation2 + $0xc2c] ss:$116 sps:$4 sm:$0xff]  }
 0xacb   :  { %16441 = vmatpush1.bf16.msra.mxu1 %v21298_v40  ;;  %v14220_v53 = vpop.f32.mrf.mxu0  ;;  %16401 = vmatprep.subr.bf16.mxu0 %v21303_v59  ;;  %v21360_v55 = vld [vmem:[#allocation2 + $0x1aac] ss:$116 sps:$4 sm:$0xff]   ;;  %v21355_v40 = vld [vmem:[#allocation2 + $0xc28] ss:$116 sps:$4 sm:$0xff]  }
 0xacc   :  { %v14261_v10 = vpop.f32.mrf.mxu1  ;;  %16442 = vmatprep.subr.bf16.mxu1 %v21306_v33  ;;  %v27776_v63 = vadd.f32 %v14259_v62, %v14219_v35  ;;  %v14221_v22 = vadd.f32 %v14220_v53, %v13531_v5  ;;  %16431 = vmatprep.mubr.bf16.mxu0 %v27619_v60  ;;  %v21358_v59 = vld [vmem:[#allocation2 + $0x1aa8] ss:$116 sps:$4 sm:$0xff]   ;;  %v21363_v33 = vld [vmem:[#allocation2 + $0xb44] ss:$116 sps:$4 sm:$0xff]   ;;  %v21361_v23 = vld [vmem:[#allocation2 + $0xb40] ss:$116 sps:$4 sm:$0xff]  }
 0xacd   :  { %16472 = vmatprep.mubr.bf16.mxu1 %v27621_v46  ;;  %v14222_v7 = vpop.f32.mrf.mxu0  ;;  %v21366_v5 = vld [vmem:[#allocation2 + $0x19c4] ss:$116 sps:$4 sm:$0xff]   ;;  %v21364_v62 = vld [vmem:[#allocation2 + $0x19c0] ss:$116 sps:$4 sm:$0xff]   ;;  %v21369_v35 = vld [vmem:[#allocation2 + $0xa5c] ss:$116 sps:$4 sm:$0xff]  }
 0xace   :  { %v14263_v3 = vpop.f32.mrf.mxu1  ;;  %v27780_v27 = vadd.f32 %v14261_v10, %v14221_v22  ;;  %16402 = vmatpush1.bf16.msra.mxu0 %v21301_v42  ;;  %v21372_v42 = vld [vmem:[#allocation2 + $0x18dc] ss:$116 sps:$4 sm:$0xff]   ;;  %v21370_v53 = vld [vmem:[#allocation2 + $0x18d8] ss:$116 sps:$4 sm:$0xff]   ;;  %v21375_v10 = vld [vmem:[#allocation2 + $0x974] ss:$116 sps:$4 sm:$0xff]  }
 0xacf   :  { %16443 = vmatpush1.bf16.msra.mxu1 %v21304_v31  ;;  %v14223_v34 = vpop.f32.mrf.mxu0  ;;  %16403 = vmatprep.subr.bf16.mxu0 %v21309_v30  ;;  %v21367_v31 = vld [vmem:[#allocation2 + $0xa58] ss:$116 sps:$4 sm:$0xff]   ;;  %v21378_v30 = vld [vmem:[#allocation2 + $0x17f4] ss:$116 sps:$4 sm:$0xff]   ;;  %v21376_v22 = vld [vmem:[#allocation2 + $0x17f0] ss:$116 sps:$4 sm:$0xff]  }
 0xad0   :  { %v14264_v14 = vpop.f32.mrf.mxu1  ;;  %16444 = vmatprep.subr.bf16.mxu1 %v21312_v29  ;;  %v14352_v18 = vcombine.low %v27776_v63, %v27780_v27  ;;  %v21373_v29 = vld [vmem:[#allocation2 + $0x970] ss:$116 sps:$4 sm:$0xff]   ;;  %v21381_v7 = vld [vmem:[#allocation2 + $0x88c] ss:$116 sps:$4 sm:$0xff]  }
 0xad1   :  { %v21384_v3 = vld [vmem:[#allocation2 + $0x170c] ss:$116 sps:$4 sm:$0xff]   ;;  %v21387_v34 = vld [vmem:[#allocation2 + $0x7a4] ss:$116 sps:$4 sm:$0xff]   ;;  %v21423_v63 = vld [vmem:[#allocation2 + $0x23c] ss:$116 sps:$4 sm:$0xff]  }
 0xad2   :  { %16404 = vmatpush1.bf16.msra.mxu0 %v21307_v36  ;;  %v21379_v36 = vld [vmem:[#allocation2 + $0x888] ss:$116 sps:$4 sm:$0xff]   ;;  %v21390_v14 = vld [vmem:[#allocation2 + $0x1624] ss:$116 sps:$4 sm:$0xff]  }
 0xad3   :  { %16445 = vmatpush1.bf16.msra.mxu1 %v21310_v48  ;;  %16405 = vmatprep.subr.bf16.mxu0 %v21315_v0  ;;  %v21382_v48 = vld [vmem:[#allocation2 + $0x1708] ss:$116 sps:$4 sm:$0xff]   ;;  %v21385_v0 = vld [vmem:[#allocation2 + $0x7a0] ss:$116 sps:$4 sm:$0xff]  }
 0xad4   :  { %16446 = vmatprep.subr.bf16.mxu1 %v21318_v6  ;;  %v21388_v6 = vld [vmem:[#allocation2 + $0x1620] ss:$116 sps:$4 sm:$0xff]   ;;  %v21426_v27 = vld [vmem:[#allocation2 + $0x10bc] ss:$116 sps:$4 sm:$0xff]  }
 0xad6   :  { %16406 = vmatpush1.bf16.msra.mxu0 %v21313_v20  ;;  %v21393_v20 = vld [vmem:[#allocation2 + $0x6c4] ss:$116 sps:$4 sm:$0xff]  }
 0xad7   :  { %16447 = vmatpush1.bf16.msra.mxu1 %v21316_v21  ;;  %16407 = vmatprep.subr.bf16.mxu0 %v21321_v24  ;;  %v21396_v21 = vld [vmem:[#allocation2 + $0x1544] ss:$116 sps:$4 sm:$0xff]   ;;  %v13535_v24 = vrot.slane %v27768_v32, %v26776_v52 }
 0xad8   :  { %16448 = vmatprep.subr.bf16.mxu1 %v21324_v19  ;;  %v21391_v19 = vld [vmem:[#allocation2 + $0x6c0] ss:$116 sps:$4 sm:$0xff]  }
 0xada   :  { %16408 = vmatpush1.bf16.msra.mxu0 %v21319_v8  ;;  %v21394_v8 = vld [vmem:[#allocation2 + $0x1540] ss:$116 sps:$4 sm:$0xff]  }
 0xadb   :  { %16449 = vmatpush1.bf16.msra.mxu1 %v21322_v58  ;;  %16409 = vmatprep.subr.bf16.mxu0 %v21327_v44  ;;  %v21399_v58 = vld [vmem:[#allocation2 + $0x5dc] ss:$116 sps:$4 sm:$0xff]  }
 0xadc   :  { %16450 = vmatprep.subr.bf16.mxu1 %v21330_v51  ;;  %v21402_v44 = vld [vmem:[#allocation2 + $0x145c] ss:$116 sps:$4 sm:$0xff]   ;;  %v13539_v51 = vrot.slane %v27768_v32, %v26783_v57 }
 0xade   :  { %16410 = vmatpush1.bf16.msra.mxu0 %v21325_v4 }
 0xadf   :  { %16451 = vmatpush1.bf16.msra.mxu1 %v21328_v12  ;;  %16411 = vmatprep.subr.bf16.mxu0 %v21333_v56 }
 0xae0   :  { %16452 = vmatprep.subr.bf16.mxu1 %v21336_v41  ;;  %v21397_v41 = vld [vmem:[#allocation2 + $0x5d8] ss:$116 sps:$4 sm:$0xff]  }
 0xae2   :  { %16412 = vmatpush1.bf16.msra.mxu0 %v21331_v49  ;;  %v21400_v49 = vld [vmem:[#allocation2 + $0x1458] ss:$116 sps:$4 sm:$0xff]  }
 0xae3   :  { %16453 = vmatpush1.bf16.msra.mxu1 %v21334_v28  ;;  %16413 = vmatprep.subr.bf16.mxu0 %v21339_v9 }
 0xae4   :  { %16454 = vmatprep.subr.bf16.mxu1 %v21342_v43  ;;  %v21405_v43 = vld [vmem:[#allocation2 + $0x4f4] ss:$116 sps:$4 sm:$0xff]  }
 0xae6   :  { %16414 = vmatpush1.bf16.msra.mxu0 %v21337_v26  ;;  %v21408_v26 = vld [vmem:[#allocation2 + $0x1374] ss:$116 sps:$4 sm:$0xff]  }
 0xae7   :  { %16455 = vmatpush1.bf16.msra.mxu1 %v21340_v2  ;;  %16415 = vmatprep.subr.bf16.mxu0 %v21345_v16 }
 0xae8   :  { %16456 = vmatprep.subr.bf16.mxu1 %v21348_v39 }
 0xaea   :  { %16416 = vmatpush2.bf16.msra.mxu0 %v21343_v54 }
 0xaeb   :  { %16457 = vmatpush2.bf16.msra.mxu1 %v21346_v45  ;;  %16417 = vmatprep.subr.bf16.mxu0 %v21351_v50  ;;  %v21403_v45 = vld [vmem:[#allocation2 + $0x4f0] ss:$116 sps:$4 sm:$0xff]  }
 0xaec   :  { %16458 = vmatprep.subr.bf16.mxu1 %v21354_v25  ;;  %v21406_v50 = vld [vmem:[#allocation2 + $0x1370] ss:$116 sps:$4 sm:$0xff]  }
 0xaee   :  { %16418 = vmatpush2.bf16.msra.mxu0 %v21349_v37 }
 0xaef   :  { %16459 = vmatpush2.bf16.msra.mxu1 %v21352_v13  ;;  %16419 = vmatprep.subr.bf16.mxu0 %v21357_v15  ;;  %v21411_v13 = vld [vmem:[#allocation2 + $0x40c] ss:$116 sps:$4 sm:$0xff]  }
 0xaf0   :  { %16460 = vmatprep.subr.bf16.mxu1 %v21360_v55  ;;  %v21414_v15 = vld [vmem:[#allocation2 + $0x128c] ss:$116 sps:$4 sm:$0xff]  }
 0xaf2   :  { %16420 = vmatpush2.bf16.msra.mxu0 %v21355_v40  ;;  %v14360_v40 = vrot.slane %v14352_v18, %v24515_v17  ;;  %v21421_v18 = vld [vmem:[#allocation2 + $0x238] ss:$116 sps:$4 sm:$0xff]  }
 0xaf3   :  { %16461 = vmatpush2.bf16.msra.mxu1 %v21358_v59  ;;  %16421 = vmatprep.subr.bf16.mxu0 %v21363_v33  ;;  %v21409_v33 = vld [vmem:[#allocation2 + $0x408] ss:$116 sps:$4 sm:$0xff]  }
 0xaf4   :  { %16462 = vmatprep.subr.bf16.mxu1 %v21366_v5  ;;  %v21412_v5 = vld [vmem:[#allocation2 + $0x1288] ss:$116 sps:$4 sm:$0xff]  }
 0xaf6   :  { %16422 = vmatpush2.bf16.msra.mxu0 %v21361_v23  ;;  %v21417_v23 = vld [vmem:[#allocation2 + $0x324] ss:$116 sps:$4 sm:$0xff]  }
 0xaf7   :  { %16463 = vmatpush2.bf16.msra.mxu1 %v21364_v62  ;;  %16423 = vmatprep.subr.bf16.mxu0 %v21369_v35  ;;  %v21420_v62 = vld [vmem:[#allocation2 + $0x11a4] ss:$116 sps:$4 sm:$0xff]  }
 0xaf8   :  { %16464 = vmatprep.subr.bf16.mxu1 %v21372_v42  ;;  %v21415_v42 = vld [vmem:[#allocation2 + $0x320] ss:$116 sps:$4 sm:$0xff]  }
 0xafa   :  { %16424 = vmatpush2.bf16.msra.mxu0 %v21367_v31  ;;  %v21418_v31 = vld [vmem:[#allocation2 + $0x11a0] ss:$116 sps:$4 sm:$0xff]  }
 0xafb   :  { %16465 = vmatpush2.bf16.msra.mxu1 %v21370_v53  ;;  %16425 = vmatprep.subr.bf16.mxu0 %v21375_v10  ;;  %v21424_v53 = vld [vmem:[#allocation2 + $0x10b8] ss:$116 sps:$4 sm:$0xff]   ;;  %v21429_v10 = vld [vmem:[#allocation2 + $0x154] ss:$116 sps:$4 sm:$0xff]  }
 0xafc   :  { %16466 = vmatprep.subr.bf16.mxu1 %v21378_v30  ;;  %v21432_v30 = vld [vmem:[#allocation2 + $0xfd4] ss:$116 sps:$4 sm:$0xff]  }
 0xafe   :  { %16426 = vmatpush2.bf16.msra.mxu0 %v21373_v29  ;;  %v21427_v29 = vld [vmem:[#allocation2 + $0x150] ss:$116 sps:$4 sm:$0xff]  }
 0xaff   :  { %16467 = vmatpush2.bf16.msra.mxu1 %v21376_v22  ;;  %16427 = vmatprep.subr.bf16.mxu0 %v21381_v7  ;;  %v21430_v22 = vld [vmem:[#allocation2 + $0xfd0] ss:$116 sps:$4 sm:$0xff]   ;;  %v21435_v7 = vld [vmem:[#allocation2 + $0x6c] ss:$116 sps:$4 sm:$0xff]  }
 0xb00   :  { %16468 = vmatprep.subr.bf16.mxu1 %v21384_v3  ;;  %v21438_v3 = vld [vmem:[#allocation2 + $0xeec] ss:$116 sps:$4 sm:$0xff]  }
 0xb02   :  { %16428 = vmatpush2.bf16.msra.mxu0 %v21379_v36  ;;  %v21433_v36 = vld [vmem:[#allocation2 + $0x68] ss:$116 sps:$4 sm:$0xff]  }
 0xb03   :  { %16469 = vmatpush2.bf16.msra.mxu1 %v21382_v48  ;;  %16429 = vmatprep.subr.bf16.mxu0 %v21387_v34  ;;  %v21436_v48 = vld [vmem:[#allocation2 + $0xee8] ss:$116 sps:$4 sm:$0xff]   ;;  %v21441_v34 = vld [vmem:[#allocation2 + $0xe04] ss:$116 sps:$4 sm:$0xff]  }
 0xb04   :  { %16470 = vmatprep.subr.bf16.mxu1 %v21390_v14  ;;  %v21444_v14 = vld [vmem:[#allocation2 + $0x1c84] ss:$116 sps:$4 sm:$0xff]  }
 0xb06   :  { %16430 = vmatpush2.bf16.msra.mxu0 %v21385_v0  ;;  %v21439_v0 = vld [vmem:[#allocation2 + $0xe00] ss:$116 sps:$4 sm:$0xff]  }
 0xb07   :  { %16471 = vmatpush2.bf16.msra.mxu1 %v21388_v6  ;;  %16481 = vmatprep.subr.bf16.mxu0 %v21393_v20  ;;  %v21442_v6 = vld [vmem:[#allocation2 + $0x1c80] ss:$116 sps:$4 sm:$0xff]   ;;  %v21447_v20 = vld [vmem:[#allocation2 + $0xd1c] ss:$116 sps:$4 sm:$0xff]  }
 0xb08   :  { %16522 = vmatprep.subr.bf16.mxu1 %v21396_v21  ;;  %v21450_v21 = vld [vmem:[#allocation2 + $0x1b9c] ss:$116 sps:$4 sm:$0xff]  }
 0xb09   :  { %v14300_v4 = vpop.f32.mrf.mxu0  ;;  %16432 = vmatmul.mubr.bf16.vlgmr.msra.gmra.mxu0 %v27615_v47 }
 0xb0a   :  { %v14341_v12 = vpop.f32.mrf.mxu1  ;;  %16473 = vmatmul.mubr.bf16.vlgmr.msra.gmra.mxu1 %v27617_v38  ;;  %v14301_v56 = vadd.f32 %v14300_v4, %v13535_v24  ;;  %16482 = vmatpush1.bf16.msra.mxu0 %v21391_v19  ;;  %v21445_v24 = vld [vmem:[#allocation2 + $0xd18] ss:$116 sps:$4 sm:$0xff]  }
 0xb0b   :  { %16523 = vmatpush1.bf16.msra.mxu1 %v21394_v8  ;;  %v14302_v28 = vpop.f32.mrf.mxu0  ;;  %16483 = vmatprep.subr.bf16.mxu0 %v21399_v58  ;;  %v21448_v19 = vld [vmem:[#allocation2 + $0x1b98] ss:$116 sps:$4 sm:$0xff]   ;;  %v21453_v8 = vld [vmem:[#allocation2 + $0xc34] ss:$116 sps:$4 sm:$0xff]  }
 0xb0c   :  { %v14343_v9 = vpop.f32.mrf.mxu1  ;;  %16524 = vmatprep.subr.bf16.mxu1 %v21402_v44  ;;  %v14342_v2 = vadd.f32 %v14341_v12, %v14301_v56  ;;  %v14303_v16 = vadd.f32 %v14302_v28, %v13539_v51  ;;  %16513 = vmatprep.mubr.bf16.mxu0 %v27619_v60  ;;  %v21456_v58 = vld [vmem:[#allocation2 + $0x1ab4] ss:$116 sps:$4 sm:$0xff]   ;;  %v21451_v44 = vld [vmem:[#allocation2 + $0xc30] ss:$116 sps:$4 sm:$0xff]   ;;  %v21459_v4 = vld [vmem:[#allocation2 + $0xb4c] ss:$116 sps:$4 sm:$0xff]  }
 0xb0d   :  { %16554 = vmatprep.mubr.bf16.mxu1 %v27621_v46  ;;  %v14304_v32 = vpop.f32.mrf.mxu0  ;;  %v21454_v51 = vld [vmem:[#allocation2 + $0x1ab0] ss:$116 sps:$4 sm:$0xff]   ;;  %v21462_v12 = vld [vmem:[#allocation2 + $0x19cc] ss:$116 sps:$4 sm:$0xff]   ;;  %v21457_v56 = vld [vmem:[#allocation2 + $0xb48] ss:$116 sps:$4 sm:$0xff]  }
 0xb0e   :  { %v14345_v39 = vpop.f32.mrf.mxu1  ;;  %v14344_v54 = vadd.f32 %v14343_v9, %v14303_v16  ;;  %16484 = vmatpush1.bf16.msra.mxu0 %v21397_v41  ;;  %v21460_v41 = vld [vmem:[#allocation2 + $0x19c8] ss:$116 sps:$4 sm:$0xff]   ;;  %v21468_v28 = vld [vmem:[#allocation2 + $0x18e4] ss:$116 sps:$4 sm:$0xff]   ;;  %v21463_v9 = vld [vmem:[#allocation2 + $0xa60] ss:$116 sps:$4 sm:$0xff]  }
 0xb0f   :  { %16525 = vmatpush1.bf16.msra.mxu1 %v21400_v49  ;;  %v14305_v25 = vpop.f32.mrf.mxu0  ;;  %16485 = vmatprep.subr.bf16.mxu0 %v21405_v43  ;;  %v21465_v49 = vld [vmem:[#allocation2 + $0xa64] ss:$116 sps:$4 sm:$0xff]   ;;  %v21466_v43 = vld [vmem:[#allocation2 + $0x18e0] ss:$116 sps:$4 sm:$0xff]  }
 0xb10   :  { %v14346_v37 = vpop.f32.mrf.mxu1  ;;  %16526 = vmatprep.subr.bf16.mxu1 %v21408_v26  ;;  %v14353_v55 = vcombine.low %v14342_v2, %v14344_v54  ;;  %v21471_v26 = vld [vmem:[#allocation2 + $0x97c] ss:$116 sps:$4 sm:$0xff]   ;;  %v21469_v16 = vld [vmem:[#allocation2 + $0x978] ss:$116 sps:$4 sm:$0xff]   ;;  %v21477_v39 = vld [vmem:[#allocation2 + $0x894] ss:$116 sps:$4 sm:$0xff]  }
 0xb11   :  { %v21474_v2 = vld [vmem:[#allocation2 + $0x17fc] ss:$116 sps:$4 sm:$0xff]   ;;  %v21472_v32 = vld [vmem:[#allocation2 + $0x17f8] ss:$116 sps:$4 sm:$0xff]   ;;  %v21480_v54 = vld [vmem:[#allocation2 + $0x1714] ss:$116 sps:$4 sm:$0xff]  }
 0xb12   :  { %v14367_v59 = vrot.slane %v14353_v55, %v24515_v17  ;;  %16486 = vmatpush1.bf16.msra.mxu0 %v21403_v45  ;;  %v21475_v45 = vld [vmem:[#allocation2 + $0x890] ss:$116 sps:$4 sm:$0xff]   ;;  %v21483_v25 = vld [vmem:[#allocation2 + $0x7ac] ss:$116 sps:$4 sm:$0xff]   ;;  %v27800_v55 = vld [vmem:[%s27846_s8 + $0x14] sm:$0xf] }
 0xb13   :  { %16527 = vmatpush1.bf16.msra.mxu1 %v21406_v50  ;;  %16487 = vmatprep.subr.bf16.mxu0 %v21411_v13  ;;  %v21478_v50 = vld [vmem:[#allocation2 + $0x1710] ss:$116 sps:$4 sm:$0xff]   ;;  %v21486_v37 = vld [vmem:[#allocation2 + $0x162c] ss:$116 sps:$4 sm:$0xff]   ;;  %v21481_v13 = vld [vmem:[#allocation2 + $0x7a8] ss:$116 sps:$4 sm:$0xff]  }
 0xb14   :  { %16528 = vmatprep.subr.bf16.mxu1 %v21414_v15  ;;  %v14368_v35 = vcombine.low %v14360_v40, %v14367_v59  ;;  %v21484_v15 = vld [vmem:[#allocation2 + $0x1628] ss:$116 sps:$4 sm:$0xff]  }
 0xb15   :  { %v21487_v40 = vld [vmem:[#allocation2 + $0xe08] ss:$116 sps:$4 sm:$0xff]  }
 0xb16   :  { %14370 = vst [vmem:[#allocation4 + $0x20] sm:$0xff] %v14368_v35  ;;  %16488 = vmatpush1.bf16.msra.mxu0 %v21409_v33  ;;  %v21488_v59 = vld [vmem:[#allocation2 + $0x1c88] ss:$116 sps:$4 sm:$0xff]   ;;  %v14504_v33 = vrot.slane %v27800_v55, %v25260_v61  ;;  %v21492_v35 = vld [vmem:[#allocation2 + $0x1ba0] ss:$116 sps:$4 sm:$0xff]  }
 0xb17   :  { %16529 = vmatpush1.bf16.msra.mxu1 %v21412_v5  ;;  %16489 = vmatprep.subr.bf16.mxu0 %v21417_v23  ;;  %v21489_v5 = vld [vmem:[#allocation2 + $0x6c8] ss:$116 sps:$4 sm:$0xff]  }
 0xb18   :  { %16530 = vmatprep.subr.bf16.mxu1 %v21420_v62  ;;  %v21490_v23 = vld [vmem:[#allocation2 + $0x1548] ss:$116 sps:$4 sm:$0xff]   ;;  %v21491_v62 = vld [vmem:[#allocation2 + $0xd20] ss:$116 sps:$4 sm:$0xff]  }
 0xb1a   :  { %16490 = vmatpush1.bf16.msra.mxu0 %v21415_v42  ;;  %v14508_v42 = vrot.slane %v27800_v55, %v25269_v1 }
 0xb1b   :  { %16531 = vmatpush1.bf16.msra.mxu1 %v21418_v31  ;;  %16491 = vmatprep.subr.bf16.mxu0 %v21423_v63 }
 0xb1c   :  { %16532 = vmatprep.subr.bf16.mxu1 %v21426_v27 }
 0xb1e   :  { %16492 = vmatpush1.bf16.msra.mxu0 %v21421_v18  ;;  %v21493_v18 = vld [vmem:[#allocation2 + $0x5e0] ss:$116 sps:$4 sm:$0xff]  }
 0xb1f   :  { %16533 = vmatpush1.bf16.msra.mxu1 %v21424_v53  ;;  %16493 = vmatprep.subr.bf16.mxu0 %v21429_v10  ;;  %v21494_v53 = vld [vmem:[#allocation2 + $0x1460] ss:$116 sps:$4 sm:$0xff]  }
 0xb20   :  { %16534 = vmatprep.subr.bf16.mxu1 %v21432_v30 }
 0xb22   :  { %16494 = vmatpush1.bf16.msra.mxu0 %v21427_v29  ;;  %v21495_v29 = vld [vmem:[#allocation2 + $0xc38] ss:$116 sps:$4 sm:$0xff]  }
 0xb23   :  { %16535 = vmatpush1.bf16.msra.mxu1 %v21430_v22  ;;  %16495 = vmatprep.subr.bf16.mxu0 %v21435_v7  ;;  %v21496_v22 = vld [vmem:[#allocation2 + $0x1ab8] ss:$116 sps:$4 sm:$0xff]  }
 0xb24   :  { %16536 = vmatprep.subr.bf16.mxu1 %v21438_v3 }
 0xb26   :  { %16496 = vmatpush1.bf16.msra.mxu0 %v21433_v36 }
 0xb27   :  { %16537 = vmatpush1.bf16.msra.mxu1 %v21436_v48  ;;  %16497 = vmatprep.subr.bf16.mxu0 %v21441_v34 }
 0xb28   :  { %16538 = vmatprep.subr.bf16.mxu1 %v21444_v14  ;;  %v21497_v14 = vld [vmem:[#allocation2 + $0x4f8] ss:$116 sps:$4 sm:$0xff]  }
 0xb2a   :  { %16498 = vmatpush2.bf16.msra.mxu0 %v21439_v0  ;;  %v21498_v0 = vld [vmem:[#allocation2 + $0x1378] ss:$116 sps:$4 sm:$0xff]  }
 0xb2b   :  { %16539 = vmatpush2.bf16.msra.mxu1 %v21442_v6  ;;  %16499 = vmatprep.subr.bf16.mxu0 %v21447_v20 }
 0xb2c   :  { %16540 = vmatprep.subr.bf16.mxu1 %v21450_v21  ;;  %v21499_v21 = vld [vmem:[#allocation2 + $0xb50] ss:$116 sps:$4 sm:$0xff]  }
 0xb2e   :  { %16500 = vmatpush2.bf16.msra.mxu0 %v21445_v24  ;;  %v21500_v24 = vld [vmem:[#allocation2 + $0x19d0] ss:$116 sps:$4 sm:$0xff]  }
 0xb2f   :  { %16541 = vmatpush2.bf16.msra.mxu1 %v21448_v19  ;;  %16501 = vmatprep.subr.bf16.mxu0 %v21453_v8  ;;  %v21503_v8 = vld [vmem:[#allocation2 + $0xa68] ss:$116 sps:$4 sm:$0xff]  }
 0xb30   :  { %16542 = vmatprep.subr.bf16.mxu1 %v21456_v58  ;;  %v21504_v58 = vld [vmem:[#allocation2 + $0x18e8] ss:$116 sps:$4 sm:$0xff]  }
 0xb32   :  { %16502 = vmatpush2.bf16.msra.mxu0 %v21451_v44  ;;  %v21505_v44 = vld [vmem:[#allocation2 + $0x328] ss:$116 sps:$4 sm:$0xff]  }
 0xb33   :  { %16543 = vmatpush2.bf16.msra.mxu1 %v21454_v51  ;;  %16503 = vmatprep.subr.bf16.mxu0 %v21459_v4  ;;  %v21506_v51 = vld [vmem:[#allocation2 + $0x11a8] ss:$116 sps:$4 sm:$0xff]   ;;  %v21507_v4 = vld [vmem:[#allocation2 + $0x980] ss:$116 sps:$4 sm:$0xff]  }
 0xb34   :  { %16544 = vmatprep.subr.bf16.mxu1 %v21462_v12  ;;  %v21508_v12 = vld [vmem:[#allocation2 + $0x1800] ss:$116 sps:$4 sm:$0xff]  }
 0xb36   :  { %16504 = vmatpush2.bf16.msra.mxu0 %v21457_v56  ;;  %v21509_v56 = vld [vmem:[#allocation2 + $0x240] ss:$116 sps:$4 sm:$0xff]  }
 0xb37   :  { %16545 = vmatpush2.bf16.msra.mxu1 %v21460_v41  ;;  %16505 = vmatprep.subr.bf16.mxu0 %v21465_v49  ;;  %v21510_v41 = vld [vmem:[#allocation2 + $0x10c0] ss:$116 sps:$4 sm:$0xff]   ;;  %v21511_v49 = vld [vmem:[#allocation2 + $0x898] ss:$116 sps:$4 sm:$0xff]  }
 0xb38   :  { %16546 = vmatprep.subr.bf16.mxu1 %v21468_v28  ;;  %v21512_v28 = vld [vmem:[#allocation2 + $0x1718] ss:$116 sps:$4 sm:$0xff]  }
 0xb3a   :  { %16506 = vmatpush2.bf16.msra.mxu0 %v21463_v9  ;;  %v21513_v9 = vld [vmem:[#allocation2 + $0x158] ss:$116 sps:$4 sm:$0xff]  }
 0xb3b   :  { %16547 = vmatpush2.bf16.msra.mxu1 %v21466_v43  ;;  %16507 = vmatprep.subr.bf16.mxu0 %v21471_v26  ;;  %v21514_v43 = vld [vmem:[#allocation2 + $0xfd8] ss:$116 sps:$4 sm:$0xff]   ;;  %v21515_v26 = vld [vmem:[#allocation2 + $0x7b0] ss:$116 sps:$4 sm:$0xff]  }
 0xb3c   :  { %16548 = vmatprep.subr.bf16.mxu1 %v21474_v2  ;;  %v21516_v2 = vld [vmem:[#allocation2 + $0x1630] ss:$116 sps:$4 sm:$0xff]  }
 0xb3e   :  { %16508 = vmatpush2.bf16.msra.mxu0 %v21469_v16  ;;  %v21517_v16 = vld [vmem:[#allocation2 + $0x70] ss:$116 sps:$4 sm:$0xff]  }
 0xb3f   :  { %16549 = vmatpush2.bf16.msra.mxu1 %v21472_v32  ;;  %16509 = vmatprep.subr.bf16.mxu0 %v21477_v39  ;;  %v21518_v32 = vld [vmem:[#allocation2 + $0xef0] ss:$116 sps:$4 sm:$0xff]   ;;  %v14512_v39 = vrot.slane %v27800_v55, %v26776_v52 }
 0xb40   :  { %16550 = vmatprep.subr.bf16.mxu1 %v21480_v54  ;;  %v14516_v54 = vrot.slane %v27800_v55, %v26783_v57  ;;  %v15540_v55 = vld [vmem:[%s27846_s8 + $0x18] sm:$0x1f]  ;;  %s21545_s8 = smov [#allocation4]  }
 0xb41   :  { %s16683_s17 = sshll.u32 %s21545_s8, 4  ;;  %s16684_s17 = int_to_ptr.vmem [resolvable:$true] %s16683_s17 }
 0xb42   :  { %16510 = vmatpush2.bf16.msra.mxu0 %v21475_v45  ;;  %s21519_s18 = scalar_lea.vmem %s16684_s17, 928  ;;  %p21524_p1 = scmp.lt.s32.totalorder %s16684_s17, %s16684_s17 }
 0xb43   :  { %16551 = vmatpush2.bf16.msra.mxu1 %v21478_v50  ;;  %16511 = vmatprep.subr.bf16.mxu0 %v21483_v25  ;;  %p21520_p0 = scmp.ne.s32.totalorder %s16684_s17, %s21519_s18  ;;  %p21525_p2 = scmp.lt.s32.totalorder %s21519_s18, %s21519_s18 }
 0xb44   :  { %16552 = vmatprep.subr.bf16.mxu1 %v21486_v37 }
 0xb45   :  { %p21526_p3 = por %p21525_p2, %p21524_p1 }
 0xb46   :  { %16512 = vmatpush2.bf16.msra.mxu0 %v21481_v13 }
 0xb47   :  { %16553 = vmatpush2.bf16.msra.mxu1 %v21484_v15  ;;  %18652 = vmatprep.subr.bf16.mxu0 %v21487_v40  ;;  %p21527_p4 = pnand %p21526_p3, %p21520_p0 }
 0xb48   :  { %18674 = vmatprep.subr.bf16.mxu1 %v21488_v59 }
 0xb49   :  { %v15195_v31 = vpop.f32.mrf.mxu0  ;;  %16514 = vmatmul.mubr.bf16.vlgmr.msra.gmra.mxu0 %v27615_v47 }
 0xb4a   :  { %v15236_v63 = vpop.f32.mrf.mxu1  ;;  %16555 = vmatmul.mubr.bf16.vlgmr.msra.gmra.mxu1 %v27617_v38  ;;  %v15196_v27 = vadd.f32 %v15195_v31, %v14504_v33  ;;  %18653 = vmatpush3.bf16.msra.mxu0 %v21489_v5  ;;  %v15545_v31 = vrot.slane %v15540_v55, %v25260_v61 }
 0xb4b   :  { %18675 = vmatpush3.bf16.msra.mxu1 %v21490_v23  ;;  %v15197_v10 = vpop.f32.mrf.mxu0  ;;  %18654 = vmatprep.subr.bf16.mxu0 %v21491_v62 }
 0xb4c   :  { %v15238_v30 = vpop.f32.mrf.mxu1  ;;  %18676 = vmatprep.subr.bf16.mxu1 %v21492_v35  ;;  %v27808_v7 = vadd.f32 %v15236_v63, %v15196_v27  ;;  %v15198_v3 = vadd.f32 %v15197_v10, %v14508_v42  ;;  %16595 = vmatprep.mubr.bf16.mxu0 %v27619_v60  ;;  %v21501_v60 = vld [vmem:[#allocation2 + $0x410] ss:$116 sps:$4 sm:$0xff]   ;;  %v15549_v63 = vrot.slane %v15540_v55, %v25269_v1 }
 0xb4d   :  { %16635 = vmatprep.mubr.bf16.mxu1 %v27621_v46  ;;  %v15199_v36 = vpop.f32.mrf.mxu0  ;;  %v21502_v46 = vld [vmem:[#allocation2 + $0x1290] ss:$116 sps:$4 sm:$0xff]  }
 0xb4e   :  { %v15240_v48 = vpop.f32.mrf.mxu1  ;;  %v27812_v34 = vadd.f32 %v15238_v30, %v15198_v3  ;;  %18655 = vmatpush3.bf16.msra.mxu0 %v21493_v18 }
 0xb4f   :  { %18677 = vmatpush3.bf16.msra.mxu1 %v21494_v53  ;;  %v15200_v6 = vpop.f32.mrf.mxu0  ;;  %18656 = vmatprep.subr.bf16.mxu0 %v21495_v29 }
 0xb50   :  { %v15241_v20 = vpop.f32.mrf.mxu1  ;;  %18678 = vmatprep.subr.bf16.mxu1 %v21496_v22  ;;  %v15329_v19 = vcombine.low %v27808_v7, %v27812_v34  ;;  %v15557_v6 = vrot.slane %v15540_v55, %v26783_v57  ;;  %v15560_v57 = vsub.s32 4, %v24497_v11 }
 0xb52   :  { %18657 = vmatpush3.bf16.msra.mxu0 %v21497_v14 }
 0xb53   :  { %18679 = vmatpush3.bf16.msra.mxu1 %v21498_v0  ;;  %18658 = vmatprep.subr.bf16.mxu0 %v21499_v21  ;;  %v15553_v0 = vrot.slane %v15540_v55, %v26776_v52 }
 0xb54   :  { %18680 = vmatprep.subr.bf16.mxu1 %v21500_v24 }
 0xb56   :  { %18659 = vmatpush3.bf16.msra.mxu0 %v21501_v60 }
 0xb57   :  { %18681 = vmatpush3.bf16.msra.mxu1 %v21502_v46  ;;  %18660 = vmatprep.subr.bf16.mxu0 %v21503_v8 }
 0xb58   :  { %18682 = vmatprep.subr.bf16.mxu1 %v21504_v58 }
 0xb5a   :  { %18661 = vmatpush3.bf16.msra.mxu0 %v21505_v44 }
 0xb5b   :  { %18683 = vmatpush3.bf16.msra.mxu1 %v21506_v51  ;;  %18662 = vmatprep.subr.bf16.mxu0 %v21507_v4 }
 0xb5c   :  { %18684 = vmatprep.subr.bf16.mxu1 %v21508_v12 }
 0xb5e   :  { %18663 = vmatpush3.bf16.msra.mxu0 %v21509_v56 }
 0xb5f   :  { %18685 = vmatpush3.bf16.msra.mxu1 %v21510_v41  ;;  %18664 = vmatprep.subr.bf16.mxu0 %v21511_v49 }
 0xb60   :  { %18686 = vmatprep.subr.bf16.mxu1 %v21512_v28  ;;  %v15561_v28 = vrot.slane %v15540_v55, %v15560_v57 }
 0xb62   :  { %18665 = vmatpush3.bf16.msra.mxu0 %v21513_v9 }
 0xb63   :  { %18687 = vmatpush3.bf16.msra.mxu1 %v21514_v43  ;;  %18666 = vmatprep.subr.bf16.mxu0 %v21515_v26 }
 0xb64   :  { %18688 = vmatprep.subr.bf16.mxu1 %v21516_v2 }
 0xb66   :  { %18667 = vmatpush3.bf16.msra.mxu0 %v21517_v16 }
 0xb67   :  { %18689 = vmatpush3.bf16.msra.mxu1 %v21518_v32 }
 0xb69   :  { %16596 = vmatmul.mubr.bf16.vlgmr.msra.gmra.mxu0 %v27615_v47 }
 0xb6a   :  { %16636 = vmatmul.mubr.bf16.vlgmr.msra.gmra.mxu1 %v27617_v38  ;;  %v15337_v38 = vrot.slane %v15329_v19, %v24515_v17 }
 0xb89   :  { %v15277_v45 = vpop.f32.mrf.mxu0 }
 0xb8a   :  { %v15318_v50 = vpop.f32.mrf.mxu1  ;;  %v15278_v25 = vadd.f32 %v15277_v45, %v14512_v39 }
 0xb8b   :  { %v15279_v37 = vpop.f32.mrf.mxu0 }
 0xb8c   :  { %v15320_v13 = vpop.f32.mrf.mxu1  ;;  %v15319_v15 = vadd.f32 %v15318_v50, %v15278_v25  ;;  %v15280_v40 = vadd.f32 %v15279_v37, %v14516_v54 }
 0xb8d   :  { %v15281_v59 = vpop.f32.mrf.mxu0 }
 0xb8e   :  { %v15322_v33 = vpop.f32.mrf.mxu1  ;;  %v15321_v5 = vadd.f32 %v15320_v13, %v15280_v40 }
 0xb8f   :  { %v15282_v23 = vpop.f32.mrf.mxu0 }
 0xb90   :  { %v15323_v47 = vpop.f32.mrf.mxu1  ;;  %v15330_v62 = vcombine.low %v15319_v15, %v15321_v5 }
 0xb92   :  { %v15344_v35 = vrot.slane %v15330_v62, %v24515_v17 }
 0xb94   :  { %v15345_v42 = vcombine.low %v15337_v38, %v15344_v35 }
 0xb96   :  { %15347 = vst [vmem:[#allocation4 + $0x28] sm:$0xff] %v15345_v42 }
 0xbc9   :  { %v16433_v27 = vpop.f32.mrf.mxu0 }
 0xbca   :  { %v16474_v18 = vpop.f32.mrf.mxu1  ;;  %v16434_v53 = vadd.f32 %v16433_v27, %v15545_v31 }
 0xbcb   :  { %v16435_v10 = vpop.f32.mrf.mxu0 }
 0xbcc   :  { %v16476_v30 = vpop.f32.mrf.mxu1  ;;  %v16475_v29 = vadd.f32 %v16474_v18, %v16434_v53  ;;  %v16436_v22 = vadd.f32 %v16435_v10, %v15549_v63 }
 0xbcd   :  { %v16437_v7 = vpop.f32.mrf.mxu0 }
 0xbce   :  { %v16478_v3 = vpop.f32.mrf.mxu1  ;;  %v16477_v36 = vadd.f32 %v16476_v30, %v16436_v22 }
 0xbcf   :  { %v16438_v48 = vpop.f32.mrf.mxu0 }
 0xbd0   :  { %v16479_v34 = vpop.f32.mrf.mxu1  ;;  %v16648_v14 = vcombine.low %v16475_v29, %v16477_v36 }
 0xbd2   :  { %v16656_v12 = vrot.slane %v16648_v14, %v24515_v17 }
 0xc09   :  { %v16515_v61 = vpop.f32.mrf.mxu0 }
 0xc0a   :  { %v16556_v20 = vpop.f32.mrf.mxu1  ;;  %v16516_v1 = vadd.f32 %v16515_v61, %v15553_v0 }
 0xc0b   :  { %v16517_v21 = vpop.f32.mrf.mxu0 }
 0xc0c   :  { %v16558_v24 = vpop.f32.mrf.mxu1  ;;  %v16557_v19 = vadd.f32 %v16556_v20, %v16516_v1  ;;  %v16518_v60 = vadd.f32 %v16517_v21, %v15557_v6 }
 0xc0d   :  { %v16519_v46 = vpop.f32.mrf.mxu0 }
 0xc0e   :  { %v16560_v8 = vpop.f32.mrf.mxu1  ;;  %v16559_v58 = vadd.f32 %v16558_v24, %v16518_v60 }
 0xc0f   :  { %v16520_v44 = vpop.f32.mrf.mxu0 }
 0xc10   :  { %v16561_v51 = vpop.f32.mrf.mxu1  ;;  %v16649_v4 = vcombine.low %v16557_v19, %v16559_v58 }
 0xc12   :  { %v16663_v56 = vrot.slane %v16649_v4, %v24515_v17 }
 0xc14   :  { %v16664_v52 = vcombine.low %v16656_v12, %v16663_v56 }
 0xc16   :  { %16674 = vst [vmem:[#allocation4 + $0x30] sm:$0xff] %v16664_v52 }
 0xc29   :  { %v18668_v41 = vpop.f32.mrf.mxu0 }
 0xc2a   :  { %v18690_v49 = vpop.f32.mrf.mxu1 }
 0xc2b   :  { %v18669_v9 = vpop.f32.mrf.mxu0 }
 0xc2c   :  { %v18691_v43 = vpop.f32.mrf.mxu1  ;;  %v18670_v26 = vadd.f32 %v18669_v9, %v18668_v41 }
 0xc2d   :  { %v18671_v2 = vpop.f32.mrf.mxu0  ;;  %v18692_v39 = vadd.f32 %v18691_v43, %v18690_v49 }
 0xc2e   :  { %v18693_v16 = vpop.f32.mrf.mxu1  ;;  %v16598_v32 = vadd.f32 %v18670_v26, %v15561_v28 }
 0xc2f   :  { %v18672_v54 = vpop.f32.mrf.mxu0 }
 0xc30   :  { %v18694_v45 = vpop.f32.mrf.mxu1  ;;  %v16638_v50 = vadd.f32 %v18692_v39, %v16598_v32 }
 0xc32   :  { %v16671_v25 = vrot.slane %v16638_v50, %v24515_v17 }
 0xc34   :  { %16676 = vst.msk [vmem:[#allocation4 + $0x38] sm:$0x3] %vm16675_vm6, %v16671_v25 }
 0xc35   :  { %21530 = shalt.err (!%p21527_p4)
}
 0xc36   :  { %16686 = dma.vmem_to_hbm [thread:$0]  %s16684_s17, 928, %s27847_s9, [#allocation5]  }
 0xc37   :  { %21541 = dma.done.wait [#allocation5], 928  }
 0xc38   :  { %21542 = vsyncadd [#allocation5], 4294966368 }
 0xc39   :  { %16690 = vsyncpa [#allocation5], 1 }
 0xc3a   :  { %16691 = vsyncmov [#allocation3] }
 0xc3d   :  { %s16692_s21 = vpop.sfrf %16691 }
 0xc3e   :  { %p18607_p5 = scmp.ne.s32.totalorder %s16692_s21, 0 }
 0xc40   :  { %16696 = shalt.err (%p18607_p5)  }

</bundles_post_ra>
